<compile_context>
chip_gen: v6e
topology: v6e:2x2x1
jax: 0.10.0
libtpu: 0.0.40
codegen_flags: <defaults>
</compile_context>

<pallas_src>
import functools

import jax
import jax.numpy as jnp
import numpy as np
from jax.experimental import pallas as pl
from jax.experimental.pallas import tpu as pltpu

LANES = 128


def _round_up(x, m):
    return (x + m - 1) // m * m


# ----------------------------------------------------------------------------
# XLA-side layout plumbing: im2col with rows grouped by 2x2 pooling corner.
# ----------------------------------------------------------------------------
def _im2col_pool_slabs(x_nhwc, k, p_pad):
    """[B,H,W,C] -> bf16 [4, B, p_pad, k*k*C].

    Slab s in {0..3} holds the conv positions that are the (s//2, s%2) corner
    of each 2x2 max-pool window; row r = i*OWp + j is pool window (i, j).
    Column index is (dy*k + dx)*C + c (matches _prep_conv's weight layout).
    """
    x = x_nhwc.astype(jnp.bfloat16)             # cast once, before duplication
    B, H, W, C = x.shape
    OH, OW = H - k + 1, W - k + 1
    assert OH % 2 == 0 and OW % 2 == 0
    OHp, OWp = OH // 2, OW // 2
    P = OHp * OWp
    pats = [x[:, dy:dy + OH, dx:dx + OW, :] for dy in range(k) for dx in range(k)]
    pat = jnp.stack(pats, axis=3).reshape(B, OH, OW, k * k * C)
    pat = pat.reshape(B, OHp, 2, OWp, 2, k * k * C)
    pat = jnp.transpose(pat, (2, 4, 0, 1, 3, 5))            # [sy, sx, B, i, j, K]
    pat = pat.reshape(4, B, P, k * k * C)
    return jnp.pad(pat, ((0, 0), (0, 0), (0, p_pad - P), (0, 0)))


# ----------------------------------------------------------------------------
# Fused conv(valid, stride 1) + bias + ReLU + 2x2 max-pool kernel
# ----------------------------------------------------------------------------
def _conv_relu_pool_kernel(x_ref, w_ref, b_ref, o_ref, *, p_pad):
    # x_ref: [4, TB*p_pad, K] bf16 im2col columns, pooling-slab major.
    # w_ref: [K, O] bf16;  b_ref: [1, O] f32;  o_ref: [TB, p_pad, O] bf16.
    tb = o_ref.shape[0]
    o = o_ref.shape[-1]
    w = w_ref[...]
    # One MXU matmul per pooling corner; the 2x2 max folds into the result
    # stream (no pre-pool activation map ever materialized at full size).
    y = jnp.dot(x_ref[0], w, preferred_element_type=jnp.float32)
    for s in range(1, 4):
        y = jnp.maximum(y, jnp.dot(x_ref[s], w, preferred_element_type=jnp.float32))
    y = jnp.maximum(y + b_ref[...], 0.0)        # bias + ReLU (post-max is equivalent)
    o_ref[...] = y.reshape(tb, p_pad, o).astype(o_ref.dtype)


def conv_relu_pool(x_nhwc, wm, bm, *, k, tb_cap=8):
    """Fused valid conv(kxk) + bias + ReLU + 2x2 max-pool.  Returns NHWC bf16."""
    B, H, W, C = x_nhwc.shape
    OH, OW = H - k + 1, W - k + 1
    OHp, OWp = OH // 2, OW // 2
    P = OHp * OWp
    p_pad = _round_up(P, 8)
    K = k * k * C
    assert wm.shape[0] == K
    O = wm.shape[1]
    TB = min(tb_cap, B)
    B_pad = _round_up(B, TB)

    cols = _im2col_pool_slabs(x_nhwc, k, p_pad)             # [4, B, p_pad, K]
    if B_pad != B:
        cols = jnp.pad(cols, ((0, 0), (0, B_pad - B), (0, 0), (0, 0)))
    cols = cols.reshape(4, B_pad * p_pad, K)

    out = pl.pallas_call(
        functools.partial(_conv_relu_pool_kernel, p_pad=p_pad),
        out_shape=jax.ShapeDtypeStruct((B_pad, p_pad, O), jnp.bfloat16),
        grid_spec=pltpu.PrefetchScalarGridSpec(
            num_scalar_prefetch=0,
            grid=(B_pad // TB,),
            in_specs=[
                pl.BlockSpec((4, TB * p_pad, K), lambda i: (0, i, 0)),
                pl.BlockSpec((K, O), lambda i: (0, 0)),
                pl.BlockSpec((1, O), lambda i: (0, 0)),
            ],
            out_specs=pl.BlockSpec((TB, p_pad, O), lambda i: (i, 0, 0)),
        ),
        compiler_params=pltpu.CompilerParams(
            dimension_semantics=("parallel",),
            vmem_limit_bytes=32 * 1024 * 1024,
        ),
    )(cols, wm, bm)
    return out[:B, :P, :].reshape(B, OHp, OWp, O)


# ----------------------------------------------------------------------------
# Fused fc1 -> relu -> fc2 -> relu -> fc3 kernel
# ----------------------------------------------------------------------------
def _fc_kernel(a_ref, w1_ref, b1_ref, w2_ref, b2_ref, w3_ref, b3_ref, o_ref):
    h = a_ref[...]                                            # bf16 [TB, 400]
    h = jnp.maximum(
        jnp.dot(h, w1_ref[...], preferred_element_type=jnp.float32) + b1_ref[...], 0.0)
    h = jnp.maximum(
        jnp.dot(h.astype(jnp.bfloat16), w2_ref[...],
                preferred_element_type=jnp.float32) + b2_ref[...], 0.0)
    o_ref[...] = (
        jnp.dot(h.astype(jnp.bfloat16), w3_ref[...],
                preferred_element_type=jnp.float32) + b3_ref[...])


def fc_fused(feat, w1, b1, w2, b2, w3, b3, *, tb_cap=128):
    B, K = feat.shape
    N = w1.shape[1]
    TB = min(tb_cap, B)
    B_pad = _round_up(B, TB)
    if B_pad != B:
        feat = jnp.pad(feat, ((0, B_pad - B), (0, 0)))
    out = pl.pallas_call(
        _fc_kernel,
        out_shape=jax.ShapeDtypeStruct((B_pad, N), jnp.float32),
        grid_spec=pltpu.PrefetchScalarGridSpec(
            num_scalar_prefetch=0,
            grid=(B_pad // TB,),
            in_specs=[
                pl.BlockSpec((TB, K), lambda i: (i, 0)),
                pl.BlockSpec((K, N), lambda i: (0, 0)),
                pl.BlockSpec((1, N), lambda i: (0, 0)),
                pl.BlockSpec((N, N), lambda i: (0, 0)),
                pl.BlockSpec((1, N), lambda i: (0, 0)),
                pl.BlockSpec((N, N), lambda i: (0, 0)),
                pl.BlockSpec((1, N), lambda i: (0, 0)),
            ],
            out_specs=pl.BlockSpec((TB, N), lambda i: (i, 0)),
        ),
        compiler_params=pltpu.CompilerParams(
            dimension_semantics=("parallel",),
            vmem_limit_bytes=32 * 1024 * 1024,
        ),
    )(feat, w1, b1, w2, b2, w3, b3)
    return out[:B]


# ----------------------------------------------------------------------------
# Parameters (PyTorch layout) and one-time kernel-layout preparation
# ----------------------------------------------------------------------------
def init_params(key):
    ks = jax.random.split(key, 10)

    def u(k, shape, fan_in):
        bound = 1.0 / jnp.sqrt(fan_in)
        return jax.random.uniform(k, shape, jnp.float32, -bound, bound)

    return {
        "conv1_w": u(ks[0], (6, 3, 5, 5), 3 * 5 * 5),
        "conv1_b": u(ks[1], (6,), 3 * 5 * 5),
        "conv2_w": u(ks[2], (16, 6, 5, 5), 6 * 5 * 5),
        "conv2_b": u(ks[3], (16,), 6 * 5 * 5),
        "fc1_w": u(ks[4], (120, 400), 400),
        "fc1_b": u(ks[5], (120,), 400),
        "fc2_w": u(ks[6], (84, 120), 120),
        "fc2_b": u(ks[7], (84,), 120),
        "fc3_w": u(ks[8], (10, 84), 84),
        "fc3_b": u(ks[9], (10,), 84),
    }


def _prep_conv(w, b):
    # torch [O, C, k, k] -> [k*k*C, O] with row index (dy*k + dx)*C + c.
    O, C, k, _ = w.shape
    wm = jnp.transpose(w, (2, 3, 1, 0)).reshape(k * k * C, O)
    return wm.astype(jnp.bfloat16), b.reshape(1, O).astype(jnp.float32)


def _pad2(a, rows, cols):
    return jnp.pad(a, ((0, rows - a.shape[0]), (0, cols - a.shape[1])))


def prepare_params(p):
    """One-time: permute / transpose / zero-pad / cast weights to kernel layout."""
    kp = {}
    kp["c1_w"], kp["c1_b"] = _prep_conv(p["conv1_w"], p["conv1_b"])
    kp["c2_w"], kp["c2_b"] = _prep_conv(p["conv2_w"], p["conv2_b"])
    # fc1: PyTorch flattens NCHW (c*25 + h*5 + w); our features are NHWC
    # ((h*5 + w)*16 + c), so permute accordingly before transposing.
    w1 = p["fc1_w"].reshape(120, 16, 5, 5)            # [n, c, h, w]
    w1 = jnp.transpose(w1, (2, 3, 1, 0)).reshape(400, 120)
    kp["fc1_w"] = _pad2(w1, 400, LANES).astype(jnp.bfloat16)
    kp["fc1_b"] = jnp.pad(p["fc1_b"], (0, LANES - 120)).reshape(1, LANES).astype(jnp.float32)
    kp["fc2_w"] = _pad2(p["fc2_w"].T, LANES, LANES).astype(jnp.bfloat16)
    kp["fc2_b"] = jnp.pad(p["fc2_b"], (0, LANES - 84)).reshape(1, LANES).astype(jnp.float32)
    kp["fc3_w"] = _pad2(p["fc3_w"].T, LANES, LANES).astype(jnp.bfloat16)
    kp["fc3_b"] = jnp.pad(p["fc3_b"], (0, LANES - 10)).reshape(1, LANES).astype(jnp.float32)
    return kp


# ----------------------------------------------------------------------------
# Forward pass
# ----------------------------------------------------------------------------
@jax.jit
def net_forward(kparams, x):
    # x: [B, 3, 32, 32] NCHW (PyTorch layout); one transpose to NHWC here.
    B = x.shape[0]
    xh = jnp.transpose(x, (0, 2, 3, 1))                                  # [B,32,32,3]
    a1 = conv_relu_pool(xh, kparams["c1_w"], kparams["c1_b"], k=5)       # [B,14,14,6]  bf16
    a2 = conv_relu_pool(a1, kparams["c2_w"], kparams["c2_b"], k=5)       # [B,5,5,16]   bf16
    feat = a2.reshape(B, 5 * 5 * 16)                                     # [B,400] bf16 (NHWC flatten)
    logits = fc_fused(feat, kparams["fc1_w"], kparams["fc1_b"],
                      kparams["fc2_w"], kparams["fc2_b"],
                      kparams["fc3_w"], kparams["fc3_b"])                # [B,128] f32
    return logits[:, :10]


# ----------------------------------------------------------------------------
# Pure-XLA reference (PyTorch semantics) for validation
# ----------------------------------------------------------------------------
def reference_forward(p, x):
    y = jax.lax.conv(x, p["conv1_w"], (1, 1), "VALID")
    y = jax.nn.relu(y + p["conv1_b"][None, :, None, None])
    y = jax.lax.reduce_window(y, -jnp.inf, jax.lax.max, (1, 1, 2, 2), (1, 1, 2, 2), "VALID")
    y = jax.lax.conv(y, p["conv2_w"], (1, 1), "VALID")
    y = jax.nn.relu(y + p["conv2_b"][None, :, None, None])
    y = jax.lax.reduce_window(y, -jnp.inf, jax.lax.max, (1, 1, 2, 2), (1, 1, 2, 2), "VALID")
    y = y.reshape(y.shape[0], -1)
    y = jax.nn.relu(y @ p["fc1_w"].T + p["fc1_b"])
    y = jax.nn.relu(y @ p["fc2_w"].T + p["fc2_b"])
    return y @ p["fc3_w"].T + p["fc3_b"]


if __name__ == "__main__":
    key = jax.random.PRNGKey(0)
    pkey, xkey = jax.random.split(key)
    params = init_params(pkey)
    kparams = prepare_params(params)
    # Spatial size must be 32x32 so the flatten matches 16*5*5 = 400.
    # B=10 exercises batch tiling (TB=8 -> 2 conv grid steps) and batch padding.
    x = jax.random.normal(xkey, (10, 3, 32, 32), dtype=jnp.float32)
    out = net_forward(kparams, x)
    jax.block_until_ready(out)
    assert out.shape == (10, 10)
    ref = reference_forward(params, x)
    np.testing.assert_allclose(np.asarray(out), np.asarray(ref), rtol=5e-2, atol=5e-2)
    print("KERNEL_OK")
</pallas_src>

<mosaic_0001>
module attributes {stable_mosaic.version = 11 : i64} {
  func.func @_conv_relu_pool_kernel(%arg0: i32, %arg1: memref<4x1600x75xbf16, #tpu.memory_space<vmem>>, %arg2: memref<75x6xbf16, #tpu.memory_space<vmem>>, %arg3: memref<1x6xf32, #tpu.memory_space<vmem>>, %arg4: memref<8x200x6xbf16, #tpu.memory_space<vmem>>) attributes {dimension_semantics = [#tpu.dimension_semantics<parallel>], iteration_bounds = array<i64: 2>, scalar_prefetch = 0 : i64, scratch_operands = 0 : i64, tpu.core_type = #tpu.core_type<tc>, window_params = [{transform_indices = @transform_0, window_bounds = array<i64: 4, 1600, 75>}, {pipeline_mode = #tpu.pipeline_mode<synchronous>, transform_indices = @transform_1, window_bounds = array<i64: 75, 6>}, {pipeline_mode = #tpu.pipeline_mode<synchronous>, transform_indices = @transform_2, window_bounds = array<i64: 1, 6>}, {transform_indices = @transform_3, window_bounds = array<i64: 8, 200, 6>}]} {
    %c0 = arith.constant 0 : index
    %c0_0 = arith.constant 0 : index
    %0 = vector.load %arg2[%c0, %c0_0] : memref<75x6xbf16, #tpu.memory_space<vmem>>, vector<75x6xbf16>
    %c0_1 = arith.constant 0 : index
    %c0_2 = arith.constant 0 : index
    %c0_3 = arith.constant 0 : index
    %1 = vector.load %arg1[%c0_1, %c0_2, %c0_3] : memref<4x1600x75xbf16, #tpu.memory_space<vmem>>, vector<1x1600x75xbf16>
    %2 = vector.shape_cast %1 : vector<1x1600x75xbf16> to vector<1600x75xbf16>
    %cst = arith.constant dense<0.000000e+00> : vector<1600x6xf32>
    %3 = tpu.matmul %2, %0, %cst {dimension_numbers = #tpu.dot_dimension_numbers<[1], [0], [0], [1], [0, 0, 1, 1], [], []>} : vector<1600x75xbf16>, vector<75x6xbf16>, vector<1600x6xf32> -> vector<1600x6xf32>
    %c1 = arith.constant 1 : index
    %c0_4 = arith.constant 0 : index
    %c0_5 = arith.constant 0 : index
    %4 = vector.load %arg1[%c1, %c0_4, %c0_5] : memref<4x1600x75xbf16, #tpu.memory_space<vmem>>, vector<1x1600x75xbf16>
    %5 = vector.shape_cast %4 : vector<1x1600x75xbf16> to vector<1600x75xbf16>
    %cst_6 = arith.constant dense<0.000000e+00> : vector<1600x6xf32>
    %6 = tpu.matmul %5, %0, %cst_6 {dimension_numbers = #tpu.dot_dimension_numbers<[1], [0], [0], [1], [0, 0, 1, 1], [], []>} : vector<1600x75xbf16>, vector<75x6xbf16>, vector<1600x6xf32> -> vector<1600x6xf32>
    %7 = arith.maximumf %3, %6 : vector<1600x6xf32>
    %c2 = arith.constant 2 : index
    %c0_7 = arith.constant 0 : index
    %c0_8 = arith.constant 0 : index
    %8 = vector.load %arg1[%c2, %c0_7, %c0_8] : memref<4x1600x75xbf16, #tpu.memory_space<vmem>>, vector<1x1600x75xbf16>
    %9 = vector.shape_cast %8 : vector<1x1600x75xbf16> to vector<1600x75xbf16>
    %cst_9 = arith.constant dense<0.000000e+00> : vector<1600x6xf32>
    %10 = tpu.matmul %9, %0, %cst_9 {dimension_numbers = #tpu.dot_dimension_numbers<[1], [0], [0], [1], [0, 0, 1, 1], [], []>} : vector<1600x75xbf16>, vector<75x6xbf16>, vector<1600x6xf32> -> vector<1600x6xf32>
    %11 = arith.maximumf %7, %10 : vector<1600x6xf32>
    %c3 = arith.constant 3 : index
    %c0_10 = arith.constant 0 : index
    %c0_11 = arith.constant 0 : index
    %12 = vector.load %arg1[%c3, %c0_10, %c0_11] : memref<4x1600x75xbf16, #tpu.memory_space<vmem>>, vector<1x1600x75xbf16>
    %13 = vector.shape_cast %12 : vector<1x1600x75xbf16> to vector<1600x75xbf16>
    %cst_12 = arith.constant dense<0.000000e+00> : vector<1600x6xf32>
    %14 = tpu.matmul %13, %0, %cst_12 {dimension_numbers = #tpu.dot_dimension_numbers<[1], [0], [0], [1], [0, 0, 1, 1], [], []>} : vector<1600x75xbf16>, vector<75x6xbf16>, vector<1600x6xf32> -> vector<1600x6xf32>
    %15 = arith.maximumf %11, %14 : vector<1600x6xf32>
    %c0_13 = arith.constant 0 : index
    %c0_14 = arith.constant 0 : index
    %16 = vector.load %arg3[%c0_13, %c0_14] : memref<1x6xf32, #tpu.memory_space<vmem>>, vector<1x6xf32>
    %17 = vector.broadcast %16 : vector<1x6xf32> to vector<1600x6xf32>
    %18 = arith.addf %15, %17 : vector<1600x6xf32>
    %cst_15 = arith.constant 0.000000e+00 : f32
    %19 = vector.broadcast %cst_15 : f32 to vector<1600x6xf32>
    %20 = arith.maximumf %18, %19 : vector<1600x6xf32>
    %21 = vector.shape_cast %20 : vector<1600x6xf32> to vector<8x200x6xf32>
    %22 = arith.truncf %21 : vector<8x200x6xf32> to vector<8x200x6xbf16>
    %c0_16 = arith.constant 0 : index
    %c0_17 = arith.constant 0 : index
    %c0_18 = arith.constant 0 : index
    %23 = vector.load %arg4[%c0_16, %c0_17, %c0_18] : memref<8x200x6xbf16, #tpu.memory_space<vmem>>, vector<8x200x6xbf16>
    tpu.vector_store %arg4[%c0_16, %c0_17, %c0_18], %22 {strides = array<i32>} : memref<8x200x6xbf16, #tpu.memory_space<vmem>>, vector<8x200x6xbf16>,
    return
  }
  func.func @transform_0(%arg0: i32) -> (i32, i32, i32) {
    %c0_i32 = arith.constant 0 : i32
    %c0_i32_0 = arith.constant 0 : i32
    %c0_i32_1 = arith.constant 0 : i32
    return %c0_i32, %arg0, %c0_i32_0 : i32, i32, i32
  }
  func.func @transform_1(%arg0: i32) -> (i32, i32) {
    %c0_i32 = arith.constant 0 : i32
    %c0_i32_0 = arith.constant 0 : i32
    %c0_i32_1 = arith.constant 0 : i32
    return %c0_i32, %c0_i32_0 : i32, i32
  }
  func.func @transform_2(%arg0: i32) -> (i32, i32) {
    %c0_i32 = arith.constant 0 : i32
    %c0_i32_0 = arith.constant 0 : i32
    %c0_i32_1 = arith.constant 0 : i32
    return %c0_i32, %c0_i32_0 : i32, i32
  }
  func.func @transform_3(%arg0: i32) -> (i32, i32, i32) {
    %c0_i32 = arith.constant 0 : i32
    %c0_i32_0 = arith.constant 0 : i32
    %c0_i32_1 = arith.constant 0 : i32
    return %arg0, %c0_i32, %c0_i32_0 : i32, i32, i32
  }
}

module attributes {stable_mosaic.version = 11 : i64} {
  func.func @_conv_relu_pool_kernel(%arg0: i32, %arg1: memref<4x256x150xbf16, #tpu.memory_space<vmem>>, %arg2: memref<150x16xbf16, #tpu.memory_space<vmem>>, %arg3: memref<1x16xf32, #tpu.memory_space<vmem>>, %arg4: memref<8x32x16xbf16, #tpu.memory_space<vmem>>) attributes {dimension_semantics = [#tpu.dimension_semantics<parallel>], iteration_bounds = array<i64: 2>, scalar_prefetch = 0 : i64, scratch_operands = 0 : i64, tpu.core_type = #tpu.core_type<tc>, window_params = [{transform_indices = @transform_0, window_bounds = array<i64: 4, 256, 150>}, {pipeline_mode = #tpu.pipeline_mode<synchronous>, transform_indices = @transform_1, window_bounds = array<i64: 150, 16>}, {pipeline_mode = #tpu.pipeline_mode<synchronous>, transform_indices = @transform_2, window_bounds = array<i64: 1, 16>}, {transform_indices = @transform_3, window_bounds = array<i64: 8, 32, 16>}]} {
    %c0 = arith.constant 0 : index
    %c0_0 = arith.constant 0 : index
    %0 = vector.load %arg2[%c0, %c0_0] : memref<150x16xbf16, #tpu.memory_space<vmem>>, vector<150x16xbf16>
    %c0_1 = arith.constant 0 : index
    %c0_2 = arith.constant 0 : index
    %c0_3 = arith.constant 0 : index
    %1 = vector.load %arg1[%c0_1, %c0_2, %c0_3] : memref<4x256x150xbf16, #tpu.memory_space<vmem>>, vector<1x256x150xbf16>
    %2 = vector.shape_cast %1 : vector<1x256x150xbf16> to vector<256x150xbf16>
    %cst = arith.constant dense<0.000000e+00> : vector<256x16xf32>
    %3 = tpu.matmul %2, %0, %cst {dimension_numbers = #tpu.dot_dimension_numbers<[1], [0], [0], [1], [0, 0, 1, 1], [], []>} : vector<256x150xbf16>, vector<150x16xbf16>, vector<256x16xf32> -> vector<256x16xf32>
    %c1 = arith.constant 1 : index
    %c0_4 = arith.constant 0 : index
    %c0_5 = arith.constant 0 : index
    %4 = vector.load %arg1[%c1, %c0_4, %c0_5] : memref<4x256x150xbf16, #tpu.memory_space<vmem>>, vector<1x256x150xbf16>
    %5 = vector.shape_cast %4 : vector<1x256x150xbf16> to vector<256x150xbf16>
    %cst_6 = arith.constant dense<0.000000e+00> : vector<256x16xf32>
    %6 = tpu.matmul %5, %0, %cst_6 {dimension_numbers = #tpu.dot_dimension_numbers<[1], [0], [0], [1], [0, 0, 1, 1], [], []>} : vector<256x150xbf16>, vector<150x16xbf16>, vector<256x16xf32> -> vector<256x16xf32>
    %7 = arith.maximumf %3, %6 : vector<256x16xf32>
    %c2 = arith.constant 2 : index
    %c0_7 = arith.constant 0 : index
    %c0_8 = arith.constant 0 : index
    %8 = vector.load %arg1[%c2, %c0_7, %c0_8] : memref<4x256x150xbf16, #tpu.memory_space<vmem>>, vector<1x256x150xbf16>
    %9 = vector.shape_cast %8 : vector<1x256x150xbf16> to vector<256x150xbf16>
    %cst_9 = arith.constant dense<0.000000e+00> : vector<256x16xf32>
    %10 = tpu.matmul %9, %0, %cst_9 {dimension_numbers = #tpu.dot_dimension_numbers<[1], [0], [0], [1], [0, 0, 1, 1], [], []>} : vector<256x150xbf16>, vector<150x16xbf16>, vector<256x16xf32> -> vector<256x16xf32>
    %11 = arith.maximumf %7, %10 : vector<256x16xf32>
    %c3 = arith.constant 3 : index
    %c0_10 = arith.constant 0 : index
    %c0_11 = arith.constant 0 : index
    %12 = vector.load %arg1[%c3, %c0_10, %c0_11] : memref<4x256x150xbf16, #tpu.memory_space<vmem>>, vector<1x256x150xbf16>
    %13 = vector.shape_cast %12 : vector<1x256x150xbf16> to vector<256x150xbf16>
    %cst_12 = arith.constant dense<0.000000e+00> : vector<256x16xf32>
    %14 = tpu.matmul %13, %0, %cst_12 {dimension_numbers = #tpu.dot_dimension_numbers<[1], [0], [0], [1], [0, 0, 1, 1], [], []>} : vector<256x150xbf16>, vector<150x16xbf16>, vector<256x16xf32> -> vector<256x16xf32>
    %15 = arith.maximumf %11, %14 : vector<256x16xf32>
    %c0_13 = arith.constant 0 : index
    %c0_14 = arith.constant 0 : index
    %16 = vector.load %arg3[%c0_13, %c0_14] : memref<1x16xf32, #tpu.memory_space<vmem>>, vector<1x16xf32>
    %17 = vector.broadcast %16 : vector<1x16xf32> to vector<256x16xf32>
    %18 = arith.addf %15, %17 : vector<256x16xf32>
    %cst_15 = arith.constant 0.000000e+00 : f32
    %19 = vector.broadcast %cst_15 : f32 to vector<256x16xf32>
    %20 = arith.maximumf %18, %19 : vector<256x16xf32>
    %21 = vector.shape_cast %20 : vector<256x16xf32> to vector<8x32x16xf32>
    %22 = arith.truncf %21 : vector<8x32x16xf32> to vector<8x32x16xbf16>
    %c0_16 = arith.constant 0 : index
    %c0_17 = arith.constant 0 : index
    %c0_18 = arith.constant 0 : index
    %23 = vector.load %arg4[%c0_16, %c0_17, %c0_18] : memref<8x32x16xbf16, #tpu.memory_space<vmem>>, vector<8x32x16xbf16>
    tpu.vector_store %arg4[%c0_16, %c0_17, %c0_18], %22 {strides = array<i32>} : memref<8x32x16xbf16, #tpu.memory_space<vmem>>, vector<8x32x16xbf16>,
    return
  }
  func.func @transform_0(%arg0: i32) -> (i32, i32, i32) {
    %c0_i32 = arith.constant 0 : i32
    %c0_i32_0 = arith.constant 0 : i32
    %c0_i32_1 = arith.constant 0 : i32
    return %c0_i32, %arg0, %c0_i32_0 : i32, i32, i32
  }
  func.func @transform_1(%arg0: i32) -> (i32, i32) {
    %c0_i32 = arith.constant 0 : i32
    %c0_i32_0 = arith.constant 0 : i32
    %c0_i32_1 = arith.constant 0 : i32
    return %c0_i32, %c0_i32_0 : i32, i32
  }
  func.func @transform_2(%arg0: i32) -> (i32, i32) {
    %c0_i32 = arith.constant 0 : i32
    %c0_i32_0 = arith.constant 0 : i32
    %c0_i32_1 = arith.constant 0 : i32
    return %c0_i32, %c0_i32_0 : i32, i32
  }
  func.func @transform_3(%arg0: i32) -> (i32, i32, i32) {
    %c0_i32 = arith.constant 0 : i32
    %c0_i32_0 = arith.constant 0 : i32
    %c0_i32_1 = arith.constant 0 : i32
    return %arg0, %c0_i32, %c0_i32_0 : i32, i32, i32
  }
}

module attributes {stable_mosaic.version = 11 : i64} {
  func.func @_fc_kernel(%arg0: i32, %arg1: memref<10x400xbf16, #tpu.memory_space<vmem>>, %arg2: memref<400x128xbf16, #tpu.memory_space<vmem>>, %arg3: memref<1x128xf32, #tpu.memory_space<vmem>>, %arg4: memref<128x128xbf16, #tpu.memory_space<vmem>>, %arg5: memref<1x128xf32, #tpu.memory_space<vmem>>, %arg6: memref<128x128xbf16, #tpu.memory_space<vmem>>, %arg7: memref<1x128xf32, #tpu.memory_space<vmem>>, %arg8: memref<10x128xf32, #tpu.memory_space<vmem>>) attributes {dimension_semantics = [#tpu.dimension_semantics<parallel>], iteration_bounds = array<i64: 1>, scalar_prefetch = 0 : i64, scratch_operands = 0 : i64, tpu.core_type = #tpu.core_type<tc>, window_params = [{transform_indices = @transform_0, window_bounds = array<i64: 10, 400>}, {pipeline_mode = #tpu.pipeline_mode<synchronous>, transform_indices = @transform_1, window_bounds = array<i64: 400, 128>}, {pipeline_mode = #tpu.pipeline_mode<synchronous>, transform_indices = @transform_2, window_bounds = array<i64: 1, 128>}, {pipeline_mode = #tpu.pipeline_mode<synchronous>, transform_indices = @transform_3, window_bounds = array<i64: 128, 128>}, {pipeline_mode = #tpu.pipeline_mode<synchronous>, transform_indices = @transform_4, window_bounds = array<i64: 1, 128>}, {pipeline_mode = #tpu.pipeline_mode<synchronous>, transform_indices = @transform_5, window_bounds = array<i64: 128, 128>}, {pipeline_mode = #tpu.pipeline_mode<synchronous>, transform_indices = @transform_6, window_bounds = array<i64: 1, 128>}, {transform_indices = @transform_7, window_bounds = array<i64: 10, 128>}]} {
    %c0 = arith.constant 0 : index
    %c0_0 = arith.constant 0 : index
    %0 = vector.load %arg1[%c0, %c0_0] : memref<10x400xbf16, #tpu.memory_space<vmem>>, vector<10x400xbf16>
    %c0_1 = arith.constant 0 : index
    %c0_2 = arith.constant 0 : index
    %1 = vector.load %arg2[%c0_1, %c0_2] : memref<400x128xbf16, #tpu.memory_space<vmem>>, vector<400x128xbf16>
    %cst = arith.constant dense<0.000000e+00> : vector<10x128xf32>
    %2 = tpu.matmul %0, %1, %cst {dimension_numbers = #tpu.dot_dimension_numbers<[1], [0], [0], [1], [0, 0, 1, 1], [], []>} : vector<10x400xbf16>, vector<400x128xbf16>, vector<10x128xf32> -> vector<10x128xf32>
    %c0_3 = arith.constant 0 : index
    %c0_4 = arith.constant 0 : index
    %3 = vector.load %arg3[%c0_3, %c0_4] : memref<1x128xf32, #tpu.memory_space<vmem>>, vector<1x128xf32>
    %4 = vector.broadcast %3 : vector<1x128xf32> to vector<10x128xf32>
    %5 = arith.addf %2, %4 : vector<10x128xf32>
    %cst_5 = arith.constant 0.000000e+00 : f32
    %6 = vector.broadcast %cst_5 : f32 to vector<10x128xf32>
    %7 = arith.maximumf %5, %6 : vector<10x128xf32>
    %8 = arith.truncf %7 : vector<10x128xf32> to vector<10x128xbf16>
    %c0_6 = arith.constant 0 : index
    %c0_7 = arith.constant 0 : index
    %9 = vector.load %arg4[%c0_6, %c0_7] : memref<128x128xbf16, #tpu.memory_space<vmem>>, vector<128x128xbf16>
    %cst_8 = arith.constant dense<0.000000e+00> : vector<10x128xf32>
    %10 = tpu.matmul %8, %9, %cst_8 {dimension_numbers = #tpu.dot_dimension_numbers<[1], [0], [0], [1], [0, 0, 1, 1], [], []>} : vector<10x128xbf16>, vector<128x128xbf16>, vector<10x128xf32> -> vector<10x128xf32>
    %c0_9 = arith.constant 0 : index
    %c0_10 = arith.constant 0 : index
    %11 = vector.load %arg5[%c0_9, %c0_10] : memref<1x128xf32, #tpu.memory_space<vmem>>, vector<1x128xf32>
    %12 = vector.broadcast %11 : vector<1x128xf32> to vector<10x128xf32>
    %13 = arith.addf %10, %12 : vector<10x128xf32>
    %cst_11 = arith.constant 0.000000e+00 : f32
    %14 = vector.broadcast %cst_11 : f32 to vector<10x128xf32>
    %15 = arith.maximumf %13, %14 : vector<10x128xf32>
    %16 = arith.truncf %15 : vector<10x128xf32> to vector<10x128xbf16>
    %c0_12 = arith.constant 0 : index
    %c0_13 = arith.constant 0 : index
    %17 = vector.load %arg6[%c0_12, %c0_13] : memref<128x128xbf16, #tpu.memory_space<vmem>>, vector<128x128xbf16>
    %cst_14 = arith.constant dense<0.000000e+00> : vector<10x128xf32>
    %18 = tpu.matmul %16, %17, %cst_14 {dimension_numbers = #tpu.dot_dimension_numbers<[1], [0], [0], [1], [0, 0, 1, 1], [], []>} : vector<10x128xbf16>, vector<128x128xbf16>, vector<10x128xf32> -> vector<10x128xf32>
    %c0_15 = arith.constant 0 : index
    %c0_16 = arith.constant 0 : index
    %19 = vector.load %arg7[%c0_15, %c0_16] : memref<1x128xf32, #tpu.memory_space<vmem>>, vector<1x128xf32>
    %20 = vector.broadcast %19 : vector<1x128xf32> to vector<10x128xf32>
    %21 = arith.addf %18, %20 : vector<10x128xf32>
    %c0_17 = arith.constant 0 : index
    %c0_18 = arith.constant 0 : index
    %22 = vector.load %arg8[%c0_17, %c0_18] : memref<10x128xf32, #tpu.memory_space<vmem>>, vector<10x128xf32>
    tpu.vector_store %arg8[%c0_17, %c0_18], %21 {strides = array<i32>} : memref<10x128xf32, #tpu.memory_space<vmem>>, vector<10x128xf32>,
    return
  }
  func.func @transform_0(%arg0: i32) -> (i32, i32) {
    %c0_i32 = arith.constant 0 : i32
    %c0_i32_0 = arith.constant 0 : i32
    return %arg0, %c0_i32 : i32, i32
  }
  func.func @transform_1(%arg0: i32) -> (i32, i32) {
    %c0_i32 = arith.constant 0 : i32
    %c0_i32_0 = arith.constant 0 : i32
    %c0_i32_1 = arith.constant 0 : i32
    return %c0_i32, %c0_i32_0 : i32, i32
  }
  func.func @transform_2(%arg0: i32) -> (i32, i32) {
    %c0_i32 = arith.constant 0 : i32
    %c0_i32_0 = arith.constant 0 : i32
    %c0_i32_1 = arith.constant 0 : i32
    return %c0_i32, %c0_i32_0 : i32, i32
  }
  func.func @transform_3(%arg0: i32) -> (i32, i32) {
    %c0_i32 = arith.constant 0 : i32
    %c0_i32_0 = arith.constant 0 : i32
    %c0_i32_1 = arith.constant 0 : i32
    return %c0_i32, %c0_i32_0 : i32, i32
  }
  func.func @transform_4(%arg0: i32) -> (i32, i32) {
    %c0_i32 = arith.constant 0 : i32
    %c0_i32_0 = arith.constant 0 : i32
    %c0_i32_1 = arith.constant 0 : i32
    return %c0_i32, %c0_i32_0 : i32, i32
  }
  func.func @transform_5(%arg0: i32) -> (i32, i32) {
    %c0_i32 = arith.constant 0 : i32
    %c0_i32_0 = arith.constant 0 : i32
    %c0_i32_1 = arith.constant 0 : i32
    return %c0_i32, %c0_i32_0 : i32, i32
  }
  func.func @transform_6(%arg0: i32) -> (i32, i32) {
    %c0_i32 = arith.constant 0 : i32
    %c0_i32_0 = arith.constant 0 : i32
    %c0_i32_1 = arith.constant 0 : i32
    return %c0_i32, %c0_i32_0 : i32, i32
  }
  func.func @transform_7(%arg0: i32) -> (i32, i32) {
    %c0_i32 = arith.constant 0 : i32
    %c0_i32_0 = arith.constant 0 : i32
    return %arg0, %c0_i32 : i32, i32
  }
}

</mosaic_0001>

<bundles_post_ra>
// kernel: net_forward.3
= control target key start
LH: loop header
LB: loop body
LE: loop exit
PB: predicated region body
PF: predicated region fallthrough
CT: control target
= control target key end

     0   :  { %s19674_s12 = smov 0   ;;  %s19676_s13 = smov 0   ;;  %s23769_s0 = inlined_call_operand.vmem [shape: bf16[4,3200,75], index: 0, kind: input, shape index: {}]   ;;  %s23770_s1 = inlined_call_operand.vmem [shape: bf16[75,6], index: 1, kind: input, shape index: {}]   ;;  %s23771_s2 = inlined_call_operand.vmem [shape: f32[1,6], index: 2, kind: input, shape index: {}]   ;;  %s23772_s3 = inlined_call_operand.vmem [shape: bf16[16,200,6], index: 3, kind: output, shape index: {}]  }
   0x1   :  { %s19678_s14 = smov 0  }
   0x2 LB: > { %s16116_s15 = sadd.s32 4294967295, %s19651_s14   ;;  %s19691_s16 = sadd.s32 1, %s19651_s14   ;;  %s19651_s14 = sphi %s19678_s14, %s25034_s14   ;;  %s19647_s13 = sphi %s19676_s13, %s25033_s13   ;;  %s19643_s12 = sphi %s19674_s12, %s25032_s12  }
   0x3   : > { %s17_s17 = ssub.s32 %s19651_s14, %s19691_s16  ;;  %s20_s18 = sadd.s32 1, %s19647_s13 }
   0x4   : > { %p18_p0 = scmp.eq.s32.totalorder %s17_s17, 0  ;;  %p27_p1 = scmp.ne.s32.totalorder %s19647_s13, %s19643_s12 }
   0x5   : > { %p28_p2 = scmp.eq.s32.totalorder %s19651_s14, 0  ;;  %p16119_p4 = scmp.ge.s32.totalorder %s19651_s14, 2 }
   0x6   : > { %s19700_s19 = scalar_select %p18_p0, %s19647_s13, %s20_s18  }
   0x7   : > { %p29_p3 = por %p28_p2, %p27_p1  ;;  %127 = sbr.rel (%p16119_p4) target bundleno = 217 (0xd9), region = 24 }
   0xc   : > { %130 = sbr.rel (!%p29_p3) target bundleno = 217 (0xd9), region = 28  ;;  %s132_s20 = sand.u32 (%p29_p3), 1, %s19647_s13  }
   0xd   : > { %s17732_s21 = smul.u32 (%p29_p3), 800, %s19651_s14 }
   0xe   : > { %s19193_s22 = smul.u32 (%p29_p3), 3200, %s132_s20 }
   0xf   : > { %s19708_s25 = scalar_lea.vmem (%p29_p3), %s23769_s0, %s17732_s21 }
  0x10   : > { %v154_v0 = vld [vmem:[%s19708_s25] sm:$0xff] (%p29_p3)   ;;  %v158_v1 = vld [vmem:[%s19708_s25 + $0x8] sm:$0xff] (%p29_p3)   ;;  %v162_v2 = vld [vmem:[%s19708_s25 + $0x10] sm:$0xff] (%p29_p3)   ;;  %s19713_s26 = scalar_lea.vmem (%p29_p3), [#allocation2], %s19193_s22 }
  0x11   : > { %155 = vst [vmem:[%s19713_s26] sm:$0xff] %v154_v0   ;;  %159 = vst [vmem:[%s19713_s26 + $0x8] sm:$0xff] %v158_v1   ;;  %v166_v3 = vld [vmem:[%s19708_s25 + $0x18] sm:$0xff]   ;;  %v170_v4 = vld [vmem:[%s19708_s25 + $0x20] sm:$0xff]  }
  0x12   : > { %163 = vst [vmem:[%s19713_s26 + $0x10] sm:$0xff] %v162_v2   ;;  %v174_v5 = vld [vmem:[%s19708_s25 + $0x28] sm:$0xff]   ;;  %167 = vst [vmem:[%s19713_s26 + $0x18] sm:$0xff] %v166_v3   ;;  %v178_v6 = vld [vmem:[%s19708_s25 + $0x30] sm:$0xff]  }
  0x13   : > { %171 = vst [vmem:[%s19713_s26 + $0x20] sm:$0xff] %v170_v4   ;;  %175 = vst [vmem:[%s19713_s26 + $0x28] sm:$0xff] %v174_v5   ;;  %v182_v7 = vld [vmem:[%s19708_s25 + $0x38] sm:$0xff]   ;;  %v186_v8 = vld [vmem:[%s19708_s25 + $0x40] sm:$0xff]  }
  0x14   : > { %179 = vst [vmem:[%s19713_s26 + $0x30] sm:$0xff] %v178_v6   ;;  %183 = vst [vmem:[%s19713_s26 + $0x38] sm:$0xff] %v182_v7   ;;  %v190_v9 = vld [vmem:[%s19708_s25 + $0x48] sm:$0xff]   ;;  %v194_v10 = vld [vmem:[%s19708_s25 + $0x50] sm:$0xff]  }
  0x15   : > { %187 = vst [vmem:[%s19713_s26 + $0x40] sm:$0xff] %v186_v8   ;;  %v198_v11 = vld [vmem:[%s19708_s25 + $0x58] sm:$0xff]   ;;  %191 = vst [vmem:[%s19713_s26 + $0x48] sm:$0xff] %v190_v9   ;;  %v202_v12 = vld [vmem:[%s19708_s25 + $0x60] sm:$0xff]  }
  0x16   : > { %195 = vst [vmem:[%s19713_s26 + $0x50] sm:$0xff] %v194_v10   ;;  %199 = vst [vmem:[%s19713_s26 + $0x58] sm:$0xff] %v198_v11   ;;  %v206_v13 = vld [vmem:[%s19708_s25 + $0x68] sm:$0xff]   ;;  %v210_v14 = vld [vmem:[%s19708_s25 + $0x70] sm:$0xff]  }
  0x17   : > { %203 = vst [vmem:[%s19713_s26 + $0x60] sm:$0xff] %v202_v12   ;;  %207 = vst [vmem:[%s19713_s26 + $0x68] sm:$0xff] %v206_v13   ;;  %v214_v15 = vld [vmem:[%s19708_s25 + $0x78] sm:$0xff]   ;;  %v218_v16 = vld [vmem:[%s19708_s25 + $0x80] sm:$0xff]  }
  0x18   : > { %211 = vst [vmem:[%s19713_s26 + $0x70] sm:$0xff] %v210_v14   ;;  %v222_v17 = vld [vmem:[%s19708_s25 + $0x88] sm:$0xff]   ;;  %215 = vst [vmem:[%s19713_s26 + $0x78] sm:$0xff] %v214_v15   ;;  %v226_v18 = vld [vmem:[%s19708_s25 + $0x90] sm:$0xff]  }
  0x19   : > { %219 = vst [vmem:[%s19713_s26 + $0x80] sm:$0xff] %v218_v16   ;;  %223 = vst [vmem:[%s19713_s26 + $0x88] sm:$0xff] %v222_v17   ;;  %v230_v19 = vld [vmem:[%s19708_s25 + $0x98] sm:$0xff]   ;;  %v234_v20 = vld [vmem:[%s19708_s25 + $0xa0] sm:$0xff]  }
  0x1a   : > { %227 = vst [vmem:[%s19713_s26 + $0x90] sm:$0xff] %v226_v18   ;;  %231 = vst [vmem:[%s19713_s26 + $0x98] sm:$0xff] %v230_v19   ;;  %v238_v21 = vld [vmem:[%s19708_s25 + $0xa8] sm:$0xff]   ;;  %v242_v22 = vld [vmem:[%s19708_s25 + $0xb0] sm:$0xff]  }
  0x1b   : > { %235 = vst [vmem:[%s19713_s26 + $0xa0] sm:$0xff] %v234_v20   ;;  %v246_v23 = vld [vmem:[%s19708_s25 + $0xb8] sm:$0xff]   ;;  %239 = vst [vmem:[%s19713_s26 + $0xa8] sm:$0xff] %v238_v21   ;;  %v250_v24 = vld [vmem:[%s19708_s25 + $0xc0] sm:$0xff]  }
  0x1c   : > { %243 = vst [vmem:[%s19713_s26 + $0xb0] sm:$0xff] %v242_v22   ;;  %247 = vst [vmem:[%s19713_s26 + $0xb8] sm:$0xff] %v246_v23   ;;  %v254_v25 = vld [vmem:[%s19708_s25 + $0xc8] sm:$0xff]   ;;  %v258_v26 = vld [vmem:[%s19708_s25 + $0xd0] sm:$0xff]  }
  0x1d   : > { %251 = vst [vmem:[%s19713_s26 + $0xc0] sm:$0xff] %v250_v24   ;;  %255 = vst [vmem:[%s19713_s26 + $0xc8] sm:$0xff] %v254_v25   ;;  %v262_v27 = vld [vmem:[%s19708_s25 + $0xd8] sm:$0xff]   ;;  %v266_v28 = vld [vmem:[%s19708_s25 + $0xe0] sm:$0xff]  }
  0x1e   : > { %259 = vst [vmem:[%s19713_s26 + $0xd0] sm:$0xff] %v258_v26   ;;  %v270_v29 = vld [vmem:[%s19708_s25 + $0xe8] sm:$0xff]   ;;  %263 = vst [vmem:[%s19713_s26 + $0xd8] sm:$0xff] %v262_v27   ;;  %v274_v30 = vld [vmem:[%s19708_s25 + $0xf0] sm:$0xff]  }
  0x1f   : > { %267 = vst [vmem:[%s19713_s26 + $0xe0] sm:$0xff] %v266_v28   ;;  %271 = vst [vmem:[%s19713_s26 + $0xe8] sm:$0xff] %v270_v29   ;;  %v278_v31 = vld [vmem:[%s19708_s25 + $0xf8] sm:$0xff]   ;;  %v282_v32 = vld [vmem:[%s19708_s25 + $0x100] sm:$0xff]  }
  0x20   : > { %275 = vst [vmem:[%s19713_s26 + $0xf0] sm:$0xff] %v274_v30   ;;  %279 = vst [vmem:[%s19713_s26 + $0xf8] sm:$0xff] %v278_v31   ;;  %v286_v33 = vld [vmem:[%s19708_s25 + $0x108] sm:$0xff]   ;;  %v290_v34 = vld [vmem:[%s19708_s25 + $0x110] sm:$0xff]  }
  0x21   : > { %283 = vst [vmem:[%s19713_s26 + $0x100] sm:$0xff] %v282_v32   ;;  %v294_v35 = vld [vmem:[%s19708_s25 + $0x118] sm:$0xff]   ;;  %287 = vst [vmem:[%s19713_s26 + $0x108] sm:$0xff] %v286_v33   ;;  %v298_v36 = vld [vmem:[%s19708_s25 + $0x120] sm:$0xff]  }
  0x22   : > { %291 = vst [vmem:[%s19713_s26 + $0x110] sm:$0xff] %v290_v34   ;;  %295 = vst [vmem:[%s19713_s26 + $0x118] sm:$0xff] %v294_v35   ;;  %v302_v37 = vld [vmem:[%s19708_s25 + $0x128] sm:$0xff]   ;;  %v306_v38 = vld [vmem:[%s19708_s25 + $0x130] sm:$0xff]  }
  0x23   : > { %299 = vst [vmem:[%s19713_s26 + $0x120] sm:$0xff] %v298_v36   ;;  %303 = vst [vmem:[%s19713_s26 + $0x128] sm:$0xff] %v302_v37   ;;  %v310_v39 = vld [vmem:[%s19708_s25 + $0x138] sm:$0xff]   ;;  %v314_v40 = vld [vmem:[%s19708_s25 + $0x140] sm:$0xff]  }
  0x24   : > { %307 = vst [vmem:[%s19713_s26 + $0x130] sm:$0xff] %v306_v38   ;;  %v318_v41 = vld [vmem:[%s19708_s25 + $0x148] sm:$0xff]   ;;  %311 = vst [vmem:[%s19713_s26 + $0x138] sm:$0xff] %v310_v39   ;;  %v322_v42 = vld [vmem:[%s19708_s25 + $0x150] sm:$0xff]  }
  0x25   : > { %315 = vst [vmem:[%s19713_s26 + $0x140] sm:$0xff] %v314_v40   ;;  %319 = vst [vmem:[%s19713_s26 + $0x148] sm:$0xff] %v318_v41   ;;  %v326_v43 = vld [vmem:[%s19708_s25 + $0x158] sm:$0xff]   ;;  %v330_v44 = vld [vmem:[%s19708_s25 + $0x160] sm:$0xff]  }
  0x26   : > { %323 = vst [vmem:[%s19713_s26 + $0x150] sm:$0xff] %v322_v42   ;;  %327 = vst [vmem:[%s19713_s26 + $0x158] sm:$0xff] %v326_v43   ;;  %v334_v45 = vld [vmem:[%s19708_s25 + $0x168] sm:$0xff]   ;;  %v338_v46 = vld [vmem:[%s19708_s25 + $0x170] sm:$0xff]  }
  0x27   : > { %331 = vst [vmem:[%s19713_s26 + $0x160] sm:$0xff] %v330_v44   ;;  %v342_v47 = vld [vmem:[%s19708_s25 + $0x178] sm:$0xff]   ;;  %335 = vst [vmem:[%s19713_s26 + $0x168] sm:$0xff] %v334_v45   ;;  %v346_v48 = vld [vmem:[%s19708_s25 + $0x180] sm:$0xff]  }
  0x28   : > { %339 = vst [vmem:[%s19713_s26 + $0x170] sm:$0xff] %v338_v46   ;;  %343 = vst [vmem:[%s19713_s26 + $0x178] sm:$0xff] %v342_v47   ;;  %v350_v49 = vld [vmem:[%s19708_s25 + $0x188] sm:$0xff]   ;;  %v354_v50 = vld [vmem:[%s19708_s25 + $0x190] sm:$0xff]  }
  0x29   : > { %347 = vst [vmem:[%s19713_s26 + $0x180] sm:$0xff] %v346_v48   ;;  %351 = vst [vmem:[%s19713_s26 + $0x188] sm:$0xff] %v350_v49   ;;  %v358_v51 = vld [vmem:[%s19708_s25 + $0x198] sm:$0xff]   ;;  %v362_v52 = vld [vmem:[%s19708_s25 + $0x1a0] sm:$0xff]  }
  0x2a   : > { %355 = vst [vmem:[%s19713_s26 + $0x190] sm:$0xff] %v354_v50   ;;  %v366_v53 = vld [vmem:[%s19708_s25 + $0x1a8] sm:$0xff]   ;;  %359 = vst [vmem:[%s19713_s26 + $0x198] sm:$0xff] %v358_v51   ;;  %v370_v54 = vld [vmem:[%s19708_s25 + $0x1b0] sm:$0xff]  }
  0x2b   : > { %363 = vst [vmem:[%s19713_s26 + $0x1a0] sm:$0xff] %v362_v52   ;;  %367 = vst [vmem:[%s19713_s26 + $0x1a8] sm:$0xff] %v366_v53   ;;  %v374_v55 = vld [vmem:[%s19708_s25 + $0x1b8] sm:$0xff]   ;;  %v378_v56 = vld [vmem:[%s19708_s25 + $0x1c0] sm:$0xff]  }
  0x2c   : > { %371 = vst [vmem:[%s19713_s26 + $0x1b0] sm:$0xff] %v370_v54   ;;  %375 = vst [vmem:[%s19713_s26 + $0x1b8] sm:$0xff] %v374_v55   ;;  %v382_v57 = vld [vmem:[%s19708_s25 + $0x1c8] sm:$0xff]   ;;  %v386_v58 = vld [vmem:[%s19708_s25 + $0x1d0] sm:$0xff]  }
  0x2d   : > { %379 = vst [vmem:[%s19713_s26 + $0x1c0] sm:$0xff] %v378_v56   ;;  %v390_v59 = vld [vmem:[%s19708_s25 + $0x1d8] sm:$0xff]   ;;  %383 = vst [vmem:[%s19713_s26 + $0x1c8] sm:$0xff] %v382_v57   ;;  %v394_v60 = vld [vmem:[%s19708_s25 + $0x1e0] sm:$0xff]  }
  0x2e   : > { %387 = vst [vmem:[%s19713_s26 + $0x1d0] sm:$0xff] %v386_v58   ;;  %391 = vst [vmem:[%s19713_s26 + $0x1d8] sm:$0xff] %v390_v59   ;;  %v398_v61 = vld [vmem:[%s19708_s25 + $0x1e8] sm:$0xff]   ;;  %v402_v62 = vld [vmem:[%s19708_s25 + $0x1f0] sm:$0xff]  }
  0x2f   : > { %395 = vst [vmem:[%s19713_s26 + $0x1e0] sm:$0xff] %v394_v60   ;;  %399 = vst [vmem:[%s19713_s26 + $0x1e8] sm:$0xff] %v398_v61   ;;  %v406_v63 = vld [vmem:[%s19708_s25 + $0x1f8] sm:$0xff]   ;;  %v410_v0 = vld [vmem:[%s19708_s25 + $0x200] sm:$0xff]  }
  0x30   : > { %403 = vst [vmem:[%s19713_s26 + $0x1f0] sm:$0xff] %v402_v62   ;;  %v414_v1 = vld [vmem:[%s19708_s25 + $0x208] sm:$0xff]   ;;  %407 = vst [vmem:[%s19713_s26 + $0x1f8] sm:$0xff] %v406_v63   ;;  %v418_v2 = vld [vmem:[%s19708_s25 + $0x210] sm:$0xff]  }
  0x31   : > { %411 = vst [vmem:[%s19713_s26 + $0x200] sm:$0xff] %v410_v0   ;;  %415 = vst [vmem:[%s19713_s26 + $0x208] sm:$0xff] %v414_v1   ;;  %v422_v3 = vld [vmem:[%s19708_s25 + $0x218] sm:$0xff]   ;;  %v426_v4 = vld [vmem:[%s19708_s25 + $0x220] sm:$0xff]  }
  0x32   : > { %419 = vst [vmem:[%s19713_s26 + $0x210] sm:$0xff] %v418_v2   ;;  %423 = vst [vmem:[%s19713_s26 + $0x218] sm:$0xff] %v422_v3   ;;  %v430_v5 = vld [vmem:[%s19708_s25 + $0x228] sm:$0xff]   ;;  %v434_v6 = vld [vmem:[%s19708_s25 + $0x230] sm:$0xff]  }
  0x33   : > { %427 = vst [vmem:[%s19713_s26 + $0x220] sm:$0xff] %v426_v4   ;;  %v438_v7 = vld [vmem:[%s19708_s25 + $0x238] sm:$0xff]   ;;  %431 = vst [vmem:[%s19713_s26 + $0x228] sm:$0xff] %v430_v5   ;;  %v442_v8 = vld [vmem:[%s19708_s25 + $0x240] sm:$0xff]  }
  0x34   : > { %435 = vst [vmem:[%s19713_s26 + $0x230] sm:$0xff] %v434_v6   ;;  %439 = vst [vmem:[%s19713_s26 + $0x238] sm:$0xff] %v438_v7   ;;  %v446_v9 = vld [vmem:[%s19708_s25 + $0x248] sm:$0xff]   ;;  %v450_v10 = vld [vmem:[%s19708_s25 + $0x250] sm:$0xff]  }
  0x35   : > { %443 = vst [vmem:[%s19713_s26 + $0x240] sm:$0xff] %v442_v8   ;;  %447 = vst [vmem:[%s19713_s26 + $0x248] sm:$0xff] %v446_v9   ;;  %v454_v11 = vld [vmem:[%s19708_s25 + $0x258] sm:$0xff]   ;;  %v458_v12 = vld [vmem:[%s19708_s25 + $0x260] sm:$0xff]  }
  0x36   : > { %451 = vst [vmem:[%s19713_s26 + $0x250] sm:$0xff] %v450_v10   ;;  %v462_v13 = vld [vmem:[%s19708_s25 + $0x268] sm:$0xff]   ;;  %455 = vst [vmem:[%s19713_s26 + $0x258] sm:$0xff] %v454_v11   ;;  %v466_v14 = vld [vmem:[%s19708_s25 + $0x270] sm:$0xff]  }
  0x37   : > { %459 = vst [vmem:[%s19713_s26 + $0x260] sm:$0xff] %v458_v12   ;;  %463 = vst [vmem:[%s19713_s26 + $0x268] sm:$0xff] %v462_v13   ;;  %v470_v15 = vld [vmem:[%s19708_s25 + $0x278] sm:$0xff]   ;;  %v474_v16 = vld [vmem:[%s19708_s25 + $0x280] sm:$0xff]  }
  0x38   : > { %467 = vst [vmem:[%s19713_s26 + $0x270] sm:$0xff] %v466_v14   ;;  %471 = vst [vmem:[%s19713_s26 + $0x278] sm:$0xff] %v470_v15   ;;  %v478_v17 = vld [vmem:[%s19708_s25 + $0x288] sm:$0xff]   ;;  %v482_v18 = vld [vmem:[%s19708_s25 + $0x290] sm:$0xff]  }
  0x39   : > { %475 = vst [vmem:[%s19713_s26 + $0x280] sm:$0xff] %v474_v16   ;;  %v486_v19 = vld [vmem:[%s19708_s25 + $0x298] sm:$0xff]   ;;  %479 = vst [vmem:[%s19713_s26 + $0x288] sm:$0xff] %v478_v17   ;;  %v490_v20 = vld [vmem:[%s19708_s25 + $0x2a0] sm:$0xff]  }
  0x3a   : > { %483 = vst [vmem:[%s19713_s26 + $0x290] sm:$0xff] %v482_v18   ;;  %487 = vst [vmem:[%s19713_s26 + $0x298] sm:$0xff] %v486_v19   ;;  %v494_v21 = vld [vmem:[%s19708_s25 + $0x2a8] sm:$0xff]   ;;  %v498_v22 = vld [vmem:[%s19708_s25 + $0x2b0] sm:$0xff]  }
  0x3b   : > { %491 = vst [vmem:[%s19713_s26 + $0x2a0] sm:$0xff] %v490_v20   ;;  %495 = vst [vmem:[%s19713_s26 + $0x2a8] sm:$0xff] %v494_v21   ;;  %v502_v23 = vld [vmem:[%s19708_s25 + $0x2b8] sm:$0xff]   ;;  %v506_v24 = vld [vmem:[%s19708_s25 + $0x2c0] sm:$0xff]  }
  0x3c   : > { %499 = vst [vmem:[%s19713_s26 + $0x2b0] sm:$0xff] %v498_v22   ;;  %v510_v25 = vld [vmem:[%s19708_s25 + $0x2c8] sm:$0xff]   ;;  %503 = vst [vmem:[%s19713_s26 + $0x2b8] sm:$0xff] %v502_v23   ;;  %v514_v26 = vld [vmem:[%s19708_s25 + $0x2d0] sm:$0xff]  }
  0x3d   : > { %507 = vst [vmem:[%s19713_s26 + $0x2c0] sm:$0xff] %v506_v24   ;;  %511 = vst [vmem:[%s19713_s26 + $0x2c8] sm:$0xff] %v510_v25   ;;  %v518_v27 = vld [vmem:[%s19708_s25 + $0x2d8] sm:$0xff]   ;;  %v522_v28 = vld [vmem:[%s19708_s25 + $0x2e0] sm:$0xff]  }
  0x3e   : > { %515 = vst [vmem:[%s19713_s26 + $0x2d0] sm:$0xff] %v514_v26   ;;  %519 = vst [vmem:[%s19713_s26 + $0x2d8] sm:$0xff] %v518_v27   ;;  %v526_v29 = vld [vmem:[%s19708_s25 + $0x2e8] sm:$0xff]   ;;  %v530_v30 = vld [vmem:[%s19708_s25 + $0x2f0] sm:$0xff]  }
  0x3f   : > { %523 = vst [vmem:[%s19713_s26 + $0x2e0] sm:$0xff] %v522_v28   ;;  %v534_v31 = vld [vmem:[%s19708_s25 + $0x2f8] sm:$0xff]   ;;  %527 = vst [vmem:[%s19713_s26 + $0x2e8] sm:$0xff] %v526_v29   ;;  %v538_v32 = vld [vmem:[%s19708_s25 + $0x300] sm:$0xff]  }
  0x40   : > { %531 = vst [vmem:[%s19713_s26 + $0x2f0] sm:$0xff] %v530_v30   ;;  %535 = vst [vmem:[%s19713_s26 + $0x2f8] sm:$0xff] %v534_v31   ;;  %v542_v33 = vld [vmem:[%s19708_s25 + $0x308] sm:$0xff]   ;;  %v546_v34 = vld [vmem:[%s19708_s25 + $0x310] sm:$0xff]  }
  0x41   : > { %539 = vst [vmem:[%s19713_s26 + $0x300] sm:$0xff] %v538_v32   ;;  %543 = vst [vmem:[%s19713_s26 + $0x308] sm:$0xff] %v542_v33   ;;  %v550_v35 = vld [vmem:[%s19708_s25 + $0x318] sm:$0xff]   ;;  %v554_v36 = vld [vmem:[%s19708_s25 + $0x640] sm:$0xff]  }
  0x42   : > { %547 = vst [vmem:[%s19713_s26 + $0x310] sm:$0xff] %v546_v34   ;;  %v558_v37 = vld [vmem:[%s19708_s25 + $0x648] sm:$0xff]   ;;  %551 = vst [vmem:[%s19713_s26 + $0x318] sm:$0xff] %v550_v35   ;;  %v562_v38 = vld [vmem:[%s19708_s25 + $0x650] sm:$0xff]  }
  0x43   : > { %555 = vst [vmem:[%s19713_s26 + $0x320] sm:$0xff] %v554_v36   ;;  %559 = vst [vmem:[%s19713_s26 + $0x328] sm:$0xff] %v558_v37   ;;  %v566_v39 = vld [vmem:[%s19708_s25 + $0x658] sm:$0xff]   ;;  %v570_v40 = vld [vmem:[%s19708_s25 + $0x660] sm:$0xff]  }
  0x44   : > { %563 = vst [vmem:[%s19713_s26 + $0x330] sm:$0xff] %v562_v38   ;;  %567 = vst [vmem:[%s19713_s26 + $0x338] sm:$0xff] %v566_v39   ;;  %v574_v41 = vld [vmem:[%s19708_s25 + $0x668] sm:$0xff]   ;;  %v578_v42 = vld [vmem:[%s19708_s25 + $0x670] sm:$0xff]  }
  0x45   : > { %571 = vst [vmem:[%s19713_s26 + $0x340] sm:$0xff] %v570_v40   ;;  %v582_v43 = vld [vmem:[%s19708_s25 + $0x678] sm:$0xff]   ;;  %575 = vst [vmem:[%s19713_s26 + $0x348] sm:$0xff] %v574_v41   ;;  %v586_v44 = vld [vmem:[%s19708_s25 + $0x680] sm:$0xff]  }
  0x46   : > { %579 = vst [vmem:[%s19713_s26 + $0x350] sm:$0xff] %v578_v42   ;;  %583 = vst [vmem:[%s19713_s26 + $0x358] sm:$0xff] %v582_v43   ;;  %v590_v45 = vld [vmem:[%s19708_s25 + $0x688] sm:$0xff]   ;;  %v594_v46 = vld [vmem:[%s19708_s25 + $0x690] sm:$0xff]  }
  0x47   : > { %587 = vst [vmem:[%s19713_s26 + $0x360] sm:$0xff] %v586_v44   ;;  %591 = vst [vmem:[%s19713_s26 + $0x368] sm:$0xff] %v590_v45   ;;  %v598_v47 = vld [vmem:[%s19708_s25 + $0x698] sm:$0xff]   ;;  %v602_v48 = vld [vmem:[%s19708_s25 + $0x6a0] sm:$0xff]  }
  0x48   : > { %595 = vst [vmem:[%s19713_s26 + $0x370] sm:$0xff] %v594_v46   ;;  %v606_v49 = vld [vmem:[%s19708_s25 + $0x6a8] sm:$0xff]   ;;  %599 = vst [vmem:[%s19713_s26 + $0x378] sm:$0xff] %v598_v47   ;;  %v610_v50 = vld [vmem:[%s19708_s25 + $0x6b0] sm:$0xff]  }
  0x49   : > { %603 = vst [vmem:[%s19713_s26 + $0x380] sm:$0xff] %v602_v48   ;;  %607 = vst [vmem:[%s19713_s26 + $0x388] sm:$0xff] %v606_v49   ;;  %v614_v51 = vld [vmem:[%s19708_s25 + $0x6b8] sm:$0xff]   ;;  %v618_v52 = vld [vmem:[%s19708_s25 + $0x6c0] sm:$0xff]  }
  0x4a   : > { %611 = vst [vmem:[%s19713_s26 + $0x390] sm:$0xff] %v610_v50   ;;  %615 = vst [vmem:[%s19713_s26 + $0x398] sm:$0xff] %v614_v51   ;;  %v622_v53 = vld [vmem:[%s19708_s25 + $0x6c8] sm:$0xff]   ;;  %v626_v54 = vld [vmem:[%s19708_s25 + $0x6d0] sm:$0xff]  }
  0x4b   : > { %619 = vst [vmem:[%s19713_s26 + $0x3a0] sm:$0xff] %v618_v52   ;;  %v630_v55 = vld [vmem:[%s19708_s25 + $0x6d8] sm:$0xff]   ;;  %623 = vst [vmem:[%s19713_s26 + $0x3a8] sm:$0xff] %v622_v53   ;;  %v634_v56 = vld [vmem:[%s19708_s25 + $0x6e0] sm:$0xff]  }
  0x4c   : > { %627 = vst [vmem:[%s19713_s26 + $0x3b0] sm:$0xff] %v626_v54   ;;  %631 = vst [vmem:[%s19713_s26 + $0x3b8] sm:$0xff] %v630_v55   ;;  %v638_v57 = vld [vmem:[%s19708_s25 + $0x6e8] sm:$0xff]   ;;  %v642_v58 = vld [vmem:[%s19708_s25 + $0x6f0] sm:$0xff]  }
  0x4d   : > { %635 = vst [vmem:[%s19713_s26 + $0x3c0] sm:$0xff] %v634_v56   ;;  %639 = vst [vmem:[%s19713_s26 + $0x3c8] sm:$0xff] %v638_v57   ;;  %v646_v59 = vld [vmem:[%s19708_s25 + $0x6f8] sm:$0xff]   ;;  %v650_v60 = vld [vmem:[%s19708_s25 + $0x700] sm:$0xff]  }
  0x4e   : > { %643 = vst [vmem:[%s19713_s26 + $0x3d0] sm:$0xff] %v642_v58   ;;  %v654_v61 = vld [vmem:[%s19708_s25 + $0x708] sm:$0xff]   ;;  %647 = vst [vmem:[%s19713_s26 + $0x3d8] sm:$0xff] %v646_v59   ;;  %v658_v62 = vld [vmem:[%s19708_s25 + $0x710] sm:$0xff]  }
  0x4f   : > { %651 = vst [vmem:[%s19713_s26 + $0x3e0] sm:$0xff] %v650_v60   ;;  %655 = vst [vmem:[%s19713_s26 + $0x3e8] sm:$0xff] %v654_v61   ;;  %v662_v63 = vld [vmem:[%s19708_s25 + $0x718] sm:$0xff]   ;;  %v666_v0 = vld [vmem:[%s19708_s25 + $0x720] sm:$0xff]  }
  0x50   : > { %659 = vst [vmem:[%s19713_s26 + $0x3f0] sm:$0xff] %v658_v62   ;;  %663 = vst [vmem:[%s19713_s26 + $0x3f8] sm:$0xff] %v662_v63   ;;  %v670_v1 = vld [vmem:[%s19708_s25 + $0x728] sm:$0xff]   ;;  %v674_v2 = vld [vmem:[%s19708_s25 + $0x730] sm:$0xff]  }
  0x51   : > { %667 = vst [vmem:[%s19713_s26 + $0x400] sm:$0xff] %v666_v0   ;;  %v678_v3 = vld [vmem:[%s19708_s25 + $0x738] sm:$0xff]   ;;  %671 = vst [vmem:[%s19713_s26 + $0x408] sm:$0xff] %v670_v1   ;;  %v682_v4 = vld [vmem:[%s19708_s25 + $0x740] sm:$0xff]  }
  0x52   : > { %675 = vst [vmem:[%s19713_s26 + $0x410] sm:$0xff] %v674_v2   ;;  %679 = vst [vmem:[%s19713_s26 + $0x418] sm:$0xff] %v678_v3   ;;  %v686_v5 = vld [vmem:[%s19708_s25 + $0x748] sm:$0xff]   ;;  %v690_v6 = vld [vmem:[%s19708_s25 + $0x750] sm:$0xff]  }
  0x53   : > { %683 = vst [vmem:[%s19713_s26 + $0x420] sm:$0xff] %v682_v4   ;;  %687 = vst [vmem:[%s19713_s26 + $0x428] sm:$0xff] %v686_v5   ;;  %v694_v7 = vld [vmem:[%s19708_s25 + $0x758] sm:$0xff]   ;;  %v698_v8 = vld [vmem:[%s19708_s25 + $0x760] sm:$0xff]  }
  0x54   : > { %691 = vst [vmem:[%s19713_s26 + $0x430] sm:$0xff] %v690_v6   ;;  %v702_v9 = vld [vmem:[%s19708_s25 + $0x768] sm:$0xff]   ;;  %695 = vst [vmem:[%s19713_s26 + $0x438] sm:$0xff] %v694_v7   ;;  %v706_v10 = vld [vmem:[%s19708_s25 + $0x770] sm:$0xff]  }
  0x55   : > { %699 = vst [vmem:[%s19713_s26 + $0x440] sm:$0xff] %v698_v8   ;;  %703 = vst [vmem:[%s19713_s26 + $0x448] sm:$0xff] %v702_v9   ;;  %v710_v11 = vld [vmem:[%s19708_s25 + $0x778] sm:$0xff]   ;;  %v714_v12 = vld [vmem:[%s19708_s25 + $0x780] sm:$0xff]  }
  0x56   : > { %707 = vst [vmem:[%s19713_s26 + $0x450] sm:$0xff] %v706_v10   ;;  %711 = vst [vmem:[%s19713_s26 + $0x458] sm:$0xff] %v710_v11   ;;  %v718_v13 = vld [vmem:[%s19708_s25 + $0x788] sm:$0xff]   ;;  %v722_v14 = vld [vmem:[%s19708_s25 + $0x790] sm:$0xff]  }
  0x57   : > { %715 = vst [vmem:[%s19713_s26 + $0x460] sm:$0xff] %v714_v12   ;;  %v726_v15 = vld [vmem:[%s19708_s25 + $0x798] sm:$0xff]   ;;  %719 = vst [vmem:[%s19713_s26 + $0x468] sm:$0xff] %v718_v13   ;;  %v730_v16 = vld [vmem:[%s19708_s25 + $0x7a0] sm:$0xff]  }
  0x58   : > { %723 = vst [vmem:[%s19713_s26 + $0x470] sm:$0xff] %v722_v14   ;;  %727 = vst [vmem:[%s19713_s26 + $0x478] sm:$0xff] %v726_v15   ;;  %v734_v17 = vld [vmem:[%s19708_s25 + $0x7a8] sm:$0xff]   ;;  %v738_v18 = vld [vmem:[%s19708_s25 + $0x7b0] sm:$0xff]  }
  0x59   : > { %731 = vst [vmem:[%s19713_s26 + $0x480] sm:$0xff] %v730_v16   ;;  %735 = vst [vmem:[%s19713_s26 + $0x488] sm:$0xff] %v734_v17   ;;  %v742_v19 = vld [vmem:[%s19708_s25 + $0x7b8] sm:$0xff]   ;;  %v746_v20 = vld [vmem:[%s19708_s25 + $0x7c0] sm:$0xff]  }
  0x5a   : > { %739 = vst [vmem:[%s19713_s26 + $0x490] sm:$0xff] %v738_v18   ;;  %v750_v21 = vld [vmem:[%s19708_s25 + $0x7c8] sm:$0xff]   ;;  %743 = vst [vmem:[%s19713_s26 + $0x498] sm:$0xff] %v742_v19   ;;  %v754_v22 = vld [vmem:[%s19708_s25 + $0x7d0] sm:$0xff]  }
  0x5b   : > { %747 = vst [vmem:[%s19713_s26 + $0x4a0] sm:$0xff] %v746_v20   ;;  %751 = vst [vmem:[%s19713_s26 + $0x4a8] sm:$0xff] %v750_v21   ;;  %v758_v23 = vld [vmem:[%s19708_s25 + $0x7d8] sm:$0xff]   ;;  %v762_v24 = vld [vmem:[%s19708_s25 + $0x7e0] sm:$0xff]  }
  0x5c   : > { %755 = vst [vmem:[%s19713_s26 + $0x4b0] sm:$0xff] %v754_v22   ;;  %759 = vst [vmem:[%s19713_s26 + $0x4b8] sm:$0xff] %v758_v23   ;;  %v766_v25 = vld [vmem:[%s19708_s25 + $0x7e8] sm:$0xff]   ;;  %v770_v26 = vld [vmem:[%s19708_s25 + $0x7f0] sm:$0xff]  }
  0x5d   : > { %763 = vst [vmem:[%s19713_s26 + $0x4c0] sm:$0xff] %v762_v24   ;;  %v774_v27 = vld [vmem:[%s19708_s25 + $0x7f8] sm:$0xff]   ;;  %767 = vst [vmem:[%s19713_s26 + $0x4c8] sm:$0xff] %v766_v25   ;;  %v778_v28 = vld [vmem:[%s19708_s25 + $0x800] sm:$0xff]  }
  0x5e   : > { %771 = vst [vmem:[%s19713_s26 + $0x4d0] sm:$0xff] %v770_v26   ;;  %775 = vst [vmem:[%s19713_s26 + $0x4d8] sm:$0xff] %v774_v27   ;;  %v782_v29 = vld [vmem:[%s19708_s25 + $0x808] sm:$0xff]   ;;  %v786_v30 = vld [vmem:[%s19708_s25 + $0x810] sm:$0xff]  }
  0x5f   : > { %779 = vst [vmem:[%s19713_s26 + $0x4e0] sm:$0xff] %v778_v28   ;;  %783 = vst [vmem:[%s19713_s26 + $0x4e8] sm:$0xff] %v782_v29   ;;  %v790_v31 = vld [vmem:[%s19708_s25 + $0x818] sm:$0xff]   ;;  %v794_v32 = vld [vmem:[%s19708_s25 + $0x820] sm:$0xff]  }
  0x60   : > { %787 = vst [vmem:[%s19713_s26 + $0x4f0] sm:$0xff] %v786_v30   ;;  %v798_v33 = vld [vmem:[%s19708_s25 + $0x828] sm:$0xff]   ;;  %791 = vst [vmem:[%s19713_s26 + $0x4f8] sm:$0xff] %v790_v31   ;;  %v802_v34 = vld [vmem:[%s19708_s25 + $0x830] sm:$0xff]  }
  0x61   : > { %795 = vst [vmem:[%s19713_s26 + $0x500] sm:$0xff] %v794_v32   ;;  %799 = vst [vmem:[%s19713_s26 + $0x508] sm:$0xff] %v798_v33   ;;  %v806_v35 = vld [vmem:[%s19708_s25 + $0x838] sm:$0xff]   ;;  %v810_v36 = vld [vmem:[%s19708_s25 + $0x840] sm:$0xff]  }
  0x62   : > { %803 = vst [vmem:[%s19713_s26 + $0x510] sm:$0xff] %v802_v34   ;;  %807 = vst [vmem:[%s19713_s26 + $0x518] sm:$0xff] %v806_v35   ;;  %v814_v37 = vld [vmem:[%s19708_s25 + $0x848] sm:$0xff]   ;;  %v818_v38 = vld [vmem:[%s19708_s25 + $0x850] sm:$0xff]  }
  0x63   : > { %811 = vst [vmem:[%s19713_s26 + $0x520] sm:$0xff] %v810_v36   ;;  %v822_v39 = vld [vmem:[%s19708_s25 + $0x858] sm:$0xff]   ;;  %815 = vst [vmem:[%s19713_s26 + $0x528] sm:$0xff] %v814_v37   ;;  %v826_v40 = vld [vmem:[%s19708_s25 + $0x860] sm:$0xff]  }
  0x64   : > { %819 = vst [vmem:[%s19713_s26 + $0x530] sm:$0xff] %v818_v38   ;;  %823 = vst [vmem:[%s19713_s26 + $0x538] sm:$0xff] %v822_v39   ;;  %v830_v41 = vld [vmem:[%s19708_s25 + $0x868] sm:$0xff]   ;;  %v834_v42 = vld [vmem:[%s19708_s25 + $0x870] sm:$0xff]  }
  0x65   : > { %827 = vst [vmem:[%s19713_s26 + $0x540] sm:$0xff] %v826_v40   ;;  %831 = vst [vmem:[%s19713_s26 + $0x548] sm:$0xff] %v830_v41   ;;  %v838_v43 = vld [vmem:[%s19708_s25 + $0x878] sm:$0xff]   ;;  %v842_v44 = vld [vmem:[%s19708_s25 + $0x880] sm:$0xff]  }
  0x66   : > { %835 = vst [vmem:[%s19713_s26 + $0x550] sm:$0xff] %v834_v42   ;;  %v846_v45 = vld [vmem:[%s19708_s25 + $0x888] sm:$0xff]   ;;  %839 = vst [vmem:[%s19713_s26 + $0x558] sm:$0xff] %v838_v43   ;;  %v850_v46 = vld [vmem:[%s19708_s25 + $0x890] sm:$0xff]  }
  0x67   : > { %843 = vst [vmem:[%s19713_s26 + $0x560] sm:$0xff] %v842_v44   ;;  %847 = vst [vmem:[%s19713_s26 + $0x568] sm:$0xff] %v846_v45   ;;  %v854_v47 = vld [vmem:[%s19708_s25 + $0x898] sm:$0xff]   ;;  %v858_v48 = vld [vmem:[%s19708_s25 + $0x8a0] sm:$0xff]  }
  0x68   : > { %851 = vst [vmem:[%s19713_s26 + $0x570] sm:$0xff] %v850_v46   ;;  %855 = vst [vmem:[%s19713_s26 + $0x578] sm:$0xff] %v854_v47   ;;  %v862_v49 = vld [vmem:[%s19708_s25 + $0x8a8] sm:$0xff]   ;;  %v866_v50 = vld [vmem:[%s19708_s25 + $0x8b0] sm:$0xff]  }
  0x69   : > { %859 = vst [vmem:[%s19713_s26 + $0x580] sm:$0xff] %v858_v48   ;;  %v870_v51 = vld [vmem:[%s19708_s25 + $0x8b8] sm:$0xff]   ;;  %863 = vst [vmem:[%s19713_s26 + $0x588] sm:$0xff] %v862_v49   ;;  %v874_v52 = vld [vmem:[%s19708_s25 + $0x8c0] sm:$0xff]  }
  0x6a   : > { %867 = vst [vmem:[%s19713_s26 + $0x590] sm:$0xff] %v866_v50   ;;  %871 = vst [vmem:[%s19713_s26 + $0x598] sm:$0xff] %v870_v51   ;;  %v878_v53 = vld [vmem:[%s19708_s25 + $0x8c8] sm:$0xff]   ;;  %v882_v54 = vld [vmem:[%s19708_s25 + $0x8d0] sm:$0xff]  }
  0x6b   : > { %875 = vst [vmem:[%s19713_s26 + $0x5a0] sm:$0xff] %v874_v52   ;;  %879 = vst [vmem:[%s19713_s26 + $0x5a8] sm:$0xff] %v878_v53   ;;  %v886_v55 = vld [vmem:[%s19708_s25 + $0x8d8] sm:$0xff]   ;;  %v890_v56 = vld [vmem:[%s19708_s25 + $0x8e0] sm:$0xff]  }
  0x6c   : > { %883 = vst [vmem:[%s19713_s26 + $0x5b0] sm:$0xff] %v882_v54   ;;  %v894_v57 = vld [vmem:[%s19708_s25 + $0x8e8] sm:$0xff]   ;;  %887 = vst [vmem:[%s19713_s26 + $0x5b8] sm:$0xff] %v886_v55   ;;  %v898_v58 = vld [vmem:[%s19708_s25 + $0x8f0] sm:$0xff]  }
  0x6d   : > { %891 = vst [vmem:[%s19713_s26 + $0x5c0] sm:$0xff] %v890_v56   ;;  %895 = vst [vmem:[%s19713_s26 + $0x5c8] sm:$0xff] %v894_v57   ;;  %v902_v59 = vld [vmem:[%s19708_s25 + $0x8f8] sm:$0xff]   ;;  %v906_v60 = vld [vmem:[%s19708_s25 + $0x900] sm:$0xff]  }
  0x6e   : > { %899 = vst [vmem:[%s19713_s26 + $0x5d0] sm:$0xff] %v898_v58   ;;  %903 = vst [vmem:[%s19713_s26 + $0x5d8] sm:$0xff] %v902_v59   ;;  %v910_v61 = vld [vmem:[%s19708_s25 + $0x908] sm:$0xff]   ;;  %v914_v62 = vld [vmem:[%s19708_s25 + $0x910] sm:$0xff]  }
  0x6f   : > { %907 = vst [vmem:[%s19713_s26 + $0x5e0] sm:$0xff] %v906_v60   ;;  %v918_v63 = vld [vmem:[%s19708_s25 + $0x918] sm:$0xff]   ;;  %911 = vst [vmem:[%s19713_s26 + $0x5e8] sm:$0xff] %v910_v61   ;;  %v922_v0 = vld [vmem:[%s19708_s25 + $0x920] sm:$0xff]  }
  0x70   : > { %915 = vst [vmem:[%s19713_s26 + $0x5f0] sm:$0xff] %v914_v62   ;;  %919 = vst [vmem:[%s19713_s26 + $0x5f8] sm:$0xff] %v918_v63   ;;  %v926_v1 = vld [vmem:[%s19708_s25 + $0x928] sm:$0xff]   ;;  %v930_v2 = vld [vmem:[%s19708_s25 + $0x930] sm:$0xff]  }
  0x71   : > { %923 = vst [vmem:[%s19713_s26 + $0x600] sm:$0xff] %v922_v0   ;;  %927 = vst [vmem:[%s19713_s26 + $0x608] sm:$0xff] %v926_v1   ;;  %v934_v3 = vld [vmem:[%s19708_s25 + $0x938] sm:$0xff]   ;;  %v938_v4 = vld [vmem:[%s19708_s25 + $0x940] sm:$0xff]  }
  0x72   : > { %931 = vst [vmem:[%s19713_s26 + $0x610] sm:$0xff] %v930_v2   ;;  %v942_v5 = vld [vmem:[%s19708_s25 + $0x948] sm:$0xff]   ;;  %935 = vst [vmem:[%s19713_s26 + $0x618] sm:$0xff] %v934_v3   ;;  %v946_v6 = vld [vmem:[%s19708_s25 + $0x950] sm:$0xff]  }
  0x73   : > { %939 = vst [vmem:[%s19713_s26 + $0x620] sm:$0xff] %v938_v4   ;;  %943 = vst [vmem:[%s19713_s26 + $0x628] sm:$0xff] %v942_v5   ;;  %v950_v7 = vld [vmem:[%s19708_s25 + $0x958] sm:$0xff]   ;;  %v954_v8 = vld [vmem:[%s19708_s25 + $0xc80] sm:$0xff]  }
  0x74   : > { %947 = vst [vmem:[%s19713_s26 + $0x630] sm:$0xff] %v946_v6   ;;  %951 = vst [vmem:[%s19713_s26 + $0x638] sm:$0xff] %v950_v7   ;;  %v958_v9 = vld [vmem:[%s19708_s25 + $0xc88] sm:$0xff]   ;;  %v962_v10 = vld [vmem:[%s19708_s25 + $0xc90] sm:$0xff]  }
  0x75   : > { %955 = vst [vmem:[%s19713_s26 + $0x640] sm:$0xff] %v954_v8   ;;  %v966_v11 = vld [vmem:[%s19708_s25 + $0xc98] sm:$0xff]   ;;  %959 = vst [vmem:[%s19713_s26 + $0x648] sm:$0xff] %v958_v9   ;;  %v970_v12 = vld [vmem:[%s19708_s25 + $0xca0] sm:$0xff]  }
  0x76   : > { %963 = vst [vmem:[%s19713_s26 + $0x650] sm:$0xff] %v962_v10   ;;  %967 = vst [vmem:[%s19713_s26 + $0x658] sm:$0xff] %v966_v11   ;;  %v974_v13 = vld [vmem:[%s19708_s25 + $0xca8] sm:$0xff]   ;;  %v978_v14 = vld [vmem:[%s19708_s25 + $0xcb0] sm:$0xff]  }
  0x77   : > { %971 = vst [vmem:[%s19713_s26 + $0x660] sm:$0xff] %v970_v12   ;;  %975 = vst [vmem:[%s19713_s26 + $0x668] sm:$0xff] %v974_v13   ;;  %v982_v15 = vld [vmem:[%s19708_s25 + $0xcb8] sm:$0xff]   ;;  %v986_v16 = vld [vmem:[%s19708_s25 + $0xcc0] sm:$0xff]  }
  0x78   : > { %979 = vst [vmem:[%s19713_s26 + $0x670] sm:$0xff] %v978_v14   ;;  %v990_v17 = vld [vmem:[%s19708_s25 + $0xcc8] sm:$0xff]   ;;  %983 = vst [vmem:[%s19713_s26 + $0x678] sm:$0xff] %v982_v15   ;;  %v994_v18 = vld [vmem:[%s19708_s25 + $0xcd0] sm:$0xff]  }
  0x79   : > { %987 = vst [vmem:[%s19713_s26 + $0x680] sm:$0xff] %v986_v16   ;;  %991 = vst [vmem:[%s19713_s26 + $0x688] sm:$0xff] %v990_v17   ;;  %v998_v19 = vld [vmem:[%s19708_s25 + $0xcd8] sm:$0xff]   ;;  %v1002_v20 = vld [vmem:[%s19708_s25 + $0xce0] sm:$0xff]  }
  0x7a   : > { %995 = vst [vmem:[%s19713_s26 + $0x690] sm:$0xff] %v994_v18   ;;  %999 = vst [vmem:[%s19713_s26 + $0x698] sm:$0xff] %v998_v19   ;;  %v1006_v21 = vld [vmem:[%s19708_s25 + $0xce8] sm:$0xff]   ;;  %v1010_v22 = vld [vmem:[%s19708_s25 + $0xcf0] sm:$0xff]  }
  0x7b   : > { %1003 = vst [vmem:[%s19713_s26 + $0x6a0] sm:$0xff] %v1002_v20   ;;  %v1014_v23 = vld [vmem:[%s19708_s25 + $0xcf8] sm:$0xff]   ;;  %1007 = vst [vmem:[%s19713_s26 + $0x6a8] sm:$0xff] %v1006_v21   ;;  %v1018_v24 = vld [vmem:[%s19708_s25 + $0xd00] sm:$0xff]  }
  0x7c   : > { %1011 = vst [vmem:[%s19713_s26 + $0x6b0] sm:$0xff] %v1010_v22   ;;  %1015 = vst [vmem:[%s19713_s26 + $0x6b8] sm:$0xff] %v1014_v23   ;;  %v1022_v25 = vld [vmem:[%s19708_s25 + $0xd08] sm:$0xff]   ;;  %v1026_v26 = vld [vmem:[%s19708_s25 + $0xd10] sm:$0xff]  }
  0x7d   : > { %1019 = vst [vmem:[%s19713_s26 + $0x6c0] sm:$0xff] %v1018_v24   ;;  %1023 = vst [vmem:[%s19713_s26 + $0x6c8] sm:$0xff] %v1022_v25   ;;  %v1030_v27 = vld [vmem:[%s19708_s25 + $0xd18] sm:$0xff]   ;;  %v1034_v28 = vld [vmem:[%s19708_s25 + $0xd20] sm:$0xff]  }
  0x7e   : > { %1027 = vst [vmem:[%s19713_s26 + $0x6d0] sm:$0xff] %v1026_v26   ;;  %v1038_v29 = vld [vmem:[%s19708_s25 + $0xd28] sm:$0xff]   ;;  %1031 = vst [vmem:[%s19713_s26 + $0x6d8] sm:$0xff] %v1030_v27   ;;  %v1042_v30 = vld [vmem:[%s19708_s25 + $0xd30] sm:$0xff]  }
  0x7f   : > { %1035 = vst [vmem:[%s19713_s26 + $0x6e0] sm:$0xff] %v1034_v28   ;;  %1039 = vst [vmem:[%s19713_s26 + $0x6e8] sm:$0xff] %v1038_v29   ;;  %v1046_v31 = vld [vmem:[%s19708_s25 + $0xd38] sm:$0xff]   ;;  %v1050_v32 = vld [vmem:[%s19708_s25 + $0xd40] sm:$0xff]  }
  0x80   : > { %1043 = vst [vmem:[%s19713_s26 + $0x6f0] sm:$0xff] %v1042_v30   ;;  %1047 = vst [vmem:[%s19713_s26 + $0x6f8] sm:$0xff] %v1046_v31   ;;  %v1054_v33 = vld [vmem:[%s19708_s25 + $0xd48] sm:$0xff]   ;;  %v1058_v34 = vld [vmem:[%s19708_s25 + $0xd50] sm:$0xff]  }
  0x81   : > { %1051 = vst [vmem:[%s19713_s26 + $0x700] sm:$0xff] %v1050_v32   ;;  %v1062_v35 = vld [vmem:[%s19708_s25 + $0xd58] sm:$0xff]   ;;  %1055 = vst [vmem:[%s19713_s26 + $0x708] sm:$0xff] %v1054_v33   ;;  %v1066_v36 = vld [vmem:[%s19708_s25 + $0xd60] sm:$0xff]  }
  0x82   : > { %1059 = vst [vmem:[%s19713_s26 + $0x710] sm:$0xff] %v1058_v34   ;;  %1063 = vst [vmem:[%s19713_s26 + $0x718] sm:$0xff] %v1062_v35   ;;  %v1070_v37 = vld [vmem:[%s19708_s25 + $0xd68] sm:$0xff]   ;;  %v1074_v38 = vld [vmem:[%s19708_s25 + $0xd70] sm:$0xff]  }
  0x83   : > { %1067 = vst [vmem:[%s19713_s26 + $0x720] sm:$0xff] %v1066_v36   ;;  %1071 = vst [vmem:[%s19713_s26 + $0x728] sm:$0xff] %v1070_v37   ;;  %v1078_v39 = vld [vmem:[%s19708_s25 + $0xd78] sm:$0xff]   ;;  %v1082_v40 = vld [vmem:[%s19708_s25 + $0xd80] sm:$0xff]  }
  0x84   : > { %1075 = vst [vmem:[%s19713_s26 + $0x730] sm:$0xff] %v1074_v38   ;;  %v1086_v41 = vld [vmem:[%s19708_s25 + $0xd88] sm:$0xff]   ;;  %1079 = vst [vmem:[%s19713_s26 + $0x738] sm:$0xff] %v1078_v39   ;;  %v1090_v42 = vld [vmem:[%s19708_s25 + $0xd90] sm:$0xff]  }
  0x85   : > { %1083 = vst [vmem:[%s19713_s26 + $0x740] sm:$0xff] %v1082_v40   ;;  %1087 = vst [vmem:[%s19713_s26 + $0x748] sm:$0xff] %v1086_v41   ;;  %v1094_v43 = vld [vmem:[%s19708_s25 + $0xd98] sm:$0xff]   ;;  %v1098_v44 = vld [vmem:[%s19708_s25 + $0xda0] sm:$0xff]  }
  0x86   : > { %1091 = vst [vmem:[%s19713_s26 + $0x750] sm:$0xff] %v1090_v42   ;;  %1095 = vst [vmem:[%s19713_s26 + $0x758] sm:$0xff] %v1094_v43   ;;  %v1102_v45 = vld [vmem:[%s19708_s25 + $0xda8] sm:$0xff]   ;;  %v1106_v46 = vld [vmem:[%s19708_s25 + $0xdb0] sm:$0xff]  }
  0x87   : > { %1099 = vst [vmem:[%s19713_s26 + $0x760] sm:$0xff] %v1098_v44   ;;  %v1110_v47 = vld [vmem:[%s19708_s25 + $0xdb8] sm:$0xff]   ;;  %1103 = vst [vmem:[%s19713_s26 + $0x768] sm:$0xff] %v1102_v45   ;;  %v1114_v48 = vld [vmem:[%s19708_s25 + $0xdc0] sm:$0xff]  }
  0x88   : > { %1107 = vst [vmem:[%s19713_s26 + $0x770] sm:$0xff] %v1106_v46   ;;  %1111 = vst [vmem:[%s19713_s26 + $0x778] sm:$0xff] %v1110_v47   ;;  %v1118_v49 = vld [vmem:[%s19708_s25 + $0xdc8] sm:$0xff]   ;;  %v1122_v50 = vld [vmem:[%s19708_s25 + $0xdd0] sm:$0xff]  }
  0x89   : > { %1115 = vst [vmem:[%s19713_s26 + $0x780] sm:$0xff] %v1114_v48   ;;  %1119 = vst [vmem:[%s19713_s26 + $0x788] sm:$0xff] %v1118_v49   ;;  %v1126_v51 = vld [vmem:[%s19708_s25 + $0xdd8] sm:$0xff]   ;;  %v1130_v52 = vld [vmem:[%s19708_s25 + $0xde0] sm:$0xff]  }
  0x8a   : > { %1123 = vst [vmem:[%s19713_s26 + $0x790] sm:$0xff] %v1122_v50   ;;  %v1134_v53 = vld [vmem:[%s19708_s25 + $0xde8] sm:$0xff]   ;;  %1127 = vst [vmem:[%s19713_s26 + $0x798] sm:$0xff] %v1126_v51   ;;  %v1138_v54 = vld [vmem:[%s19708_s25 + $0xdf0] sm:$0xff]  }
  0x8b   : > { %1131 = vst [vmem:[%s19713_s26 + $0x7a0] sm:$0xff] %v1130_v52   ;;  %1135 = vst [vmem:[%s19713_s26 + $0x7a8] sm:$0xff] %v1134_v53   ;;  %v1142_v55 = vld [vmem:[%s19708_s25 + $0xdf8] sm:$0xff]   ;;  %v1146_v56 = vld [vmem:[%s19708_s25 + $0xe00] sm:$0xff]  }
  0x8c   : > { %1139 = vst [vmem:[%s19713_s26 + $0x7b0] sm:$0xff] %v1138_v54   ;;  %1143 = vst [vmem:[%s19713_s26 + $0x7b8] sm:$0xff] %v1142_v55   ;;  %v1150_v57 = vld [vmem:[%s19708_s25 + $0xe08] sm:$0xff]   ;;  %v1154_v58 = vld [vmem:[%s19708_s25 + $0xe10] sm:$0xff]  }
  0x8d   : > { %1147 = vst [vmem:[%s19713_s26 + $0x7c0] sm:$0xff] %v1146_v56   ;;  %v1158_v59 = vld [vmem:[%s19708_s25 + $0xe18] sm:$0xff]   ;;  %1151 = vst [vmem:[%s19713_s26 + $0x7c8] sm:$0xff] %v1150_v57   ;;  %v1162_v60 = vld [vmem:[%s19708_s25 + $0xe20] sm:$0xff]  }
  0x8e   : > { %1155 = vst [vmem:[%s19713_s26 + $0x7d0] sm:$0xff] %v1154_v58   ;;  %1159 = vst [vmem:[%s19713_s26 + $0x7d8] sm:$0xff] %v1158_v59   ;;  %v1166_v61 = vld [vmem:[%s19708_s25 + $0xe28] sm:$0xff]   ;;  %v1170_v62 = vld [vmem:[%s19708_s25 + $0xe30] sm:$0xff]  }
  0x8f   : > { %1163 = vst [vmem:[%s19713_s26 + $0x7e0] sm:$0xff] %v1162_v60   ;;  %1167 = vst [vmem:[%s19713_s26 + $0x7e8] sm:$0xff] %v1166_v61   ;;  %v1174_v63 = vld [vmem:[%s19708_s25 + $0xe38] sm:$0xff]   ;;  %v1178_v0 = vld [vmem:[%s19708_s25 + $0xe40] sm:$0xff]  }
  0x90   : > { %1171 = vst [vmem:[%s19713_s26 + $0x7f0] sm:$0xff] %v1170_v62   ;;  %v1182_v1 = vld [vmem:[%s19708_s25 + $0xe48] sm:$0xff]   ;;  %1175 = vst [vmem:[%s19713_s26 + $0x7f8] sm:$0xff] %v1174_v63   ;;  %v1186_v2 = vld [vmem:[%s19708_s25 + $0xe50] sm:$0xff]  }
  0x91   : > { %1179 = vst [vmem:[%s19713_s26 + $0x800] sm:$0xff] %v1178_v0   ;;  %1183 = vst [vmem:[%s19713_s26 + $0x808] sm:$0xff] %v1182_v1   ;;  %v1190_v3 = vld [vmem:[%s19708_s25 + $0xe58] sm:$0xff]   ;;  %v1194_v4 = vld [vmem:[%s19708_s25 + $0xe60] sm:$0xff]  }
  0x92   : > { %1187 = vst [vmem:[%s19713_s26 + $0x810] sm:$0xff] %v1186_v2   ;;  %1191 = vst [vmem:[%s19713_s26 + $0x818] sm:$0xff] %v1190_v3   ;;  %v1198_v5 = vld [vmem:[%s19708_s25 + $0xe68] sm:$0xff]   ;;  %v1202_v6 = vld [vmem:[%s19708_s25 + $0xe70] sm:$0xff]  }
  0x93   : > { %1195 = vst [vmem:[%s19713_s26 + $0x820] sm:$0xff] %v1194_v4   ;;  %v1206_v7 = vld [vmem:[%s19708_s25 + $0xe78] sm:$0xff]   ;;  %1199 = vst [vmem:[%s19713_s26 + $0x828] sm:$0xff] %v1198_v5   ;;  %v1210_v8 = vld [vmem:[%s19708_s25 + $0xe80] sm:$0xff]  }
  0x94   : > { %1203 = vst [vmem:[%s19713_s26 + $0x830] sm:$0xff] %v1202_v6   ;;  %1207 = vst [vmem:[%s19713_s26 + $0x838] sm:$0xff] %v1206_v7   ;;  %v1214_v9 = vld [vmem:[%s19708_s25 + $0xe88] sm:$0xff]   ;;  %v1218_v10 = vld [vmem:[%s19708_s25 + $0xe90] sm:$0xff]  }
  0x95   : > { %1211 = vst [vmem:[%s19713_s26 + $0x840] sm:$0xff] %v1210_v8   ;;  %1215 = vst [vmem:[%s19713_s26 + $0x848] sm:$0xff] %v1214_v9   ;;  %v1222_v11 = vld [vmem:[%s19708_s25 + $0xe98] sm:$0xff]   ;;  %v1226_v12 = vld [vmem:[%s19708_s25 + $0xea0] sm:$0xff]  }
  0x96   : > { %1219 = vst [vmem:[%s19713_s26 + $0x850] sm:$0xff] %v1218_v10   ;;  %v1230_v13 = vld [vmem:[%s19708_s25 + $0xea8] sm:$0xff]   ;;  %1223 = vst [vmem:[%s19713_s26 + $0x858] sm:$0xff] %v1222_v11   ;;  %v1234_v14 = vld [vmem:[%s19708_s25 + $0xeb0] sm:$0xff]  }
  0x97   : > { %1227 = vst [vmem:[%s19713_s26 + $0x860] sm:$0xff] %v1226_v12   ;;  %1231 = vst [vmem:[%s19713_s26 + $0x868] sm:$0xff] %v1230_v13   ;;  %v1238_v15 = vld [vmem:[%s19708_s25 + $0xeb8] sm:$0xff]   ;;  %v1242_v16 = vld [vmem:[%s19708_s25 + $0xec0] sm:$0xff]  }
  0x98   : > { %1235 = vst [vmem:[%s19713_s26 + $0x870] sm:$0xff] %v1234_v14   ;;  %1239 = vst [vmem:[%s19713_s26 + $0x878] sm:$0xff] %v1238_v15   ;;  %v1246_v17 = vld [vmem:[%s19708_s25 + $0xec8] sm:$0xff]   ;;  %v1250_v18 = vld [vmem:[%s19708_s25 + $0xed0] sm:$0xff]  }
  0x99   : > { %1243 = vst [vmem:[%s19713_s26 + $0x880] sm:$0xff] %v1242_v16   ;;  %v1254_v19 = vld [vmem:[%s19708_s25 + $0xed8] sm:$0xff]   ;;  %1247 = vst [vmem:[%s19713_s26 + $0x888] sm:$0xff] %v1246_v17   ;;  %v1258_v20 = vld [vmem:[%s19708_s25 + $0xee0] sm:$0xff]  }
  0x9a   : > { %1251 = vst [vmem:[%s19713_s26 + $0x890] sm:$0xff] %v1250_v18   ;;  %1255 = vst [vmem:[%s19713_s26 + $0x898] sm:$0xff] %v1254_v19   ;;  %v1262_v21 = vld [vmem:[%s19708_s25 + $0xee8] sm:$0xff]   ;;  %v1266_v22 = vld [vmem:[%s19708_s25 + $0xef0] sm:$0xff]  }
  0x9b   : > { %1259 = vst [vmem:[%s19713_s26 + $0x8a0] sm:$0xff] %v1258_v20   ;;  %1263 = vst [vmem:[%s19713_s26 + $0x8a8] sm:$0xff] %v1262_v21   ;;  %v1270_v23 = vld [vmem:[%s19708_s25 + $0xef8] sm:$0xff]   ;;  %v1274_v24 = vld [vmem:[%s19708_s25 + $0xf00] sm:$0xff]  }
  0x9c   : > { %1267 = vst [vmem:[%s19713_s26 + $0x8b0] sm:$0xff] %v1266_v22   ;;  %v1278_v25 = vld [vmem:[%s19708_s25 + $0xf08] sm:$0xff]   ;;  %1271 = vst [vmem:[%s19713_s26 + $0x8b8] sm:$0xff] %v1270_v23   ;;  %v1282_v26 = vld [vmem:[%s19708_s25 + $0xf10] sm:$0xff]  }
  0x9d   : > { %1275 = vst [vmem:[%s19713_s26 + $0x8c0] sm:$0xff] %v1274_v24   ;;  %1279 = vst [vmem:[%s19713_s26 + $0x8c8] sm:$0xff] %v1278_v25   ;;  %v1286_v27 = vld [vmem:[%s19708_s25 + $0xf18] sm:$0xff]   ;;  %v1290_v28 = vld [vmem:[%s19708_s25 + $0xf20] sm:$0xff]  }
  0x9e   : > { %1283 = vst [vmem:[%s19713_s26 + $0x8d0] sm:$0xff] %v1282_v26   ;;  %1287 = vst [vmem:[%s19713_s26 + $0x8d8] sm:$0xff] %v1286_v27   ;;  %v1294_v29 = vld [vmem:[%s19708_s25 + $0xf28] sm:$0xff]   ;;  %v1298_v30 = vld [vmem:[%s19708_s25 + $0xf30] sm:$0xff]  }
  0x9f   : > { %1291 = vst [vmem:[%s19713_s26 + $0x8e0] sm:$0xff] %v1290_v28   ;;  %v1302_v31 = vld [vmem:[%s19708_s25 + $0xf38] sm:$0xff]   ;;  %1295 = vst [vmem:[%s19713_s26 + $0x8e8] sm:$0xff] %v1294_v29   ;;  %v1306_v32 = vld [vmem:[%s19708_s25 + $0xf40] sm:$0xff]  }
  0xa0   : > { %1299 = vst [vmem:[%s19713_s26 + $0x8f0] sm:$0xff] %v1298_v30   ;;  %1303 = vst [vmem:[%s19713_s26 + $0x8f8] sm:$0xff] %v1302_v31   ;;  %v1310_v33 = vld [vmem:[%s19708_s25 + $0xf48] sm:$0xff]   ;;  %v1314_v34 = vld [vmem:[%s19708_s25 + $0xf50] sm:$0xff]  }
  0xa1   : > { %1307 = vst [vmem:[%s19713_s26 + $0x900] sm:$0xff] %v1306_v32   ;;  %1311 = vst [vmem:[%s19713_s26 + $0x908] sm:$0xff] %v1310_v33   ;;  %v1318_v35 = vld [vmem:[%s19708_s25 + $0xf58] sm:$0xff]   ;;  %v1322_v36 = vld [vmem:[%s19708_s25 + $0xf60] sm:$0xff]  }
  0xa2   : > { %1315 = vst [vmem:[%s19713_s26 + $0x910] sm:$0xff] %v1314_v34   ;;  %v1326_v37 = vld [vmem:[%s19708_s25 + $0xf68] sm:$0xff]   ;;  %1319 = vst [vmem:[%s19713_s26 + $0x918] sm:$0xff] %v1318_v35   ;;  %v1330_v38 = vld [vmem:[%s19708_s25 + $0xf70] sm:$0xff]  }
  0xa3   : > { %1323 = vst [vmem:[%s19713_s26 + $0x920] sm:$0xff] %v1322_v36   ;;  %1327 = vst [vmem:[%s19713_s26 + $0x928] sm:$0xff] %v1326_v37   ;;  %v1334_v39 = vld [vmem:[%s19708_s25 + $0xf78] sm:$0xff]   ;;  %v1338_v40 = vld [vmem:[%s19708_s25 + $0xf80] sm:$0xff]  }
  0xa4   : > { %1331 = vst [vmem:[%s19713_s26 + $0x930] sm:$0xff] %v1330_v38   ;;  %1335 = vst [vmem:[%s19713_s26 + $0x938] sm:$0xff] %v1334_v39   ;;  %v1342_v41 = vld [vmem:[%s19708_s25 + $0xf88] sm:$0xff]   ;;  %v1346_v42 = vld [vmem:[%s19708_s25 + $0xf90] sm:$0xff]  }
  0xa5   : > { %1339 = vst [vmem:[%s19713_s26 + $0x940] sm:$0xff] %v1338_v40   ;;  %v1350_v43 = vld [vmem:[%s19708_s25 + $0xf98] sm:$0xff]   ;;  %1343 = vst [vmem:[%s19713_s26 + $0x948] sm:$0xff] %v1342_v41   ;;  %v1354_v44 = vld [vmem:[%s19708_s25 + $0x12c0] sm:$0xff]  }
  0xa6   : > { %1347 = vst [vmem:[%s19713_s26 + $0x950] sm:$0xff] %v1346_v42   ;;  %1351 = vst [vmem:[%s19713_s26 + $0x958] sm:$0xff] %v1350_v43   ;;  %v1358_v45 = vld [vmem:[%s19708_s25 + $0x12c8] sm:$0xff]   ;;  %v1362_v46 = vld [vmem:[%s19708_s25 + $0x12d0] sm:$0xff]  }
  0xa7   : > { %1355 = vst [vmem:[%s19713_s26 + $0x960] sm:$0xff] %v1354_v44   ;;  %1359 = vst [vmem:[%s19713_s26 + $0x968] sm:$0xff] %v1358_v45   ;;  %v1366_v47 = vld [vmem:[%s19708_s25 + $0x12d8] sm:$0xff]   ;;  %v1370_v48 = vld [vmem:[%s19708_s25 + $0x12e0] sm:$0xff]  }
  0xa8   : > { %1363 = vst [vmem:[%s19713_s26 + $0x970] sm:$0xff] %v1362_v46   ;;  %v1374_v49 = vld [vmem:[%s19708_s25 + $0x12e8] sm:$0xff]   ;;  %1367 = vst [vmem:[%s19713_s26 + $0x978] sm:$0xff] %v1366_v47   ;;  %v1378_v50 = vld [vmem:[%s19708_s25 + $0x12f0] sm:$0xff]  }
  0xa9   : > { %1371 = vst [vmem:[%s19713_s26 + $0x980] sm:$0xff] %v1370_v48   ;;  %1375 = vst [vmem:[%s19713_s26 + $0x988] sm:$0xff] %v1374_v49   ;;  %v1382_v51 = vld [vmem:[%s19708_s25 + $0x12f8] sm:$0xff]   ;;  %v1386_v52 = vld [vmem:[%s19708_s25 + $0x1300] sm:$0xff]  }
  0xaa   : > { %1379 = vst [vmem:[%s19713_s26 + $0x990] sm:$0xff] %v1378_v50   ;;  %1383 = vst [vmem:[%s19713_s26 + $0x998] sm:$0xff] %v1382_v51   ;;  %v1390_v53 = vld [vmem:[%s19708_s25 + $0x1308] sm:$0xff]   ;;  %v1394_v54 = vld [vmem:[%s19708_s25 + $0x1310] sm:$0xff]  }
  0xab   : > { %1387 = vst [vmem:[%s19713_s26 + $0x9a0] sm:$0xff] %v1386_v52   ;;  %v1398_v55 = vld [vmem:[%s19708_s25 + $0x1318] sm:$0xff]   ;;  %1391 = vst [vmem:[%s19713_s26 + $0x9a8] sm:$0xff] %v1390_v53   ;;  %v1402_v56 = vld [vmem:[%s19708_s25 + $0x1320] sm:$0xff]  }
  0xac   : > { %1395 = vst [vmem:[%s19713_s26 + $0x9b0] sm:$0xff] %v1394_v54   ;;  %1399 = vst [vmem:[%s19713_s26 + $0x9b8] sm:$0xff] %v1398_v55   ;;  %v1406_v57 = vld [vmem:[%s19708_s25 + $0x1328] sm:$0xff]   ;;  %v1410_v58 = vld [vmem:[%s19708_s25 + $0x1330] sm:$0xff]  }
  0xad   : > { %1403 = vst [vmem:[%s19713_s26 + $0x9c0] sm:$0xff] %v1402_v56   ;;  %1407 = vst [vmem:[%s19713_s26 + $0x9c8] sm:$0xff] %v1406_v57   ;;  %v1414_v59 = vld [vmem:[%s19708_s25 + $0x1338] sm:$0xff]   ;;  %v1418_v60 = vld [vmem:[%s19708_s25 + $0x1340] sm:$0xff]  }
  0xae   : > { %1411 = vst [vmem:[%s19713_s26 + $0x9d0] sm:$0xff] %v1410_v58   ;;  %v1422_v61 = vld [vmem:[%s19708_s25 + $0x1348] sm:$0xff]   ;;  %1415 = vst [vmem:[%s19713_s26 + $0x9d8] sm:$0xff] %v1414_v59   ;;  %v1426_v62 = vld [vmem:[%s19708_s25 + $0x1350] sm:$0xff]  }
  0xaf   : > { %1419 = vst [vmem:[%s19713_s26 + $0x9e0] sm:$0xff] %v1418_v60   ;;  %1423 = vst [vmem:[%s19713_s26 + $0x9e8] sm:$0xff] %v1422_v61   ;;  %v1430_v63 = vld [vmem:[%s19708_s25 + $0x1358] sm:$0xff]   ;;  %v1434_v0 = vld [vmem:[%s19708_s25 + $0x1360] sm:$0xff]  }
  0xb0   : > { %1427 = vst [vmem:[%s19713_s26 + $0x9f0] sm:$0xff] %v1426_v62   ;;  %1431 = vst [vmem:[%s19713_s26 + $0x9f8] sm:$0xff] %v1430_v63   ;;  %v1438_v1 = vld [vmem:[%s19708_s25 + $0x1368] sm:$0xff]   ;;  %v1442_v2 = vld [vmem:[%s19708_s25 + $0x1370] sm:$0xff]  }
  0xb1   : > { %1435 = vst [vmem:[%s19713_s26 + $0xa00] sm:$0xff] %v1434_v0   ;;  %v1446_v3 = vld [vmem:[%s19708_s25 + $0x1378] sm:$0xff]   ;;  %1439 = vst [vmem:[%s19713_s26 + $0xa08] sm:$0xff] %v1438_v1   ;;  %v1450_v4 = vld [vmem:[%s19708_s25 + $0x1380] sm:$0xff]  }
  0xb2   : > { %1443 = vst [vmem:[%s19713_s26 + $0xa10] sm:$0xff] %v1442_v2   ;;  %1447 = vst [vmem:[%s19713_s26 + $0xa18] sm:$0xff] %v1446_v3   ;;  %v1454_v5 = vld [vmem:[%s19708_s25 + $0x1388] sm:$0xff]   ;;  %v1458_v6 = vld [vmem:[%s19708_s25 + $0x1390] sm:$0xff]  }
  0xb3   : > { %1451 = vst [vmem:[%s19713_s26 + $0xa20] sm:$0xff] %v1450_v4   ;;  %1455 = vst [vmem:[%s19713_s26 + $0xa28] sm:$0xff] %v1454_v5   ;;  %v1462_v7 = vld [vmem:[%s19708_s25 + $0x1398] sm:$0xff]   ;;  %v1466_v8 = vld [vmem:[%s19708_s25 + $0x13a0] sm:$0xff]  }
  0xb4   : > { %1459 = vst [vmem:[%s19713_s26 + $0xa30] sm:$0xff] %v1458_v6   ;;  %v1470_v9 = vld [vmem:[%s19708_s25 + $0x13a8] sm:$0xff]   ;;  %1463 = vst [vmem:[%s19713_s26 + $0xa38] sm:$0xff] %v1462_v7   ;;  %v1474_v10 = vld [vmem:[%s19708_s25 + $0x13b0] sm:$0xff]  }
  0xb5   : > { %1467 = vst [vmem:[%s19713_s26 + $0xa40] sm:$0xff] %v1466_v8   ;;  %1471 = vst [vmem:[%s19713_s26 + $0xa48] sm:$0xff] %v1470_v9   ;;  %v1478_v11 = vld [vmem:[%s19708_s25 + $0x13b8] sm:$0xff]   ;;  %v1482_v12 = vld [vmem:[%s19708_s25 + $0x13c0] sm:$0xff]  }
  0xb6   : > { %1475 = vst [vmem:[%s19713_s26 + $0xa50] sm:$0xff] %v1474_v10   ;;  %1479 = vst [vmem:[%s19713_s26 + $0xa58] sm:$0xff] %v1478_v11   ;;  %v1486_v13 = vld [vmem:[%s19708_s25 + $0x13c8] sm:$0xff]   ;;  %v1490_v14 = vld [vmem:[%s19708_s25 + $0x13d0] sm:$0xff]  }
  0xb7   : > { %1483 = vst [vmem:[%s19713_s26 + $0xa60] sm:$0xff] %v1482_v12   ;;  %v1494_v15 = vld [vmem:[%s19708_s25 + $0x13d8] sm:$0xff]   ;;  %1487 = vst [vmem:[%s19713_s26 + $0xa68] sm:$0xff] %v1486_v13   ;;  %v1498_v16 = vld [vmem:[%s19708_s25 + $0x13e0] sm:$0xff]  }
  0xb8   : > { %1491 = vst [vmem:[%s19713_s26 + $0xa70] sm:$0xff] %v1490_v14   ;;  %1495 = vst [vmem:[%s19713_s26 + $0xa78] sm:$0xff] %v1494_v15   ;;  %v1502_v17 = vld [vmem:[%s19708_s25 + $0x13e8] sm:$0xff]   ;;  %v1506_v18 = vld [vmem:[%s19708_s25 + $0x13f0] sm:$0xff]  }
  0xb9   : > { %1499 = vst [vmem:[%s19713_s26 + $0xa80] sm:$0xff] %v1498_v16   ;;  %1503 = vst [vmem:[%s19713_s26 + $0xa88] sm:$0xff] %v1502_v17   ;;  %v1510_v19 = vld [vmem:[%s19708_s25 + $0x13f8] sm:$0xff]   ;;  %v1514_v20 = vld [vmem:[%s19708_s25 + $0x1400] sm:$0xff]  }
  0xba   : > { %1507 = vst [vmem:[%s19713_s26 + $0xa90] sm:$0xff] %v1506_v18   ;;  %v1518_v21 = vld [vmem:[%s19708_s25 + $0x1408] sm:$0xff]   ;;  %1511 = vst [vmem:[%s19713_s26 + $0xa98] sm:$0xff] %v1510_v19   ;;  %v1522_v22 = vld [vmem:[%s19708_s25 + $0x1410] sm:$0xff]  }
  0xbb   : > { %1515 = vst [vmem:[%s19713_s26 + $0xaa0] sm:$0xff] %v1514_v20   ;;  %1519 = vst [vmem:[%s19713_s26 + $0xaa8] sm:$0xff] %v1518_v21   ;;  %v1526_v23 = vld [vmem:[%s19708_s25 + $0x1418] sm:$0xff]   ;;  %v1530_v24 = vld [vmem:[%s19708_s25 + $0x1420] sm:$0xff]  }
  0xbc   : > { %1523 = vst [vmem:[%s19713_s26 + $0xab0] sm:$0xff] %v1522_v22   ;;  %1527 = vst [vmem:[%s19713_s26 + $0xab8] sm:$0xff] %v1526_v23   ;;  %v1534_v25 = vld [vmem:[%s19708_s25 + $0x1428] sm:$0xff]   ;;  %v1538_v26 = vld [vmem:[%s19708_s25 + $0x1430] sm:$0xff]  }
  0xbd   : > { %1531 = vst [vmem:[%s19713_s26 + $0xac0] sm:$0xff] %v1530_v24   ;;  %v1542_v27 = vld [vmem:[%s19708_s25 + $0x1438] sm:$0xff]   ;;  %1535 = vst [vmem:[%s19713_s26 + $0xac8] sm:$0xff] %v1534_v25   ;;  %v1546_v28 = vld [vmem:[%s19708_s25 + $0x1440] sm:$0xff]  }
  0xbe   : > { %1539 = vst [vmem:[%s19713_s26 + $0xad0] sm:$0xff] %v1538_v26   ;;  %1543 = vst [vmem:[%s19713_s26 + $0xad8] sm:$0xff] %v1542_v27   ;;  %v1550_v29 = vld [vmem:[%s19708_s25 + $0x1448] sm:$0xff]   ;;  %v1554_v30 = vld [vmem:[%s19708_s25 + $0x1450] sm:$0xff]  }
  0xbf   : > { %1547 = vst [vmem:[%s19713_s26 + $0xae0] sm:$0xff] %v1546_v28   ;;  %1551 = vst [vmem:[%s19713_s26 + $0xae8] sm:$0xff] %v1550_v29   ;;  %v1558_v31 = vld [vmem:[%s19708_s25 + $0x1458] sm:$0xff]   ;;  %v1562_v32 = vld [vmem:[%s19708_s25 + $0x1460] sm:$0xff]  }
  0xc0   : > { %1555 = vst [vmem:[%s19713_s26 + $0xaf0] sm:$0xff] %v1554_v30   ;;  %v1566_v33 = vld [vmem:[%s19708_s25 + $0x1468] sm:$0xff]   ;;  %1559 = vst [vmem:[%s19713_s26 + $0xaf8] sm:$0xff] %v1558_v31   ;;  %v1570_v34 = vld [vmem:[%s19708_s25 + $0x1470] sm:$0xff]  }
  0xc1   : > { %1563 = vst [vmem:[%s19713_s26 + $0xb00] sm:$0xff] %v1562_v32   ;;  %1567 = vst [vmem:[%s19713_s26 + $0xb08] sm:$0xff] %v1566_v33   ;;  %v1574_v35 = vld [vmem:[%s19708_s25 + $0x1478] sm:$0xff]   ;;  %v1578_v36 = vld [vmem:[%s19708_s25 + $0x1480] sm:$0xff]  }
  0xc2   : > { %1571 = vst [vmem:[%s19713_s26 + $0xb10] sm:$0xff] %v1570_v34   ;;  %1575 = vst [vmem:[%s19713_s26 + $0xb18] sm:$0xff] %v1574_v35   ;;  %v1582_v37 = vld [vmem:[%s19708_s25 + $0x1488] sm:$0xff]   ;;  %v1586_v38 = vld [vmem:[%s19708_s25 + $0x1490] sm:$0xff]  }
  0xc3   : > { %1579 = vst [vmem:[%s19713_s26 + $0xb20] sm:$0xff] %v1578_v36   ;;  %v1590_v39 = vld [vmem:[%s19708_s25 + $0x1498] sm:$0xff]   ;;  %1583 = vst [vmem:[%s19713_s26 + $0xb28] sm:$0xff] %v1582_v37   ;;  %v1594_v40 = vld [vmem:[%s19708_s25 + $0x14a0] sm:$0xff]  }
  0xc4   : > { %1587 = vst [vmem:[%s19713_s26 + $0xb30] sm:$0xff] %v1586_v38   ;;  %1591 = vst [vmem:[%s19713_s26 + $0xb38] sm:$0xff] %v1590_v39   ;;  %v1598_v41 = vld [vmem:[%s19708_s25 + $0x14a8] sm:$0xff]   ;;  %v1602_v42 = vld [vmem:[%s19708_s25 + $0x14b0] sm:$0xff]  }
  0xc5   : > { %1595 = vst [vmem:[%s19713_s26 + $0xb40] sm:$0xff] %v1594_v40   ;;  %1599 = vst [vmem:[%s19713_s26 + $0xb48] sm:$0xff] %v1598_v41   ;;  %v1606_v43 = vld [vmem:[%s19708_s25 + $0x14b8] sm:$0xff]   ;;  %v1610_v44 = vld [vmem:[%s19708_s25 + $0x14c0] sm:$0xff]  }
  0xc6   : > { %1603 = vst [vmem:[%s19713_s26 + $0xb50] sm:$0xff] %v1602_v42   ;;  %v1614_v45 = vld [vmem:[%s19708_s25 + $0x14c8] sm:$0xff]   ;;  %1607 = vst [vmem:[%s19713_s26 + $0xb58] sm:$0xff] %v1606_v43   ;;  %v1618_v46 = vld [vmem:[%s19708_s25 + $0x14d0] sm:$0xff]  }
  0xc7   : > { %1611 = vst [vmem:[%s19713_s26 + $0xb60] sm:$0xff] %v1610_v44   ;;  %1615 = vst [vmem:[%s19713_s26 + $0xb68] sm:$0xff] %v1614_v45   ;;  %v1622_v47 = vld [vmem:[%s19708_s25 + $0x14d8] sm:$0xff]   ;;  %v1626_v48 = vld [vmem:[%s19708_s25 + $0x14e0] sm:$0xff]  }
  0xc8   : > { %1619 = vst [vmem:[%s19713_s26 + $0xb70] sm:$0xff] %v1618_v46   ;;  %1623 = vst [vmem:[%s19713_s26 + $0xb78] sm:$0xff] %v1622_v47   ;;  %v1630_v49 = vld [vmem:[%s19708_s25 + $0x14e8] sm:$0xff]   ;;  %v1634_v50 = vld [vmem:[%s19708_s25 + $0x14f0] sm:$0xff]  }
  0xc9   : > { %1627 = vst [vmem:[%s19713_s26 + $0xb80] sm:$0xff] %v1626_v48   ;;  %v1638_v51 = vld [vmem:[%s19708_s25 + $0x14f8] sm:$0xff]   ;;  %1631 = vst [vmem:[%s19713_s26 + $0xb88] sm:$0xff] %v1630_v49   ;;  %v1642_v52 = vld [vmem:[%s19708_s25 + $0x1500] sm:$0xff]  }
  0xca   : > { %1635 = vst [vmem:[%s19713_s26 + $0xb90] sm:$0xff] %v1634_v50   ;;  %1639 = vst [vmem:[%s19713_s26 + $0xb98] sm:$0xff] %v1638_v51   ;;  %v1646_v53 = vld [vmem:[%s19708_s25 + $0x1508] sm:$0xff]   ;;  %v1650_v54 = vld [vmem:[%s19708_s25 + $0x1510] sm:$0xff]  }
  0xcb   : > { %1643 = vst [vmem:[%s19713_s26 + $0xba0] sm:$0xff] %v1642_v52   ;;  %1647 = vst [vmem:[%s19713_s26 + $0xba8] sm:$0xff] %v1646_v53   ;;  %v1654_v55 = vld [vmem:[%s19708_s25 + $0x1518] sm:$0xff]   ;;  %v1658_v56 = vld [vmem:[%s19708_s25 + $0x1520] sm:$0xff]  }
  0xcc   : > { %1651 = vst [vmem:[%s19713_s26 + $0xbb0] sm:$0xff] %v1650_v54   ;;  %v1662_v57 = vld [vmem:[%s19708_s25 + $0x1528] sm:$0xff]   ;;  %1655 = vst [vmem:[%s19713_s26 + $0xbb8] sm:$0xff] %v1654_v55   ;;  %v1666_v58 = vld [vmem:[%s19708_s25 + $0x1530] sm:$0xff]  }
  0xcd   : > { %1659 = vst [vmem:[%s19713_s26 + $0xbc0] sm:$0xff] %v1658_v56   ;;  %1663 = vst [vmem:[%s19713_s26 + $0xbc8] sm:$0xff] %v1662_v57   ;;  %v1670_v59 = vld [vmem:[%s19708_s25 + $0x1538] sm:$0xff]   ;;  %v1674_v60 = vld [vmem:[%s19708_s25 + $0x1540] sm:$0xff]  }
  0xce   : > { %1667 = vst [vmem:[%s19713_s26 + $0xbd0] sm:$0xff] %v1666_v58   ;;  %1671 = vst [vmem:[%s19713_s26 + $0xbd8] sm:$0xff] %v1670_v59   ;;  %v1678_v61 = vld [vmem:[%s19708_s25 + $0x1548] sm:$0xff]   ;;  %v1682_v62 = vld [vmem:[%s19708_s25 + $0x1550] sm:$0xff]  }
  0xcf   : > { %1675 = vst [vmem:[%s19713_s26 + $0xbe0] sm:$0xff] %v1674_v60   ;;  %v1686_v63 = vld [vmem:[%s19708_s25 + $0x1558] sm:$0xff]   ;;  %1679 = vst [vmem:[%s19713_s26 + $0xbe8] sm:$0xff] %v1678_v61   ;;  %v1690_v0 = vld [vmem:[%s19708_s25 + $0x1560] sm:$0xff]  }
  0xd0   : > { %1683 = vst [vmem:[%s19713_s26 + $0xbf0] sm:$0xff] %v1682_v62   ;;  %1687 = vst [vmem:[%s19713_s26 + $0xbf8] sm:$0xff] %v1686_v63   ;;  %v1694_v1 = vld [vmem:[%s19708_s25 + $0x1568] sm:$0xff]   ;;  %v1698_v2 = vld [vmem:[%s19708_s25 + $0x1570] sm:$0xff]  }
  0xd1   : > { %1691 = vst [vmem:[%s19713_s26 + $0xc00] sm:$0xff] %v1690_v0   ;;  %1695 = vst [vmem:[%s19713_s26 + $0xc08] sm:$0xff] %v1694_v1   ;;  %v1702_v3 = vld [vmem:[%s19708_s25 + $0x1578] sm:$0xff]   ;;  %v1706_v4 = vld [vmem:[%s19708_s25 + $0x1580] sm:$0xff]  }
  0xd2   : > { %1699 = vst [vmem:[%s19713_s26 + $0xc10] sm:$0xff] %v1698_v2   ;;  %v1710_v5 = vld [vmem:[%s19708_s25 + $0x1588] sm:$0xff]   ;;  %1703 = vst [vmem:[%s19713_s26 + $0xc18] sm:$0xff] %v1702_v3   ;;  %v1714_v6 = vld [vmem:[%s19708_s25 + $0x1590] sm:$0xff]  }
  0xd3   : > { %1707 = vst [vmem:[%s19713_s26 + $0xc20] sm:$0xff] %v1706_v4   ;;  %1711 = vst [vmem:[%s19713_s26 + $0xc28] sm:$0xff] %v1710_v5   ;;  %v1718_v7 = vld [vmem:[%s19708_s25 + $0x1598] sm:$0xff]   ;;  %v1722_v8 = vld [vmem:[%s19708_s25 + $0x15a0] sm:$0xff]  }
  0xd4   : > { %1715 = vst [vmem:[%s19713_s26 + $0xc30] sm:$0xff] %v1714_v6   ;;  %1719 = vst [vmem:[%s19713_s26 + $0xc38] sm:$0xff] %v1718_v7   ;;  %v1726_v9 = vld [vmem:[%s19708_s25 + $0x15a8] sm:$0xff]   ;;  %v1730_v10 = vld [vmem:[%s19708_s25 + $0x15b0] sm:$0xff]  }
  0xd5   : > { %1723 = vst [vmem:[%s19713_s26 + $0xc40] sm:$0xff] %v1722_v8   ;;  %v1734_v11 = vld [vmem:[%s19708_s25 + $0x15b8] sm:$0xff]   ;;  %1727 = vst [vmem:[%s19713_s26 + $0xc48] sm:$0xff] %v1726_v9   ;;  %v1738_v12 = vld [vmem:[%s19708_s25 + $0x15c0] sm:$0xff]  }
  0xd6   : > { %1731 = vst [vmem:[%s19713_s26 + $0xc50] sm:$0xff] %v1730_v10   ;;  %1735 = vst [vmem:[%s19713_s26 + $0xc58] sm:$0xff] %v1734_v11   ;;  %v1742_v13 = vld [vmem:[%s19708_s25 + $0x15c8] sm:$0xff]   ;;  %v1746_v14 = vld [vmem:[%s19708_s25 + $0x15d0] sm:$0xff]  }
  0xd7   : > { %1739 = vst [vmem:[%s19713_s26 + $0xc60] sm:$0xff] %v1738_v12   ;;  %1743 = vst [vmem:[%s19713_s26 + $0xc68] sm:$0xff] %v1742_v13   ;;  %v1750_v15 = vld [vmem:[%s19708_s25 + $0x15d8] sm:$0xff]  }
  0xd8   : > { %1747 = vst [vmem:[%s19713_s26 + $0xc70] sm:$0xff] %v1746_v14   ;;  %1751 = vst [vmem:[%s19713_s26 + $0xc78] sm:$0xff] %v1750_v15  }
  0xd9 PF: > { %p16121_p5 = scmp.ge.s32.totalorder %s19651_s14, 1  ;;  %p6606_p6 = scmp.lt.s32.totalorder %s19651_s14, 3 }
  0xdb   : > { %p6607_p7 = pnand %p16121_p5, %p6606_p6 }
  0xdd   : > { %6610 = sbr.rel (%p6607_p7) target bundleno = 1254 (0x4e6), region = 80 }
  0xe2   : > { %v19221_v16 = vld [vmem:[%s23770_s1 + $0x20] sm:$0x3f]   ;;  %vm7686_vm0 = vcmask 1044480   ;;  %vm7687_vm1 = vcmask 1045504   ;;  %v19653_v17 = vmov 65535   ;;  %v19222_v20 = vld [vmem:[%s23770_s1 + $0x18] sm:$0xff]  }
  0xe3   : > { %v7688_v18 = vsel %vm7686_vm0, 4294967295, %v19653_v17  ;;  %s6613_s4 = sand.u32 1, %s19643_s12   ;;  %v19223_v22 = vld [vmem:[%s23770_s1 + $0x10] sm:$0xff]   ;;  %vm7385_vm2 = vcmask 613376   ;;  %v19224_v25 = vld [vmem:[%s23770_s1 + $0x8] sm:$0xff]   ;;  %v19225_v26 = vld [vmem:[%s23770_s1] sm:$0xff]  }
  0xe4   : > { %v7689_v19 = vsel %vm7687_vm1, %v7688_v18, 0  ;;  %s19194_s5 = smul.u32 3200, %s6613_s4  ;;  %s16122_s17 = sshll.u32 %s16116_s15, 3  ;;  %vm15843_vm3 = vcmask 44032  }
  0xe5   : > { %v7691_v21 = vand.u32 %v19221_v16, %v7689_v19  ;;  %p6639_p8 = scmp.lt.s32.totalorder %s16122_s17, 15 }
  0xe6   : > { %s20524_s8 = scalar_lea.vmem [#allocation2], %s19194_s5 }
  0xe7   : > { %18353 = vmatprep.subr.bf16.mxu0 %v7691_v21  ;;  %18563 = vmatprep.subr.bf16.mxu1 %v7691_v21  ;;  %v19226_v23 = vld [vmem:[%s20524_s8] sm:$0xff]   ;;  %v19228_v27 = vld [vmem:[%s20524_s8 + $0x8] sm:$0xff]   ;;  %v19230_v29 = vld [vmem:[%s20524_s8 + $0x10] sm:$0xff]   ;;  %s25036_s17 = smov (!%p6639_p8, %s16122_s17), 15 }
  0xe8   : > { %18354 = vmatpush3.bf16.msra.mxu0 %v7691_v21  ;;  %18564 = vmatpush3.bf16.msra.mxu1 %v7691_v21  ;;  %v19227_v24 = vld [vmem:[%s20524_s8 + $0x320] sm:$0xff]   ;;  %v19229_v28 = vld [vmem:[%s20524_s8 + $0x328] sm:$0xff]   ;;  %v19231_v30 = vld [vmem:[%s20524_s8 + $0x330] sm:$0xff]   ;;  %s19195_s18 = smul.u32 100, %s25036_s17 }
  0xe9   : > { %18355 = vmatprep.subr.bf16.mxu0 %v19222_v20  ;;  %18565 = vmatprep.subr.bf16.mxu1 %v19222_v20  ;;  %v19232_v31 = vld [vmem:[%s20524_s8 + $0x18] sm:$0xff]   ;;  %v19234_v33 = vld [vmem:[%s20524_s8 + $0x20] sm:$0xff]   ;;  %v19236_v35 = vld [vmem:[%s20524_s8 + $0x28] sm:$0xff]  }
  0xea   : > { %18363 = vmatprep.mubr.msk.bf16.mxu0 %vm7385_vm2, %v19226_v23  ;;  %18573 = vmatprep.mubr.msk.bf16.mxu1 %vm7385_vm2, %v19227_v24  ;;  %v19233_v32 = vld [vmem:[%s20524_s8 + $0x338] sm:$0xff]   ;;  %v19235_v34 = vld [vmem:[%s20524_s8 + $0x340] sm:$0xff]   ;;  %v19237_v36 = vld [vmem:[%s20524_s8 + $0x348] sm:$0xff]   ;;  %s22364_s22 = scalar_lea.vmem %s23772_s3, %s19195_s18 }
  0xeb   : > { %v19238_v37 = vld [vmem:[%s20524_s8 + $0x30] sm:$0xff]   ;;  %v19240_v39 = vld [vmem:[%s20524_s8 + $0x38] sm:$0xff]   ;;  %v19242_v41 = vld [vmem:[%s20524_s8 + $0x40] sm:$0xff]  }
  0xec   : > { %18356 = vmatpush3.bf16.msra.mxu0 %v19222_v20  ;;  %18566 = vmatpush3.bf16.msra.mxu1 %v19222_v20  ;;  %v19239_v38 = vld [vmem:[%s20524_s8 + $0x350] sm:$0xff]   ;;  %v19241_v40 = vld [vmem:[%s20524_s8 + $0x358] sm:$0xff]   ;;  %v19243_v42 = vld [vmem:[%s20524_s8 + $0x360] sm:$0xff]  }
  0xed   : > { %18357 = vmatprep.subr.bf16.mxu0 %v19223_v22  ;;  %18567 = vmatprep.subr.bf16.mxu1 %v19223_v22  ;;  %v19244_v43 = vld [vmem:[%s20524_s8 + $0x48] sm:$0xff]   ;;  %v19246_v45 = vld [vmem:[%s20524_s8 + $0x50] sm:$0xff]   ;;  %v19248_v47 = vld [vmem:[%s20524_s8 + $0x58] sm:$0xff]  }
  0xee   : > { %v19245_v44 = vld [vmem:[%s20524_s8 + $0x368] sm:$0xff]   ;;  %v19247_v46 = vld [vmem:[%s20524_s8 + $0x370] sm:$0xff]   ;;  %v19249_v48 = vld [vmem:[%s20524_s8 + $0x378] sm:$0xff]  }
  0xef   : > { %v19250_v49 = vld [vmem:[%s20524_s8 + $0x60] sm:$0xff]   ;;  %v19252_v51 = vld [vmem:[%s20524_s8 + $0x68] sm:$0xff]   ;;  %v19254_v53 = vld [vmem:[%s20524_s8 + $0x70] sm:$0xff]  }
  0xf0   : > { %18358 = vmatpush3.bf16.msra.mxu0 %v19223_v22  ;;  %18568 = vmatpush3.bf16.msra.mxu1 %v19223_v22  ;;  %v19251_v50 = vld [vmem:[%s20524_s8 + $0x380] sm:$0xff]   ;;  %v19253_v52 = vld [vmem:[%s20524_s8 + $0x388] sm:$0xff]   ;;  %v19255_v54 = vld [vmem:[%s20524_s8 + $0x390] sm:$0xff]  }
  0xf1   : > { %18359 = vmatprep.subr.bf16.mxu0 %v19224_v25  ;;  %18569 = vmatprep.subr.bf16.mxu1 %v19224_v25  ;;  %v19256_v55 = vld [vmem:[%s20524_s8 + $0x78] sm:$0xff]   ;;  %v19258_v57 = vld [vmem:[%s20524_s8 + $0x80] sm:$0xff]   ;;  %v19260_v59 = vld [vmem:[%s20524_s8 + $0x88] sm:$0xff]  }
  0xf2   : > { %v19257_v56 = vld [vmem:[%s20524_s8 + $0x398] sm:$0xff]   ;;  %v19259_v58 = vld [vmem:[%s20524_s8 + $0x3a0] sm:$0xff]   ;;  %v19261_v60 = vld [vmem:[%s20524_s8 + $0x3a8] sm:$0xff]  }
  0xf3   : > { %v19262_v61 = vld [vmem:[%s20524_s8 + $0x90] sm:$0xff]   ;;  %v19264_v63 = vld [vmem:[%s20524_s8 + $0x98] sm:$0xff]   ;;  %v19266_v1 = vld [vmem:[%s20524_s8 + $0xa0] sm:$0xff]  }
  0xf4   : > { %18360 = vmatpush3.bf16.msra.mxu0 %v19224_v25  ;;  %18570 = vmatpush3.bf16.msra.mxu1 %v19224_v25  ;;  %v19263_v62 = vld [vmem:[%s20524_s8 + $0x3b0] sm:$0xff]   ;;  %v19265_v0 = vld [vmem:[%s20524_s8 + $0x3b8] sm:$0xff]   ;;  %v19267_v2 = vld [vmem:[%s20524_s8 + $0x3c0] sm:$0xff]  }
  0xf5   : > { %18361 = vmatprep.subr.bf16.mxu0 %v19225_v26  ;;  %18571 = vmatprep.subr.bf16.mxu1 %v19225_v26  ;;  %v19268_v3 = vld [vmem:[%s20524_s8 + $0xa8] sm:$0xff]   ;;  %v19270_v5 = vld [vmem:[%s20524_s8 + $0xb0] sm:$0xff]   ;;  %v19272_v7 = vld [vmem:[%s20524_s8 + $0xb8] sm:$0xff]  }
  0xf6   : > { %v19269_v4 = vld [vmem:[%s20524_s8 + $0x3c8] sm:$0xff]   ;;  %v19271_v6 = vld [vmem:[%s20524_s8 + $0x3d0] sm:$0xff]   ;;  %v19273_v8 = vld [vmem:[%s20524_s8 + $0x3d8] sm:$0xff]  }
  0xf7   : > { %v19274_v9 = vld [vmem:[%s20524_s8 + $0xc0] sm:$0xff]   ;;  %v19276_v11 = vld [vmem:[%s20524_s8 + $0xc8] sm:$0xff]   ;;  %v19278_v13 = vld [vmem:[%s20524_s8 + $0xd0] sm:$0xff]  }
  0xf8   : > { %18362 = vmatpush3.bf16.msra.mxu0 %v19225_v26  ;;  %18572 = vmatpush3.bf16.msra.mxu1 %v19225_v26  ;;  %v19275_v10 = vld [vmem:[%s20524_s8 + $0x3e0] sm:$0xff]   ;;  %v19277_v12 = vld [vmem:[%s20524_s8 + $0x3e8] sm:$0xff]   ;;  %v19279_v14 = vld [vmem:[%s20524_s8 + $0x3f0] sm:$0xff]  }
  0xf9   : > { %18773 = vmatprep.subr.bf16.mxu0 %v7691_v21  ;;  %18983 = vmatprep.subr.bf16.mxu1 %v7691_v21  ;;  %v19280_v15 = vld [vmem:[%s20524_s8 + $0xd8] sm:$0xff]   ;;  %v19282_v17 = vld [vmem:[%s20524_s8 + $0xe0] sm:$0xff]   ;;  %v19284_v19 = vld [vmem:[%s20524_s8 + $0xe8] sm:$0xff]  }
  0xfa   : > { %v19281_v16 = vld [vmem:[%s20524_s8 + $0x3f8] sm:$0xff]   ;;  %v19283_v18 = vld [vmem:[%s20524_s8 + $0x400] sm:$0xff]  }
  0xfb   : > { %18364 = vmatmul.mubr.msk.bf16.vlgmr.msra.gmra.mxu0 %vm7385_vm2, %v19228_v27  ;;  %18574 = vmatmul.mubr.msk.bf16.vlgmr.msra.gmra.mxu1 %vm7385_vm2, %v19229_v28  ;;  %v19288_v23 = vld [vmem:[%s20524_s8 + $0xf8] sm:$0xff]   ;;  %v19292_v27 = vld [vmem:[%s20524_s8 + $0x108] sm:$0xff]  }
  0xfc   : > { %18774 = vmatpush3.bf16.msra.mxu0 %v7691_v21  ;;  %18984 = vmatpush3.bf16.msra.mxu1 %v7691_v21  ;;  %v19286_v21 = vld [vmem:[%s20524_s8 + $0xf0] sm:$0xff]   ;;  %v19289_v24 = vld [vmem:[%s20524_s8 + $0x418] sm:$0xff]   ;;  %v19293_v28 = vld [vmem:[%s20524_s8 + $0x428] sm:$0xff]  }
  0xfd   : > { %18367 = vmatprep.mubr.msk.bf16.mxu0 %vm7385_vm2, %v19230_v29  ;;  %18577 = vmatprep.mubr.msk.bf16.mxu1 %vm7385_vm2, %v19231_v30  ;;  %v19294_v29 = vld [vmem:[%s20524_s8 + $0x110] sm:$0xff]  }
  0xfe   : > { %18775 = vmatprep.subr.bf16.mxu0 %v19222_v20  ;;  %18985 = vmatprep.subr.bf16.mxu1 %v19222_v20  ;;  %v19295_v30 = vld [vmem:[%s20524_s8 + $0x430] sm:$0xff]  }
 0x100   : > { %18776 = vmatpush3.bf16.msra.mxu0 %v19222_v20  ;;  %18986 = vmatpush3.bf16.msra.mxu1 %v19222_v20  ;;  %v19285_v20 = vld [vmem:[%s20524_s8 + $0x408] sm:$0xff]  }
 0x101   : > { %18777 = vmatprep.subr.bf16.mxu0 %v19223_v22  ;;  %18987 = vmatprep.subr.bf16.mxu1 %v19223_v22 }
 0x103   : > { %18368 = vmatmul.mubr.msk.bf16.gmra.mxu0 %vm7385_vm2, %v19232_v31  ;;  %18578 = vmatmul.mubr.msk.bf16.gmra.mxu1 %vm7385_vm2, %v19233_v32  ;;  %v19296_v31 = vld [vmem:[%s20524_s8 + $0x118] sm:$0xff]  }
 0x104   : > { %18371 = vmatprep.mubr.msk.bf16.mxu0 %vm7385_vm2, %v19234_v33  ;;  %18581 = vmatprep.mubr.msk.bf16.mxu1 %vm7385_vm2, %v19235_v34  ;;  %v19297_v32 = vld [vmem:[%s20524_s8 + $0x438] sm:$0xff]   ;;  %v19298_v33 = vld [vmem:[%s20524_s8 + $0x120] sm:$0xff]  }
 0x105   : > { %18778 = vmatpush3.bf16.msra.mxu0 %v19223_v22  ;;  %18988 = vmatpush3.bf16.msra.mxu1 %v19223_v22  ;;  %v19287_v22 = vld [vmem:[%s20524_s8 + $0x410] sm:$0xff]   ;;  %v19299_v34 = vld [vmem:[%s20524_s8 + $0x440] sm:$0xff]  }
 0x106   : > { %18779 = vmatprep.subr.bf16.mxu0 %v19224_v25  ;;  %18989 = vmatprep.subr.bf16.mxu1 %v19224_v25 }
 0x109   : > { %18780 = vmatpush3.bf16.msra.mxu0 %v19224_v25  ;;  %18990 = vmatpush3.bf16.msra.mxu1 %v19224_v25  ;;  %v19290_v25 = vld [vmem:[%s20524_s8 + $0x100] sm:$0xff]  }
 0x10a   : > { %18781 = vmatprep.subr.bf16.mxu0 %v19225_v26  ;;  %18991 = vmatprep.subr.bf16.mxu1 %v19225_v26 }
 0x10b   : > { %18372 = vmatmul.mubr.msk.bf16.gmra.mxu0 %vm7385_vm2, %v19236_v35  ;;  %18582 = vmatmul.mubr.msk.bf16.gmra.mxu1 %vm7385_vm2, %v19237_v36  ;;  %v19300_v35 = vld [vmem:[%s20524_s8 + $0x128] sm:$0xff]  }
 0x10c   : > { %18375 = vmatprep.mubr.msk.bf16.mxu0 %vm7385_vm2, %v19238_v37  ;;  %18585 = vmatprep.mubr.msk.bf16.mxu1 %vm7385_vm2, %v19239_v38  ;;  %v19301_v36 = vld [vmem:[%s20524_s8 + $0x448] sm:$0xff]   ;;  %v19302_v37 = vld [vmem:[%s20524_s8 + $0x130] sm:$0xff]  }
 0x10d   : > { %18782 = vmatpush3.bf16.msra.mxu0 %v19225_v26  ;;  %18992 = vmatpush3.bf16.msra.mxu1 %v19225_v26  ;;  %v19291_v26 = vld [vmem:[%s20524_s8 + $0x420] sm:$0xff]   ;;  %v19303_v38 = vld [vmem:[%s20524_s8 + $0x450] sm:$0xff]  }
 0x113   : > { %18376 = vmatmul.mubr.msk.bf16.gmra.mxu0 %vm7385_vm2, %v19240_v39  ;;  %18586 = vmatmul.mubr.msk.bf16.gmra.mxu1 %vm7385_vm2, %v19241_v40  ;;  %v19304_v39 = vld [vmem:[%s20524_s8 + $0x138] sm:$0xff]  }
 0x114   : > { %18379 = vmatprep.mubr.msk.bf16.mxu0 %vm7385_vm2, %v19242_v41  ;;  %18589 = vmatprep.mubr.msk.bf16.mxu1 %vm7385_vm2, %v19243_v42  ;;  %v19305_v40 = vld [vmem:[%s20524_s8 + $0x458] sm:$0xff]   ;;  %v19306_v41 = vld [vmem:[%s20524_s8 + $0x140] sm:$0xff]  }
 0x115   : > { %v19307_v42 = vld [vmem:[%s20524_s8 + $0x460] sm:$0xff]  }
 0x11b   : > { %18380 = vmatmul.mubr.msk.bf16.gmra.mxu0 %vm7385_vm2, %v19244_v43  ;;  %18590 = vmatmul.mubr.msk.bf16.gmra.mxu1 %vm7385_vm2, %v19245_v44  ;;  %v19308_v43 = vld [vmem:[%s20524_s8 + $0x148] sm:$0xff]  }
 0x11c   : > { %18383 = vmatprep.mubr.msk.bf16.mxu0 %vm7385_vm2, %v19246_v45  ;;  %18593 = vmatprep.mubr.msk.bf16.mxu1 %vm7385_vm2, %v19247_v46  ;;  %v19309_v44 = vld [vmem:[%s20524_s8 + $0x468] sm:$0xff]   ;;  %v19310_v45 = vld [vmem:[%s20524_s8 + $0x150] sm:$0xff]  }
 0x11d   : > { %v19311_v46 = vld [vmem:[%s20524_s8 + $0x470] sm:$0xff]  }
 0x123   : > { %18384 = vmatmul.mubr.msk.bf16.gmra.mxu0 %vm7385_vm2, %v19248_v47  ;;  %18594 = vmatmul.mubr.msk.bf16.gmra.mxu1 %vm7385_vm2, %v19249_v48  ;;  %v19312_v47 = vld [vmem:[%s20524_s8 + $0x158] sm:$0xff]  }
 0x124   : > { %18387 = vmatprep.mubr.msk.bf16.mxu0 %vm7385_vm2, %v19250_v49  ;;  %18597 = vmatprep.mubr.msk.bf16.mxu1 %vm7385_vm2, %v19251_v50  ;;  %v19313_v48 = vld [vmem:[%s20524_s8 + $0x478] sm:$0xff]   ;;  %v19314_v49 = vld [vmem:[%s20524_s8 + $0x160] sm:$0xff]  }
 0x125   : > { %v19315_v50 = vld [vmem:[%s20524_s8 + $0x480] sm:$0xff]  }
 0x12b   : > { %18388 = vmatmul.mubr.msk.bf16.gmra.mxu0 %vm7385_vm2, %v19252_v51  ;;  %18598 = vmatmul.mubr.msk.bf16.gmra.mxu1 %vm7385_vm2, %v19253_v52  ;;  %v19316_v51 = vld [vmem:[%s20524_s8 + $0x168] sm:$0xff]  }
 0x12c   : > { %18391 = vmatprep.mubr.msk.bf16.mxu0 %vm7385_vm2, %v19254_v53  ;;  %18601 = vmatprep.mubr.msk.bf16.mxu1 %vm7385_vm2, %v19255_v54  ;;  %v19317_v52 = vld [vmem:[%s20524_s8 + $0x488] sm:$0xff]   ;;  %v19318_v53 = vld [vmem:[%s20524_s8 + $0x170] sm:$0xff]  }
 0x12d   : > { %v19319_v54 = vld [vmem:[%s20524_s8 + $0x490] sm:$0xff]  }
 0x133   : > { %18392 = vmatmul.mubr.msk.bf16.gmra.mxu0 %vm7385_vm2, %v19256_v55  ;;  %18602 = vmatmul.mubr.msk.bf16.gmra.mxu1 %vm7385_vm2, %v19257_v56  ;;  %v19320_v55 = vld [vmem:[%s20524_s8 + $0x178] sm:$0xff]  }
 0x134   : > { %18395 = vmatprep.mubr.msk.bf16.mxu0 %vm7385_vm2, %v19258_v57  ;;  %18605 = vmatprep.mubr.msk.bf16.mxu1 %vm7385_vm2, %v19259_v58  ;;  %v19321_v56 = vld [vmem:[%s20524_s8 + $0x498] sm:$0xff]   ;;  %v19322_v57 = vld [vmem:[%s20524_s8 + $0x180] sm:$0xff]  }
 0x135   : > { %v19323_v58 = vld [vmem:[%s20524_s8 + $0x4a0] sm:$0xff]  }
 0x13b   : > { %18396 = vmatmul.mubr.msk.bf16.gmra.mxu0 %vm7385_vm2, %v19260_v59  ;;  %18606 = vmatmul.mubr.msk.bf16.gmra.mxu1 %vm7385_vm2, %v19261_v60  ;;  %v19324_v59 = vld [vmem:[%s20524_s8 + $0x188] sm:$0xff]  }
 0x13c   : > { %18399 = vmatprep.mubr.msk.bf16.mxu0 %vm7385_vm2, %v19262_v61  ;;  %18609 = vmatprep.mubr.msk.bf16.mxu1 %vm7385_vm2, %v19263_v62  ;;  %v19325_v60 = vld [vmem:[%s20524_s8 + $0x4a8] sm:$0xff]   ;;  %v19326_v61 = vld [vmem:[%s20524_s8 + $0x190] sm:$0xff]  }
 0x13d   : > { %v19327_v62 = vld [vmem:[%s20524_s8 + $0x4b0] sm:$0xff]  }
 0x143   : > { %18400 = vmatmul.mubr.msk.bf16.gmra.mxu0 %vm7385_vm2, %v19264_v63  ;;  %18610 = vmatmul.mubr.msk.bf16.gmra.mxu1 %vm7385_vm2, %v19265_v0 }
 0x144   : > { %18403 = vmatprep.mubr.msk.bf16.mxu0 %vm7385_vm2, %v19266_v1  ;;  %18613 = vmatprep.mubr.msk.bf16.mxu1 %vm7385_vm2, %v19267_v2 }
 0x14b   : > { %18404 = vmatmul.mubr.msk.bf16.gmra.mxu0 %vm7385_vm2, %v19268_v3  ;;  %18614 = vmatmul.mubr.msk.bf16.gmra.mxu1 %vm7385_vm2, %v19269_v4  ;;  %v19328_v4 = vld [vmem:[%s20524_s8 + $0x198] sm:$0xff]  }
 0x14c   : > { %18407 = vmatprep.mubr.msk.bf16.mxu0 %vm7385_vm2, %v19270_v5  ;;  %18617 = vmatprep.mubr.msk.bf16.mxu1 %vm7385_vm2, %v19271_v6  ;;  %v19329_v5 = vld [vmem:[%s20524_s8 + $0x4b8] sm:$0xff]  }
 0x153   : > { %18408 = vmatmul.mubr.msk.bf16.gmra.mxu0 %vm7385_vm2, %v19272_v7  ;;  %18618 = vmatmul.mubr.msk.bf16.gmra.mxu1 %vm7385_vm2, %v19273_v8 }
 0x154   : > { %18411 = vmatprep.mubr.msk.bf16.mxu0 %vm7385_vm2, %v19274_v9  ;;  %18621 = vmatprep.mubr.msk.bf16.mxu1 %vm7385_vm2, %v19275_v10  ;;  %v19330_v10 = vld [vmem:[%s20524_s8 + $0x1a0] sm:$0xff]  }
 0x15b   : > { %18412 = vmatmul.mubr.msk.bf16.gmra.mxu0 %vm7385_vm2, %v19276_v11  ;;  %18622 = vmatmul.mubr.msk.bf16.gmra.mxu1 %vm7385_vm2, %v19277_v12  ;;  %v19331_v11 = vld [vmem:[%s20524_s8 + $0x4c0] sm:$0xff]  }
 0x15c   : > { %18415 = vmatprep.mubr.msk.bf16.mxu0 %vm7385_vm2, %v19278_v13  ;;  %18625 = vmatprep.mubr.msk.bf16.mxu1 %vm7385_vm2, %v19279_v14 }
 0x163   : > { %18416 = vmatmul.mubr.msk.bf16.gmra.mxu0 %vm7385_vm2, %v19280_v15  ;;  %18626 = vmatmul.mubr.msk.bf16.gmra.mxu1 %vm7385_vm2, %v19281_v16 }
 0x164   : > { %18419 = vmatprep.mubr.msk.bf16.mxu0 %vm7385_vm2, %v19282_v17  ;;  %18629 = vmatprep.mubr.msk.bf16.mxu1 %vm7385_vm2, %v19283_v18 }
 0x16b   : > { %18420 = vmatmul.mubr.msk.bf16.gmra.mxu0 %vm7385_vm2, %v19284_v19  ;;  %18630 = vmatmul.mubr.msk.bf16.gmra.mxu1 %vm7385_vm2, %v19285_v20  ;;  %v19332_v20 = vld [vmem:[%s20524_s8 + $0x1a8] sm:$0xff]  }
 0x16c   : > { %18423 = vmatprep.mubr.msk.bf16.mxu0 %vm7385_vm2, %v19286_v21  ;;  %18633 = vmatprep.mubr.msk.bf16.mxu1 %vm7385_vm2, %v19287_v22  ;;  %v19333_v21 = vld [vmem:[%s20524_s8 + $0x4c8] sm:$0xff]   ;;  %v19353_v22 = vld [vmem:[%s20524_s8 + $0x518] sm:$0xff]  }
 0x173   : > { %18424 = vmatmul.mubr.msk.bf16.gmra.mxu0 %vm7385_vm2, %v19288_v23  ;;  %18634 = vmatmul.mubr.msk.bf16.gmra.mxu1 %vm7385_vm2, %v19289_v24 }
 0x174   : > { %18427 = vmatprep.mubr.msk.bf16.mxu0 %vm7385_vm2, %v19290_v25  ;;  %18637 = vmatprep.mubr.msk.bf16.mxu1 %vm7385_vm2, %v19291_v26  ;;  %v19334_v26 = vld [vmem:[%s20524_s8 + $0x1b0] sm:$0xff]   ;;  %v19352_v25 = vld [vmem:[%s20524_s8 + $0x1f8] sm:$0xff]  }
 0x17b   : > { %18428 = vmatmul.mubr.msk.bf16.gmra.mxu0 %vm7385_vm2, %v19292_v27  ;;  %18638 = vmatmul.mubr.msk.bf16.gmra.mxu1 %vm7385_vm2, %v19293_v28  ;;  %v19335_v27 = vld [vmem:[%s20524_s8 + $0x4d0] sm:$0xff]  }
 0x17c   : > { %18431 = vmatprep.mubr.msk.bf16.mxu0 %vm7385_vm2, %v19294_v29  ;;  %18641 = vmatprep.mubr.msk.bf16.mxu1 %vm7385_vm2, %v19295_v30 }
 0x183   : > { %18432 = vmatmul.mubr.msk.bf16.gmra.mxu0 %vm7385_vm2, %v19296_v31  ;;  %18642 = vmatmul.mubr.msk.bf16.gmra.mxu1 %vm7385_vm2, %v19297_v32 }
 0x184   : > { %18435 = vmatprep.mubr.msk.bf16.mxu0 %vm7385_vm2, %v19298_v33  ;;  %18645 = vmatprep.mubr.msk.bf16.mxu1 %vm7385_vm2, %v19299_v34 }
 0x18b   : > { %18436 = vmatmul.mubr.msk.bf16.gmra.mxu0 %vm7385_vm2, %v19300_v35  ;;  %18646 = vmatmul.mubr.msk.bf16.gmra.mxu1 %vm7385_vm2, %v19301_v36  ;;  %v19336_v36 = vld [vmem:[%s20524_s8 + $0x1b8] sm:$0xff]  }
 0x18c   : > { %18439 = vmatprep.mubr.msk.bf16.mxu0 %vm7385_vm2, %v19302_v37  ;;  %18649 = vmatprep.mubr.msk.bf16.mxu1 %vm7385_vm2, %v19303_v38  ;;  %v19337_v37 = vld [vmem:[%s20524_s8 + $0x4d8] sm:$0xff]  }
 0x193   : > { %18440 = vmatmul.mubr.msk.bf16.gmra.mxu0 %vm7385_vm2, %v19304_v39  ;;  %18650 = vmatmul.mubr.msk.bf16.gmra.mxu1 %vm7385_vm2, %v19305_v40 }
 0x194   : > { %18443 = vmatprep.mubr.msk.bf16.mxu0 %vm7385_vm2, %v19306_v41  ;;  %18653 = vmatprep.mubr.msk.bf16.mxu1 %vm7385_vm2, %v19307_v42  ;;  %v19338_v42 = vld [vmem:[%s20524_s8 + $0x1c0] sm:$0xff]  }
 0x19b   : > { %18444 = vmatmul.mubr.msk.bf16.gmra.mxu0 %vm7385_vm2, %v19308_v43  ;;  %18654 = vmatmul.mubr.msk.bf16.gmra.mxu1 %vm7385_vm2, %v19309_v44  ;;  %v19339_v43 = vld [vmem:[%s20524_s8 + $0x4e0] sm:$0xff]  }
 0x19c   : > { %18447 = vmatprep.mubr.msk.bf16.mxu0 %vm7385_vm2, %v19310_v45  ;;  %18657 = vmatprep.mubr.msk.bf16.mxu1 %vm7385_vm2, %v19311_v46 }
 0x1a3   : > { %18448 = vmatmul.mubr.msk.bf16.gmra.mxu0 %vm7385_vm2, %v19312_v47  ;;  %18658 = vmatmul.mubr.msk.bf16.gmra.mxu1 %vm7385_vm2, %v19313_v48 }
 0x1a4   : > { %18451 = vmatprep.mubr.msk.bf16.mxu0 %vm7385_vm2, %v19314_v49  ;;  %18661 = vmatprep.mubr.msk.bf16.mxu1 %vm7385_vm2, %v19315_v50 }
 0x1ab   : > { %18452 = vmatmul.mubr.msk.bf16.gmra.mxu0 %vm7385_vm2, %v19316_v51  ;;  %18662 = vmatmul.mubr.msk.bf16.gmra.mxu1 %vm7385_vm2, %v19317_v52  ;;  %v19340_v52 = vld [vmem:[%s20524_s8 + $0x1c8] sm:$0xff]  }
 0x1ac   : > { %18455 = vmatprep.mubr.msk.bf16.mxu0 %vm7385_vm2, %v19318_v53  ;;  %18665 = vmatprep.mubr.msk.bf16.mxu1 %vm7385_vm2, %v19319_v54  ;;  %v19341_v53 = vld [vmem:[%s20524_s8 + $0x4e8] sm:$0xff]  }
 0x1ad   : > { %v19349_v54 = vld [vmem:[%s20524_s8 + $0x508] sm:$0xff]  }
 0x1b3   : > { %18456 = vmatmul.mubr.msk.bf16.gmra.mxu0 %vm7385_vm2, %v19320_v55  ;;  %18666 = vmatmul.mubr.msk.bf16.gmra.mxu1 %vm7385_vm2, %v19321_v56 }
 0x1b4   : > { %18459 = vmatprep.mubr.msk.bf16.mxu0 %vm7385_vm2, %v19322_v57  ;;  %18669 = vmatprep.mubr.msk.bf16.mxu1 %vm7385_vm2, %v19323_v58  ;;  %v19342_v58 = vld [vmem:[%s20524_s8 + $0x1d0] sm:$0xff]   ;;  %v19348_v57 = vld [vmem:[%s20524_s8 + $0x1e8] sm:$0xff]  }
 0x1bb   : > { %v20732_v63 = vpop.f32.mrf.mxu0  ;;  %18460 = vmatmul.mubr.msk.bf16.gmra.mxu0 %vm7385_vm2, %v19324_v59  ;;  %v20735_v0 = vpop.f32.mrf.mxu1  ;;  %18670 = vmatmul.mubr.msk.bf16.gmra.mxu1 %vm7385_vm2, %v19325_v60  ;;  %v19343_v59 = vld [vmem:[%s20524_s8 + $0x4f0] sm:$0xff]  }
 0x1bc   : > { %18463 = vmatprep.mubr.msk.bf16.mxu0 %vm7385_vm2, %v19326_v61  ;;  %18673 = vmatprep.mubr.msk.bf16.mxu1 %vm7385_vm2, %v19327_v62 }
 0x1bd   : > { %v20742_v2 = vpop.f32.mrf.mxu0  ;;  %v20744_v3 = vpop.f32.mrf.mxu1 }
 0x1bf   : > { %v20750_v7 = vpop.f32.mrf.mxu0  ;;  %v20752_v8 = vpop.f32.mrf.mxu1 }
 0x1c1   : > { %v20758_v12 = vpop.f32.mrf.mxu0  ;;  %v20760_v13 = vpop.f32.mrf.mxu1 }
 0x1c3   : > { %v20764_v15 = vpop.f32.mrf.mxu0  ;;  %18464 = vmatmul.mubr.msk.bf16.gmra.mxu0 %vm7385_vm2, %v19328_v4  ;;  %v20767_v16 = vpop.f32.mrf.mxu1  ;;  %18674 = vmatmul.mubr.msk.bf16.gmra.mxu1 %vm7385_vm2, %v19329_v5 }
 0x1c4   : > { %18467 = vmatprep.mubr.msk.bf16.mxu0 %vm7385_vm2, %v19330_v10  ;;  %18677 = vmatprep.mubr.msk.bf16.mxu1 %vm7385_vm2, %v19331_v11 }
 0x1c5   : > { %v20774_v18 = vpop.f32.mrf.mxu0  ;;  %v20776_v19 = vpop.f32.mrf.mxu1 }
 0x1c7   : > { %v20782_v23 = vpop.f32.mrf.mxu0  ;;  %v20784_v24 = vpop.f32.mrf.mxu1 }
 0x1c9   : > { %v20790_v28 = vpop.f32.mrf.mxu0  ;;  %v20792_v29 = vpop.f32.mrf.mxu1 }
 0x1cb   : > { %v20796_v31 = vpop.f32.mrf.mxu0  ;;  %18468 = vmatmul.mubr.msk.bf16.gmra.mxu0 %vm7385_vm2, %v19332_v20  ;;  %v20799_v32 = vpop.f32.mrf.mxu1  ;;  %18678 = vmatmul.mubr.msk.bf16.gmra.mxu1 %vm7385_vm2, %v19333_v21  ;;  %v19344_v21 = vld [vmem:[%s20524_s8 + $0x1d8] sm:$0xff]  }
 0x1cc   : > { %18471 = vmatprep.mubr.msk.bf16.mxu0 %vm7385_vm2, %v19334_v26  ;;  %18681 = vmatprep.mubr.msk.bf16.mxu1 %vm7385_vm2, %v19335_v27  ;;  %v19345_v26 = vld [vmem:[%s20524_s8 + $0x4f8] sm:$0xff]  }
 0x1cd   : > { %v20806_v34 = vpop.f32.mrf.mxu0  ;;  %v20808_v35 = vpop.f32.mrf.mxu1 }
 0x1cf   : > { %v20814_v39 = vpop.f32.mrf.mxu0  ;;  %v20816_v40 = vpop.f32.mrf.mxu1 }
 0x1d1   : > { %v20822_v44 = vpop.f32.mrf.mxu0  ;;  %v20824_v45 = vpop.f32.mrf.mxu1 }
 0x1d3   : > { %v20828_v47 = vpop.f32.mrf.mxu0  ;;  %18472 = vmatmul.mubr.msk.bf16.gmra.mxu0 %vm7385_vm2, %v19336_v36  ;;  %v20831_v48 = vpop.f32.mrf.mxu1  ;;  %18682 = vmatmul.mubr.msk.bf16.gmra.mxu1 %vm7385_vm2, %v19337_v37 }
 0x1d4   : > { %18475 = vmatprep.mubr.msk.bf16.mxu0 %vm7385_vm2, %v19338_v42  ;;  %18685 = vmatprep.mubr.msk.bf16.mxu1 %vm7385_vm2, %v19339_v43  ;;  %v19346_v43 = vld [vmem:[%s20524_s8 + $0x1e0] sm:$0xff]  }
 0x1d5   : > { %v20838_v50 = vpop.f32.mrf.mxu0  ;;  %v20840_v51 = vpop.f32.mrf.mxu1 }
 0x1d7   : > { %v20846_v55 = vpop.f32.mrf.mxu0  ;;  %v20848_v56 = vpop.f32.mrf.mxu1 }
 0x1d9   : > { %v20854_v60 = vpop.f32.mrf.mxu0  ;;  %v20856_v61 = vpop.f32.mrf.mxu1 }
 0x1db   : > { %v20860_v4 = vpop.f32.mrf.mxu0  ;;  %18476 = vmatmul.mubr.msk.bf16.gmra.mxu0 %vm7385_vm2, %v19340_v52  ;;  %v20863_v5 = vpop.f32.mrf.mxu1  ;;  %18686 = vmatmul.mubr.msk.bf16.gmra.mxu1 %vm7385_vm2, %v19341_v53  ;;  %v19347_v52 = vld [vmem:[%s20524_s8 + $0x500] sm:$0xff]  }
 0x1dc   : > { %18479 = vmatprep.mubr.msk.bf16.mxu0 %vm7385_vm2, %v19342_v58  ;;  %18689 = vmatprep.mubr.msk.bf16.mxu1 %vm7385_vm2, %v19343_v59 }
 0x1dd   : > { %v20870_v11 = vpop.f32.mrf.mxu0  ;;  %v20872_v20 = vpop.f32.mrf.mxu1 }
 0x1df   : > { %v20878_v36 = vpop.f32.mrf.mxu0  ;;  %v20880_v37 = vpop.f32.mrf.mxu1 }
 0x1e1   : > { %v20886_v53 = vpop.f32.mrf.mxu0  ;;  %v20888_v58 = vpop.f32.mrf.mxu1 }
 0x1e3   : > { %v20892_v27 = vpop.f32.mrf.mxu0  ;;  %18480 = vmatmul.mubr.msk.bf16.gmra.mxu0 %vm7385_vm2, %v19344_v21  ;;  %v20895_v10 = vpop.f32.mrf.mxu1  ;;  %18690 = vmatmul.mubr.msk.bf16.gmra.mxu1 %vm7385_vm2, %v19345_v26 }
 0x1e4   : > { %18483 = vmatprep.mubr.msk.bf16.mxu0 %vm7385_vm2, %v19346_v43  ;;  %18693 = vmatprep.mubr.msk.bf16.mxu1 %vm7385_vm2, %v19347_v52  ;;  %v19350_v43 = vld [vmem:[%s20524_s8 + $0x1f0] sm:$0xff]  }
 0x1e5   : > { %v20902_v62 = vpop.f32.mrf.mxu0  ;;  %v20904_v59 = vpop.f32.mrf.mxu1  ;;  %v19351_v52 = vld [vmem:[%s20524_s8 + $0x510] sm:$0xff]  }
 0x1e7   : > { %v20910_v49 = vpop.f32.mrf.mxu0  ;;  %v20912_v46 = vpop.f32.mrf.mxu1 }
 0x1e9   : > { %v20918_v42 = vpop.f32.mrf.mxu0  ;;  %v20920_v41 = vpop.f32.mrf.mxu1 }
 0x1ea   : > { %24126 = vst [vmem:[#allocation3_spill] sm:$0xff] %v20920_v41 }
 0x1eb   : > { %v20924_v21 = vpop.f32.mrf.mxu0  ;;  %18484 = vmatmul.mubr.msk.bf16.gmra.mxu0 %vm7385_vm2, %v19348_v57  ;;  %v20927_v33 = vpop.f32.mrf.mxu1  ;;  %18694 = vmatmul.mubr.msk.bf16.gmra.mxu1 %vm7385_vm2, %v19349_v54 }
 0x1ec   : > { %24127 = vst [vmem:[#allocation4_spill] sm:$0xff] %v20924_v21  ;;  %24128 = vst [vmem:[#allocation5_spill] sm:$0xff] %v20927_v33  ;;  %18487 = vmatprep.mubr.msk.bf16.mxu0 %vm7385_vm2, %v19350_v43  ;;  %18697 = vmatprep.mubr.msk.bf16.mxu1 %vm7385_vm2, %v19351_v52  ;;  %v19354_v43 = vld [vmem:[%s20524_s8 + $0x200] sm:$0xff]  }
 0x1ed   : > { %v20934_v30 = vpop.f32.mrf.mxu0  ;;  %v20936_v38 = vpop.f32.mrf.mxu1  ;;  %v19355_v52 = vld [vmem:[%s20524_s8 + $0x520] sm:$0xff]  }
 0x1ee   : > { %24129 = vst [vmem:[#allocation6_spill] sm:$0xff] %v20934_v30  ;;  %24130 = vst [vmem:[#allocation7_spill] sm:$0xff] %v20936_v38  ;;  %v19530_v33 = vld [vmem:[%s20524_s8 + $0x7e0] sm:$0xff]  }
 0x1ef   : > { %v20942_v17 = vpop.f32.mrf.mxu0  ;;  %v20944_v14 = vpop.f32.mrf.mxu1  ;;  %v19531_v21 = vld [vmem:[%s20524_s8 + $0xb00] sm:$0xff]  }
 0x1f0   : > { %24131 = vst [vmem:[#allocation8_spill] sm:$0xff] %v20942_v17  ;;  %24132 = vst [vmem:[#allocation9_spill] sm:$0xff] %v20944_v14 }
 0x1f1   : > { %v20950_v26 = vpop.f32.mrf.mxu0  ;;  %v20952_v9 = vpop.f32.mrf.mxu1 }
 0x1f2   : > { %24133 = vst [vmem:[#allocation10_spill] sm:$0xff] %v20950_v26  ;;  %24134 = vst [vmem:[#allocation11_spill] sm:$0xff] %v20952_v9  ;;  %v19356_v9 = vld [vmem:[%s20524_s8 + $0x208] sm:$0xff]  }
 0x1f3   : > { %v20956_v57 = vpop.f32.mrf.mxu0  ;;  %18488 = vmatmul.mubr.msk.bf16.gmra.mxu0 %vm7385_vm2, %v19352_v25  ;;  %v20959_v1 = vpop.f32.mrf.mxu1  ;;  %18698 = vmatmul.mubr.msk.bf16.gmra.mxu1 %vm7385_vm2, %v19353_v22  ;;  %v19357_v26 = vld [vmem:[%s20524_s8 + $0x528] sm:$0xff]  }
 0x1f4   : > { %24135 = vst [vmem:[#allocation12_spill] sm:$0xff] %v20956_v57  ;;  %24136 = vst [vmem:[#allocation13_spill] sm:$0xff] %v20959_v1  ;;  %18491 = vmatprep.mubr.msk.bf16.mxu0 %vm7385_vm2, %v19354_v43  ;;  %18701 = vmatprep.mubr.msk.bf16.mxu1 %vm7385_vm2, %v19355_v52  ;;  %v19358_v43 = vld [vmem:[%s20524_s8 + $0x210] sm:$0xff]  }
 0x1f5   : > { %v20966_v14 = vpop.f32.mrf.mxu0  ;;  %v20968_v6 = vpop.f32.mrf.mxu1  ;;  %v19359_v52 = vld [vmem:[%s20524_s8 + $0x530] sm:$0xff]  }
 0x1f6   : > { %24137 = vst [vmem:[#allocation14_spill] sm:$0xff] %v20966_v14  ;;  %24138 = vst [vmem:[#allocation15_spill] sm:$0xff] %v20968_v6 }
 0x1f7   : > { %v20974_v17 = vpop.f32.mrf.mxu0  ;;  %v20976_v38 = vpop.f32.mrf.mxu1 }
 0x1f8   : > { %24139 = vst [vmem:[#allocation16_spill] sm:$0xff] %v20974_v17  ;;  %24140 = vst [vmem:[#allocation17_spill] sm:$0xff] %v20976_v38 }
 0x1f9   : > { %v20982_v54 = vpop.f32.mrf.mxu0  ;;  %v20984_v1 = vpop.f32.mrf.mxu1 }
 0x1fa   : > { %24141 = vst [vmem:[#allocation18_spill] sm:$0xff] %v20982_v54  ;;  %24142 = vst [vmem:[#allocation19_spill] sm:$0xff] %v20984_v1  ;;  %v19360_v1 = vld [vmem:[%s20524_s8 + $0x218] sm:$0xff]  }
 0x1fb   : > { %v20988_v25 = vpop.f32.mrf.mxu0  ;;  %18492 = vmatmul.mubr.msk.bf16.gmra.mxu0 %vm7385_vm2, %v19356_v9  ;;  %v20991_v6 = vpop.f32.mrf.mxu1  ;;  %18702 = vmatmul.mubr.msk.bf16.gmra.mxu1 %vm7385_vm2, %v19357_v26  ;;  %v19361_v54 = vld [vmem:[%s20524_s8 + $0x538] sm:$0xff]  }
 0x1fc   : > { %24143 = vst [vmem:[#allocation20_spill] sm:$0xff] %v20988_v25  ;;  %24144 = vst [vmem:[#allocation21_spill] sm:$0xff] %v20991_v6  ;;  %18495 = vmatprep.mubr.msk.bf16.mxu0 %vm7385_vm2, %v19358_v43  ;;  %18705 = vmatprep.mubr.msk.bf16.mxu1 %vm7385_vm2, %v19359_v52  ;;  %v19362_v43 = vld [vmem:[%s20524_s8 + $0x220] sm:$0xff]  }
 0x1fd   : > { %v20998_v38 = vpop.f32.mrf.mxu0  ;;  %v21000_v57 = vpop.f32.mrf.mxu1  ;;  %v19363_v52 = vld [vmem:[%s20524_s8 + $0x540] sm:$0xff]  }
 0x1fe   : > { %24145 = vst [vmem:[#allocation22_spill] sm:$0xff] %v20998_v38  ;;  %24146 = vst [vmem:[#allocation23_spill] sm:$0xff] %v21000_v57 }
 0x1ff   : > { %v21006_v17 = vpop.f32.mrf.mxu0  ;;  %v21008_v14 = vpop.f32.mrf.mxu1 }
 0x200   : > { %24147 = vst [vmem:[#allocation24_spill] sm:$0xff] %v21006_v17  ;;  %24148 = vst [vmem:[#allocation25_spill] sm:$0xff] %v21008_v14 }
 0x201   : > { %v21014_v22 = vpop.f32.mrf.mxu0  ;;  %v21016_v6 = vpop.f32.mrf.mxu1 }
 0x202   : > { %24149 = vst [vmem:[#allocation26_spill] sm:$0xff] %v21014_v22  ;;  %24150 = vst [vmem:[#allocation27_spill] sm:$0xff] %v21016_v6  ;;  %v19364_v6 = vld [vmem:[%s20524_s8 + $0x228] sm:$0xff]  }
 0x203   : > { %v21020_v9 = vpop.f32.mrf.mxu0  ;;  %18496 = vmatmul.mubr.msk.bf16.gmra.mxu0 %vm7385_vm2, %v19360_v1  ;;  %v21023_v57 = vpop.f32.mrf.mxu1  ;;  %18706 = vmatmul.mubr.msk.bf16.gmra.mxu1 %vm7385_vm2, %v19361_v54  ;;  %v19365_v22 = vld [vmem:[%s20524_s8 + $0x548] sm:$0xff]  }
 0x204   : > { %24151 = vst [vmem:[#allocation28_spill] sm:$0xff] %v21020_v9  ;;  %24152 = vst [vmem:[#allocation29_spill] sm:$0xff] %v21023_v57  ;;  %18499 = vmatprep.mubr.msk.bf16.mxu0 %vm7385_vm2, %v19362_v43  ;;  %18709 = vmatprep.mubr.msk.bf16.mxu1 %vm7385_vm2, %v19363_v52  ;;  %v19366_v43 = vld [vmem:[%s20524_s8 + $0x230] sm:$0xff]  }
 0x205   : > { %v21030_v14 = vpop.f32.mrf.mxu0  ;;  %v21032_v25 = vpop.f32.mrf.mxu1  ;;  %v19367_v52 = vld [vmem:[%s20524_s8 + $0x550] sm:$0xff]  }
 0x206   : > { %24153 = vst [vmem:[#allocation30_spill] sm:$0xff] %v21030_v14  ;;  %24154 = vst [vmem:[#allocation31_spill] sm:$0xff] %v21032_v25 }
 0x207   : > { %v21038_v17 = vpop.f32.mrf.mxu0  ;;  %v21040_v38 = vpop.f32.mrf.mxu1 }
 0x208   : > { %24155 = vst [vmem:[#allocation32_spill] sm:$0xff] %v21038_v17  ;;  %24156 = vst [vmem:[#allocation33_spill] sm:$0xff] %v21040_v38 }
 0x209   : > { %v21046_v26 = vpop.f32.mrf.mxu0  ;;  %v21048_v57 = vpop.f32.mrf.mxu1 }
 0x20a   : > { %24157 = vst [vmem:[#allocation34_spill] sm:$0xff] %v21046_v26  ;;  %24158 = vst [vmem:[#allocation35_spill] sm:$0xff] %v21048_v57  ;;  %v19368_v57 = vld [vmem:[%s20524_s8 + $0x238] sm:$0xff]  }
 0x20b   : > { %v21052_v1 = vpop.f32.mrf.mxu0  ;;  %18500 = vmatmul.mubr.msk.bf16.gmra.mxu0 %vm7385_vm2, %v19364_v6  ;;  %v21055_v25 = vpop.f32.mrf.mxu1  ;;  %18710 = vmatmul.mubr.msk.bf16.gmra.mxu1 %vm7385_vm2, %v19365_v22  ;;  %v19369_v26 = vld [vmem:[%s20524_s8 + $0x558] sm:$0xff]  }
 0x20c   : > { %24159 = vst [vmem:[#allocation36_spill] sm:$0xff] %v21052_v1  ;;  %24160 = vst [vmem:[#allocation37_spill] sm:$0xff] %v21055_v25  ;;  %18503 = vmatprep.mubr.msk.bf16.mxu0 %vm7385_vm2, %v19366_v43  ;;  %18713 = vmatprep.mubr.msk.bf16.mxu1 %vm7385_vm2, %v19367_v52  ;;  %v19370_v43 = vld [vmem:[%s20524_s8 + $0x240] sm:$0xff]  }
 0x20d   : > { %v21062_v38 = vpop.f32.mrf.mxu0  ;;  %v21064_v9 = vpop.f32.mrf.mxu1  ;;  %v19371_v52 = vld [vmem:[%s20524_s8 + $0x560] sm:$0xff]  }
 0x20e   : > { %24161 = vst [vmem:[#allocation38_spill] sm:$0xff] %v21062_v38  ;;  %24162 = vst [vmem:[#allocation39_spill] sm:$0xff] %v21064_v9 }
 0x20f   : > { %v21070_v17 = vpop.f32.mrf.mxu0  ;;  %v21072_v14 = vpop.f32.mrf.mxu1 }
 0x210   : > { %24163 = vst [vmem:[#allocation40_spill] sm:$0xff] %v21070_v17  ;;  %24164 = vst [vmem:[#allocation41_spill] sm:$0xff] %v21072_v14 }
 0x211   : > { %v21078_v54 = vpop.f32.mrf.mxu0  ;;  %v21080_v25 = vpop.f32.mrf.mxu1 }
 0x212   : > { %24165 = vst [vmem:[#allocation42_spill] sm:$0xff] %v21078_v54  ;;  %24166 = vst [vmem:[#allocation43_spill] sm:$0xff] %v21080_v25  ;;  %v19372_v25 = vld [vmem:[%s20524_s8 + $0x248] sm:$0xff]  }
 0x213   : > { %v21084_v6 = vpop.f32.mrf.mxu0  ;;  %18504 = vmatmul.mubr.msk.bf16.gmra.mxu0 %vm7385_vm2, %v19368_v57  ;;  %v21087_v9 = vpop.f32.mrf.mxu1  ;;  %18714 = vmatmul.mubr.msk.bf16.gmra.mxu1 %vm7385_vm2, %v19369_v26  ;;  %v19373_v54 = vld [vmem:[%s20524_s8 + $0x568] sm:$0xff]  }
 0x214   : > { %24167 = vst [vmem:[#allocation44_spill] sm:$0xff] %v21084_v6  ;;  %24168 = vst [vmem:[#allocation45_spill] sm:$0xff] %v21087_v9  ;;  %18507 = vmatprep.mubr.msk.bf16.mxu0 %vm7385_vm2, %v19370_v43  ;;  %18717 = vmatprep.mubr.msk.bf16.mxu1 %vm7385_vm2, %v19371_v52  ;;  %v19374_v43 = vld [vmem:[%s20524_s8 + $0x250] sm:$0xff]  }
 0x215   : > { %v21094_v14 = vpop.f32.mrf.mxu0  ;;  %v21096_v1 = vpop.f32.mrf.mxu1  ;;  %v19375_v52 = vld [vmem:[%s20524_s8 + $0x570] sm:$0xff]  }
 0x216   : > { %24169 = vst [vmem:[#allocation46_spill] sm:$0xff] %v21094_v14  ;;  %24170 = vst [vmem:[#allocation47_spill] sm:$0xff] %v21096_v1 }
 0x217   : > { %v21102_v17 = vpop.f32.mrf.mxu0  ;;  %v21104_v38 = vpop.f32.mrf.mxu1 }
 0x218   : > { %24171 = vst [vmem:[#allocation48_spill] sm:$0xff] %v21102_v17  ;;  %24172 = vst [vmem:[#allocation49_spill] sm:$0xff] %v21104_v38 }
 0x219   : > { %v21110_v22 = vpop.f32.mrf.mxu0  ;;  %v21112_v9 = vpop.f32.mrf.mxu1 }
 0x21a   : > { %24173 = vst [vmem:[#allocation50_spill] sm:$0xff] %v21110_v22  ;;  %24174 = vst [vmem:[#allocation51_spill] sm:$0xff] %v21112_v9  ;;  %v19376_v9 = vld [vmem:[%s20524_s8 + $0x258] sm:$0xff]  }
 0x21b   : > { %v21116_v57 = vpop.f32.mrf.mxu0  ;;  %18508 = vmatmul.mubr.msk.bf16.gmra.mxu0 %vm7385_vm2, %v19372_v25  ;;  %v21119_v1 = vpop.f32.mrf.mxu1  ;;  %18718 = vmatmul.mubr.msk.bf16.gmra.mxu1 %vm7385_vm2, %v19373_v54  ;;  %v19377_v22 = vld [vmem:[%s20524_s8 + $0x578] sm:$0xff]  }
 0x21c   : > { %24175 = vst [vmem:[#allocation52_spill] sm:$0xff] %v21116_v57  ;;  %24176 = vst [vmem:[#allocation53_spill] sm:$0xff] %v21119_v1  ;;  %18511 = vmatprep.mubr.msk.bf16.mxu0 %vm7385_vm2, %v19374_v43  ;;  %18721 = vmatprep.mubr.msk.bf16.mxu1 %vm7385_vm2, %v19375_v52  ;;  %v19378_v43 = vld [vmem:[%s20524_s8 + $0x260] sm:$0xff]  }
 0x21d   : > { %v21126_v38 = vpop.f32.mrf.mxu0  ;;  %v21128_v6 = vpop.f32.mrf.mxu1  ;;  %v19379_v52 = vld [vmem:[%s20524_s8 + $0x580] sm:$0xff]  }
 0x21e   : > { %24177 = vst [vmem:[#allocation54_spill] sm:$0xff] %v21126_v38  ;;  %24178 = vst [vmem:[#allocation55_spill] sm:$0xff] %v21128_v6 }
 0x21f   : > { %v21134_v17 = vpop.f32.mrf.mxu0  ;;  %v21136_v14 = vpop.f32.mrf.mxu1 }
 0x220   : > { %24179 = vst [vmem:[#allocation56_spill] sm:$0xff] %v21134_v17  ;;  %24180 = vst [vmem:[#allocation57_spill] sm:$0xff] %v21136_v14 }
 0x221   : > { %v21142_v26 = vpop.f32.mrf.mxu0  ;;  %v21144_v1 = vpop.f32.mrf.mxu1 }
 0x222   : > { %24181 = vst [vmem:[#allocation58_spill] sm:$0xff] %v21142_v26  ;;  %24182 = vst [vmem:[#allocation59_spill] sm:$0xff] %v21144_v1  ;;  %v19380_v1 = vld [vmem:[%s20524_s8 + $0x268] sm:$0xff]  }
 0x223   : > { %v21148_v25 = vpop.f32.mrf.mxu0  ;;  %18512 = vmatmul.mubr.msk.bf16.gmra.mxu0 %vm7385_vm2, %v19376_v9  ;;  %v21151_v6 = vpop.f32.mrf.mxu1  ;;  %18722 = vmatmul.mubr.msk.bf16.gmra.mxu1 %vm7385_vm2, %v19377_v22  ;;  %v19381_v26 = vld [vmem:[%s20524_s8 + $0x588] sm:$0xff]  }
 0x224   : > { %24183 = vst [vmem:[#allocation60_spill] sm:$0xff] %v21148_v25  ;;  %24184 = vst [vmem:[#allocation61_spill] sm:$0xff] %v21151_v6  ;;  %18515 = vmatprep.mubr.msk.bf16.mxu0 %vm7385_vm2, %v19378_v43  ;;  %18725 = vmatprep.mubr.msk.bf16.mxu1 %vm7385_vm2, %v19379_v52  ;;  %v19382_v43 = vld [vmem:[%s20524_s8 + $0x270] sm:$0xff]  }
 0x225   : > { %v21158_v14 = vpop.f32.mrf.mxu0  ;;  %v21160_v57 = vpop.f32.mrf.mxu1  ;;  %v19383_v52 = vld [vmem:[%s20524_s8 + $0x590] sm:$0xff]  }
 0x226   : > { %24185 = vst [vmem:[#allocation62_spill] sm:$0xff] %v21158_v14  ;;  %24186 = vst [vmem:[#allocation63_spill] sm:$0xff] %v21160_v57 }
 0x227   : > { %v21166_v17 = vpop.f32.mrf.mxu0  ;;  %v21168_v38 = vpop.f32.mrf.mxu1 }
 0x228   : > { %24187 = vst [vmem:[#allocation64_spill] sm:$0xff] %v21166_v17  ;;  %24188 = vst [vmem:[#allocation65_spill] sm:$0xff] %v21168_v38 }
 0x229   : > { %v21174_v54 = vpop.f32.mrf.mxu0  ;;  %v21176_v6 = vpop.f32.mrf.mxu1 }
 0x22a   : > { %24189 = vst [vmem:[#allocation66_spill] sm:$0xff] %v21174_v54  ;;  %24190 = vst [vmem:[#allocation67_spill] sm:$0xff] %v21176_v6  ;;  %v19384_v6 = vld [vmem:[%s20524_s8 + $0x278] sm:$0xff]  }
 0x22b   : > { %v21180_v9 = vpop.f32.mrf.mxu0  ;;  %18516 = vmatmul.mubr.msk.bf16.gmra.mxu0 %vm7385_vm2, %v19380_v1  ;;  %v21183_v57 = vpop.f32.mrf.mxu1  ;;  %18726 = vmatmul.mubr.msk.bf16.gmra.mxu1 %vm7385_vm2, %v19381_v26  ;;  %v19385_v54 = vld [vmem:[%s20524_s8 + $0x598] sm:$0xff]  }
 0x22c   : > { %24191 = vst [vmem:[#allocation68_spill] sm:$0xff] %v21180_v9  ;;  %24192 = vst [vmem:[#allocation69_spill] sm:$0xff] %v21183_v57  ;;  %18519 = vmatprep.mubr.msk.bf16.mxu0 %vm7385_vm2, %v19382_v43  ;;  %18729 = vmatprep.mubr.msk.bf16.mxu1 %vm7385_vm2, %v19383_v52  ;;  %v19386_v43 = vld [vmem:[%s20524_s8 + $0x280] sm:$0xff]  }
 0x22d   : > { %v21190_v38 = vpop.f32.mrf.mxu0  ;;  %v21192_v25 = vpop.f32.mrf.mxu1  ;;  %v19387_v52 = vld [vmem:[%s20524_s8 + $0x5a0] sm:$0xff]  }
 0x22e   : > { %24193 = vst [vmem:[#allocation70_spill] sm:$0xff] %v21190_v38  ;;  %24194 = vst [vmem:[#allocation71_spill] sm:$0xff] %v21192_v25 }
 0x22f   : > { %v21198_v17 = vpop.f32.mrf.mxu0  ;;  %v21200_v14 = vpop.f32.mrf.mxu1 }
 0x230   : > { %24195 = vst [vmem:[#allocation72_spill] sm:$0xff] %v21198_v17  ;;  %24196 = vst [vmem:[#allocation73_spill] sm:$0xff] %v21200_v14 }
 0x231   : > { %v21206_v22 = vpop.f32.mrf.mxu0  ;;  %v21208_v57 = vpop.f32.mrf.mxu1 }
 0x232   : > { %24197 = vst [vmem:[#allocation74_spill] sm:$0xff] %v21206_v22  ;;  %24198 = vst [vmem:[#allocation75_spill] sm:$0xff] %v21208_v57  ;;  %v19388_v57 = vld [vmem:[%s20524_s8 + $0x288] sm:$0xff]  }
 0x233   : > { %v21212_v1 = vpop.f32.mrf.mxu0  ;;  %18520 = vmatmul.mubr.msk.bf16.gmra.mxu0 %vm7385_vm2, %v19384_v6  ;;  %v21215_v25 = vpop.f32.mrf.mxu1  ;;  %18730 = vmatmul.mubr.msk.bf16.gmra.mxu1 %vm7385_vm2, %v19385_v54  ;;  %v19389_v22 = vld [vmem:[%s20524_s8 + $0x5a8] sm:$0xff]   ;;  %v19394_v54 = vld [vmem:[%s20524_s8 + $0x2a0] sm:$0xff]  }
 0x234   : > { %24199 = vst [vmem:[#allocation76_spill] sm:$0xff] %v21212_v1  ;;  %24200 = vst [vmem:[#allocation77_spill] sm:$0xff] %v21215_v25  ;;  %18523 = vmatprep.mubr.msk.bf16.mxu0 %vm7385_vm2, %v19386_v43  ;;  %18733 = vmatprep.mubr.msk.bf16.mxu1 %vm7385_vm2, %v19387_v52  ;;  %v19390_v43 = vld [vmem:[%s20524_s8 + $0x290] sm:$0xff]  }
 0x235   : > { %v21222_v14 = vpop.f32.mrf.mxu0  ;;  %v21224_v9 = vpop.f32.mrf.mxu1  ;;  %v19391_v52 = vld [vmem:[%s20524_s8 + $0x5b0] sm:$0xff]  }
 0x236   : > { %24201 = vst [vmem:[#allocation78_spill] sm:$0xff] %v21222_v14  ;;  %24202 = vst [vmem:[#allocation79_spill] sm:$0xff] %v21224_v9 }
 0x237   : > { %v21230_v17 = vpop.f32.mrf.mxu0  ;;  %v21232_v38 = vpop.f32.mrf.mxu1 }
 0x238   : > { %24203 = vst [vmem:[#allocation80_spill] sm:$0xff] %v21230_v17  ;;  %24204 = vst [vmem:[#allocation81_spill] sm:$0xff] %v21232_v38 }
 0x239   : > { %v21238_v26 = vpop.f32.mrf.mxu0  ;;  %v21240_v25 = vpop.f32.mrf.mxu1 }
 0x23a   : > { %24205 = vst [vmem:[#allocation82_spill] sm:$0xff] %v21238_v26  ;;  %24206 = vst [vmem:[#allocation83_spill] sm:$0xff] %v21240_v25  ;;  %v19392_v25 = vld [vmem:[%s20524_s8 + $0x298] sm:$0xff]  }
 0x23b   : > { %v21244_v6 = vpop.f32.mrf.mxu0  ;;  %18524 = vmatmul.mubr.msk.bf16.gmra.mxu0 %vm7385_vm2, %v19388_v57  ;;  %v21247_v9 = vpop.f32.mrf.mxu1  ;;  %18734 = vmatmul.mubr.msk.bf16.gmra.mxu1 %vm7385_vm2, %v19389_v22  ;;  %v19393_v26 = vld [vmem:[%s20524_s8 + $0x5b8] sm:$0xff]   ;;  %v19525_v22 = vld [vmem:[%s20524_s8 + $0xae8] sm:$0xff]  }
 0x23c   : > { %24207 = vst [vmem:[#allocation84_spill] sm:$0xff] %v21244_v6  ;;  %24208 = vst [vmem:[#allocation85_spill] sm:$0xff] %v21247_v9  ;;  %18527 = vmatprep.mubr.msk.bf16.mxu0 %vm7385_vm2, %v19390_v43  ;;  %18737 = vmatprep.mubr.msk.bf16.mxu1 %vm7385_vm2, %v19391_v52  ;;  %v19395_v43 = vld [vmem:[%s20524_s8 + $0x5c0] sm:$0xff]  }
 0x23d   : > { %v21254_v38 = vpop.f32.mrf.mxu0  ;;  %v21256_v1 = vpop.f32.mrf.mxu1 }
 0x23e   : > { %24209 = vst [vmem:[#allocation86_spill] sm:$0xff] %v21254_v38  ;;  %24210 = vst [vmem:[#allocation87_spill] sm:$0xff] %v21256_v1  ;;  %v22344_v38 = vld [vmem:[%s23771_s2] ss:$0 sm:$0xff] }
 0x23f   : > { %v21262_v17 = vpop.f32.mrf.mxu0  ;;  %v21264_v14 = vpop.f32.mrf.mxu1 }
 0x240   : > { %24211 = vst [vmem:[#allocation88_spill] sm:$0xff] %v21262_v17  ;;  %24212 = vst [vmem:[#allocation89_spill] sm:$0xff] %v21264_v14  ;;  %v19396_v17 = vld [vmem:[%s20524_s8 + $0x2a8] sm:$0xff]  }
 0x241   : > { %v21270_v52 = vpop.f32.mrf.mxu0  ;;  %v21272_v9 = vpop.f32.mrf.mxu1 }
 0x242   : > { %24213 = vst [vmem:[#allocation90_spill] sm:$0xff] %v21270_v52  ;;  %24214 = vst [vmem:[#allocation91_spill] sm:$0xff] %v21272_v9 }
 0x243   : > { %v21276_v57 = vpop.f32.mrf.mxu0  ;;  %18528 = vmatmul.mubr.msk.bf16.gmra.mxu0 %vm7385_vm2, %v19392_v25  ;;  %v21279_v1 = vpop.f32.mrf.mxu1  ;;  %18738 = vmatmul.mubr.msk.bf16.gmra.mxu1 %vm7385_vm2, %v19393_v26  ;;  %v19397_v26 = vld [vmem:[%s20524_s8 + $0x5c8] sm:$0xff]  }
 0x244   : > { %24215 = vst [vmem:[#allocation92_spill] sm:$0xff] %v21276_v57  ;;  %24216 = vst [vmem:[#allocation93_spill] sm:$0xff] %v21279_v1  ;;  %18531 = vmatprep.mubr.msk.bf16.mxu0 %vm7385_vm2, %v19394_v54  ;;  %18741 = vmatprep.mubr.msk.bf16.mxu1 %vm7385_vm2, %v19395_v43  ;;  %v19398_v1 = vld [vmem:[%s20524_s8 + $0x2b0] sm:$0xff]  }
 0x245   : > { %v21286_v14 = vpop.f32.mrf.mxu0  ;;  %v21288_v6 = vpop.f32.mrf.mxu1  ;;  %v19399_v54 = vld [vmem:[%s20524_s8 + $0x5d0] sm:$0xff]  }
 0x246   : > { %24217 = vst [vmem:[#allocation94_spill] sm:$0xff] %v21286_v14  ;;  %24218 = vst [vmem:[#allocation95_spill] sm:$0xff] %v21288_v6 }
 0x247   : > { %v21292_v52 = vpop.f32.mrf.mxu0  ;;  %v21294_v25 = vpop.f32.mrf.mxu1 }
 0x248   : > { %24219 = vst [vmem:[#allocation96_spill] sm:$0xff] %v21292_v52  ;;  %24220 = vst [vmem:[#allocation97_spill] sm:$0xff] %v21294_v25  ;;  %v19400_v52 = vld [vmem:[%s20524_s8 + $0x2b8] sm:$0xff]  }
 0x249   : > { %v21302_v43 = vpop.f32.mrf.mxu0  ;;  %v21304_v57 = vpop.f32.mrf.mxu1 }
 0x24a   : > { %24221 = vst [vmem:[#allocation98_spill] sm:$0xff] %v21302_v43  ;;  %24222 = vst [vmem:[#allocation99_spill] sm:$0xff] %v21304_v57 }
 0x24b   : > { %v21308_v6 = vpop.f32.mrf.mxu0  ;;  %18532 = vmatmul.mubr.msk.bf16.gmra.mxu0 %vm7385_vm2, %v19396_v17  ;;  %v21311_v14 = vpop.f32.mrf.mxu1  ;;  %18742 = vmatmul.mubr.msk.bf16.gmra.mxu1 %vm7385_vm2, %v19397_v26  ;;  %v19401_v26 = vld [vmem:[%s20524_s8 + $0x5d8] sm:$0xff]  }
 0x24c   : > { %24223 = vst [vmem:[#allocation100_spill] sm:$0xff] %v21308_v6  ;;  %24224 = vst [vmem:[#allocation101_spill] sm:$0xff] %v21311_v14  ;;  %18535 = vmatprep.mubr.msk.bf16.mxu0 %vm7385_vm2, %v19398_v1  ;;  %18745 = vmatprep.mubr.msk.bf16.mxu1 %vm7385_vm2, %v19399_v54  ;;  %v19402_v14 = vld [vmem:[%s20524_s8 + $0x2c0] sm:$0xff]  }
 0x24d   : > { %v21318_v25 = vpop.f32.mrf.mxu0  ;;  %v21320_v9 = vpop.f32.mrf.mxu1  ;;  %v19403_v1 = vld [vmem:[%s20524_s8 + $0x5e0] sm:$0xff]  }
 0x24e   : > { %24225 = vst [vmem:[#allocation102_spill] sm:$0xff] %v21318_v25  ;;  %24226 = vst [vmem:[#allocation103_spill] sm:$0xff] %v21320_v9 }
 0x24f   : > { %v21324_v43 = vpop.f32.mrf.mxu0  ;;  %v21326_v17 = vpop.f32.mrf.mxu1 }
 0x250   : > { %24227 = vst [vmem:[#allocation104_spill] sm:$0xff] %v21324_v43  ;;  %24228 = vst [vmem:[#allocation105_spill] sm:$0xff] %v21326_v17  ;;  %v19404_v43 = vld [vmem:[%s20524_s8 + $0x2c8] sm:$0xff]  }
 0x251   : > { %v21334_v54 = vpop.f32.mrf.mxu0  ;;  %v21336_v6 = vpop.f32.mrf.mxu1 }
 0x252   : > { %24229 = vst [vmem:[#allocation106_spill] sm:$0xff] %v21334_v54  ;;  %24230 = vst [vmem:[#allocation107_spill] sm:$0xff] %v21336_v6 }
 0x253   : > { %v21340_v9 = vpop.f32.mrf.mxu0  ;;  %18536 = vmatmul.mubr.msk.bf16.gmra.mxu0 %vm7385_vm2, %v19400_v52  ;;  %v21343_v25 = vpop.f32.mrf.mxu1  ;;  %18746 = vmatmul.mubr.msk.bf16.gmra.mxu1 %vm7385_vm2, %v19401_v26  ;;  %v19405_v26 = vld [vmem:[%s20524_s8 + $0x5e8] sm:$0xff]  }
 0x254   : > { %24231 = vst [vmem:[#allocation108_spill] sm:$0xff] %v21340_v9  ;;  %24232 = vst [vmem:[#allocation109_spill] sm:$0xff] %v21343_v25  ;;  %18539 = vmatprep.mubr.msk.bf16.mxu0 %vm7385_vm2, %v19402_v14  ;;  %18749 = vmatprep.mubr.msk.bf16.mxu1 %vm7385_vm2, %v19403_v1  ;;  %v19406_v25 = vld [vmem:[%s20524_s8 + $0x2d0] sm:$0xff]  }
 0x255   : > { %v21350_v17 = vpop.f32.mrf.mxu0  ;;  %v21352_v57 = vpop.f32.mrf.mxu1  ;;  %v19407_v14 = vld [vmem:[%s20524_s8 + $0x5f0] sm:$0xff]  }
 0x256   : > { %24233 = vst [vmem:[#allocation110_spill] sm:$0xff] %v21350_v17  ;;  %24234 = vst [vmem:[#allocation111_spill] sm:$0xff] %v21352_v57 }
 0x257   : > { %v21356_v54 = vpop.f32.mrf.mxu0  ;;  %v21358_v52 = vpop.f32.mrf.mxu1 }
 0x258   : > { %24235 = vst [vmem:[#allocation112_spill] sm:$0xff] %v21356_v54  ;;  %24236 = vst [vmem:[#allocation113_spill] sm:$0xff] %v21358_v52  ;;  %v19408_v54 = vld [vmem:[%s20524_s8 + $0x2d8] sm:$0xff]  }
 0x259   : > { %v21366_v1 = vpop.f32.mrf.mxu0  ;;  %v21368_v9 = vpop.f32.mrf.mxu1 }
 0x25a   : > { %24237 = vst [vmem:[#allocation114_spill] sm:$0xff] %v21366_v1  ;;  %24238 = vst [vmem:[#allocation115_spill] sm:$0xff] %v21368_v9 }
 0x25b   : > { %v21372_v57 = vpop.f32.mrf.mxu0  ;;  %18540 = vmatmul.mubr.msk.bf16.gmra.mxu0 %vm7385_vm2, %v19404_v43  ;;  %v21375_v17 = vpop.f32.mrf.mxu1  ;;  %18750 = vmatmul.mubr.msk.bf16.gmra.mxu1 %vm7385_vm2, %v19405_v26  ;;  %v19409_v26 = vld [vmem:[%s20524_s8 + $0x5f8] sm:$0xff]  }
 0x25c   : > { %24239 = vst [vmem:[#allocation116_spill] sm:$0xff] %v21372_v57  ;;  %24240 = vst [vmem:[#allocation117_spill] sm:$0xff] %v21375_v17  ;;  %18543 = vmatprep.mubr.msk.bf16.mxu0 %vm7385_vm2, %v19406_v25  ;;  %18753 = vmatprep.mubr.msk.bf16.mxu1 %vm7385_vm2, %v19407_v14  ;;  %v19410_v17 = vld [vmem:[%s20524_s8 + $0x2e0] sm:$0xff]  }
 0x25d   : > { %v21382_v52 = vpop.f32.mrf.mxu0  ;;  %v21384_v6 = vpop.f32.mrf.mxu1  ;;  %v19411_v25 = vld [vmem:[%s20524_s8 + $0x600] sm:$0xff]  }
 0x25e   : > { %24241 = vst [vmem:[#allocation118_spill] sm:$0xff] %v21382_v52  ;;  %24242 = vst [vmem:[#allocation119_spill] sm:$0xff] %v21384_v6 }
 0x25f   : > { %v21388_v1 = vpop.f32.mrf.mxu0  ;;  %v21390_v43 = vpop.f32.mrf.mxu1 }
 0x260   : > { %24243 = vst [vmem:[#allocation120_spill] sm:$0xff] %v21388_v1  ;;  %24244 = vst [vmem:[#allocation121_spill] sm:$0xff] %v21390_v43  ;;  %v19412_v1 = vld [vmem:[%s20524_s8 + $0x2e8] sm:$0xff]  }
 0x261   : > { %v21398_v14 = vpop.f32.mrf.mxu0  ;;  %v21400_v57 = vpop.f32.mrf.mxu1 }
 0x262   : > { %24245 = vst [vmem:[#allocation122_spill] sm:$0xff] %v21398_v14  ;;  %24246 = vst [vmem:[#allocation123_spill] sm:$0xff] %v21400_v57 }
 0x263   : > { %v21404_v6 = vpop.f32.mrf.mxu0  ;;  %18544 = vmatmul.mubr.msk.bf16.gmra.mxu0 %vm7385_vm2, %v19408_v54  ;;  %v21407_v52 = vpop.f32.mrf.mxu1  ;;  %18754 = vmatmul.mubr.msk.bf16.gmra.mxu1 %vm7385_vm2, %v19409_v26  ;;  %v19413_v26 = vld [vmem:[%s20524_s8 + $0x608] sm:$0xff]  }
 0x264   : > { %24247 = vst [vmem:[#allocation124_spill] sm:$0xff] %v21404_v6  ;;  %24248 = vst [vmem:[#allocation125_spill] sm:$0xff] %v21407_v52  ;;  %18547 = vmatprep.mubr.msk.bf16.mxu0 %vm7385_vm2, %v19410_v17  ;;  %18757 = vmatprep.mubr.msk.bf16.mxu1 %vm7385_vm2, %v19411_v25  ;;  %v19414_v52 = vld [vmem:[%s20524_s8 + $0x2f0] sm:$0xff]  }
 0x265   : > { %v21414_v43 = vpop.f32.mrf.mxu0  ;;  %v21416_v9 = vpop.f32.mrf.mxu1  ;;  %v19415_v17 = vld [vmem:[%s20524_s8 + $0x610] sm:$0xff]  }
 0x266   : > { %24249 = vst [vmem:[#allocation126_spill] sm:$0xff] %v21414_v43  ;;  %24250 = vst [vmem:[#allocation127_spill] sm:$0xff] %v21416_v9 }
 0x267   : > { %v21420_v14 = vpop.f32.mrf.mxu0  ;;  %v21422_v54 = vpop.f32.mrf.mxu1 }
 0x268   : > { %24251 = vst [vmem:[#allocation128_spill] sm:$0xff] %v21420_v14  ;;  %24252 = vst [vmem:[#allocation129_spill] sm:$0xff] %v21422_v54  ;;  %v19416_v14 = vld [vmem:[%s20524_s8 + $0x2f8] sm:$0xff]  }
 0x269   : > { %v21430_v25 = vpop.f32.mrf.mxu0  ;;  %v21432_v6 = vpop.f32.mrf.mxu1 }
 0x26a   : > { %24253 = vst [vmem:[#allocation130_spill] sm:$0xff] %v21430_v25  ;;  %24254 = vst [vmem:[#allocation131_spill] sm:$0xff] %v21432_v6 }
 0x26b   : > { %v21436_v9 = vpop.f32.mrf.mxu0  ;;  %18548 = vmatmul.mubr.msk.bf16.gmra.mxu0 %vm7385_vm2, %v19412_v1  ;;  %v21439_v43 = vpop.f32.mrf.mxu1  ;;  %18758 = vmatmul.mubr.msk.bf16.gmra.mxu1 %vm7385_vm2, %v19413_v26  ;;  %v19417_v26 = vld [vmem:[%s20524_s8 + $0x618] sm:$0xff]  }
 0x26c   : > { %24255 = vst [vmem:[#allocation132_spill] sm:$0xff] %v21436_v9  ;;  %24256 = vst [vmem:[#allocation133_spill] sm:$0xff] %v21439_v43  ;;  %18551 = vmatprep.mubr.msk.bf16.mxu0 %vm7385_vm2, %v19414_v52  ;;  %18761 = vmatprep.mubr.msk.bf16.mxu1 %vm7385_vm2, %v19415_v17  ;;  %v19418_v43 = vld [vmem:[%s20524_s8 + $0x300] sm:$0xff]  }
 0x26d   : > { %v21446_v54 = vpop.f32.mrf.mxu0  ;;  %v21448_v57 = vpop.f32.mrf.mxu1  ;;  %v19419_v52 = vld [vmem:[%s20524_s8 + $0x620] sm:$0xff]  }
 0x26e   : > { %24257 = vst [vmem:[#allocation134_spill] sm:$0xff] %v21446_v54  ;;  %24258 = vst [vmem:[#allocation135_spill] sm:$0xff] %v21448_v57 }
 0x26f   : > { %v21452_v25 = vpop.f32.mrf.mxu0  ;;  %v21454_v1 = vpop.f32.mrf.mxu1 }
 0x270   : > { %24259 = vst [vmem:[#allocation136_spill] sm:$0xff] %v21452_v25  ;;  %24260 = vst [vmem:[#allocation137_spill] sm:$0xff] %v21454_v1  ;;  %v19420_v25 = vld [vmem:[%s20524_s8 + $0x308] sm:$0xff]  }
 0x271   : > { %v21462_v17 = vpop.f32.mrf.mxu0  ;;  %v21464_v9 = vpop.f32.mrf.mxu1 }
 0x272   : > { %24261 = vst [vmem:[#allocation138_spill] sm:$0xff] %v21462_v17  ;;  %24262 = vst [vmem:[#allocation139_spill] sm:$0xff] %v21464_v9 }
 0x273   : > { %v21468_v57 = vpop.f32.mrf.mxu0  ;;  %18552 = vmatmul.mubr.msk.bf16.gmra.mxu0 %vm7385_vm2, %v19416_v14  ;;  %v21471_v54 = vpop.f32.mrf.mxu1  ;;  %18762 = vmatmul.mubr.msk.bf16.gmra.mxu1 %vm7385_vm2, %v19417_v26  ;;  %v19421_v26 = vld [vmem:[%s20524_s8 + $0x628] sm:$0xff]  }
 0x274   : > { %24263 = vst [vmem:[#allocation140_spill] sm:$0xff] %v21468_v57  ;;  %24264 = vst [vmem:[#allocation141_spill] sm:$0xff] %v21471_v54  ;;  %18555 = vmatprep.mubr.msk.bf16.mxu0 %vm7385_vm2, %v19418_v43  ;;  %18765 = vmatprep.mubr.msk.bf16.mxu1 %vm7385_vm2, %v19419_v52  ;;  %v19422_v54 = vld [vmem:[%s20524_s8 + $0x310] sm:$0xff]  }
 0x275   : > { %v21478_v1 = vpop.f32.mrf.mxu0  ;;  %v21480_v6 = vpop.f32.mrf.mxu1  ;;  %v19423_v43 = vld [vmem:[%s20524_s8 + $0x630] sm:$0xff]  }
 0x276   : > { %24265 = vst [vmem:[#allocation142_spill] sm:$0xff] %v21478_v1  ;;  %24266 = vst [vmem:[#allocation143_spill] sm:$0xff] %v21480_v6 }
 0x277   : > { %v21484_v17 = vpop.f32.mrf.mxu0  ;;  %v21486_v14 = vpop.f32.mrf.mxu1 }
 0x278   : > { %24267 = vst [vmem:[#allocation144_spill] sm:$0xff] %v21484_v17  ;;  %24268 = vst [vmem:[#allocation145_spill] sm:$0xff] %v21486_v14  ;;  %v19424_v17 = vld [vmem:[%s20524_s8 + $0x318] sm:$0xff]  }
 0x279   : > { %v21494_v52 = vpop.f32.mrf.mxu0  ;;  %v21496_v57 = vpop.f32.mrf.mxu1 }
 0x27a   : > { %24269 = vst [vmem:[#allocation146_spill] sm:$0xff] %v21494_v52  ;;  %24270 = vst [vmem:[#allocation147_spill] sm:$0xff] %v21496_v57 }
 0x27b   : > { %v21500_v6 = vpop.f32.mrf.mxu0  ;;  %18556 = vmatmul.mubr.msk.bf16.gmra.mxu0 %vm7385_vm2, %v19420_v25  ;;  %v21503_v1 = vpop.f32.mrf.mxu1  ;;  %18766 = vmatmul.mubr.msk.bf16.gmra.mxu1 %vm7385_vm2, %v19421_v26  ;;  %v19425_v26 = vld [vmem:[%s20524_s8 + $0x638] sm:$0xff]  }
 0x27c   : > { %24271 = vst [vmem:[#allocation148_spill] sm:$0xff] %v21500_v6  ;;  %24272 = vst [vmem:[#allocation149_spill] sm:$0xff] %v21503_v1  ;;  %18559 = vmatprep.mubr.msk.bf16.mxu0 %vm7385_vm2, %v19422_v54  ;;  %18769 = vmatprep.mubr.msk.bf16.mxu1 %vm7385_vm2, %v19423_v43  ;;  %v19426_v1 = vld [vmem:[%s20524_s8 + $0x640] sm:$0xff]  }
 0x27d   : > { %v21510_v14 = vpop.f32.mrf.mxu0  ;;  %v21512_v9 = vpop.f32.mrf.mxu1  ;;  %v19427_v54 = vld [vmem:[%s20524_s8 + $0x960] sm:$0xff]  }
 0x27e   : > { %24273 = vst [vmem:[#allocation150_spill] sm:$0xff] %v21510_v14  ;;  %24274 = vst [vmem:[#allocation151_spill] sm:$0xff] %v21512_v9 }
 0x27f   : > { %v21516_v52 = vpop.f32.mrf.mxu0  ;;  %v21518_v25 = vpop.f32.mrf.mxu1 }
 0x280   : > { %24275 = vst [vmem:[#allocation152_spill] sm:$0xff] %v21516_v52  ;;  %24276 = vst [vmem:[#allocation153_spill] sm:$0xff] %v21518_v25  ;;  %v19428_v52 = vld [vmem:[%s20524_s8 + $0x648] sm:$0xff]  }
 0x281   : > { %v21526_v43 = vpop.f32.mrf.mxu0  ;;  %v21528_v6 = vpop.f32.mrf.mxu1 }
 0x282   : > { %24277 = vst [vmem:[#allocation154_spill] sm:$0xff] %v21526_v43  ;;  %24278 = vst [vmem:[#allocation155_spill] sm:$0xff] %v21528_v6 }
 0x283   : > { %v21532_v9 = vpop.f32.mrf.mxu0  ;;  %18560 = vmatmul.mubr.msk.bf16.gmra.mxu0 %vm7385_vm2, %v19424_v17  ;;  %v21535_v14 = vpop.f32.mrf.mxu1  ;;  %18770 = vmatmul.mubr.msk.bf16.gmra.mxu1 %vm7385_vm2, %v19425_v26  ;;  %v19429_v26 = vld [vmem:[%s20524_s8 + $0x968] sm:$0xff]  }
 0x284   : > { %24279 = vst [vmem:[#allocation156_spill] sm:$0xff] %v21532_v9  ;;  %24280 = vst [vmem:[#allocation157_spill] sm:$0xff] %v21535_v14  ;;  %18783 = vmatprep.mubr.msk.bf16.mxu0 %vm7385_vm2, %v19426_v1  ;;  %18993 = vmatprep.mubr.msk.bf16.mxu1 %vm7385_vm2, %v19427_v54  ;;  %v19430_v14 = vld [vmem:[%s20524_s8 + $0x650] sm:$0xff]  }
 0x285   : > { %v21542_v25 = vpop.f32.mrf.mxu0  ;;  %v21544_v57 = vpop.f32.mrf.mxu1  ;;  %v19431_v1 = vld [vmem:[%s20524_s8 + $0x970] sm:$0xff]  }
 0x286   : > { %24281 = vst [vmem:[#allocation158_spill] sm:$0xff] %v21542_v25  ;;  %24282 = vst [vmem:[#allocation159_spill] sm:$0xff] %v21544_v57 }
 0x287   : > { %v21548_v43 = vpop.f32.mrf.mxu0  ;;  %v21550_v17 = vpop.f32.mrf.mxu1 }
 0x288   : > { %24283 = vst [vmem:[#allocation160_spill] sm:$0xff] %v21548_v43  ;;  %24284 = vst [vmem:[#allocation161_spill] sm:$0xff] %v21550_v17 }
 0x289   : > { %v21558_v54 = vpop.f32.mrf.mxu0  ;;  %v21560_v9 = vpop.f32.mrf.mxu1 }
 0x28a   : > { %24285 = vst [vmem:[#allocation162_spill] sm:$0xff] %v21558_v54  ;;  %24286 = vst [vmem:[#allocation163_spill] sm:$0xff] %v21560_v9 }
 0x28b   : > { %v21564_v57 = vpop.f32.mrf.mxu0  ;;  %v21566_v25 = vpop.f32.mrf.mxu1  ;;  %18784 = vmatmul.mubr.msk.bf16.vlgmr.msra.gmra.mxu0 %vm7385_vm2, %v19428_v52  ;;  %18994 = vmatmul.mubr.msk.bf16.vlgmr.msra.gmra.mxu1 %vm7385_vm2, %v19429_v26  ;;  %v19432_v52 = vld [vmem:[%s20524_s8 + $0x658] sm:$0xff]  }
 0x28c   : > { %24287 = vst [vmem:[#allocation164_spill] sm:$0xff] %v21564_v57  ;;  %24288 = vst [vmem:[#allocation165_spill] sm:$0xff] %v21566_v25  ;;  %18787 = vmatprep.mubr.msk.bf16.mxu0 %vm7385_vm2, %v19430_v14  ;;  %18997 = vmatprep.mubr.msk.bf16.mxu1 %vm7385_vm2, %v19431_v1  ;;  %v19433_v26 = vld [vmem:[%s20524_s8 + $0x978] sm:$0xff]   ;;  %v19434_v25 = vld [vmem:[%s20524_s8 + $0x660] sm:$0xff]  }
 0x28d   : > { %v21574_v17 = vpop.f32.mrf.mxu0  ;;  %v21576_v6 = vpop.f32.mrf.mxu1  ;;  %v19435_v14 = vld [vmem:[%s20524_s8 + $0x980] sm:$0xff]  }
 0x28e   : > { %24289 = vst [vmem:[#allocation166_spill] sm:$0xff] %v21574_v17  ;;  %24290 = vst [vmem:[#allocation167_spill] sm:$0xff] %v21576_v6 }
 0x28f   : > { %v21580_v54 = vpop.f32.mrf.mxu0  ;;  %v21582_v43 = vpop.f32.mrf.mxu1 }
 0x290   : > { %24291 = vst [vmem:[#allocation168_spill] sm:$0xff] %v21580_v54  ;;  %24292 = vst [vmem:[#allocation169_spill] sm:$0xff] %v21582_v43 }
 0x291   : > { %v21590_v1 = vpop.f32.mrf.mxu0  ;;  %v21592_v57 = vpop.f32.mrf.mxu1 }
 0x292   : > { %24293 = vst [vmem:[#allocation170_spill] sm:$0xff] %v21590_v1  ;;  %24294 = vst [vmem:[#allocation171_spill] sm:$0xff] %v21592_v57 }
 0x293   : > { %v21596_v6 = vpop.f32.mrf.mxu0  ;;  %v21598_v17 = vpop.f32.mrf.mxu1  ;;  %18788 = vmatmul.mubr.msk.bf16.gmra.mxu0 %vm7385_vm2, %v19432_v52  ;;  %18998 = vmatmul.mubr.msk.bf16.gmra.mxu1 %vm7385_vm2, %v19433_v26  ;;  %v19436_v52 = vld [vmem:[%s20524_s8 + $0x668] sm:$0xff]  }
 0x294   : > { %24295 = vst [vmem:[#allocation172_spill] sm:$0xff] %v21596_v6  ;;  %24296 = vst [vmem:[#allocation173_spill] sm:$0xff] %v21598_v17  ;;  %18791 = vmatprep.mubr.msk.bf16.mxu0 %vm7385_vm2, %v19434_v25  ;;  %19001 = vmatprep.mubr.msk.bf16.mxu1 %vm7385_vm2, %v19435_v14  ;;  %v19437_v26 = vld [vmem:[%s20524_s8 + $0x988] sm:$0xff]   ;;  %v19438_v17 = vld [vmem:[%s20524_s8 + $0x670] sm:$0xff]  }
 0x295   : > { %v21606_v43 = vpop.f32.mrf.mxu0  ;;  %v21608_v9 = vpop.f32.mrf.mxu1  ;;  %v19439_v25 = vld [vmem:[%s20524_s8 + $0x990] sm:$0xff]  }
 0x296   : > { %24297 = vst [vmem:[#allocation174_spill] sm:$0xff] %v21606_v43  ;;  %24298 = vst [vmem:[#allocation175_spill] sm:$0xff] %v21608_v9 }
 0x297   : > { %v21612_v1 = vpop.f32.mrf.mxu0  ;;  %v21614_v54 = vpop.f32.mrf.mxu1 }
 0x298   : > { %24299 = vst [vmem:[#allocation176_spill] sm:$0xff] %v21612_v1  ;;  %24300 = vst [vmem:[#allocation177_spill] sm:$0xff] %v21614_v54 }
 0x299   : > { %v21622_v14 = vpop.f32.mrf.mxu0  ;;  %v21624_v6 = vpop.f32.mrf.mxu1 }
 0x29a   : > { %24301 = vst [vmem:[#allocation178_spill] sm:$0xff] %v21622_v14  ;;  %24302 = vst [vmem:[#allocation179_spill] sm:$0xff] %v21624_v6 }
 0x29b   : > { %v21628_v9 = vpop.f32.mrf.mxu0  ;;  %v21630_v43 = vpop.f32.mrf.mxu1  ;;  %18792 = vmatmul.mubr.msk.bf16.gmra.mxu0 %vm7385_vm2, %v19436_v52  ;;  %19002 = vmatmul.mubr.msk.bf16.gmra.mxu1 %vm7385_vm2, %v19437_v26  ;;  %v19440_v52 = vld [vmem:[%s20524_s8 + $0x678] sm:$0xff]  }
 0x29c   : > { %24303 = vst [vmem:[#allocation180_spill] sm:$0xff] %v21628_v9  ;;  %24304 = vst [vmem:[#allocation181_spill] sm:$0xff] %v21630_v43  ;;  %18795 = vmatprep.mubr.msk.bf16.mxu0 %vm7385_vm2, %v19438_v17  ;;  %19005 = vmatprep.mubr.msk.bf16.mxu1 %vm7385_vm2, %v19439_v25  ;;  %v19441_v26 = vld [vmem:[%s20524_s8 + $0x998] sm:$0xff]   ;;  %v19442_v43 = vld [vmem:[%s20524_s8 + $0x680] sm:$0xff]  }
 0x29d   : > { %v21638_v54 = vpop.f32.mrf.mxu0  ;;  %v21640_v57 = vpop.f32.mrf.mxu1  ;;  %v19443_v17 = vld [vmem:[%s20524_s8 + $0x9a0] sm:$0xff]  }
 0x29e   : > { %24305 = vst [vmem:[#allocation182_spill] sm:$0xff] %v21638_v54  ;;  %24306 = vst [vmem:[#allocation183_spill] sm:$0xff] %v21640_v57 }
 0x29f   : > { %v21644_v14 = vpop.f32.mrf.mxu0  ;;  %v21646_v1 = vpop.f32.mrf.mxu1 }
 0x2a0   : > { %24307 = vst [vmem:[#allocation184_spill] sm:$0xff] %v21644_v14  ;;  %24308 = vst [vmem:[#allocation185_spill] sm:$0xff] %v21646_v1 }
 0x2a1   : > { %v21654_v25 = vpop.f32.mrf.mxu0  ;;  %v21656_v9 = vpop.f32.mrf.mxu1 }
 0x2a2   : > { %24309 = vst [vmem:[#allocation186_spill] sm:$0xff] %v21654_v25  ;;  %24310 = vst [vmem:[#allocation187_spill] sm:$0xff] %v21656_v9 }
 0x2a3   : > { %v21660_v57 = vpop.f32.mrf.mxu0  ;;  %v21662_v54 = vpop.f32.mrf.mxu1  ;;  %18796 = vmatmul.mubr.msk.bf16.gmra.mxu0 %vm7385_vm2, %v19440_v52  ;;  %19006 = vmatmul.mubr.msk.bf16.gmra.mxu1 %vm7385_vm2, %v19441_v26  ;;  %v19444_v52 = vld [vmem:[%s20524_s8 + $0x688] sm:$0xff]  }
 0x2a4   : > { %24311 = vst [vmem:[#allocation188_spill] sm:$0xff] %v21660_v57  ;;  %24312 = vst [vmem:[#allocation189_spill] sm:$0xff] %v21662_v54  ;;  %18799 = vmatprep.mubr.msk.bf16.mxu0 %vm7385_vm2, %v19442_v43  ;;  %19009 = vmatprep.mubr.msk.bf16.mxu1 %vm7385_vm2, %v19443_v17  ;;  %v19445_v26 = vld [vmem:[%s20524_s8 + $0x9a8] sm:$0xff]   ;;  %v19446_v54 = vld [vmem:[%s20524_s8 + $0x690] sm:$0xff]  }
 0x2a5   : > { %v21670_v1 = vpop.f32.mrf.mxu0  ;;  %v21672_v6 = vpop.f32.mrf.mxu1  ;;  %v19447_v43 = vld [vmem:[%s20524_s8 + $0x9b0] sm:$0xff]  }
 0x2a6   : > { %24313 = vst [vmem:[#allocation190_spill] sm:$0xff] %v21670_v1  ;;  %24314 = vst [vmem:[#allocation191_spill] sm:$0xff] %v21672_v6 }
 0x2a7   : > { %v21676_v25 = vpop.f32.mrf.mxu0  ;;  %v21678_v14 = vpop.f32.mrf.mxu1 }
 0x2a8   : > { %24315 = vst [vmem:[#allocation192_spill] sm:$0xff] %v21676_v25  ;;  %24316 = vst [vmem:[#allocation193_spill] sm:$0xff] %v21678_v14 }
 0x2a9   : > { %v21686_v17 = vpop.f32.mrf.mxu0  ;;  %v21688_v57 = vpop.f32.mrf.mxu1 }
 0x2aa   : > { %24317 = vst [vmem:[#allocation194_spill] sm:$0xff] %v21686_v17  ;;  %24318 = vst [vmem:[#allocation195_spill] sm:$0xff] %v21688_v57 }
 0x2ab   : > { %v21692_v6 = vpop.f32.mrf.mxu0  ;;  %v21694_v1 = vpop.f32.mrf.mxu1  ;;  %18800 = vmatmul.mubr.msk.bf16.gmra.mxu0 %vm7385_vm2, %v19444_v52  ;;  %19010 = vmatmul.mubr.msk.bf16.gmra.mxu1 %vm7385_vm2, %v19445_v26  ;;  %v19448_v52 = vld [vmem:[%s20524_s8 + $0x698] sm:$0xff]  }
 0x2ac   : > { %24319 = vst [vmem:[#allocation196_spill] sm:$0xff] %v21692_v6  ;;  %24320 = vst [vmem:[#allocation197_spill] sm:$0xff] %v21694_v1  ;;  %18803 = vmatprep.mubr.msk.bf16.mxu0 %vm7385_vm2, %v19446_v54  ;;  %19013 = vmatprep.mubr.msk.bf16.mxu1 %vm7385_vm2, %v19447_v43  ;;  %v19449_v26 = vld [vmem:[%s20524_s8 + $0x9b8] sm:$0xff]   ;;  %v19450_v1 = vld [vmem:[%s20524_s8 + $0x6a0] sm:$0xff]  }
 0x2ad   : > { %v21702_v14 = vpop.f32.mrf.mxu0  ;;  %v21704_v9 = vpop.f32.mrf.mxu1  ;;  %v19451_v54 = vld [vmem:[%s20524_s8 + $0x9c0] sm:$0xff]  }
 0x2ae   : > { %24321 = vst [vmem:[#allocation198_spill] sm:$0xff] %v21702_v14  ;;  %24322 = vst [vmem:[#allocation199_spill] sm:$0xff] %v21704_v9 }
 0x2af   : > { %v21708_v17 = vpop.f32.mrf.mxu0  ;;  %v21710_v25 = vpop.f32.mrf.mxu1 }
 0x2b0   : > { %24323 = vst [vmem:[#allocation200_spill] sm:$0xff] %v21708_v17  ;;  %24324 = vst [vmem:[#allocation201_spill] sm:$0xff] %v21710_v25 }
 0x2b1   : > { %v21718_v43 = vpop.f32.mrf.mxu0  ;;  %v21720_v6 = vpop.f32.mrf.mxu1 }
 0x2b2   : > { %24325 = vst [vmem:[#allocation202_spill] sm:$0xff] %v21718_v43  ;;  %24326 = vst [vmem:[#allocation203_spill] sm:$0xff] %v21720_v6 }
 0x2b3   : > { %v21724_v9 = vpop.f32.mrf.mxu0  ;;  %v21726_v14 = vpop.f32.mrf.mxu1  ;;  %18804 = vmatmul.mubr.msk.bf16.gmra.mxu0 %vm7385_vm2, %v19448_v52  ;;  %19014 = vmatmul.mubr.msk.bf16.gmra.mxu1 %vm7385_vm2, %v19449_v26  ;;  %v19452_v52 = vld [vmem:[%s20524_s8 + $0x6a8] sm:$0xff]  }
 0x2b4   : > { %24327 = vst [vmem:[#allocation204_spill] sm:$0xff] %v21724_v9  ;;  %24328 = vst [vmem:[#allocation205_spill] sm:$0xff] %v21726_v14  ;;  %18807 = vmatprep.mubr.msk.bf16.mxu0 %vm7385_vm2, %v19450_v1  ;;  %19017 = vmatprep.mubr.msk.bf16.mxu1 %vm7385_vm2, %v19451_v54  ;;  %v19453_v26 = vld [vmem:[%s20524_s8 + $0x9c8] sm:$0xff]   ;;  %v19454_v14 = vld [vmem:[%s20524_s8 + $0x6b0] sm:$0xff]  }
 0x2b5   : > { %v21734_v25 = vpop.f32.mrf.mxu0  ;;  %v21736_v57 = vpop.f32.mrf.mxu1  ;;  %v19455_v1 = vld [vmem:[%s20524_s8 + $0x9d0] sm:$0xff]  }
 0x2b6   : > { %24329 = vst [vmem:[#allocation206_spill] sm:$0xff] %v21734_v25  ;;  %24330 = vst [vmem:[#allocation207_spill] sm:$0xff] %v21736_v57 }
 0x2b7   : > { %v21740_v43 = vpop.f32.mrf.mxu0  ;;  %v21742_v17 = vpop.f32.mrf.mxu1 }
 0x2b8   : > { %24331 = vst [vmem:[#allocation208_spill] sm:$0xff] %v21740_v43  ;;  %24332 = vst [vmem:[#allocation209_spill] sm:$0xff] %v21742_v17 }
 0x2b9   : > { %v21750_v54 = vpop.f32.mrf.mxu0  ;;  %v21752_v9 = vpop.f32.mrf.mxu1 }
 0x2ba   : > { %24333 = vst [vmem:[#allocation210_spill] sm:$0xff] %v21750_v54  ;;  %24334 = vst [vmem:[#allocation211_spill] sm:$0xff] %v21752_v9 }
 0x2bb   : > { %v21756_v57 = vpop.f32.mrf.mxu0  ;;  %v21758_v25 = vpop.f32.mrf.mxu1  ;;  %18808 = vmatmul.mubr.msk.bf16.gmra.mxu0 %vm7385_vm2, %v19452_v52  ;;  %19018 = vmatmul.mubr.msk.bf16.gmra.mxu1 %vm7385_vm2, %v19453_v26  ;;  %v19456_v52 = vld [vmem:[%s20524_s8 + $0x6b8] sm:$0xff]  }
 0x2bc   : > { %24335 = vst [vmem:[#allocation212_spill] sm:$0xff] %v21756_v57  ;;  %24336 = vst [vmem:[#allocation213_spill] sm:$0xff] %v21758_v25  ;;  %18811 = vmatprep.mubr.msk.bf16.mxu0 %vm7385_vm2, %v19454_v14  ;;  %19021 = vmatprep.mubr.msk.bf16.mxu1 %vm7385_vm2, %v19455_v1  ;;  %v19457_v26 = vld [vmem:[%s20524_s8 + $0x9d8] sm:$0xff]   ;;  %v19458_v25 = vld [vmem:[%s20524_s8 + $0x6c0] sm:$0xff]  }
 0x2bd   : > { %v21766_v17 = vpop.f32.mrf.mxu0  ;;  %v21768_v6 = vpop.f32.mrf.mxu1  ;;  %v19459_v14 = vld [vmem:[%s20524_s8 + $0x9e0] sm:$0xff]  }
 0x2be   : > { %24337 = vst [vmem:[#allocation214_spill] sm:$0xff] %v21766_v17  ;;  %24338 = vst [vmem:[#allocation215_spill] sm:$0xff] %v21768_v6 }
 0x2bf   : > { %v21772_v54 = vpop.f32.mrf.mxu0  ;;  %v21774_v43 = vpop.f32.mrf.mxu1 }
 0x2c0   : > { %24339 = vst [vmem:[#allocation216_spill] sm:$0xff] %v21772_v54  ;;  %24340 = vst [vmem:[#allocation217_spill] sm:$0xff] %v21774_v43 }
 0x2c1   : > { %v21782_v1 = vpop.f32.mrf.mxu0  ;;  %v21784_v57 = vpop.f32.mrf.mxu1 }
 0x2c2   : > { %24341 = vst [vmem:[#allocation218_spill] sm:$0xff] %v21782_v1  ;;  %24342 = vst [vmem:[#allocation219_spill] sm:$0xff] %v21784_v57 }
 0x2c3   : > { %v21788_v6 = vpop.f32.mrf.mxu0  ;;  %v21790_v17 = vpop.f32.mrf.mxu1  ;;  %18812 = vmatmul.mubr.msk.bf16.gmra.mxu0 %vm7385_vm2, %v19456_v52  ;;  %19022 = vmatmul.mubr.msk.bf16.gmra.mxu1 %vm7385_vm2, %v19457_v26  ;;  %v19460_v52 = vld [vmem:[%s20524_s8 + $0x6c8] sm:$0xff]  }
 0x2c4   : > { %24343 = vst [vmem:[#allocation220_spill] sm:$0xff] %v21788_v6  ;;  %24344 = vst [vmem:[#allocation221_spill] sm:$0xff] %v21790_v17  ;;  %18815 = vmatprep.mubr.msk.bf16.mxu0 %vm7385_vm2, %v19458_v25  ;;  %19025 = vmatprep.mubr.msk.bf16.mxu1 %vm7385_vm2, %v19459_v14  ;;  %v19461_v26 = vld [vmem:[%s20524_s8 + $0x9e8] sm:$0xff]   ;;  %v19462_v17 = vld [vmem:[%s20524_s8 + $0x6d0] sm:$0xff]  }
 0x2c5   : > { %v21798_v43 = vpop.f32.mrf.mxu0  ;;  %v21800_v9 = vpop.f32.mrf.mxu1  ;;  %v19463_v25 = vld [vmem:[%s20524_s8 + $0x9f0] sm:$0xff]  }
 0x2c6   : > { %24345 = vst [vmem:[#allocation222_spill] sm:$0xff] %v21798_v43  ;;  %24346 = vst [vmem:[#allocation223_spill] sm:$0xff] %v21800_v9 }
 0x2c7   : > { %v21804_v1 = vpop.f32.mrf.mxu0  ;;  %v21806_v54 = vpop.f32.mrf.mxu1 }
 0x2c8   : > { %24347 = vst [vmem:[#allocation224_spill] sm:$0xff] %v21804_v1  ;;  %24348 = vst [vmem:[#allocation225_spill] sm:$0xff] %v21806_v54 }
 0x2c9   : > { %v21814_v14 = vpop.f32.mrf.mxu0  ;;  %v21816_v6 = vpop.f32.mrf.mxu1 }
 0x2ca   : > { %24349 = vst [vmem:[#allocation226_spill] sm:$0xff] %v21814_v14  ;;  %24350 = vst [vmem:[#allocation227_spill] sm:$0xff] %v21816_v6 }
 0x2cb   : > { %v21820_v9 = vpop.f32.mrf.mxu0  ;;  %v21822_v43 = vpop.f32.mrf.mxu1  ;;  %18816 = vmatmul.mubr.msk.bf16.gmra.mxu0 %vm7385_vm2, %v19460_v52  ;;  %19026 = vmatmul.mubr.msk.bf16.gmra.mxu1 %vm7385_vm2, %v19461_v26  ;;  %v19464_v52 = vld [vmem:[%s20524_s8 + $0x6d8] sm:$0xff]  }
 0x2cc   : > { %24351 = vst [vmem:[#allocation228_spill] sm:$0xff] %v21820_v9  ;;  %24352 = vst [vmem:[#allocation229_spill] sm:$0xff] %v21822_v43  ;;  %18819 = vmatprep.mubr.msk.bf16.mxu0 %vm7385_vm2, %v19462_v17  ;;  %19029 = vmatprep.mubr.msk.bf16.mxu1 %vm7385_vm2, %v19463_v25  ;;  %v19465_v26 = vld [vmem:[%s20524_s8 + $0x9f8] sm:$0xff]   ;;  %v19466_v43 = vld [vmem:[%s20524_s8 + $0x6e0] sm:$0xff]  }
 0x2cd   : > { %v21830_v54 = vpop.f32.mrf.mxu0  ;;  %v21832_v57 = vpop.f32.mrf.mxu1  ;;  %v19467_v17 = vld [vmem:[%s20524_s8 + $0xa00] sm:$0xff]  }
 0x2ce   : > { %24353 = vst [vmem:[#allocation230_spill] sm:$0xff] %v21830_v54  ;;  %24354 = vst [vmem:[#allocation231_spill] sm:$0xff] %v21832_v57 }
 0x2cf   : > { %v21836_v14 = vpop.f32.mrf.mxu0  ;;  %v21838_v1 = vpop.f32.mrf.mxu1 }
 0x2d0   : > { %24355 = vst [vmem:[#allocation232_spill] sm:$0xff] %v21836_v14  ;;  %24356 = vst [vmem:[#allocation233_spill] sm:$0xff] %v21838_v1 }
 0x2d1   : > { %v21846_v25 = vpop.f32.mrf.mxu0  ;;  %v21848_v9 = vpop.f32.mrf.mxu1 }
 0x2d2   : > { %24357 = vst [vmem:[#allocation234_spill] sm:$0xff] %v21846_v25  ;;  %24358 = vst [vmem:[#allocation235_spill] sm:$0xff] %v21848_v9 }
 0x2d3   : > { %v21852_v57 = vpop.f32.mrf.mxu0  ;;  %v21854_v54 = vpop.f32.mrf.mxu1  ;;  %18820 = vmatmul.mubr.msk.bf16.gmra.mxu0 %vm7385_vm2, %v19464_v52  ;;  %19030 = vmatmul.mubr.msk.bf16.gmra.mxu1 %vm7385_vm2, %v19465_v26  ;;  %v19468_v52 = vld [vmem:[%s20524_s8 + $0x6e8] sm:$0xff]  }
 0x2d4   : > { %24359 = vst [vmem:[#allocation236_spill] sm:$0xff] %v21852_v57  ;;  %24360 = vst [vmem:[#allocation237_spill] sm:$0xff] %v21854_v54  ;;  %18823 = vmatprep.mubr.msk.bf16.mxu0 %vm7385_vm2, %v19466_v43  ;;  %19033 = vmatprep.mubr.msk.bf16.mxu1 %vm7385_vm2, %v19467_v17  ;;  %v19469_v26 = vld [vmem:[%s20524_s8 + $0xa08] sm:$0xff]   ;;  %v19470_v54 = vld [vmem:[%s20524_s8 + $0x6f0] sm:$0xff]  }
 0x2d5   : > { %v21862_v1 = vpop.f32.mrf.mxu0  ;;  %v21864_v6 = vpop.f32.mrf.mxu1  ;;  %v19471_v43 = vld [vmem:[%s20524_s8 + $0xa10] sm:$0xff]  }
 0x2d6   : > { %24361 = vst [vmem:[#allocation238_spill] sm:$0xff] %v21862_v1  ;;  %24362 = vst [vmem:[#allocation239_spill] sm:$0xff] %v21864_v6 }
 0x2d7   : > { %v21868_v25 = vpop.f32.mrf.mxu0  ;;  %v21870_v14 = vpop.f32.mrf.mxu1 }
 0x2d8   : > { %24363 = vst [vmem:[#allocation240_spill] sm:$0xff] %v21868_v25  ;;  %24364 = vst [vmem:[#allocation241_spill] sm:$0xff] %v21870_v14 }
 0x2d9   : > { %v21878_v17 = vpop.f32.mrf.mxu0  ;;  %v21880_v57 = vpop.f32.mrf.mxu1 }
 0x2da   : > { %24365 = vst [vmem:[#allocation242_spill] sm:$0xff] %v21878_v17  ;;  %24366 = vst [vmem:[#allocation243_spill] sm:$0xff] %v21880_v57 }
 0x2db   : > { %v21884_v6 = vpop.f32.mrf.mxu0  ;;  %v21886_v1 = vpop.f32.mrf.mxu1  ;;  %18824 = vmatmul.mubr.msk.bf16.gmra.mxu0 %vm7385_vm2, %v19468_v52  ;;  %19034 = vmatmul.mubr.msk.bf16.gmra.mxu1 %vm7385_vm2, %v19469_v26  ;;  %v19472_v52 = vld [vmem:[%s20524_s8 + $0x6f8] sm:$0xff]  }
 0x2dc   : > { %24367 = vst [vmem:[#allocation244_spill] sm:$0xff] %v21884_v6  ;;  %24368 = vst [vmem:[#allocation245_spill] sm:$0xff] %v21886_v1  ;;  %18827 = vmatprep.mubr.msk.bf16.mxu0 %vm7385_vm2, %v19470_v54  ;;  %19037 = vmatprep.mubr.msk.bf16.mxu1 %vm7385_vm2, %v19471_v43  ;;  %v19473_v26 = vld [vmem:[%s20524_s8 + $0xa18] sm:$0xff]   ;;  %v19474_v1 = vld [vmem:[%s20524_s8 + $0x700] sm:$0xff]  }
 0x2dd   : > { %v21894_v14 = vpop.f32.mrf.mxu0  ;;  %v21896_v9 = vpop.f32.mrf.mxu1  ;;  %v19475_v54 = vld [vmem:[%s20524_s8 + $0xa20] sm:$0xff]  }
 0x2de   : > { %24369 = vst [vmem:[#allocation246_spill] sm:$0xff] %v21894_v14  ;;  %24370 = vst [vmem:[#allocation247_spill] sm:$0xff] %v21896_v9 }
 0x2df   : > { %v21900_v17 = vpop.f32.mrf.mxu0  ;;  %v21902_v25 = vpop.f32.mrf.mxu1 }
 0x2e0   : > { %24371 = vst [vmem:[#allocation248_spill] sm:$0xff] %v21900_v17  ;;  %24372 = vst [vmem:[#allocation249_spill] sm:$0xff] %v21902_v25 }
 0x2e1   : > { %v21910_v43 = vpop.f32.mrf.mxu0  ;;  %v21912_v6 = vpop.f32.mrf.mxu1 }
 0x2e2   : > { %24373 = vst [vmem:[#allocation250_spill] sm:$0xff] %v21910_v43  ;;  %24374 = vst [vmem:[#allocation251_spill] sm:$0xff] %v21912_v6 }
 0x2e3   : > { %v21916_v9 = vpop.f32.mrf.mxu0  ;;  %v21918_v14 = vpop.f32.mrf.mxu1  ;;  %18828 = vmatmul.mubr.msk.bf16.gmra.mxu0 %vm7385_vm2, %v19472_v52  ;;  %19038 = vmatmul.mubr.msk.bf16.gmra.mxu1 %vm7385_vm2, %v19473_v26  ;;  %v19476_v52 = vld [vmem:[%s20524_s8 + $0x708] sm:$0xff]  }
 0x2e4   : > { %24375 = vst [vmem:[#allocation252_spill] sm:$0xff] %v21916_v9  ;;  %24376 = vst [vmem:[#allocation253_spill] sm:$0xff] %v21918_v14  ;;  %18831 = vmatprep.mubr.msk.bf16.mxu0 %vm7385_vm2, %v19474_v1  ;;  %19041 = vmatprep.mubr.msk.bf16.mxu1 %vm7385_vm2, %v19475_v54  ;;  %v19477_v26 = vld [vmem:[%s20524_s8 + $0xa28] sm:$0xff]   ;;  %v19478_v14 = vld [vmem:[%s20524_s8 + $0x710] sm:$0xff]  }
 0x2e5   : > { %v21926_v25 = vpop.f32.mrf.mxu0  ;;  %v21928_v57 = vpop.f32.mrf.mxu1  ;;  %v19479_v1 = vld [vmem:[%s20524_s8 + $0xa30] sm:$0xff]  }
 0x2e6   : > { %24377 = vst [vmem:[#allocation254_spill] sm:$0xff] %v21926_v25  ;;  %24378 = vst [vmem:[#allocation255_spill] sm:$0xff] %v21928_v57 }
 0x2e7   : > { %v21932_v43 = vpop.f32.mrf.mxu0  ;;  %v21934_v17 = vpop.f32.mrf.mxu1 }
 0x2e8   : > { %24379 = vst [vmem:[#allocation256_spill] sm:$0xff] %v21932_v43  ;;  %24380 = vst [vmem:[#allocation257_spill] sm:$0xff] %v21934_v17 }
 0x2e9   : > { %v21942_v54 = vpop.f32.mrf.mxu0  ;;  %v21944_v9 = vpop.f32.mrf.mxu1 }
 0x2ea   : > { %24381 = vst [vmem:[#allocation258_spill] sm:$0xff] %v21942_v54  ;;  %24382 = vst [vmem:[#allocation259_spill] sm:$0xff] %v21944_v9 }
 0x2eb   : > { %v21948_v57 = vpop.f32.mrf.mxu0  ;;  %v21950_v25 = vpop.f32.mrf.mxu1  ;;  %18832 = vmatmul.mubr.msk.bf16.gmra.mxu0 %vm7385_vm2, %v19476_v52  ;;  %19042 = vmatmul.mubr.msk.bf16.gmra.mxu1 %vm7385_vm2, %v19477_v26  ;;  %v19480_v52 = vld [vmem:[%s20524_s8 + $0x718] sm:$0xff]  }
 0x2ec   : > { %24383 = vst [vmem:[#allocation260_spill] sm:$0xff] %v21948_v57  ;;  %24384 = vst [vmem:[#allocation261_spill] sm:$0xff] %v21950_v25  ;;  %18835 = vmatprep.mubr.msk.bf16.mxu0 %vm7385_vm2, %v19478_v14  ;;  %19045 = vmatprep.mubr.msk.bf16.mxu1 %vm7385_vm2, %v19479_v1  ;;  %v19481_v26 = vld [vmem:[%s20524_s8 + $0xa38] sm:$0xff]   ;;  %v19482_v25 = vld [vmem:[%s20524_s8 + $0x720] sm:$0xff]  }
 0x2ed   : > { %v21958_v17 = vpop.f32.mrf.mxu0  ;;  %v21960_v6 = vpop.f32.mrf.mxu1  ;;  %v19483_v14 = vld [vmem:[%s20524_s8 + $0xa40] sm:$0xff]  }
 0x2ee   : > { %24385 = vst [vmem:[#allocation262_spill] sm:$0xff] %v21958_v17  ;;  %24386 = vst [vmem:[#allocation263_spill] sm:$0xff] %v21960_v6 }
 0x2ef   : > { %v21964_v54 = vpop.f32.mrf.mxu0  ;;  %v21966_v43 = vpop.f32.mrf.mxu1 }
 0x2f0   : > { %24387 = vst [vmem:[#allocation264_spill] sm:$0xff] %v21964_v54  ;;  %24388 = vst [vmem:[#allocation265_spill] sm:$0xff] %v21966_v43 }
 0x2f1   : > { %v21974_v1 = vpop.f32.mrf.mxu0  ;;  %v21976_v57 = vpop.f32.mrf.mxu1 }
 0x2f2   : > { %24389 = vst [vmem:[#allocation266_spill] sm:$0xff] %v21974_v1  ;;  %24390 = vst [vmem:[#allocation267_spill] sm:$0xff] %v21976_v57 }
 0x2f3   : > { %v21980_v6 = vpop.f32.mrf.mxu0  ;;  %v21982_v17 = vpop.f32.mrf.mxu1  ;;  %18836 = vmatmul.mubr.msk.bf16.gmra.mxu0 %vm7385_vm2, %v19480_v52  ;;  %19046 = vmatmul.mubr.msk.bf16.gmra.mxu1 %vm7385_vm2, %v19481_v26  ;;  %v19484_v52 = vld [vmem:[%s20524_s8 + $0x728] sm:$0xff]  }
 0x2f4   : > { %24391 = vst [vmem:[#allocation268_spill] sm:$0xff] %v21980_v6  ;;  %24392 = vst [vmem:[#allocation269_spill] sm:$0xff] %v21982_v17  ;;  %18839 = vmatprep.mubr.msk.bf16.mxu0 %vm7385_vm2, %v19482_v25  ;;  %19049 = vmatprep.mubr.msk.bf16.mxu1 %vm7385_vm2, %v19483_v14  ;;  %v19485_v26 = vld [vmem:[%s20524_s8 + $0xa48] sm:$0xff]   ;;  %v19486_v17 = vld [vmem:[%s20524_s8 + $0x730] sm:$0xff]  }
 0x2f5   : > { %v21990_v43 = vpop.f32.mrf.mxu0  ;;  %v21992_v9 = vpop.f32.mrf.mxu1  ;;  %v19487_v25 = vld [vmem:[%s20524_s8 + $0xa50] sm:$0xff]  }
 0x2f6   : > { %24393 = vst [vmem:[#allocation270_spill] sm:$0xff] %v21990_v43  ;;  %24394 = vst [vmem:[#allocation271_spill] sm:$0xff] %v21992_v9 }
 0x2f7   : > { %v21996_v1 = vpop.f32.mrf.mxu0  ;;  %v21998_v54 = vpop.f32.mrf.mxu1 }
 0x2f8   : > { %24395 = vst [vmem:[#allocation272_spill] sm:$0xff] %v21996_v1  ;;  %24396 = vst [vmem:[#allocation273_spill] sm:$0xff] %v21998_v54 }
 0x2f9   : > { %v22006_v14 = vpop.f32.mrf.mxu0  ;;  %v22008_v6 = vpop.f32.mrf.mxu1 }
 0x2fa   : > { %24397 = vst [vmem:[#allocation274_spill] sm:$0xff] %v22006_v14  ;;  %24398 = vst [vmem:[#allocation275_spill] sm:$0xff] %v22008_v6 }
 0x2fb   : > { %v22012_v9 = vpop.f32.mrf.mxu0  ;;  %v22014_v43 = vpop.f32.mrf.mxu1  ;;  %18840 = vmatmul.mubr.msk.bf16.gmra.mxu0 %vm7385_vm2, %v19484_v52  ;;  %19050 = vmatmul.mubr.msk.bf16.gmra.mxu1 %vm7385_vm2, %v19485_v26  ;;  %v19488_v52 = vld [vmem:[%s20524_s8 + $0x738] sm:$0xff]  }
 0x2fc   : > { %24399 = vst [vmem:[#allocation276_spill] sm:$0xff] %v22012_v9  ;;  %24400 = vst [vmem:[#allocation277_spill] sm:$0xff] %v22014_v43  ;;  %18843 = vmatprep.mubr.msk.bf16.mxu0 %vm7385_vm2, %v19486_v17  ;;  %19053 = vmatprep.mubr.msk.bf16.mxu1 %vm7385_vm2, %v19487_v25  ;;  %v19489_v26 = vld [vmem:[%s20524_s8 + $0xa58] sm:$0xff]   ;;  %v19490_v43 = vld [vmem:[%s20524_s8 + $0x740] sm:$0xff]  }
 0x2fd   : > { %v22022_v54 = vpop.f32.mrf.mxu0  ;;  %v22024_v57 = vpop.f32.mrf.mxu1  ;;  %v19491_v17 = vld [vmem:[%s20524_s8 + $0xa60] sm:$0xff]  }
 0x2fe   : > { %24401 = vst [vmem:[#allocation278_spill] sm:$0xff] %v22022_v54  ;;  %24402 = vst [vmem:[#allocation279_spill] sm:$0xff] %v22024_v57 }
 0x2ff   : > { %v22028_v14 = vpop.f32.mrf.mxu0  ;;  %v22030_v1 = vpop.f32.mrf.mxu1 }
 0x300   : > { %24403 = vst [vmem:[#allocation280_spill] sm:$0xff] %v22028_v14  ;;  %24404 = vst [vmem:[#allocation281_spill] sm:$0xff] %v22030_v1 }
 0x301   : > { %v22038_v25 = vpop.f32.mrf.mxu0  ;;  %v22040_v9 = vpop.f32.mrf.mxu1 }
 0x302   : > { %24405 = vst [vmem:[#allocation282_spill] sm:$0xff] %v22038_v25  ;;  %24406 = vst [vmem:[#allocation283_spill] sm:$0xff] %v22040_v9 }
 0x303   : > { %v22044_v57 = vpop.f32.mrf.mxu0  ;;  %v22046_v54 = vpop.f32.mrf.mxu1  ;;  %18844 = vmatmul.mubr.msk.bf16.gmra.mxu0 %vm7385_vm2, %v19488_v52  ;;  %19054 = vmatmul.mubr.msk.bf16.gmra.mxu1 %vm7385_vm2, %v19489_v26  ;;  %v19492_v52 = vld [vmem:[%s20524_s8 + $0x748] sm:$0xff]  }
 0x304   : > { %24407 = vst [vmem:[#allocation284_spill] sm:$0xff] %v22044_v57  ;;  %24408 = vst [vmem:[#allocation285_spill] sm:$0xff] %v22046_v54  ;;  %18847 = vmatprep.mubr.msk.bf16.mxu0 %vm7385_vm2, %v19490_v43  ;;  %19057 = vmatprep.mubr.msk.bf16.mxu1 %vm7385_vm2, %v19491_v17  ;;  %v19493_v26 = vld [vmem:[%s20524_s8 + $0xa68] sm:$0xff]   ;;  %v19494_v54 = vld [vmem:[%s20524_s8 + $0x750] sm:$0xff]  }
 0x305   : > { %v22054_v1 = vpop.f32.mrf.mxu0  ;;  %v22056_v6 = vpop.f32.mrf.mxu1  ;;  %v19495_v43 = vld [vmem:[%s20524_s8 + $0xa70] sm:$0xff]  }
 0x306   : > { %24409 = vst [vmem:[#allocation286_spill] sm:$0xff] %v22054_v1  ;;  %24410 = vst [vmem:[#allocation287_spill] sm:$0xff] %v22056_v6 }
 0x307   : > { %v22060_v25 = vpop.f32.mrf.mxu0  ;;  %v22062_v14 = vpop.f32.mrf.mxu1 }
 0x308   : > { %24411 = vst [vmem:[#allocation288_spill] sm:$0xff] %v22060_v25  ;;  %24412 = vst [vmem:[#allocation289_spill] sm:$0xff] %v22062_v14 }
 0x309   : > { %v22070_v17 = vpop.f32.mrf.mxu0  ;;  %v22072_v57 = vpop.f32.mrf.mxu1 }
 0x30a   : > { %24413 = vst [vmem:[#allocation290_spill] sm:$0xff] %v22070_v17  ;;  %24414 = vst [vmem:[#allocation291_spill] sm:$0xff] %v22072_v57 }
 0x30b   : > { %v22076_v6 = vpop.f32.mrf.mxu0  ;;  %v22078_v1 = vpop.f32.mrf.mxu1  ;;  %18848 = vmatmul.mubr.msk.bf16.gmra.mxu0 %vm7385_vm2, %v19492_v52  ;;  %19058 = vmatmul.mubr.msk.bf16.gmra.mxu1 %vm7385_vm2, %v19493_v26  ;;  %v19496_v52 = vld [vmem:[%s20524_s8 + $0x758] sm:$0xff]  }
 0x30c   : > { %24415 = vst [vmem:[#allocation292_spill] sm:$0xff] %v22076_v6  ;;  %24416 = vst [vmem:[#allocation293_spill] sm:$0xff] %v22078_v1  ;;  %18851 = vmatprep.mubr.msk.bf16.mxu0 %vm7385_vm2, %v19494_v54  ;;  %19061 = vmatprep.mubr.msk.bf16.mxu1 %vm7385_vm2, %v19495_v43  ;;  %v19497_v26 = vld [vmem:[%s20524_s8 + $0xa78] sm:$0xff]   ;;  %v19498_v1 = vld [vmem:[%s20524_s8 + $0x760] sm:$0xff]  }
 0x30d   : > { %v22086_v14 = vpop.f32.mrf.mxu0  ;;  %v22088_v9 = vpop.f32.mrf.mxu1  ;;  %v19499_v54 = vld [vmem:[%s20524_s8 + $0xa80] sm:$0xff]  }
 0x30e   : > { %24417 = vst [vmem:[#allocation294_spill] sm:$0xff] %v22086_v14  ;;  %24418 = vst [vmem:[#allocation295_spill] sm:$0xff] %v22088_v9 }
 0x30f   : > { %v22092_v17 = vpop.f32.mrf.mxu0  ;;  %v22094_v25 = vpop.f32.mrf.mxu1 }
 0x310   : > { %24419 = vst [vmem:[#allocation296_spill] sm:$0xff] %v22092_v17  ;;  %24420 = vst [vmem:[#allocation297_spill] sm:$0xff] %v22094_v25 }
 0x311   : > { %v22102_v43 = vpop.f32.mrf.mxu0  ;;  %v22104_v6 = vpop.f32.mrf.mxu1 }
 0x312   : > { %24421 = vst [vmem:[#allocation298_spill] sm:$0xff] %v22102_v43  ;;  %24422 = vst [vmem:[#allocation299_spill] sm:$0xff] %v22104_v6 }
 0x313   : > { %v22108_v9 = vpop.f32.mrf.mxu0  ;;  %v22110_v14 = vpop.f32.mrf.mxu1  ;;  %18852 = vmatmul.mubr.msk.bf16.gmra.mxu0 %vm7385_vm2, %v19496_v52  ;;  %19062 = vmatmul.mubr.msk.bf16.gmra.mxu1 %vm7385_vm2, %v19497_v26  ;;  %v19500_v52 = vld [vmem:[%s20524_s8 + $0x768] sm:$0xff]  }
 0x314   : > { %24423 = vst [vmem:[#allocation300_spill] sm:$0xff] %v22108_v9  ;;  %24424 = vst [vmem:[#allocation301_spill] sm:$0xff] %v22110_v14  ;;  %18855 = vmatprep.mubr.msk.bf16.mxu0 %vm7385_vm2, %v19498_v1  ;;  %19065 = vmatprep.mubr.msk.bf16.mxu1 %vm7385_vm2, %v19499_v54  ;;  %v19501_v26 = vld [vmem:[%s20524_s8 + $0xa88] sm:$0xff]   ;;  %v19502_v14 = vld [vmem:[%s20524_s8 + $0x770] sm:$0xff]  }
 0x315   : > { %v22118_v25 = vpop.f32.mrf.mxu0  ;;  %v22120_v57 = vpop.f32.mrf.mxu1  ;;  %v19503_v1 = vld [vmem:[%s20524_s8 + $0xa90] sm:$0xff]  }
 0x316   : > { %24425 = vst [vmem:[#allocation302_spill] sm:$0xff] %v22118_v25  ;;  %24426 = vst [vmem:[#allocation303_spill] sm:$0xff] %v22120_v57 }
 0x317   : > { %v22124_v43 = vpop.f32.mrf.mxu0  ;;  %v22126_v17 = vpop.f32.mrf.mxu1 }
 0x318   : > { %24427 = vst [vmem:[#allocation304_spill] sm:$0xff] %v22124_v43  ;;  %24428 = vst [vmem:[#allocation305_spill] sm:$0xff] %v22126_v17 }
 0x319   : > { %v22134_v54 = vpop.f32.mrf.mxu0  ;;  %v22136_v9 = vpop.f32.mrf.mxu1 }
 0x31a   : > { %24429 = vst [vmem:[#allocation306_spill] sm:$0xff] %v22134_v54  ;;  %24430 = vst [vmem:[#allocation307_spill] sm:$0xff] %v22136_v9 }
 0x31b   : > { %v22140_v57 = vpop.f32.mrf.mxu0  ;;  %v22142_v25 = vpop.f32.mrf.mxu1  ;;  %18856 = vmatmul.mubr.msk.bf16.gmra.mxu0 %vm7385_vm2, %v19500_v52  ;;  %19066 = vmatmul.mubr.msk.bf16.gmra.mxu1 %vm7385_vm2, %v19501_v26  ;;  %v19504_v52 = vld [vmem:[%s20524_s8 + $0x778] sm:$0xff]  }
 0x31c   : > { %24431 = vst [vmem:[#allocation308_spill] sm:$0xff] %v22140_v57  ;;  %24432 = vst [vmem:[#allocation309_spill] sm:$0xff] %v22142_v25  ;;  %18859 = vmatprep.mubr.msk.bf16.mxu0 %vm7385_vm2, %v19502_v14  ;;  %19069 = vmatprep.mubr.msk.bf16.mxu1 %vm7385_vm2, %v19503_v1  ;;  %v19505_v26 = vld [vmem:[%s20524_s8 + $0xa98] sm:$0xff]   ;;  %v19506_v25 = vld [vmem:[%s20524_s8 + $0x780] sm:$0xff]  }
 0x31d   : > { %v22150_v17 = vpop.f32.mrf.mxu0  ;;  %v22152_v6 = vpop.f32.mrf.mxu1  ;;  %v19507_v14 = vld [vmem:[%s20524_s8 + $0xaa0] sm:$0xff]  }
 0x31e   : > { %24433 = vst [vmem:[#allocation310_spill] sm:$0xff] %v22150_v17  ;;  %24434 = vst [vmem:[#allocation311_spill] sm:$0xff] %v22152_v6 }
 0x31f   : > { %v22156_v54 = vpop.f32.mrf.mxu0  ;;  %v22158_v43 = vpop.f32.mrf.mxu1 }
 0x320   : > { %24435 = vst [vmem:[#allocation312_spill] sm:$0xff] %v22156_v54  ;;  %24436 = vst [vmem:[#allocation313_spill] sm:$0xff] %v22158_v43 }
 0x321   : > { %v22166_v1 = vpop.f32.mrf.mxu0  ;;  %v22168_v57 = vpop.f32.mrf.mxu1 }
 0x322   : > { %24437 = vst [vmem:[#allocation314_spill] sm:$0xff] %v22166_v1  ;;  %24438 = vst [vmem:[#allocation315_spill] sm:$0xff] %v22168_v57 }
 0x323   : > { %v22172_v6 = vpop.f32.mrf.mxu0  ;;  %v22174_v17 = vpop.f32.mrf.mxu1  ;;  %18860 = vmatmul.mubr.msk.bf16.gmra.mxu0 %vm7385_vm2, %v19504_v52  ;;  %19070 = vmatmul.mubr.msk.bf16.gmra.mxu1 %vm7385_vm2, %v19505_v26  ;;  %v19508_v52 = vld [vmem:[%s20524_s8 + $0x788] sm:$0xff]  }
 0x324   : > { %24439 = vst [vmem:[#allocation316_spill] sm:$0xff] %v22172_v6  ;;  %24440 = vst [vmem:[#allocation317_spill] sm:$0xff] %v22174_v17  ;;  %18863 = vmatprep.mubr.msk.bf16.mxu0 %vm7385_vm2, %v19506_v25  ;;  %19073 = vmatprep.mubr.msk.bf16.mxu1 %vm7385_vm2, %v19507_v14  ;;  %v19509_v26 = vld [vmem:[%s20524_s8 + $0xaa8] sm:$0xff]   ;;  %v19510_v17 = vld [vmem:[%s20524_s8 + $0x790] sm:$0xff]  }
 0x325   : > { %v22182_v43 = vpop.f32.mrf.mxu0  ;;  %v22184_v9 = vpop.f32.mrf.mxu1  ;;  %v19511_v25 = vld [vmem:[%s20524_s8 + $0xab0] sm:$0xff]  }
 0x326   : > { %24441 = vst [vmem:[#allocation318_spill] sm:$0xff] %v22182_v43  ;;  %24442 = vst [vmem:[#allocation319_spill] sm:$0xff] %v22184_v9 }
 0x327   : > { %v22188_v1 = vpop.f32.mrf.mxu0  ;;  %v22190_v54 = vpop.f32.mrf.mxu1 }
 0x328   : > { %24443 = vst [vmem:[#allocation320_spill] sm:$0xff] %v22188_v1  ;;  %24444 = vst [vmem:[#allocation321_spill] sm:$0xff] %v22190_v54 }
 0x329   : > { %v22198_v14 = vpop.f32.mrf.mxu0  ;;  %v22200_v6 = vpop.f32.mrf.mxu1 }
 0x32a   : > { %24445 = vst [vmem:[#allocation322_spill] sm:$0xff] %v22198_v14  ;;  %24446 = vst [vmem:[#allocation323_spill] sm:$0xff] %v22200_v6 }
 0x32b   : > { %v22204_v9 = vpop.f32.mrf.mxu0  ;;  %v22206_v43 = vpop.f32.mrf.mxu1  ;;  %18864 = vmatmul.mubr.msk.bf16.gmra.mxu0 %vm7385_vm2, %v19508_v52  ;;  %19074 = vmatmul.mubr.msk.bf16.gmra.mxu1 %vm7385_vm2, %v19509_v26  ;;  %v19512_v52 = vld [vmem:[%s20524_s8 + $0x798] sm:$0xff]  }
 0x32c   : > { %24447 = vst [vmem:[#allocation324_spill] sm:$0xff] %v22204_v9  ;;  %24448 = vst [vmem:[#allocation325_spill] sm:$0xff] %v22206_v43  ;;  %18867 = vmatprep.mubr.msk.bf16.mxu0 %vm7385_vm2, %v19510_v17  ;;  %19077 = vmatprep.mubr.msk.bf16.mxu1 %vm7385_vm2, %v19511_v25  ;;  %v19513_v26 = vld [vmem:[%s20524_s8 + $0xab8] sm:$0xff]   ;;  %v19514_v43 = vld [vmem:[%s20524_s8 + $0x7a0] sm:$0xff]  }
 0x32d   : > { %v22214_v54 = vpop.f32.mrf.mxu0  ;;  %v22216_v57 = vpop.f32.mrf.mxu1  ;;  %v19515_v17 = vld [vmem:[%s20524_s8 + $0xac0] sm:$0xff]  }
 0x32e   : > { %24449 = vst [vmem:[#allocation326_spill] sm:$0xff] %v22214_v54  ;;  %24450 = vst [vmem:[#allocation327_spill] sm:$0xff] %v22216_v57 }
 0x32f   : > { %v22220_v14 = vpop.f32.mrf.mxu0  ;;  %v22222_v1 = vpop.f32.mrf.mxu1 }
 0x330   : > { %24451 = vst [vmem:[#allocation328_spill] sm:$0xff] %v22220_v14  ;;  %24452 = vst [vmem:[#allocation329_spill] sm:$0xff] %v22222_v1 }
 0x331   : > { %v22230_v25 = vpop.f32.mrf.mxu0  ;;  %v22232_v9 = vpop.f32.mrf.mxu1 }
 0x332   : > { %24453 = vst [vmem:[#allocation330_spill] sm:$0xff] %v22230_v25  ;;  %24454 = vst [vmem:[#allocation331_spill] sm:$0xff] %v22232_v9 }
 0x333   : > { %v22236_v57 = vpop.f32.mrf.mxu0  ;;  %v22238_v54 = vpop.f32.mrf.mxu1  ;;  %18868 = vmatmul.mubr.msk.bf16.gmra.mxu0 %vm7385_vm2, %v19512_v52  ;;  %19078 = vmatmul.mubr.msk.bf16.gmra.mxu1 %vm7385_vm2, %v19513_v26  ;;  %v19516_v52 = vld [vmem:[%s20524_s8 + $0x7a8] sm:$0xff]  }
 0x334   : > { %24455 = vst [vmem:[#allocation332_spill] sm:$0xff] %v22236_v57  ;;  %24456 = vst [vmem:[#allocation333_spill] sm:$0xff] %v22238_v54  ;;  %18871 = vmatprep.mubr.msk.bf16.mxu0 %vm7385_vm2, %v19514_v43  ;;  %19081 = vmatprep.mubr.msk.bf16.mxu1 %vm7385_vm2, %v19515_v17  ;;  %v19517_v26 = vld [vmem:[%s20524_s8 + $0xac8] sm:$0xff]   ;;  %v19518_v54 = vld [vmem:[%s20524_s8 + $0x7b0] sm:$0xff]  }
 0x335   : > { %v22246_v1 = vpop.f32.mrf.mxu0  ;;  %v22248_v6 = vpop.f32.mrf.mxu1  ;;  %v19519_v43 = vld [vmem:[%s20524_s8 + $0xad0] sm:$0xff]  }
 0x336   : > { %24457 = vst [vmem:[#allocation334_spill] sm:$0xff] %v22246_v1  ;;  %24458 = vst [vmem:[#allocation335_spill] sm:$0xff] %v22248_v6 }
 0x337   : > { %v22252_v25 = vpop.f32.mrf.mxu0  ;;  %v22254_v14 = vpop.f32.mrf.mxu1 }
 0x338   : > { %24459 = vst [vmem:[#allocation336_spill] sm:$0xff] %v22252_v25  ;;  %24460 = vst [vmem:[#allocation337_spill] sm:$0xff] %v22254_v14 }
 0x339   : > { %v22262_v17 = vpop.f32.mrf.mxu0  ;;  %v22264_v57 = vpop.f32.mrf.mxu1 }
 0x33a   : > { %24461 = vst [vmem:[#allocation338_spill] sm:$0xff] %v22262_v17  ;;  %24462 = vst [vmem:[#allocation339_spill] sm:$0xff] %v22264_v57 }
 0x33b   : > { %v22268_v6 = vpop.f32.mrf.mxu0  ;;  %v22270_v1 = vpop.f32.mrf.mxu1  ;;  %18872 = vmatmul.mubr.msk.bf16.gmra.mxu0 %vm7385_vm2, %v19516_v52  ;;  %19082 = vmatmul.mubr.msk.bf16.gmra.mxu1 %vm7385_vm2, %v19517_v26  ;;  %v19520_v52 = vld [vmem:[%s20524_s8 + $0x7b8] sm:$0xff]  }
 0x33c   : > { %24463 = vst [vmem:[#allocation340_spill] sm:$0xff] %v22268_v6  ;;  %24464 = vst [vmem:[#allocation341_spill] sm:$0xff] %v22270_v1  ;;  %18875 = vmatprep.mubr.msk.bf16.mxu0 %vm7385_vm2, %v19518_v54  ;;  %19085 = vmatprep.mubr.msk.bf16.mxu1 %vm7385_vm2, %v19519_v43  ;;  %v19521_v26 = vld [vmem:[%s20524_s8 + $0xad8] sm:$0xff]   ;;  %v19522_v54 = vld [vmem:[%s20524_s8 + $0x7c0] sm:$0xff]  }
 0x33d   : > { %v22278_v14 = vpop.f32.mrf.mxu0  ;;  %v22280_v9 = vpop.f32.mrf.mxu1  ;;  %v19523_v1 = vld [vmem:[%s20524_s8 + $0xae0] sm:$0xff]  }
 0x33e   : > { %24465 = vst [vmem:[#allocation342_spill] sm:$0xff] %v22278_v14  ;;  %24466 = vst [vmem:[#allocation343_spill] sm:$0xff] %v22280_v9 }
 0x33f   : > { %v22284_v17 = vpop.f32.mrf.mxu0  ;;  %v22286_v25 = vpop.f32.mrf.mxu1 }
 0x340   : > { %24467 = vst [vmem:[#allocation344_spill] sm:$0xff] %v22284_v17  ;;  %24468 = vst [vmem:[#allocation345_spill] sm:$0xff] %v22286_v25 }
 0x341   : > { %v22294_v43 = vpop.f32.mrf.mxu0  ;;  %v22296_v6 = vpop.f32.mrf.mxu1 }
 0x342   : > { %24469 = vst [vmem:[#allocation346_spill] sm:$0xff] %v22294_v43  ;;  %24470 = vst [vmem:[#allocation347_spill] sm:$0xff] %v22296_v6 }
 0x343   : > { %v22300_v9 = vpop.f32.mrf.mxu0  ;;  %v22302_v14 = vpop.f32.mrf.mxu1  ;;  %18876 = vmatmul.mubr.msk.bf16.gmra.mxu0 %vm7385_vm2, %v19520_v52  ;;  %19086 = vmatmul.mubr.msk.bf16.gmra.mxu1 %vm7385_vm2, %v19521_v26  ;;  %v19524_v26 = vld [vmem:[%s20524_s8 + $0x7c8] sm:$0xff]  }
 0x344   : > { %24471 = vst [vmem:[#allocation348_spill] sm:$0xff] %v22300_v9  ;;  %24472 = vst [vmem:[#allocation349_spill] sm:$0xff] %v22302_v14  ;;  %18879 = vmatprep.mubr.msk.bf16.mxu0 %vm7385_vm2, %v19522_v54  ;;  %19089 = vmatprep.mubr.msk.bf16.mxu1 %vm7385_vm2, %v19523_v1  ;;  %v19526_v1 = vld [vmem:[%s20524_s8 + $0x7d0] sm:$0xff]   ;;  %v24479_v54 = vmax.f32 %v20732_v63, %v20735_v0 }
 0x345   : > { %v22312_v57 = vpop.f32.mrf.mxu0  ;;  %v22314_v6 = vpop.f32.mrf.mxu1  ;;  %v19527_v14 = vld [vmem:[%s20524_s8 + $0xaf0] sm:$0xff]  }
 0x346   : > { %24473 = vst [vmem:[#allocation350_spill] sm:$0xff] %v22312_v57  ;;  %24474 = vst [vmem:[#allocation351_spill] sm:$0xff] %v22314_v6  ;;  %v24481_v57 = vmax.f32 %v20750_v7, %v20752_v8 }
 0x347   : > { %v22318_v52 = vpop.f32.mrf.mxu0  ;;  %v22320_v25 = vpop.f32.mrf.mxu1 }
 0x348   : > { %24475 = vst [vmem:[#allocation352_spill] sm:$0xff] %v22318_v52  ;;  %24476 = vst [vmem:[#allocation353_spill] sm:$0xff] %v22320_v25 }
 0x349   : > { %v22328_v9 = vpop.f32.mrf.mxu0  ;;  %v22330_v17 = vpop.f32.mrf.mxu1 }
 0x34a   : > { %24477 = vst [vmem:[#allocation354_spill] sm:$0xff] %v22328_v9  ;;  %24478 = vst [vmem:[#allocation355_spill] sm:$0xff] %v22330_v17 }
 0x34b   : > { %v18785_v43 = vpop.f32.mrf.mxu0  ;;  %18880 = vmatmul.mubr.msk.bf16.gmra.mxu0 %vm7385_vm2, %v19524_v26  ;;  %v18995_v6 = vpop.f32.mrf.mxu1  ;;  %19090 = vmatmul.mubr.msk.bf16.gmra.mxu1 %vm7385_vm2, %v19525_v22  ;;  %v24480_v22 = vmax.f32 %v20742_v2, %v20744_v3 }
 0x34c   : > { %v12396_v25 = vmax.f32 %v24479_v54, %v18785_v43  ;;  %18883 = vmatprep.mubr.msk.bf16.mxu0 %vm7385_vm2, %v19526_v1  ;;  %19093 = vmatprep.mubr.msk.bf16.mxu1 %vm7385_vm2, %v19527_v14  ;;  %v19528_v43 = vld [vmem:[%s20524_s8 + $0x7d8] sm:$0xff]  }
 0x34d   : > { %v11595_v26 = vpop.f32.mrf.mxu0  ;;  %v13629_v17 = vpop.f32.mrf.mxu1  ;;  %v19529_v54 = vld [vmem:[%s20524_s8 + $0xaf8] sm:$0xff]  }
 0x34e   : > { %v14430_v9 = vmax.f32 %v12396_v25, %v18995_v6  ;;  %v12394_v52 = vmax.f32 %v24480_v22, %v11595_v26  ;;  %v24482_v26 = vmax.f32 %v20758_v12, %v20760_v13  ;;  %v24483_v13 = vmax.f32 %v20764_v15, %v20767_v16  ;;  %v19532_v15 = vld [vmem:[%s20524_s8 + $0x7e8] sm:$0xff]  }
 0x34f   : > { %v18786_v63 = vpop.f32.mrf.mxu0  ;;  %v18996_v0 = vpop.f32.mrf.mxu1  ;;  %v19533_v16 = vld [vmem:[%s20524_s8 + $0xb08] sm:$0xff]  }
 0x350   : > { %v14637_v1 = vadd.f32 %v22344_v38, %v14430_v9  ;;  %v14428_v14 = vmax.f32 %v12394_v52, %v13629_v17  ;;  %v12397_v30 = vmax.f32 %v24481_v57, %v18786_v63 }
 0x351   : > { %v11598_v41 = vpop.f32.mrf.mxu0  ;;  %v13632_v6 = vpop.f32.mrf.mxu1 }
 0x352   : > { %v14837_v25 = vmax.f32 %v14637_v1, 0.0  ;;  %v14635_v2 = vadd.f32 %v22344_v38, %v14428_v14  ;;  %v14431_v3 = vmax.f32 %v12397_v30, %v18996_v0  ;;  %v12395_v22 = vmax.f32 %v24482_v26, %v11598_v41 }
 0x353   : > { %v18789_v7 = vpop.f32.mrf.mxu0  ;;  %18884 = vmatmul.mubr.msk.bf16.gmra.mxu0 %vm7385_vm2, %v19528_v43  ;;  %v18999_v8 = vpop.f32.mrf.mxu1  ;;  %19094 = vmatmul.mubr.msk.bf16.gmra.mxu1 %vm7385_vm2, %v19529_v54  ;;  %v24484_v54 = vmax.f32 %v20774_v18, %v20776_v19 }
 0x354   : > { %v17735_v9 = vpack.c.bf16 %v14837_v25, %v14837_v25  ;;  %v14835_v57 = vmax.f32 %v14635_v2, 0.0  ;;  %v14638_v30 = vadd.f32 %v22344_v38, %v14431_v3  ;;  %v14429_v12 = vmax.f32 %v12395_v22, %v13632_v6  ;;  %18887 = vmatprep.mubr.msk.bf16.mxu0 %vm7385_vm2, %v19530_v33  ;;  %19097 = vmatprep.mubr.msk.bf16.mxu1 %vm7385_vm2, %v19531_v21  ;;  %v19534_v22 = vld [vmem:[%s20524_s8 + $0x7f0] sm:$0xff]  }
 0x355   : > { %v12400_v41 = vmax.f32 %v24483_v13, %v18789_v7  ;;  %v11611_v17 = vpop.f32.mrf.mxu0  ;;  %v13645_v52 = vpop.f32.mrf.mxu1  ;;  %v24485_v3 = vmax.f32 %v20782_v23, %v20784_v24  ;;  %v19535_v7 = vld [vmem:[%s20524_s8 + $0xb10] sm:$0xff]  }
 0x356   : > { %15846 = vst.msk [vmem:[%s22364_s22 + $0x8] sm:$0xf] %vm15843_vm3, %v17735_v9  ;;  %v17733_v63 = vpack.c.bf16 %v14835_v57, %v14835_v57  ;;  %v14838_v0 = vmax.f32 %v14638_v30, 0.0  ;;  %v14636_v43 = vadd.f32 %v22344_v38, %v14429_v12  ;;  %v12398_v33 = vmax.f32 %v24484_v54, %v11611_v17 }
 0x357   : > { %v14434_v21 = vmax.f32 %v12400_v41, %v18999_v8  ;;  %v18790_v1 = vpop.f32.mrf.mxu0  ;;  %v19000_v14 = vpop.f32.mrf.mxu1  ;;  %v24486_v12 = vmax.f32 %v20790_v28, %v20792_v29 }
 0x358   : > { %15844 = vst.msk [vmem:[%s22364_s22] sm:$0xf] %vm15843_vm3, %v17733_v63  ;;  %v17736_v6 = vpack.c.bf16 %v14838_v0, %v14838_v0  ;;  %v14836_v25 = vmax.f32 %v14636_v43, 0.0  ;;  %v14432_v2 = vmax.f32 %v12398_v33, %v13645_v52  ;;  %v12401_v26 = vmax.f32 %v24485_v3, %v18790_v1 }
 0x359   : > { %v14641_v18 = vadd.f32 %v22344_v38, %v14434_v21  ;;  %v11614_v19 = vpop.f32.mrf.mxu0  ;;  %v13648_v8 = vpop.f32.mrf.mxu1  ;;  %v24487_v0 = vmax.f32 %v20796_v31, %v20799_v32  ;;  %v24488_v31 = vmax.f32 %v20806_v34, %v20808_v35 }
 0x35a   : > { %15847 = vst.msk [vmem:[%s22364_s22 + $0xc] sm:$0xf] %vm15843_vm3, %v17736_v6  ;;  %v17734_v9 = vpack.c.bf16 %v14836_v25, %v14836_v25  ;;  %v14639_v57 = vadd.f32 %v22344_v38, %v14432_v2  ;;  %v14435_v30 = vmax.f32 %v12401_v26, %v19000_v14  ;;  %v12399_v13 = vmax.f32 %v24486_v12, %v11614_v19  ;;  %v19536_v6 = vld [vmem:[%s20524_s8 + $0x7f8] sm:$0xff]  }
 0x35b   : > { %v14841_v41 = vmax.f32 %v14641_v18, 0.0  ;;  %v18793_v23 = vpop.f32.mrf.mxu0  ;;  %18888 = vmatmul.mubr.msk.bf16.gmra.mxu0 %vm7385_vm2, %v19532_v15  ;;  %v19003_v24 = vpop.f32.mrf.mxu1  ;;  %19098 = vmatmul.mubr.msk.bf16.gmra.mxu1 %vm7385_vm2, %v19533_v16  ;;  %v19537_v25 = vld [vmem:[%s20524_s8 + $0xb18] sm:$0xff]   ;;  %v19538_v18 = vld [vmem:[%s20524_s8 + $0x800] sm:$0xff]   ;;  %v24490_v12 = vmax.f32 %v20822_v44, %v20824_v45  ;;  %v24491_v44 = vmax.f32 %v20828_v47, %v20831_v48  ;;  %v24492_v47 = vmax.f32 %v20838_v50, %v20840_v51 }
 0x35c   : > { %15845 = vst.msk [vmem:[%s22364_s22 + $0x4] sm:$0xf] %vm15843_vm3, %v17734_v9  ;;  %v14839_v17 = vmax.f32 %v14639_v57, 0.0  ;;  %v14642_v52 = vadd.f32 %v22344_v38, %v14435_v30  ;;  %v14433_v63 = vmax.f32 %v12399_v13, %v13648_v8  ;;  %v12404_v28 = vmax.f32 %v24487_v0, %v18793_v23  ;;  %18891 = vmatprep.mubr.msk.bf16.mxu0 %vm7385_vm2, %v19534_v22  ;;  %v19539_v8 = vld [vmem:[%s20524_s8 + $0xb20] sm:$0xff]  }
 0x35d   : > { %19101 = vmatprep.mubr.msk.bf16.mxu1 %vm7385_vm2, %v19535_v7  ;;  %v17739_v29 = vpack.c.bf16 %v14841_v41, %v14841_v41  ;;  %v11627_v43 = vpop.f32.mrf.mxu0  ;;  %v13661_v54 = vpop.f32.mrf.mxu1  ;;  %v24489_v22 = vmax.f32 %v20814_v39, %v20816_v40  ;;  %v24493_v50 = vmax.f32 %v20846_v55, %v20848_v56 }
 0x35e   : > { %v17737_v33 = vpack.c.bf16 %v14839_v17, %v14839_v17  ;;  %v14842_v21 = vmax.f32 %v14642_v52, 0.0  ;;  %v14640_v1 = vadd.f32 %v22344_v38, %v14433_v63  ;;  %v14438_v14 = vmax.f32 %v12404_v28, %v19003_v24 }
 0x35f   : > { %15850 = vst.msk [vmem:[%s22364_s22 + $0x18] sm:$0xf] %vm15843_vm3, %v17739_v29  ;;  %v12402_v32 = vmax.f32 %v24488_v31, %v11627_v43  ;;  %v18794_v15 = vpop.f32.mrf.mxu0  ;;  %v19004_v16 = vpop.f32.mrf.mxu1 }
 0x360   : > { %15848 = vst.msk [vmem:[%s22364_s22 + $0x10] sm:$0xf] %vm15843_vm3, %v17737_v33  ;;  %v17740_v2 = vpack.c.bf16 %v14842_v21, %v14842_v21  ;;  %v14840_v3 = vmax.f32 %v14640_v1, 0.0  ;;  %v14645_v26 = vadd.f32 %v22344_v38, %v14438_v14  ;;  %v12405_v7 = vmax.f32 %v24489_v22, %v18794_v15  ;;  %v19540_v1 = vld [vmem:[%s20524_s8 + $0x808] sm:$0xff]  }
 0x361   : > { %v14436_v19 = vmax.f32 %v12402_v32, %v13661_v54  ;;  %v11630_v34 = vpop.f32.mrf.mxu0  ;;  %v13664_v35 = vpop.f32.mrf.mxu1  ;;  %v19541_v14 = vld [vmem:[%s20524_s8 + $0xb28] sm:$0xff]  }
 0x362   : > { %15851 = vst.msk [vmem:[%s22364_s22 + $0x1c] sm:$0xf] %vm15843_vm3, %v17740_v2  ;;  %v17738_v9 = vpack.c.bf16 %v14840_v3, %v14840_v3  ;;  %v14845_v57 = vmax.f32 %v14645_v26, 0.0  ;;  %v14439_v30 = vmax.f32 %v12405_v7, %v19004_v16  ;;  %v12403_v13 = vmax.f32 %v24490_v12, %v11630_v34 }
 0x363   : > { %v14643_v41 = vadd.f32 %v22344_v38, %v14436_v19  ;;  %v18797_v39 = vpop.f32.mrf.mxu0  ;;  %18892 = vmatmul.mubr.msk.bf16.gmra.mxu0 %vm7385_vm2, %v19536_v6  ;;  %v19007_v40 = vpop.f32.mrf.mxu1  ;;  %19102 = vmatmul.mubr.msk.bf16.gmra.mxu1 %vm7385_vm2, %v19537_v25  ;;  %v19542_v6 = vld [vmem:[%s20524_s8 + $0x810] sm:$0xff]  }
 0x364   : > { %15849 = vst.msk [vmem:[%s22364_s22 + $0x14] sm:$0xf] %vm15843_vm3, %v17738_v9  ;;  %v17743_v23 = vpack.c.bf16 %v14845_v57, %v14845_v57  ;;  %v14646_v24 = vadd.f32 %v22344_v38, %v14439_v30  ;;  %v14437_v17 = vmax.f32 %v12403_v13, %v13664_v35  ;;  %v12408_v45 = vmax.f32 %v24491_v44, %v18797_v39  ;;  %v19543_v25 = vld [vmem:[%s20524_s8 + $0xb30] sm:$0xff]   ;;  %v19545_v44 = vld [vmem:[%s20524_s8 + $0xb38] sm:$0xff]  }
 0x365   : > { %18895 = vmatprep.mubr.msk.bf16.mxu0 %vm7385_vm2, %v19538_v18  ;;  %v14843_v52 = vmax.f32 %v14643_v41, 0.0  ;;  %v11643_v63 = vpop.f32.mrf.mxu0  ;;  %v13677_v0 = vpop.f32.mrf.mxu1  ;;  %19105 = vmatprep.mubr.msk.bf16.mxu1 %vm7385_vm2, %v19539_v8  ;;  %v24494_v18 = vmax.f32 %v20854_v60, %v20856_v61  ;;  %v24495_v57 = vmax.f32 %v20860_v4, %v20863_v5  ;;  %v24496_v4 = vmax.f32 %v20870_v11, %v20872_v20  ;;  %v19547_v11 = vld [vmem:[%s20524_s8 + $0xb40] sm:$0xff]  }
 0x366   : > { %15854 = vst.msk [vmem:[%s22364_s22 + $0x28] sm:$0xf] %vm15843_vm3, %v17743_v23  ;;  %v14846_v28 = vmax.f32 %v14646_v24, 0.0  ;;  %v14644_v29 = vadd.f32 %v22344_v38, %v14437_v17  ;;  %v14442_v43 = vmax.f32 %v12408_v45, %v19007_v40  ;;  %v12406_v48 = vmax.f32 %v24492_v47, %v11643_v63  ;;  %v19544_v17 = vld [vmem:[%s20524_s8 + $0x818] sm:$0xff]  }
 0x367   : > { %v17741_v54 = vpack.c.bf16 %v14843_v52, %v14843_v52  ;;  %v18798_v33 = vpop.f32.mrf.mxu0  ;;  %v19008_v21 = vpop.f32.mrf.mxu1 }
 0x368   : > { %v17744_v31 = vpack.c.bf16 %v14846_v28, %v14846_v28  ;;  %v14844_v32 = vmax.f32 %v14644_v29, 0.0  ;;  %v14649_v15 = vadd.f32 %v22344_v38, %v14442_v43  ;;  %v14440_v16 = vmax.f32 %v12406_v48, %v13677_v0  ;;  %v19546_v29 = vld [vmem:[%s20524_s8 + $0x820] sm:$0xff]  }
 0x369   : > { %15852 = vst.msk [vmem:[%s22364_s22 + $0x20] sm:$0xf] %vm15843_vm3, %v17741_v54  ;;  %v12409_v51 = vmax.f32 %v24493_v50, %v18798_v33  ;;  %v11646_v2 = vpop.f32.mrf.mxu0  ;;  %v13680_v3 = vpop.f32.mrf.mxu1  ;;  %v24497_v0 = vmax.f32 %v20878_v36, %v20880_v37 }
 0x36a   : > { %15855 = vst.msk [vmem:[%s22364_s22 + $0x2c] sm:$0xf] %vm15843_vm3, %v17744_v31  ;;  %v17742_v26 = vpack.c.bf16 %v14844_v32, %v14844_v32  ;;  %v14849_v22 = vmax.f32 %v14649_v15, 0.0  ;;  %v14647_v7 = vadd.f32 %v22344_v38, %v14440_v16  ;;  %v12407_v19 = vmax.f32 %v24494_v18, %v11646_v2  ;;  %v19549_v18 = vld [vmem:[%s20524_s8 + $0xb48] sm:$0xff]  }
 0x36b   : > { %v14443_v34 = vmax.f32 %v12409_v51, %v19008_v21  ;;  %v18801_v35 = vpop.f32.mrf.mxu0  ;;  %18896 = vmatmul.mubr.msk.bf16.gmra.mxu0 %vm7385_vm2, %v19540_v1  ;;  %v19011_v8 = vpop.f32.mrf.mxu1  ;;  %19106 = vmatmul.mubr.msk.bf16.gmra.mxu1 %vm7385_vm2, %v19541_v14  ;;  %v24498_v1 = vmax.f32 %v20886_v53, %v20888_v58  ;;  %v24499_v16 = vmax.f32 %v20892_v27, %v20895_v10 }
 0x36c   : > { %15853 = vst.msk [vmem:[%s22364_s22 + $0x24] sm:$0xf] %vm15843_vm3, %v17742_v26  ;;  %v17747_v55 = vpack.c.bf16 %v14849_v22, %v14849_v22  ;;  %v14847_v56 = vmax.f32 %v14647_v7, 0.0  ;;  %v14441_v9 = vmax.f32 %v12407_v19, %v13680_v3  ;;  %v12412_v60 = vmax.f32 %v24495_v57, %v18801_v35  ;;  %18899 = vmatprep.mubr.msk.bf16.mxu0 %vm7385_vm2, %v19542_v6  ;;  %v19548_v7 = vld [vmem:[%s20524_s8 + $0x828] sm:$0xff]  }
 0x36d   : > { %19109 = vmatprep.mubr.msk.bf16.mxu1 %vm7385_vm2, %v19543_v25  ;;  %v14650_v61 = vadd.f32 %v22344_v38, %v14443_v34  ;;  %v11659_v30 = vpop.f32.mrf.mxu0  ;;  %v13693_v12 = vpop.f32.mrf.mxu1  ;;  %v24500_v10 = vmax.f32 %v20902_v62, %v20904_v59  ;;  %v19551_v62 = vld [vmem:[%s20524_s8 + $0xb50] sm:$0xff]  }
 0x36e   : > { %15858 = vst.msk [vmem:[%s22364_s22 + $0x38] sm:$0xf] %vm15843_vm3, %v17747_v55  ;;  %v17745_v13 = vpack.c.bf16 %v14847_v56, %v14847_v56  ;;  %v14648_v41 = vadd.f32 %v22344_v38, %v14441_v9  ;;  %v14446_v39 = vmax.f32 %v12412_v60, %v19011_v8  ;;  %v12410_v5 = vmax.f32 %v24496_v4, %v11659_v30  ;;  %v19550_v56 = vld [vmem:[%s20524_s8 + $0x830] sm:$0xff]  }
 0x36f   : > { %v14850_v40 = vmax.f32 %v14650_v61, 0.0  ;;  %v18802_v23 = vpop.f32.mrf.mxu0  ;;  %v19012_v24 = vpop.f32.mrf.mxu1  ;;  %v24501_v8 = vmax.f32 %v20910_v49, %v20912_v46 }
 0x370   : > { %15856 = vst.msk [vmem:[%s22364_s22 + $0x30] sm:$0xf] %vm15843_vm3, %v17745_v13  ;;  %v14848_v45 = vmax.f32 %v14648_v41, 0.0  ;;  %v14653_v52 = vadd.f32 %v22344_v38, %v14446_v39  ;;  %v14444_v63 = vmax.f32 %v12410_v5, %v13693_v12  ;;  %v12413_v28 = vmax.f32 %v24497_v0, %v18802_v23  ;;  %v24502_v12 = vld [vmem:[#allocation3_spill] sm:$0xff] }
 0x371   : > { %v17748_v20 = vpack.c.bf16 %v14850_v40, %v14850_v40  ;;  %v11662_v43 = vpop.f32.mrf.mxu0  ;;  %v13696_v47 = vpop.f32.mrf.mxu1  ;;  %v24503_v13 = vmax.f32 %v20918_v42, %v24502_v12  ;;  %v24504_v42 = vld [vmem:[#allocation4_spill] sm:$0xff] }
 0x372   : > { %v17746_v48 = vpack.c.bf16 %v14848_v45, %v14848_v45  ;;  %v14853_v54 = vmax.f32 %v14653_v52, 0.0  ;;  %v14651_v33 = vadd.f32 %v22344_v38, %v14444_v63  ;;  %v14447_v21 = vmax.f32 %v12413_v28, %v19012_v24  ;;  %v24505_v24 = vld [vmem:[#allocation5_spill] sm:$0xff] }
 0x373   : > { %15859 = vst.msk [vmem:[%s22364_s22 + $0x3c] sm:$0xf] %vm15843_vm3, %v17748_v20  ;;  %v12411_v14 = vmax.f32 %v24498_v1, %v11662_v43  ;;  %v18805_v36 = vpop.f32.mrf.mxu0  ;;  %18900 = vmatmul.mubr.msk.bf16.gmra.mxu0 %vm7385_vm2, %v19544_v17  ;;  %v19015_v37 = vpop.f32.mrf.mxu1  ;;  %19110 = vmatmul.mubr.msk.bf16.gmra.mxu1 %vm7385_vm2, %v19545_v44  ;;  %v24506_v17 = vmax.f32 %v24504_v42, %v24505_v24 }
 0x374   : > { %15857 = vst.msk [vmem:[%s22364_s22 + $0x34] sm:$0xf] %vm15843_vm3, %v17746_v48  ;;  %v17751_v31 = vpack.c.bf16 %v14853_v54, %v14853_v54  ;;  %v14851_v32 = vmax.f32 %v14651_v33, 0.0  ;;  %v14654_v15 = vadd.f32 %v22344_v38, %v14447_v21  ;;  %v12416_v53 = vmax.f32 %v24499_v16, %v18805_v36  ;;  %18903 = vmatprep.mubr.msk.bf16.mxu0 %vm7385_vm2, %v19546_v29  ;;  %v24507_v29 = vld [vmem:[#allocation6_spill] sm:$0xff]  ;;  %v19554_v16 = vld [vmem:[%s20524_s8 + $0x840] sm:$0xff]  }
 0x375   : > { %19113 = vmatprep.mubr.msk.bf16.mxu1 %vm7385_vm2, %v19547_v11  ;;  %v14445_v58 = vmax.f32 %v12411_v14, %v13696_v47  ;;  %v11675_v6 = vpop.f32.mrf.mxu0  ;;  %v13709_v25 = vpop.f32.mrf.mxu1  ;;  %v24508_v11 = vld [vmem:[#allocation7_spill] sm:$0xff]  ;;  %v19552_v33 = vld [vmem:[%s20524_s8 + $0x838] sm:$0xff]  }
 0x376   : > { %15862 = vst.msk [vmem:[%s22364_s22 + $0x48] sm:$0xf] %vm15843_vm3, %v17751_v31  ;;  %v17749_v50 = vpack.c.bf16 %v14851_v32, %v14851_v32  ;;  %v14854_v51 = vmax.f32 %v14654_v15, 0.0  ;;  %v14450_v2 = vmax.f32 %v12416_v53, %v19015_v37  ;;  %v12414_v27 = vmax.f32 %v24500_v10, %v11675_v6  ;;  %v19553_v21 = vld [vmem:[%s20524_s8 + $0xb58] sm:$0xff]   ;;  %v24510_v37 = vld [vmem:[#allocation8_spill] sm:$0xff]  ;;  %v24511_v31 = vld [vmem:[#allocation9_spill] sm:$0xff] }
 0x377   : > { %v14652_v3 = vadd.f32 %v22344_v38, %v14445_v58  ;;  %v18806_v26 = vpop.f32.mrf.mxu0  ;;  %v19016_v22 = vpop.f32.mrf.mxu1  ;;  %v24509_v20 = vmax.f32 %v24507_v29, %v24508_v11  ;;  %v24512_v32 = vmax.f32 %v24510_v37, %v24511_v31  ;;  %v19555_v53 = vld [vmem:[%s20524_s8 + $0xb60] sm:$0xff]   ;;  %v24513_v10 = vld [vmem:[#allocation10_spill] sm:$0xff]  ;;  %v19559_v11 = vld [vmem:[%s20524_s8 + $0xb70] sm:$0xff]  }
 0x378   : > { %15860 = vst.msk [vmem:[%s22364_s22 + $0x40] sm:$0xf] %vm15843_vm3, %v17749_v50  ;;  %v17752_v19 = vpack.c.bf16 %v14854_v51, %v14854_v51  ;;  %v14657_v34 = vadd.f32 %v22344_v38, %v14450_v2  ;;  %v14448_v35 = vmax.f32 %v12414_v27, %v13709_v25  ;;  %v12417_v55 = vmax.f32 %v24501_v8, %v18806_v26  ;;  %v24514_v27 = vld [vmem:[#allocation11_spill] sm:$0xff]  ;;  %v24516_v8 = vld [vmem:[#allocation12_spill] sm:$0xff] }
 0x379   : > { %v14852_v59 = vmax.f32 %v14652_v3, 0.0  ;;  %v11678_v9 = vpop.f32.mrf.mxu0  ;;  %v13712_v57 = vpop.f32.mrf.mxu1  ;;  %v24515_v3 = vmax.f32 %v24513_v10, %v24514_v27  ;;  %v24531_v27 = vld [vmem:[#allocation22_spill] sm:$0xff] }
 0x37a   : > { %15863 = vst.msk [vmem:[%s22364_s22 + $0x4c] sm:$0xf] %vm15843_vm3, %v17752_v19  ;;  %v14857_v60 = vmax.f32 %v14657_v34, 0.0  ;;  %v14655_v61 = vadd.f32 %v22344_v38, %v14448_v35  ;;  %v14451_v30 = vmax.f32 %v12417_v55, %v19016_v22  ;;  %v12415_v41 = vmax.f32 %v24503_v13, %v11678_v9  ;;  %v24517_v55 = vld [vmem:[#allocation13_spill] sm:$0xff]  ;;  %v24519_v13 = vld [vmem:[#allocation14_spill] sm:$0xff] }
 0x37b   : > { %v17750_v39 = vpack.c.bf16 %v14852_v59, %v14852_v59  ;;  %v18809_v46 = vpop.f32.mrf.mxu0  ;;  %18904 = vmatmul.mubr.msk.bf16.gmra.mxu0 %vm7385_vm2, %v19548_v7  ;;  %v19019_v49 = vpop.f32.mrf.mxu1  ;;  %19114 = vmatmul.mubr.msk.bf16.gmra.mxu1 %vm7385_vm2, %v19549_v18 }
 0x37c   : > { %v17755_v4 = vpack.c.bf16 %v14857_v60, %v14857_v60  ;;  %v14855_v5 = vmax.f32 %v14655_v61, 0.0  ;;  %v14658_v40 = vadd.f32 %v22344_v38, %v14451_v30  ;;  %v14449_v23 = vmax.f32 %v12415_v41, %v13712_v57  ;;  %18907 = vmatprep.mubr.msk.bf16.mxu0 %vm7385_vm2, %v19550_v56  ;;  %19117 = vmatprep.mubr.msk.bf16.mxu1 %vm7385_vm2, %v19551_v62  ;;  %v24520_v41 = vld [vmem:[#allocation15_spill] sm:$0xff] }
 0x37d   : > { %15861 = vst.msk [vmem:[%s22364_s22 + $0x44] sm:$0xf] %vm15843_vm3, %v17750_v39  ;;  %v12420_v44 = vmax.f32 %v24506_v17, %v18809_v46  ;;  %v11691_v45 = vpop.f32.mrf.mxu0  ;;  %v13725_v52 = vpop.f32.mrf.mxu1  ;;  %v24518_v56 = vmax.f32 %v24516_v8, %v24517_v55  ;;  %v24521_v39 = vmax.f32 %v24519_v13, %v24520_v41  ;;  %v24522_v17 = vld [vmem:[#allocation16_spill] sm:$0xff] }
 0x37e   : > { %15866 = vst.msk [vmem:[%s22364_s22 + $0x58] sm:$0xf] %vm15843_vm3, %v17755_v4  ;;  %v17753_v63 = vpack.c.bf16 %v14855_v5, %v14855_v5  ;;  %v14858_v0 = vmax.f32 %v14658_v40, 0.0  ;;  %v14656_v28 = vadd.f32 %v22344_v38, %v14449_v23  ;;  %v12418_v43 = vmax.f32 %v24509_v20, %v11691_v45  ;;  %v19556_v5 = vld [vmem:[%s20524_s8 + $0x848] sm:$0xff]  }
 0x37f   : > { %v14454_v47 = vmax.f32 %v12420_v44, %v19019_v49  ;;  %v18810_v48 = vpop.f32.mrf.mxu0  ;;  %v19020_v54 = vpop.f32.mrf.mxu1  ;;  %v19557_v40 = vld [vmem:[%s20524_s8 + $0xb68] sm:$0xff]   ;;  %v24523_v44 = vld [vmem:[#allocation17_spill] sm:$0xff] }
 0x380   : > { %15864 = vst.msk [vmem:[%s22364_s22 + $0x50] sm:$0xf] %vm15843_vm3, %v17753_v63  ;;  %v17756_v1 = vpack.c.bf16 %v14858_v0, %v14858_v0  ;;  %v14856_v14 = vmax.f32 %v14656_v28, 0.0  ;;  %v14452_v36 = vmax.f32 %v12418_v43, %v13725_v52  ;;  %v12421_v15 = vmax.f32 %v24512_v32, %v18810_v48  ;;  %v19558_v63 = vld [vmem:[%s20524_s8 + $0x850] sm:$0xff]   ;;  %v24525_v48 = vld [vmem:[#allocation18_spill] sm:$0xff] }
 0x381   : > { %v14661_v58 = vadd.f32 %v22344_v38, %v14454_v47  ;;  %v11694_v6 = vpop.f32.mrf.mxu0  ;;  %v13728_v25 = vpop.f32.mrf.mxu1  ;;  %v24524_v45 = vmax.f32 %v24522_v17, %v24523_v44 }
 0x382   : > { %15867 = vst.msk [vmem:[%s22364_s22 + $0x5c] sm:$0xf] %vm15843_vm3, %v17756_v1  ;;  %v17754_v50 = vpack.c.bf16 %v14856_v14, %v14856_v14  ;;  %v14659_v51 = vadd.f32 %v22344_v38, %v14452_v36  ;;  %v14455_v2 = vmax.f32 %v12421_v15, %v19020_v54  ;;  %v12419_v26 = vmax.f32 %v24515_v3, %v11694_v6  ;;  %v24526_v54 = vld [vmem:[#allocation19_spill] sm:$0xff]  ;;  %v24528_v15 = vld [vmem:[#allocation20_spill] sm:$0xff] }
 0x383   : > { %v14861_v22 = vmax.f32 %v14661_v58, 0.0  ;;  %v18813_v7 = vpop.f32.mrf.mxu0  ;;  %18908 = vmatmul.mubr.msk.bf16.gmra.mxu0 %vm7385_vm2, %v19552_v33  ;;  %v19023_v18 = vpop.f32.mrf.mxu1  ;;  %19118 = vmatmul.mubr.msk.bf16.gmra.mxu1 %vm7385_vm2, %v19553_v21  ;;  %v24527_v33 = vmax.f32 %v24525_v48, %v24526_v54  ;;  %v24532_v3 = vld [vmem:[#allocation23_spill] sm:$0xff]  ;;  %v24543_v54 = vld [vmem:[#allocation30_spill] sm:$0xff] }
 0x384   : > { %15865 = vst.msk [vmem:[%s22364_s22 + $0x54] sm:$0xf] %vm15843_vm3, %v17754_v50  ;;  %v14859_v19 = vmax.f32 %v14659_v51, 0.0  ;;  %v14662_v34 = vadd.f32 %v22344_v38, %v14455_v2  ;;  %v14453_v35 = vmax.f32 %v12419_v26, %v13728_v25  ;;  %v12424_v62 = vmax.f32 %v24518_v56, %v18813_v7  ;;  %18911 = vmatprep.mubr.msk.bf16.mxu0 %vm7385_vm2, %v19554_v16  ;;  %v24529_v16 = vld [vmem:[#allocation21_spill] sm:$0xff] }
 0x385   : > { %19121 = vmatprep.mubr.msk.bf16.mxu1 %vm7385_vm2, %v19555_v53  ;;  %v17759_v59 = vpack.c.bf16 %v14861_v22, %v14861_v22  ;;  %v11707_v9 = vpop.f32.mrf.mxu0  ;;  %v13741_v57 = vpop.f32.mrf.mxu1  ;;  %v24530_v53 = vmax.f32 %v24528_v15, %v24529_v16  ;;  %v24533_v26 = vmax.f32 %v24531_v27, %v24532_v3 }
 0x386   : > { %v17757_v60 = vpack.c.bf16 %v14859_v19, %v14859_v19  ;;  %v14862_v61 = vmax.f32 %v14662_v34, 0.0  ;;  %v14660_v30 = vadd.f32 %v22344_v38, %v14453_v35  ;;  %v14458_v12 = vmax.f32 %v12424_v62, %v19023_v18  ;;  %v19560_v34 = vld [vmem:[%s20524_s8 + $0x858] sm:$0xff]  }
 0x387   : > { %15870 = vst.msk [vmem:[%s22364_s22 + $0x68] sm:$0xf] %vm15843_vm3, %v17759_v59  ;;  %v12422_v46 = vmax.f32 %v24521_v39, %v11707_v9  ;;  %v18814_v49 = vpop.f32.mrf.mxu0  ;;  %v19024_v4 = vpop.f32.mrf.mxu1  ;;  %v19561_v35 = vld [vmem:[%s20524_s8 + $0xb78] sm:$0xff]   ;;  %v19562_v59 = vld [vmem:[%s20524_s8 + $0x860] sm:$0xff]  }
 0x388   : > { %15868 = vst.msk [vmem:[%s22364_s22 + $0x60] sm:$0xf] %vm15843_vm3, %v17757_v60  ;;  %v17760_v23 = vpack.c.bf16 %v14862_v61, %v14862_v61  ;;  %v14860_v42 = vmax.f32 %v14660_v30, 0.0  ;;  %v14665_v24 = vadd.f32 %v22344_v38, %v14458_v12  ;;  %v12425_v52 = vmax.f32 %v24524_v45, %v18814_v49  ;;  %v19563_v9 = vld [vmem:[%s20524_s8 + $0xb80] sm:$0xff]   ;;  %v24535_v60 = vld [vmem:[#allocation25_spill] sm:$0xff]  ;;  %v24537_v49 = vld [vmem:[#allocation26_spill] sm:$0xff] }
 0x389   : > { %v14456_v0 = vmax.f32 %v12422_v46, %v13741_v57  ;;  %v11710_v28 = vpop.f32.mrf.mxu0  ;;  %v13744_v29 = vpop.f32.mrf.mxu1  ;;  %v24534_v57 = vld [vmem:[#allocation24_spill] sm:$0xff] }
 0x38a   : > { %15871 = vst.msk [vmem:[%s22364_s22 + $0x6c] sm:$0xf] %vm15843_vm3, %v17760_v23  ;;  %v17758_v20 = vpack.c.bf16 %v14860_v42, %v14860_v42  ;;  %v14865_v43 = vmax.f32 %v14665_v24, 0.0  ;;  %v14459_v47 = vmax.f32 %v12425_v52, %v19024_v4  ;;  %v12423_v21 = vmax.f32 %v24527_v33, %v11710_v28  ;;  %v24538_v4 = vld [vmem:[#allocation27_spill] sm:$0xff]  ;;  %v24540_v52 = vld [vmem:[#allocation28_spill] sm:$0xff] }
 0x38b   : > { %v14663_v1 = vadd.f32 %v22344_v38, %v14456_v0  ;;  %v18817_v14 = vpop.f32.mrf.mxu0  ;;  %18912 = vmatmul.mubr.msk.bf16.gmra.mxu0 %vm7385_vm2, %v19556_v5  ;;  %v19027_v36 = vpop.f32.mrf.mxu1  ;;  %19122 = vmatmul.mubr.msk.bf16.gmra.mxu1 %vm7385_vm2, %v19557_v40  ;;  %v24536_v61 = vmax.f32 %v24534_v57, %v24535_v60  ;;  %v24539_v5 = vmax.f32 %v24537_v49, %v24538_v4  ;;  %v24544_v33 = vld [vmem:[#allocation31_spill] sm:$0xff]  ;;  %v24552_v57 = vld [vmem:[#allocation36_spill] sm:$0xff]  ;;  %v24553_v60 = vld [vmem:[#allocation37_spill] sm:$0xff] }
 0x38c   : > { %15869 = vst.msk [vmem:[%s22364_s22 + $0x64] sm:$0xf] %vm15843_vm3, %v17758_v20  ;;  %v17763_v37 = vpack.c.bf16 %v14865_v43, %v14865_v43  ;;  %v14666_v31 = vadd.f32 %v22344_v38, %v14459_v47  ;;  %v14457_v32 = vmax.f32 %v12423_v21, %v13744_v29  ;;  %v12428_v58 = vmax.f32 %v24530_v53, %v18817_v14  ;;  %v24555_v4 = vld [vmem:[#allocation38_spill] sm:$0xff] }
 0x38d   : > { %18915 = vmatprep.mubr.msk.bf16.mxu0 %vm7385_vm2, %v19558_v63  ;;  %v14863_v6 = vmax.f32 %v14663_v1, 0.0  ;;  %v11723_v25 = vpop.f32.mrf.mxu0  ;;  %v13757_v50 = vpop.f32.mrf.mxu1  ;;  %19125 = vmatprep.mubr.msk.bf16.mxu1 %vm7385_vm2, %v19559_v11  ;;  %v24541_v63 = vld [vmem:[#allocation29_spill] sm:$0xff]  ;;  %v24545_v21 = vmax.f32 %v24543_v54, %v24544_v33 }
 0x38e   : > { %15874 = vst.msk [vmem:[%s22364_s22 + $0x78] sm:$0xf] %vm15843_vm3, %v17763_v37  ;;  %v14866_v51 = vmax.f32 %v14666_v31, 0.0  ;;  %v14664_v2 = vadd.f32 %v22344_v38, %v14457_v32  ;;  %v14462_v10 = vmax.f32 %v12428_v58, %v19027_v36  ;;  %v12426_v22 = vmax.f32 %v24533_v26, %v11723_v25  ;;  %v19564_v31 = vld [vmem:[%s20524_s8 + $0x868] sm:$0xff]  }
 0x38f   : > { %v17761_v7 = vpack.c.bf16 %v14863_v6, %v14863_v6  ;;  %v18818_v18 = vpop.f32.mrf.mxu0  ;;  %v19028_v19 = vpop.f32.mrf.mxu1  ;;  %v24542_v0 = vmax.f32 %v24540_v52, %v24541_v63  ;;  %v19565_v32 = vld [vmem:[%s20524_s8 + $0xb88] sm:$0xff]   ;;  %v24547_v6 = vld [vmem:[#allocation33_spill] sm:$0xff] }
 0x390   : > { %v17764_v8 = vpack.c.bf16 %v14866_v51, %v14866_v51  ;;  %v14864_v55 = vmax.f32 %v14664_v2, 0.0  ;;  %v14669_v56 = vadd.f32 %v22344_v38, %v14462_v10  ;;  %v14460_v62 = vmax.f32 %v12426_v22, %v13757_v50  ;;  %v24546_v58 = vld [vmem:[#allocation32_spill] sm:$0xff]  ;;  %v19566_v51 = vld [vmem:[%s20524_s8 + $0x870] sm:$0xff]  }
 0x391   : > { %15872 = vst.msk [vmem:[%s22364_s22 + $0x70] sm:$0xf] %vm15843_vm3, %v17761_v7  ;;  %v12429_v30 = vmax.f32 %v24536_v61, %v18818_v18  ;;  %v11726_v12 = vpop.f32.mrf.mxu0  ;;  %v13760_v13 = vpop.f32.mrf.mxu1  ;;  %v24548_v25 = vmax.f32 %v24546_v58, %v24547_v6  ;;  %v19567_v2 = vld [vmem:[%s20524_s8 + $0xb90] sm:$0xff]   ;;  %v24554_v61 = vmax.f32 %v24552_v57, %v24553_v60 }
 0x392   : > { %15875 = vst.msk [vmem:[%s22364_s22 + $0x7c] sm:$0xf] %vm15843_vm3, %v17764_v8  ;;  %v17762_v41 = vpack.c.bf16 %v14864_v55, %v14864_v55  ;;  %v14869_v39 = vmax.f32 %v14669_v56, 0.0  ;;  %v14667_v46 = vadd.f32 %v22344_v38, %v14460_v62  ;;  %v12427_v40 = vmax.f32 %v24539_v5, %v11726_v12  ;;  %v24556_v5 = vld [vmem:[#allocation39_spill] sm:$0xff] }
 0x393   : > { %v14463_v23 = vmax.f32 %v12429_v30, %v19028_v19  ;;  %v18821_v42 = vpop.f32.mrf.mxu0  ;;  %18916 = vmatmul.mubr.msk.bf16.gmra.mxu0 %vm7385_vm2, %v19560_v34  ;;  %v19031_v24 = vpop.f32.mrf.mxu1  ;;  %19126 = vmatmul.mubr.msk.bf16.gmra.mxu1 %vm7385_vm2, %v19561_v35  ;;  %v24549_v19 = vld [vmem:[#allocation34_spill] sm:$0xff]  ;;  %v24550_v34 = vld [vmem:[#allocation35_spill] sm:$0xff] }
 0x394   : > { %15873 = vst.msk [vmem:[%s22364_s22 + $0x74] sm:$0xf] %vm15843_vm3, %v17762_v41  ;;  %v17767_v17 = vpack.c.bf16 %v14869_v39, %v14869_v39  ;;  %v14867_v44 = vmax.f32 %v14667_v46, 0.0  ;;  %v14461_v45 = vmax.f32 %v12427_v40, %v13760_v13  ;;  %v12432_v28 = vmax.f32 %v24542_v0, %v18821_v42  ;;  %18919 = vmatprep.mubr.msk.bf16.mxu0 %vm7385_vm2, %v19562_v59 }
 0x395   : > { %19129 = vmatprep.mubr.msk.bf16.mxu1 %vm7385_vm2, %v19563_v9  ;;  %v14670_v29 = vadd.f32 %v22344_v38, %v14463_v23  ;;  %v11739_v11 = vpop.f32.mrf.mxu0  ;;  %v13773_v20 = vpop.f32.mrf.mxu1  ;;  %v24551_v35 = vmax.f32 %v24549_v19, %v24550_v34  ;;  %v24557_v40 = vmax.f32 %v24555_v4, %v24556_v5  ;;  %v24567_v19 = vld [vmem:[#allocation46_spill] sm:$0xff]  ;;  %v24568_v34 = vld [vmem:[#allocation47_spill] sm:$0xff] }
 0x396   : > { %15878 = vst.msk [vmem:[%s22364_s22 + $0x88] sm:$0xf] %vm15843_vm3, %v17767_v17  ;;  %v17765_v43 = vpack.c.bf16 %v14867_v44, %v14867_v44  ;;  %v14668_v47 = vadd.f32 %v22344_v38, %v14461_v45  ;;  %v14466_v48 = vmax.f32 %v12432_v28, %v19031_v24  ;;  %v12430_v1 = vmax.f32 %v24545_v21, %v11739_v11  ;;  %v19568_v44 = vld [vmem:[%s20524_s8 + $0x878] sm:$0xff]   ;;  %v24558_v28 = vld [vmem:[#allocation40_spill] sm:$0xff] }
 0x397   : > { %v14870_v14 = vmax.f32 %v14670_v29, 0.0  ;;  %v18822_v36 = vpop.f32.mrf.mxu0  ;;  %v19032_v37 = vpop.f32.mrf.mxu1  ;;  %v19569_v45 = vld [vmem:[%s20524_s8 + $0xb98] sm:$0xff]   ;;  %v24559_v29 = vld [vmem:[#allocation41_spill] sm:$0xff] }
 0x398   : > { %15876 = vst.msk [vmem:[%s22364_s22 + $0x80] sm:$0xf] %vm15843_vm3, %v17765_v43  ;;  %v14868_v15 = vmax.f32 %v14668_v47, 0.0  ;;  %v14673_v16 = vadd.f32 %v22344_v38, %v14466_v48  ;;  %v14464_v53 = vmax.f32 %v12430_v1, %v13773_v20  ;;  %v12433_v50 = vmax.f32 %v24548_v25, %v18822_v36  ;;  %v19570_v43 = vld [vmem:[%s20524_s8 + $0x880] sm:$0xff]   ;;  %v24561_v36 = vld [vmem:[#allocation42_spill] sm:$0xff] }
 0x399   : > { %v17768_v10 = vpack.c.bf16 %v14870_v14, %v14870_v14  ;;  %v11742_v27 = vpop.f32.mrf.mxu0  ;;  %v13776_v3 = vpop.f32.mrf.mxu1  ;;  %v24560_v11 = vmax.f32 %v24558_v28, %v24559_v29  ;;  %v19571_v47 = vld [vmem:[%s20524_s8 + $0xba0] sm:$0xff]  }
 0x39a   : > { %v17766_v26 = vpack.c.bf16 %v14868_v15, %v14868_v15  ;;  %v14873_v22 = vmax.f32 %v14673_v16, 0.0  ;;  %v14671_v7 = vadd.f32 %v22344_v38, %v14464_v53  ;;  %v14467_v18 = vmax.f32 %v12433_v50, %v19032_v37  ;;  %v24562_v37 = vld [vmem:[#allocation43_spill] sm:$0xff] }
 0x39b   : > { %15879 = vst.msk [vmem:[%s22364_s22 + $0x8c] sm:$0xf] %vm15843_vm3, %v17768_v10  ;;  %v12431_v8 = vmax.f32 %v24551_v35, %v11742_v27  ;;  %v18825_v55 = vpop.f32.mrf.mxu0  ;;  %18920 = vmatmul.mubr.msk.bf16.gmra.mxu0 %vm7385_vm2, %v19564_v31  ;;  %v19035_v56 = vpop.f32.mrf.mxu1  ;;  %19130 = vmatmul.mubr.msk.bf16.gmra.mxu1 %vm7385_vm2, %v19565_v32  ;;  %v24563_v31 = vmax.f32 %v24561_v36, %v24562_v37 }
 0x39c   : > { %15877 = vst.msk [vmem:[%s22364_s22 + $0x84] sm:$0xf] %vm15843_vm3, %v17766_v26  ;;  %v17771_v62 = vpack.c.bf16 %v14873_v22, %v14873_v22  ;;  %v14871_v59 = vmax.f32 %v14671_v7, 0.0  ;;  %v14674_v9 = vadd.f32 %v22344_v38, %v14467_v18  ;;  %v12436_v30 = vmax.f32 %v24554_v61, %v18825_v55  ;;  %18923 = vmatprep.mubr.msk.bf16.mxu0 %vm7385_vm2, %v19566_v51  ;;  %v24564_v51 = vld [vmem:[#allocation44_spill] sm:$0xff] }
 0x39d   : > { %19133 = vmatprep.mubr.msk.bf16.mxu1 %vm7385_vm2, %v19567_v2  ;;  %v14465_v12 = vmax.f32 %v12431_v8, %v13776_v3  ;;  %v11755_v13 = vpop.f32.mrf.mxu0  ;;  %v13789_v41 = vpop.f32.mrf.mxu1  ;;  %v24565_v2 = vld [vmem:[#allocation45_spill] sm:$0xff]  ;;  %v24569_v35 = vmax.f32 %v24567_v19, %v24568_v34  ;;  %v19579_v34 = vld [vmem:[%s20524_s8 + $0xbc0] sm:$0xff]  }
 0x39e   : > { %15882 = vst.msk [vmem:[%s22364_s22 + $0x98] sm:$0xf] %vm15843_vm3, %v17771_v62  ;;  %v17769_v39 = vpack.c.bf16 %v14871_v59, %v14871_v59  ;;  %v14874_v46 = vmax.f32 %v14674_v9, 0.0  ;;  %v14470_v49 = vmax.f32 %v12436_v30, %v19035_v56  ;;  %v12434_v23 = vmax.f32 %v24557_v40, %v11755_v13  ;;  %v19572_v59 = vld [vmem:[%s20524_s8 + $0x888] sm:$0xff]  }
 0x39f   : > { %v14672_v42 = vadd.f32 %v22344_v38, %v14465_v12  ;;  %v18826_v24 = vpop.f32.mrf.mxu0  ;;  %v19036_v17 = vpop.f32.mrf.mxu1  ;;  %v24566_v10 = vmax.f32 %v24564_v51, %v24565_v2  ;;  %v19573_v9 = vld [vmem:[%s20524_s8 + $0xba8] sm:$0xff]   ;;  %v24571_v12 = vld [vmem:[#allocation49_spill] sm:$0xff] }
 0x3a0   : > { %15880 = vst.msk [vmem:[%s22364_s22 + $0x90] sm:$0xf] %vm15843_vm3, %v17769_v39  ;;  %v17772_v52 = vpack.c.bf16 %v14874_v46, %v14874_v46  ;;  %v14677_v63 = vadd.f32 %v22344_v38, %v14470_v49  ;;  %v14468_v0 = vmax.f32 %v12434_v23, %v13789_v41  ;;  %v12437_v20 = vmax.f32 %v24560_v11, %v18826_v24  ;;  %v24570_v30 = vld [vmem:[#allocation48_spill] sm:$0xff]  ;;  %v19574_v39 = vld [vmem:[%s20524_s8 + $0x890] sm:$0xff]   ;;  %v24573_v24 = vld [vmem:[#allocation50_spill] sm:$0xff] }
 0x3a1   : > { %v14872_v48 = vmax.f32 %v14672_v42, 0.0  ;;  %v11758_v54 = vpop.f32.mrf.mxu0  ;;  %v13792_v33 = vpop.f32.mrf.mxu1  ;;  %v24572_v13 = vmax.f32 %v24570_v30, %v24571_v12  ;;  %v19575_v46 = vld [vmem:[%s20524_s8 + $0xbb0] sm:$0xff]  }
 0x3a2   : > { %15883 = vst.msk [vmem:[%s22364_s22 + $0x9c] sm:$0xf] %vm15843_vm3, %v17772_v52  ;;  %v14877_v21 = vmax.f32 %v14677_v63, 0.0  ;;  %v14675_v1 = vadd.f32 %v22344_v38, %v14468_v0  ;;  %v14471_v14 = vmax.f32 %v12437_v20, %v19036_v17  ;;  %v12435_v32 = vmax.f32 %v24563_v31, %v11758_v54  ;;  %v24574_v17 = vld [vmem:[#allocation51_spill] sm:$0xff]  ;;  %v24576_v20 = vld [vmem:[#allocation52_spill] sm:$0xff]  ;;  %v24579_v31 = vld [vmem:[#allocation54_spill] sm:$0xff] }
 0x3a3   : > { %v17770_v15 = vpack.c.bf16 %v14872_v48, %v14872_v48  ;;  %v18829_v16 = vpop.f32.mrf.mxu0  ;;  %18924 = vmatmul.mubr.msk.bf16.gmra.mxu0 %vm7385_vm2, %v19568_v44  ;;  %v19039_v53 = vpop.f32.mrf.mxu1  ;;  %19134 = vmatmul.mubr.msk.bf16.gmra.mxu1 %vm7385_vm2, %v19569_v45  ;;  %v24575_v44 = vmax.f32 %v24573_v24, %v24574_v17  ;;  %v24591_v17 = vld [vmem:[#allocation62_spill] sm:$0xff] }
 0x3a4   : > { %v17775_v58 = vpack.c.bf16 %v14877_v21, %v14877_v21  ;;  %v14875_v6 = vmax.f32 %v14675_v1, 0.0  ;;  %v14678_v25 = vadd.f32 %v22344_v38, %v14471_v14  ;;  %v14469_v50 = vmax.f32 %v12435_v32, %v13792_v33  ;;  %18927 = vmatprep.mubr.msk.bf16.mxu0 %vm7385_vm2, %v19570_v43  ;;  %19137 = vmatprep.mubr.msk.bf16.mxu1 %vm7385_vm2, %v19571_v47  ;;  %v24577_v43 = vld [vmem:[#allocation53_spill] sm:$0xff]  ;;  %v24580_v32 = vld [vmem:[#allocation55_spill] sm:$0xff] }
 0x3a5   : > { %15881 = vst.msk [vmem:[%s22364_s22 + $0x94] sm:$0xf] %vm15843_vm3, %v17770_v15  ;;  %v12440_v27 = vmax.f32 %v24566_v10, %v18829_v16  ;;  %v11771_v3 = vpop.f32.mrf.mxu0  ;;  %v13805_v26 = vpop.f32.mrf.mxu1  ;;  %v24578_v47 = vmax.f32 %v24576_v20, %v24577_v43  ;;  %v24581_v15 = vmax.f32 %v24579_v31, %v24580_v32  ;;  %v24582_v10 = vld [vmem:[#allocation56_spill] sm:$0xff] }
 0x3a6   : > { %15886 = vst.msk [vmem:[%s22364_s22 + $0xa8] sm:$0xf] %vm15843_vm3, %v17775_v58  ;;  %v17773_v22 = vpack.c.bf16 %v14875_v6, %v14875_v6  ;;  %v14878_v7 = vmax.f32 %v14678_v25, 0.0  ;;  %v14676_v18 = vadd.f32 %v22344_v38, %v14469_v50  ;;  %v12438_v8 = vmax.f32 %v24569_v35, %v11771_v3  ;;  %v19576_v6 = vld [vmem:[%s20524_s8 + $0x898] sm:$0xff]  }
 0x3a7   : > { %v14474_v55 = vmax.f32 %v12440_v27, %v19039_v53  ;;  %v18830_v56 = vpop.f32.mrf.mxu0  ;;  %v19040_v62 = vpop.f32.mrf.mxu1  ;;  %v19577_v25 = vld [vmem:[%s20524_s8 + $0xbb8] sm:$0xff]   ;;  %v24583_v27 = vld [vmem:[#allocation57_spill] sm:$0xff] }
 0x3a8   : > { %15884 = vst.msk [vmem:[%s22364_s22 + $0xa0] sm:$0xf] %vm15843_vm3, %v17773_v22  ;;  %v17776_v57 = vpack.c.bf16 %v14878_v7, %v14878_v7  ;;  %v14876_v60 = vmax.f32 %v14676_v18, 0.0  ;;  %v14472_v61 = vmax.f32 %v12438_v8, %v13805_v26  ;;  %v12441_v41 = vmax.f32 %v24572_v13, %v18830_v56  ;;  %v19578_v22 = vld [vmem:[%s20524_s8 + $0x8a0] sm:$0xff]   ;;  %v24585_v56 = vld [vmem:[#allocation58_spill] sm:$0xff] }
 0x3a9   : > { %v14681_v49 = vadd.f32 %v22344_v38, %v14474_v55  ;;  %v11774_v4 = vpop.f32.mrf.mxu0  ;;  %v13808_v5 = vpop.f32.mrf.mxu1  ;;  %v24584_v3 = vmax.f32 %v24582_v10, %v24583_v27 }
 0x3aa   : > { %15887 = vst.msk [vmem:[%s22364_s22 + $0xac] sm:$0xf] %vm15843_vm3, %v17776_v57  ;;  %v17774_v40 = vpack.c.bf16 %v14876_v60, %v14876_v60  ;;  %v14679_v23 = vadd.f32 %v22344_v38, %v14472_v61  ;;  %v14475_v42 = vmax.f32 %v12441_v41, %v19040_v62  ;;  %v12439_v45 = vmax.f32 %v24575_v44, %v11774_v4  ;;  %v24586_v62 = vld [vmem:[#allocation59_spill] sm:$0xff]  ;;  %v24588_v41 = vld [vmem:[#allocation60_spill] sm:$0xff] }
 0x3ab   : > { %v14881_v52 = vmax.f32 %v14681_v49, 0.0  ;;  %v18833_v63 = vpop.f32.mrf.mxu0  ;;  %18928 = vmatmul.mubr.msk.bf16.gmra.mxu0 %vm7385_vm2, %v19572_v59  ;;  %v19043_v0 = vpop.f32.mrf.mxu1  ;;  %19138 = vmatmul.mubr.msk.bf16.gmra.mxu1 %vm7385_vm2, %v19573_v9  ;;  %v24587_v59 = vmax.f32 %v24585_v56, %v24586_v62  ;;  %v24592_v44 = vld [vmem:[#allocation63_spill] sm:$0xff]  ;;  %v24603_v62 = vld [vmem:[#allocation70_spill] sm:$0xff] }
 0x3ac   : > { %15885 = vst.msk [vmem:[%s22364_s22 + $0xa4] sm:$0xf] %vm15843_vm3, %v17774_v40  ;;  %v14879_v28 = vmax.f32 %v14679_v23, 0.0  ;;  %v14682_v29 = vadd.f32 %v22344_v38, %v14475_v42  ;;  %v14473_v11 = vmax.f32 %v12439_v45, %v13808_v5  ;;  %v12444_v48 = vmax.f32 %v24578_v47, %v18833_v63  ;;  %18931 = vmatprep.mubr.msk.bf16.mxu0 %vm7385_vm2, %v19574_v39  ;;  %v24589_v39 = vld [vmem:[#allocation61_spill] sm:$0xff] }
 0x3ad   : > { %19141 = vmatprep.mubr.msk.bf16.mxu1 %vm7385_vm2, %v19575_v46  ;;  %v17779_v54 = vpack.c.bf16 %v14881_v52, %v14881_v52  ;;  %v11787_v33 = vpop.f32.mrf.mxu0  ;;  %v13821_v21 = vpop.f32.mrf.mxu1  ;;  %v24590_v46 = vmax.f32 %v24588_v41, %v24589_v39  ;;  %v24593_v45 = vmax.f32 %v24591_v17, %v24592_v44 }
 0x3ae   : > { %v17777_v1 = vpack.c.bf16 %v14879_v28, %v14879_v28  ;;  %v14882_v14 = vmax.f32 %v14682_v29, 0.0  ;;  %v14680_v36 = vadd.f32 %v22344_v38, %v14473_v11  ;;  %v14478_v37 = vmax.f32 %v12444_v48, %v19043_v0  ;;  %v19580_v29 = vld [vmem:[%s20524_s8 + $0x8a8] sm:$0xff]  }
 0x3af   : > { %15890 = vst.msk [vmem:[%s22364_s22 + $0xb8] sm:$0xf] %vm15843_vm3, %v17779_v54  ;;  %v12442_v16 = vmax.f32 %v24581_v15, %v11787_v33  ;;  %v18834_v53 = vpop.f32.mrf.mxu0  ;;  %v19044_v58 = vpop.f32.mrf.mxu1  ;;  %v19581_v11 = vld [vmem:[%s20524_s8 + $0xbc8] sm:$0xff]   ;;  %v19582_v54 = vld [vmem:[%s20524_s8 + $0x8b0] sm:$0xff]  }
 0x3b0   : > { %15888 = vst.msk [vmem:[%s22364_s22 + $0xb0] sm:$0xf] %vm15843_vm3, %v17777_v1  ;;  %v17780_v50 = vpack.c.bf16 %v14882_v14, %v14882_v14  ;;  %v14880_v51 = vmax.f32 %v14680_v36, 0.0  ;;  %v14685_v2 = vadd.f32 %v22344_v38, %v14478_v37  ;;  %v12445_v26 = vmax.f32 %v24584_v3, %v18834_v53  ;;  %v19583_v33 = vld [vmem:[%s20524_s8 + $0xbd0] sm:$0xff]   ;;  %v24597_v53 = vld [vmem:[#allocation66_spill] sm:$0xff] }
 0x3b1   : > { %v14476_v7 = vmax.f32 %v12442_v16, %v13821_v21  ;;  %v11790_v18 = vpop.f32.mrf.mxu0  ;;  %v13824_v19 = vpop.f32.mrf.mxu1  ;;  %v24594_v21 = vld [vmem:[#allocation64_spill] sm:$0xff]  ;;  %v24595_v1 = vld [vmem:[#allocation65_spill] sm:$0xff] }
 0x3b2   : > { %15891 = vst.msk [vmem:[%s22364_s22 + $0xbc] sm:$0xf] %vm15843_vm3, %v17780_v50  ;;  %v17778_v35 = vpack.c.bf16 %v14880_v51, %v14880_v51  ;;  %v14885_v8 = vmax.f32 %v14685_v2, 0.0  ;;  %v14479_v55 = vmax.f32 %v12445_v26, %v19044_v58  ;;  %v12443_v9 = vmax.f32 %v24587_v59, %v11790_v18  ;;  %v24598_v58 = vld [vmem:[#allocation67_spill] sm:$0xff]  ;;  %v24600_v26 = vld [vmem:[#allocation68_spill] sm:$0xff] }
 0x3b3   : > { %v14683_v57 = vadd.f32 %v22344_v38, %v14476_v7  ;;  %v18837_v60 = vpop.f32.mrf.mxu0  ;;  %18932 = vmatmul.mubr.msk.bf16.gmra.mxu0 %vm7385_vm2, %v19576_v6  ;;  %v19047_v61 = vpop.f32.mrf.mxu1  ;;  %19142 = vmatmul.mubr.msk.bf16.gmra.mxu1 %vm7385_vm2, %v19577_v25  ;;  %v24596_v14 = vmax.f32 %v24594_v21, %v24595_v1  ;;  %v24599_v6 = vmax.f32 %v24597_v53, %v24598_v58  ;;  %v24604_v59 = vld [vmem:[#allocation71_spill] sm:$0xff]  ;;  %v24612_v21 = vld [vmem:[#allocation76_spill] sm:$0xff]  ;;  %v24613_v1 = vld [vmem:[#allocation77_spill] sm:$0xff] }
 0x3b4   : > { %15889 = vst.msk [vmem:[%s22364_s22 + $0xb4] sm:$0xf] %vm15843_vm3, %v17778_v35  ;;  %v17783_v30 = vpack.c.bf16 %v14885_v8, %v14885_v8  ;;  %v14686_v12 = vadd.f32 %v22344_v38, %v14479_v55  ;;  %v14477_v13 = vmax.f32 %v12443_v9, %v13824_v19  ;;  %v12448_v49 = vmax.f32 %v24590_v46, %v18837_v60  ;;  %v22763_v38 = vld [vmem:[%s23771_s2] ss:$0 sm:$0xff]  ;;  %v24615_v58 = vld [vmem:[#allocation78_spill] sm:$0xff] }
 0x3b5   : > { %18935 = vmatprep.mubr.msk.bf16.mxu0 %vm7385_vm2, %v19578_v22  ;;  %v14883_v4 = vmax.f32 %v14683_v57, 0.0  ;;  %v11803_v5 = vpop.f32.mrf.mxu0  ;;  %v13837_v40 = vpop.f32.mrf.mxu1  ;;  %19145 = vmatprep.mubr.msk.bf16.mxu1 %vm7385_vm2, %v19579_v34  ;;  %v24601_v22 = vld [vmem:[#allocation69_spill] sm:$0xff]  ;;  %v24605_v9 = vmax.f32 %v24603_v62, %v24604_v59 }
 0x3b6   : > { %15894 = vst.msk [vmem:[%s22364_s22 + $0xc8] sm:$0xf] %vm15843_vm3, %v17783_v30  ;;  %v14886_v23 = vmax.f32 %v14686_v12, 0.0  ;;  %v14684_v42 = vadd.f32 %v22763_v38, %v14477_v13  ;;  %v14482_v24 = vmax.f32 %v12448_v49, %v19047_v61  ;;  %v12446_v52 = vmax.f32 %v24593_v45, %v11803_v5  ;;  %v19584_v12 = vld [vmem:[%s20524_s8 + $0x8b8] sm:$0xff]   ;;  %v24606_v49 = vld [vmem:[#allocation72_spill] sm:$0xff] }
 0x3b7   : > { %v17781_v63 = vpack.c.bf16 %v14883_v4, %v14883_v4  ;;  %v18838_v0 = vpop.f32.mrf.mxu0  ;;  %v19048_v28 = vpop.f32.mrf.mxu1  ;;  %v24602_v7 = vmax.f32 %v24600_v26, %v24601_v22  ;;  %v19585_v13 = vld [vmem:[%s20524_s8 + $0xbd8] sm:$0xff]   ;;  %v24607_v4 = vld [vmem:[#allocation73_spill] sm:$0xff] }
 0x3b8   : > { %v17784_v20 = vpack.c.bf16 %v14886_v23, %v14886_v23  ;;  %v14884_v43 = vmax.f32 %v14684_v42, 0.0  ;;  %v14689_v47 = vadd.f32 %v22763_v38, %v14482_v24  ;;  %v14480_v48 = vmax.f32 %v12446_v52, %v13837_v40  ;;  %v19586_v23 = vld [vmem:[%s20524_s8 + $0x8c0] sm:$0xff]  }
 0x3b9   : > { %15892 = vst.msk [vmem:[%s22364_s22 + $0xc0] sm:$0xf] %vm15843_vm3, %v17781_v63  ;;  %v12449_v36 = vmax.f32 %v24596_v14, %v18838_v0  ;;  %v11806_v37 = vpop.f32.mrf.mxu0  ;;  %v13840_v31 = vpop.f32.mrf.mxu1  ;;  %v24608_v5 = vmax.f32 %v24606_v49, %v24607_v4  ;;  %v19587_v42 = vld [vmem:[%s20524_s8 + $0xbe0] sm:$0xff]   ;;  %v24614_v14 = vmax.f32 %v24612_v21, %v24613_v1 }
 0x3ba   : > { %15895 = vst.msk [vmem:[%s22364_s22 + $0xcc] sm:$0xf] %vm15843_vm3, %v17784_v20  ;;  %v17782_v32 = vpack.c.bf16 %v14884_v43, %v14884_v43  ;;  %v14889_v15 = vmax.f32 %v14689_v47, 0.0  ;;  %v14687_v16 = vadd.f32 %v22763_v38, %v14480_v48  ;;  %v12447_v25 = vmax.f32 %v24599_v6, %v11806_v37  ;;  %v24616_v6 = vld [vmem:[#allocation79_spill] sm:$0xff] }
 0x3bb   : > { %v14483_v50 = vmax.f32 %v12449_v36, %v19048_v28  ;;  %v18841_v51 = vpop.f32.mrf.mxu0  ;;  %18936 = vmatmul.mubr.msk.bf16.gmra.mxu0 %vm7385_vm2, %v19580_v29  ;;  %v19051_v2 = vpop.f32.mrf.mxu1  ;;  %19146 = vmatmul.mubr.msk.bf16.gmra.mxu1 %vm7385_vm2, %v19581_v11  ;;  %v24609_v28 = vld [vmem:[#allocation74_spill] sm:$0xff]  ;;  %v24610_v29 = vld [vmem:[#allocation75_spill] sm:$0xff] }
 0x3bc   : > { %15893 = vst.msk [vmem:[%s22364_s22 + $0xc4] sm:$0xf] %vm15843_vm3, %v17782_v32  ;;  %v17787_v10 = vpack.c.bf16 %v14889_v15, %v14889_v15  ;;  %v14887_v27 = vmax.f32 %v14687_v16, 0.0  ;;  %v14481_v3 = vmax.f32 %v12447_v25, %v13840_v31  ;;  %v12452_v18 = vmax.f32 %v24602_v7, %v18841_v51  ;;  %18939 = vmatprep.mubr.msk.bf16.mxu0 %vm7385_vm2, %v19582_v54 }
 0x3bd   : > { %19149 = vmatprep.mubr.msk.bf16.mxu1 %vm7385_vm2, %v19583_v33  ;;  %v14690_v19 = vadd.f32 %v22763_v38, %v14483_v50  ;;  %v11819_v34 = vpop.f32.mrf.mxu0  ;;  %v13853_v35 = vpop.f32.mrf.mxu1  ;;  %v24611_v11 = vmax.f32 %v24609_v28, %v24610_v29  ;;  %v24617_v25 = vmax.f32 %v24615_v58, %v24616_v6  ;;  %v24627_v28 = vld [vmem:[#allocation86_spill] sm:$0xff]  ;;  %v24628_v29 = vld [vmem:[#allocation87_spill] sm:$0xff] }
 0x3be   : > { %15898 = vst.msk [vmem:[%s22364_s22 + $0xd8] sm:$0xf] %vm15843_vm3, %v17787_v10  ;;  %v17785_v8 = vpack.c.bf16 %v14887_v27, %v14887_v27  ;;  %v14688_v55 = vadd.f32 %v22763_v38, %v14481_v3  ;;  %v14486_v56 = vmax.f32 %v12452_v18, %v19051_v2  ;;  %v12450_v57 = vmax.f32 %v24605_v9, %v11819_v34  ;;  %v19588_v27 = vld [vmem:[%s20524_s8 + $0x8c8] sm:$0xff]  }
 0x3bf   : > { %v14890_v60 = vmax.f32 %v14690_v19, 0.0  ;;  %v18842_v61 = vpop.f32.mrf.mxu0  ;;  %v19052_v30 = vpop.f32.mrf.mxu1  ;;  %v19589_v3 = vld [vmem:[%s20524_s8 + $0xbe8] sm:$0xff]   ;;  %v24619_v19 = vld [vmem:[#allocation81_spill] sm:$0xff] }
 0x3c0   : > { %15896 = vst.msk [vmem:[%s22364_s22 + $0xd0] sm:$0xf] %vm15843_vm3, %v17785_v8  ;;  %v14888_v41 = vmax.f32 %v14688_v55, 0.0  ;;  %v14693_v39 = vadd.f32 %v22763_v38, %v14486_v56  ;;  %v14484_v46 = vmax.f32 %v12450_v57, %v13853_v35  ;;  %v12453_v40 = vmax.f32 %v24608_v5, %v18842_v61  ;;  %v24618_v18 = vld [vmem:[#allocation80_spill] sm:$0xff]  ;;  %v19590_v8 = vld [vmem:[%s20524_s8 + $0x8d0] sm:$0xff]   ;;  %v24621_v61 = vld [vmem:[#allocation82_spill] sm:$0xff] }
 0x3c1   : > { %v17788_v24 = vpack.c.bf16 %v14890_v60, %v14890_v60  ;;  %v11822_v17 = vpop.f32.mrf.mxu0  ;;  %v13856_v44 = vpop.f32.mrf.mxu1  ;;  %v24620_v34 = vmax.f32 %v24618_v18, %v24619_v19  ;;  %v19591_v55 = vld [vmem:[%s20524_s8 + $0xbf0] sm:$0xff]  }
 0x3c2   : > { %v17786_v45 = vpack.c.bf16 %v14888_v41, %v14888_v41  ;;  %v14893_v52 = vmax.f32 %v14693_v39, 0.0  ;;  %v14691_v63 = vadd.f32 %v22763_v38, %v14484_v46  ;;  %v14487_v0 = vmax.f32 %v12453_v40, %v19052_v30  ;;  %v24622_v30 = vld [vmem:[#allocation83_spill] sm:$0xff] }
 0x3c3   : > { %15899 = vst.msk [vmem:[%s22364_s22 + $0xdc] sm:$0xf] %vm15843_vm3, %v17788_v24  ;;  %v12451_v20 = vmax.f32 %v24611_v11, %v11822_v17  ;;  %v18845_v43 = vpop.f32.mrf.mxu0  ;;  %18940 = vmatmul.mubr.msk.bf16.gmra.mxu0 %vm7385_vm2, %v19584_v12  ;;  %v19055_v47 = vpop.f32.mrf.mxu1  ;;  %19150 = vmatmul.mubr.msk.bf16.gmra.mxu1 %vm7385_vm2, %v19585_v13  ;;  %v24623_v12 = vmax.f32 %v24621_v61, %v24622_v30 }
 0x3c4   : > { %15897 = vst.msk [vmem:[%s22364_s22 + $0xd4] sm:$0xf] %vm15843_vm3, %v17786_v45  ;;  %v17791_v48 = vpack.c.bf16 %v14893_v52, %v14893_v52  ;;  %v14891_v54 = vmax.f32 %v14691_v63, 0.0  ;;  %v14694_v33 = vadd.f32 %v22763_v38, %v14487_v0  ;;  %v12456_v36 = vmax.f32 %v24614_v14, %v18845_v43  ;;  %18943 = vmatprep.mubr.msk.bf16.mxu0 %vm7385_vm2, %v19586_v23  ;;  %v24624_v23 = vld [vmem:[#allocation84_spill] sm:$0xff] }
 0x3c5   : > { %19153 = vmatprep.mubr.msk.bf16.mxu1 %vm7385_vm2, %v19587_v42  ;;  %v14485_v37 = vmax.f32 %v12451_v20, %v13856_v44  ;;  %v11835_v31 = vpop.f32.mrf.mxu0  ;;  %v13869_v32 = vpop.f32.mrf.mxu1  ;;  %v24625_v42 = vld [vmem:[#allocation85_spill] sm:$0xff]  ;;  %v24629_v11 = vmax.f32 %v24627_v28, %v24628_v29 }
 0x3c6   : > { %15902 = vst.msk [vmem:[%s22364_s22 + $0xe8] sm:$0xf] %vm15843_vm3, %v17791_v48  ;;  %v17789_v15 = vpack.c.bf16 %v14891_v54, %v14891_v54  ;;  %v14894_v16 = vmax.f32 %v14694_v33, 0.0  ;;  %v14490_v53 = vmax.f32 %v12456_v36, %v19055_v47  ;;  %v12454_v50 = vmax.f32 %v24617_v25, %v11835_v31  ;;  %v19592_v54 = vld [vmem:[%s20524_s8 + $0x8d8] sm:$0xff]   ;;  %v24630_v36 = vld [vmem:[#allocation88_spill] sm:$0xff]  ;;  %v19599_v29 = vld [vmem:[%s20524_s8 + $0xc10] sm:$0xff]  }
 0x3c7   : > { %v14692_v51 = vadd.f32 %v22763_v38, %v14485_v37  ;;  %v18846_v2 = vpop.f32.mrf.mxu0  ;;  %v19056_v10 = vpop.f32.mrf.mxu1  ;;  %v24626_v24 = vmax.f32 %v24624_v23, %v24625_v42  ;;  %v19593_v33 = vld [vmem:[%s20524_s8 + $0xbf8] sm:$0xff]   ;;  %v24631_v37 = vld [vmem:[#allocation89_spill] sm:$0xff] }
 0x3c8   : > { %15900 = vst.msk [vmem:[%s22364_s22 + $0xe0] sm:$0xf] %vm15843_vm3, %v17789_v15  ;;  %v17792_v26 = vpack.c.bf16 %v14894_v16, %v14894_v16  ;;  %v14697_v22 = vadd.f32 %v22763_v38, %v14490_v53  ;;  %v14488_v7 = vmax.f32 %v12454_v50, %v13869_v32  ;;  %v12457_v35 = vmax.f32 %v24620_v34, %v18846_v2  ;;  %v19594_v15 = vld [vmem:[%s20524_s8 + $0x8e0] sm:$0xff]   ;;  %v24633_v2 = vld [vmem:[#allocation90_spill] sm:$0xff] }
 0x3c9   : > { %v14892_v56 = vmax.f32 %v14692_v51, 0.0  ;;  %v11838_v62 = vpop.f32.mrf.mxu0  ;;  %v13872_v59 = vpop.f32.mrf.mxu1  ;;  %v24632_v31 = vmax.f32 %v24630_v36, %v24631_v37  ;;  %v19595_v16 = vld [vmem:[%s20524_s8 + $0xc00] sm:$0xff]  }
 0x3ca   : > { %15903 = vst.msk [vmem:[%s22364_s22 + $0xec] sm:$0xf] %vm15843_vm3, %v17792_v26  ;;  %v14897_v9 = vmax.f32 %v14697_v22, 0.0  ;;  %v14695_v57 = vadd.f32 %v22763_v38, %v14488_v7  ;;  %v14491_v60 = vmax.f32 %v12457_v35, %v19056_v10  ;;  %v12455_v13 = vmax.f32 %v24623_v12, %v11838_v62  ;;  %v24634_v10 = vld [vmem:[#allocation91_spill] sm:$0xff]  ;;  %v24636_v35 = vld [vmem:[#allocation92_spill] sm:$0xff]  ;;  %v24639_v12 = vld [vmem:[#allocation94_spill] sm:$0xff] }
 0x3cb   : > { %v17790_v41 = vpack.c.bf16 %v14892_v56, %v14892_v56  ;;  %v18849_v39 = vpop.f32.mrf.mxu0  ;;  %18944 = vmatmul.mubr.msk.bf16.gmra.mxu0 %vm7385_vm2, %v19588_v27  ;;  %v19059_v46 = vpop.f32.mrf.mxu1  ;;  %19154 = vmatmul.mubr.msk.bf16.gmra.mxu1 %vm7385_vm2, %v19589_v3  ;;  %v24635_v27 = vmax.f32 %v24633_v2, %v24634_v10  ;;  %v24651_v10 = vld [vmem:[#allocation102_spill] sm:$0xff] }
 0x3cc   : > { %v17795_v49 = vpack.c.bf16 %v14897_v9, %v14897_v9  ;;  %v14895_v4 = vmax.f32 %v14695_v57, 0.0  ;;  %v14698_v5 = vadd.f32 %v22763_v38, %v14491_v60  ;;  %v14489_v40 = vmax.f32 %v12455_v13, %v13872_v59  ;;  %18947 = vmatprep.mubr.msk.bf16.mxu0 %vm7385_vm2, %v19590_v8  ;;  %19157 = vmatprep.mubr.msk.bf16.mxu1 %vm7385_vm2, %v19591_v55  ;;  %v24637_v8 = vld [vmem:[#allocation93_spill] sm:$0xff]  ;;  %v24640_v13 = vld [vmem:[#allocation95_spill] sm:$0xff] }
 0x3cd   : > { %15901 = vst.msk [vmem:[%s22364_s22 + $0xe4] sm:$0xf] %vm15843_vm3, %v17790_v41  ;;  %v12460_v17 = vmax.f32 %v24626_v24, %v18849_v39  ;;  %v11851_v44 = vpop.f32.mrf.mxu0  ;;  %v13885_v45 = vpop.f32.mrf.mxu1  ;;  %v24638_v55 = vmax.f32 %v24636_v35, %v24637_v8  ;;  %v24641_v41 = vmax.f32 %v24639_v12, %v24640_v13  ;;  %v24642_v24 = vld [vmem:[#allocation96_spill] sm:$0xff] }
 0x3ce   : > { %15906 = vst.msk [vmem:[%s22364_s22 + $0xf8] sm:$0xf] %vm15843_vm3, %v17795_v49  ;;  %v17793_v52 = vpack.c.bf16 %v14895_v4, %v14895_v4  ;;  %v14898_v63 = vmax.f32 %v14698_v5, 0.0  ;;  %v14696_v0 = vadd.f32 %v22763_v38, %v14489_v40  ;;  %v12458_v20 = vmax.f32 %v24629_v11, %v11851_v44  ;;  %v19596_v4 = vld [vmem:[%s20524_s8 + $0x8e8] sm:$0xff]  }
 0x3cf   : > { %v14494_v43 = vmax.f32 %v12460_v17, %v19059_v46  ;;  %v18850_v47 = vpop.f32.mrf.mxu0  ;;  %v19060_v48 = vpop.f32.mrf.mxu1  ;;  %v19597_v5 = vld [vmem:[%s20524_s8 + $0xc08] sm:$0xff]   ;;  %v24643_v17 = vld [vmem:[#allocation97_spill] sm:$0xff] }
 0x3d0   : > { %15904 = vst.msk [vmem:[%s22364_s22 + $0xf0] sm:$0xf] %vm15843_vm3, %v17793_v52  ;;  %v17796_v21 = vpack.c.bf16 %v14898_v63, %v14898_v63  ;;  %v14896_v1 = vmax.f32 %v14696_v0, 0.0  ;;  %v14492_v14 = vmax.f32 %v12458_v20, %v13885_v45  ;;  %v12461_v32 = vmax.f32 %v24632_v31, %v18850_v47  ;;  %v19598_v52 = vld [vmem:[%s20524_s8 + $0x8f0] sm:$0xff]   ;;  %v24645_v47 = vld [vmem:[#allocation98_spill] sm:$0xff] }
 0x3d1   : > { %v14701_v53 = vadd.f32 %v22763_v38, %v14494_v43  ;;  %v11854_v58 = vpop.f32.mrf.mxu0  ;;  %v13888_v6 = vpop.f32.mrf.mxu1  ;;  %v24644_v44 = vmax.f32 %v24642_v24, %v24643_v17 }
 0x3d2   : > { %15907 = vst.msk [vmem:[%s22364_s22 + $0xfc] sm:$0xf] %vm15843_vm3, %v17796_v21  ;;  %v17794_v25 = vpack.c.bf16 %v14896_v1, %v14896_v1  ;;  %v14699_v50 = vadd.f32 %v22763_v38, %v14492_v14  ;;  %v14495_v51 = vmax.f32 %v12461_v32, %v19060_v48  ;;  %v12459_v3 = vmax.f32 %v24635_v27, %v11854_v58  ;;  %v24646_v48 = vld [vmem:[#allocation99_spill] sm:$0xff]  ;;  %v24648_v32 = vld [vmem:[#allocation100_spill] sm:$0xff] }
 0x3d3   : > { %v14901_v26 = vmax.f32 %v14701_v53, 0.0  ;;  %v18853_v22 = vpop.f32.mrf.mxu0  ;;  %18948 = vmatmul.mubr.msk.bf16.gmra.mxu0 %vm7385_vm2, %v19592_v54  ;;  %v19063_v7 = vpop.f32.mrf.mxu1  ;;  %19158 = vmatmul.mubr.msk.bf16.gmra.mxu1 %vm7385_vm2, %v19593_v33  ;;  %v24647_v54 = vmax.f32 %v24645_v47, %v24646_v48  ;;  %v24652_v27 = vld [vmem:[#allocation103_spill] sm:$0xff]  ;;  %v24663_v48 = vld [vmem:[#allocation110_spill] sm:$0xff] }
 0x3d4   : > { %15905 = vst.msk [vmem:[%s22364_s22 + $0xf4] sm:$0xf] %vm15843_vm3, %v17794_v25  ;;  %v14899_v18 = vmax.f32 %v14699_v50, 0.0  ;;  %v14702_v19 = vadd.f32 %v22763_v38, %v14495_v51  ;;  %v14493_v34 = vmax.f32 %v12459_v3, %v13888_v6  ;;  %v12464_v56 = vmax.f32 %v24638_v55, %v18853_v22  ;;  %18951 = vmatprep.mubr.msk.bf16.mxu0 %vm7385_vm2, %v19594_v15  ;;  %v24649_v15 = vld [vmem:[#allocation101_spill] sm:$0xff] }
 0x3d5   : > { %19161 = vmatprep.mubr.msk.bf16.mxu1 %vm7385_vm2, %v19595_v16  ;;  %v17799_v62 = vpack.c.bf16 %v14901_v26, %v14901_v26  ;;  %v11867_v59 = vpop.f32.mrf.mxu0  ;;  %v13901_v9 = vpop.f32.mrf.mxu1  ;;  %v24650_v16 = vmax.f32 %v24648_v32, %v24649_v15  ;;  %v24653_v3 = vmax.f32 %v24651_v10, %v24652_v27 }
 0x3d6   : > { %v17797_v57 = vpack.c.bf16 %v14899_v18, %v14899_v18  ;;  %v14902_v60 = vmax.f32 %v14702_v19, 0.0  ;;  %v14700_v61 = vadd.f32 %v22763_v38, %v14493_v34  ;;  %v14498_v30 = vmax.f32 %v12464_v56, %v19063_v7  ;;  %v19600_v19 = vld [vmem:[%s20524_s8 + $0x8f8] sm:$0xff]  }
 0x3d7   : > { %15910 = vst.msk [vmem:[%s22364_s22 + $0x108] sm:$0xf] %vm15843_vm3, %v17799_v62  ;;  %v12462_v39 = vmax.f32 %v24641_v41, %v11867_v59  ;;  %v18854_v46 = vpop.f32.mrf.mxu0  ;;  %v19064_v49 = vpop.f32.mrf.mxu1  ;;  %v19601_v34 = vld [vmem:[%s20524_s8 + $0xc18] sm:$0xff]   ;;  %v19602_v62 = vld [vmem:[%s20524_s8 + $0x900] sm:$0xff]  }
 0x3d8   : > { %15908 = vst.msk [vmem:[%s22364_s22 + $0x100] sm:$0xf] %vm15843_vm3, %v17797_v57  ;;  %v17800_v40 = vpack.c.bf16 %v14902_v60, %v14902_v60  ;;  %v14900_v23 = vmax.f32 %v14700_v61, 0.0  ;;  %v14705_v42 = vadd.f32 %v22763_v38, %v14498_v30  ;;  %v12465_v45 = vmax.f32 %v24644_v44, %v18854_v46  ;;  %v19603_v59 = vld [vmem:[%s20524_s8 + $0xc20] sm:$0xff]   ;;  %v24655_v57 = vld [vmem:[#allocation105_spill] sm:$0xff]  ;;  %v24657_v46 = vld [vmem:[#allocation106_spill] sm:$0xff] }
 0x3d9   : > { %v14496_v63 = vmax.f32 %v12462_v39, %v13901_v9  ;;  %v11870_v0 = vpop.f32.mrf.mxu0  ;;  %v13904_v28 = vpop.f32.mrf.mxu1  ;;  %v24654_v9 = vld [vmem:[#allocation104_spill] sm:$0xff] }
 0x3da   : > { %15911 = vst.msk [vmem:[%s22364_s22 + $0x10c] sm:$0xf] %vm15843_vm3, %v17800_v40  ;;  %v17798_v11 = vpack.c.bf16 %v14900_v23, %v14900_v23  ;;  %v14905_v20 = vmax.f32 %v14705_v42, 0.0  ;;  %v14499_v43 = vmax.f32 %v12465_v45, %v19064_v49  ;;  %v12463_v33 = vmax.f32 %v24647_v54, %v11870_v0  ;;  %v24658_v49 = vld [vmem:[#allocation107_spill] sm:$0xff]  ;;  %v24660_v45 = vld [vmem:[#allocation108_spill] sm:$0xff] }
 0x3db   : > { %v14703_v21 = vadd.f32 %v22763_v38, %v14496_v63  ;;  %v18857_v1 = vpop.f32.mrf.mxu0  ;;  %18952 = vmatmul.mubr.msk.bf16.gmra.mxu0 %vm7385_vm2, %v19596_v4  ;;  %v19067_v14 = vpop.f32.mrf.mxu1  ;;  %19162 = vmatmul.mubr.msk.bf16.gmra.mxu1 %vm7385_vm2, %v19597_v5  ;;  %v24656_v60 = vmax.f32 %v24654_v9, %v24655_v57  ;;  %v24659_v4 = vmax.f32 %v24657_v46, %v24658_v49  ;;  %v24664_v54 = vld [vmem:[#allocation111_spill] sm:$0xff]  ;;  %v24672_v9 = vld [vmem:[#allocation116_spill] sm:$0xff]  ;;  %v24673_v57 = vld [vmem:[#allocation117_spill] sm:$0xff] }
 0x3dc   : > { %15909 = vst.msk [vmem:[%s22364_s22 + $0x104] sm:$0xf] %vm15843_vm3, %v17798_v11  ;;  %v17803_v36 = vpack.c.bf16 %v14905_v20, %v14905_v20  ;;  %v14706_v37 = vadd.f32 %v22763_v38, %v14499_v43  ;;  %v14497_v31 = vmax.f32 %v12463_v33, %v13904_v28  ;;  %v12468_v53 = vmax.f32 %v24650_v16, %v18857_v1  ;;  %v24675_v49 = vld [vmem:[#allocation118_spill] sm:$0xff] }
 0x3dd   : > { %18955 = vmatprep.mubr.msk.bf16.mxu0 %vm7385_vm2, %v19598_v52  ;;  %v14903_v58 = vmax.f32 %v14703_v21, 0.0  ;;  %v11883_v6 = vpop.f32.mrf.mxu0  ;;  %v13917_v25 = vpop.f32.mrf.mxu1  ;;  %19165 = vmatprep.mubr.msk.bf16.mxu1 %vm7385_vm2, %v19599_v29  ;;  %v24661_v52 = vld [vmem:[#allocation109_spill] sm:$0xff]  ;;  %v24665_v33 = vmax.f32 %v24663_v48, %v24664_v54 }
 0x3de   : > { %15914 = vst.msk [vmem:[%s22364_s22 + $0x118] sm:$0xf] %vm15843_vm3, %v17803_v36  ;;  %v14906_v50 = vmax.f32 %v14706_v37, 0.0  ;;  %v14704_v51 = vadd.f32 %v22763_v38, %v14497_v31  ;;  %v14502_v2 = vmax.f32 %v12468_v53, %v19067_v14  ;;  %v12466_v26 = vmax.f32 %v24653_v3, %v11883_v6  ;;  %v19604_v37 = vld [vmem:[%s20524_s8 + $0x908] sm:$0xff]  }
 0x3df   : > { %v17801_v22 = vpack.c.bf16 %v14903_v58, %v14903_v58  ;;  %v18858_v7 = vpop.f32.mrf.mxu0  ;;  %v19068_v18 = vpop.f32.mrf.mxu1  ;;  %v24662_v63 = vmax.f32 %v24660_v45, %v24661_v52  ;;  %v19605_v31 = vld [vmem:[%s20524_s8 + $0xc28] sm:$0xff]   ;;  %v24667_v58 = vld [vmem:[#allocation113_spill] sm:$0xff] }
 0x3e0   : > { %v17804_v35 = vpack.c.bf16 %v14906_v50, %v14906_v50  ;;  %v14904_v8 = vmax.f32 %v14704_v51, 0.0  ;;  %v14709_v55 = vadd.f32 %v22763_v38, %v14502_v2  ;;  %v14500_v56 = vmax.f32 %v12466_v26, %v13917_v25  ;;  %v24666_v53 = vld [vmem:[#allocation112_spill] sm:$0xff]  ;;  %v19606_v50 = vld [vmem:[%s20524_s8 + $0x910] sm:$0xff]  }
 0x3e1   : > { %15912 = vst.msk [vmem:[%s22364_s22 + $0x110] sm:$0xf] %vm15843_vm3, %v17801_v22  ;;  %v12469_v61 = vmax.f32 %v24656_v60, %v18858_v7  ;;  %v11886_v30 = vpop.f32.mrf.mxu0  ;;  %v13920_v12 = vpop.f32.mrf.mxu1  ;;  %v24668_v6 = vmax.f32 %v24666_v53, %v24667_v58  ;;  %v19607_v51 = vld [vmem:[%s20524_s8 + $0xc30] sm:$0xff]   ;;  %v24674_v60 = vmax.f32 %v24672_v9, %v24673_v57 }
 0x3e2   : > { %15915 = vst.msk [vmem:[%s22364_s22 + $0x11c] sm:$0xf] %vm15843_vm3, %v17804_v35  ;;  %v17802_v13 = vpack.c.bf16 %v14904_v8, %v14904_v8  ;;  %v14909_v41 = vmax.f32 %v14709_v55, 0.0  ;;  %v14707_v39 = vadd.f32 %v22763_v38, %v14500_v56  ;;  %v12467_v5 = vmax.f32 %v24659_v4, %v11886_v30  ;;  %v24676_v4 = vld [vmem:[#allocation119_spill] sm:$0xff] }
 0x3e3   : > { %v14503_v40 = vmax.f32 %v12469_v61, %v19068_v18  ;;  %v18861_v23 = vpop.f32.mrf.mxu0  ;;  %18956 = vmatmul.mubr.msk.bf16.gmra.mxu0 %vm7385_vm2, %v19600_v19  ;;  %v19071_v42 = vpop.f32.mrf.mxu1  ;;  %19166 = vmatmul.mubr.msk.bf16.gmra.mxu1 %vm7385_vm2, %v19601_v34  ;;  %v24669_v18 = vld [vmem:[#allocation114_spill] sm:$0xff]  ;;  %v24670_v19 = vld [vmem:[#allocation115_spill] sm:$0xff] }
 0x3e4   : > { %15913 = vst.msk [vmem:[%s22364_s22 + $0x114] sm:$0xf] %vm15843_vm3, %v17802_v13  ;;  %v17807_v24 = vpack.c.bf16 %v14909_v41, %v14909_v41  ;;  %v14907_v17 = vmax.f32 %v14707_v39, 0.0  ;;  %v14501_v44 = vmax.f32 %v12467_v5, %v13920_v12  ;;  %v12472_v0 = vmax.f32 %v24662_v63, %v18861_v23  ;;  %18959 = vmatprep.mubr.msk.bf16.mxu0 %vm7385_vm2, %v19602_v62 }
 0x3e5   : > { %19169 = vmatprep.mubr.msk.bf16.mxu1 %vm7385_vm2, %v19603_v59  ;;  %v14710_v28 = vadd.f32 %v22763_v38, %v14503_v40  ;;  %v11899_v29 = vpop.f32.mrf.mxu0  ;;  %v13933_v11 = vpop.f32.mrf.mxu1  ;;  %v24671_v34 = vmax.f32 %v24669_v18, %v24670_v19  ;;  %v24677_v5 = vmax.f32 %v24675_v49, %v24676_v4  ;;  %v24687_v18 = vld [vmem:[#allocation126_spill] sm:$0xff]  ;;  %v24688_v19 = vld [vmem:[#allocation127_spill] sm:$0xff] }
 0x3e6   : > { %15918 = vst.msk [vmem:[%s22364_s22 + $0x128] sm:$0xf] %vm15843_vm3, %v17807_v24  ;;  %v17805_v20 = vpack.c.bf16 %v14907_v17, %v14907_v17  ;;  %v14708_v43 = vadd.f32 %v22763_v38, %v14501_v44  ;;  %v14506_v47 = vmax.f32 %v12472_v0, %v19071_v42  ;;  %v12470_v21 = vmax.f32 %v24665_v33, %v11899_v29  ;;  %v19608_v17 = vld [vmem:[%s20524_s8 + $0x918] sm:$0xff]   ;;  %v24678_v0 = vld [vmem:[#allocation120_spill] sm:$0xff] }
 0x3e7   : > { %v14910_v1 = vmax.f32 %v14710_v28, 0.0  ;;  %v18862_v14 = vpop.f32.mrf.mxu0  ;;  %v19072_v36 = vpop.f32.mrf.mxu1  ;;  %v19609_v44 = vld [vmem:[%s20524_s8 + $0xc38] sm:$0xff]   ;;  %v24679_v28 = vld [vmem:[#allocation121_spill] sm:$0xff] }
 0x3e8   : > { %15916 = vst.msk [vmem:[%s22364_s22 + $0x120] sm:$0xf] %vm15843_vm3, %v17805_v20  ;;  %v14908_v32 = vmax.f32 %v14708_v43, 0.0  ;;  %v14713_v15 = vadd.f32 %v22763_v38, %v14506_v47  ;;  %v14504_v16 = vmax.f32 %v12470_v21, %v13933_v11  ;;  %v12473_v25 = vmax.f32 %v24668_v6, %v18862_v14  ;;  %v19610_v20 = vld [vmem:[%s20524_s8 + $0x920] sm:$0xff]   ;;  %v24681_v14 = vld [vmem:[#allocation122_spill] sm:$0xff] }
 0x3e9   : > { %v17808_v2 = vpack.c.bf16 %v14910_v1, %v14910_v1  ;;  %v11902_v10 = vpop.f32.mrf.mxu0  ;;  %v13936_v27 = vpop.f32.mrf.mxu1  ;;  %v24680_v29 = vmax.f32 %v24678_v0, %v24679_v28  ;;  %v19611_v43 = vld [vmem:[%s20524_s8 + $0xc40] sm:$0xff]  }
 0x3ea   : > { %v17806_v3 = vpack.c.bf16 %v14908_v32, %v14908_v32  ;;  %v14913_v26 = vmax.f32 %v14713_v15, 0.0  ;;  %v14711_v22 = vadd.f32 %v22763_v38, %v14504_v16  ;;  %v14507_v7 = vmax.f32 %v12473_v25, %v19072_v36  ;;  %v24682_v36 = vld [vmem:[#allocation123_spill] sm:$0xff] }
 0x3eb   : > { %15919 = vst.msk [vmem:[%s22364_s22 + $0x12c] sm:$0xf] %vm15843_vm3, %v17808_v2  ;;  %v12471_v35 = vmax.f32 %v24671_v34, %v11902_v10  ;;  %v18865_v8 = vpop.f32.mrf.mxu0  ;;  %18960 = vmatmul.mubr.msk.bf16.gmra.mxu0 %vm7385_vm2, %v19604_v37  ;;  %v19075_v55 = vpop.f32.mrf.mxu1  ;;  %19170 = vmatmul.mubr.msk.bf16.gmra.mxu1 %vm7385_vm2, %v19605_v31  ;;  %v24683_v37 = vmax.f32 %v24681_v14, %v24682_v36 }
 0x3ec   : > { %15917 = vst.msk [vmem:[%s22364_s22 + $0x124] sm:$0xf] %vm15843_vm3, %v17806_v3  ;;  %v17811_v56 = vpack.c.bf16 %v14913_v26, %v14913_v26  ;;  %v14911_v62 = vmax.f32 %v14711_v22, 0.0  ;;  %v14714_v59 = vadd.f32 %v22763_v38, %v14507_v7  ;;  %v12476_v61 = vmax.f32 %v24674_v60, %v18865_v8  ;;  %18963 = vmatprep.mubr.msk.bf16.mxu0 %vm7385_vm2, %v19606_v50  ;;  %v24684_v50 = vld [vmem:[#allocation124_spill] sm:$0xff] }
 0x3ed   : > { %19173 = vmatprep.mubr.msk.bf16.mxu1 %vm7385_vm2, %v19607_v51  ;;  %v14505_v30 = vmax.f32 %v12471_v35, %v13936_v27  ;;  %v11915_v12 = vpop.f32.mrf.mxu0  ;;  %v13949_v13 = vpop.f32.mrf.mxu1  ;;  %v24685_v51 = vld [vmem:[#allocation125_spill] sm:$0xff]  ;;  %v24689_v34 = vmax.f32 %v24687_v18, %v24688_v19  ;;  %v19619_v19 = vld [vmem:[%s20524_s8 + $0xc60] sm:$0xff]  }
 0x3ee   : > { %15922 = vst.msk [vmem:[%s22364_s22 + $0x138] sm:$0xf] %vm15843_vm3, %v17811_v56  ;;  %v17809_v41 = vpack.c.bf16 %v14911_v62, %v14911_v62  ;;  %v14914_v39 = vmax.f32 %v14714_v59, 0.0  ;;  %v14510_v46 = vmax.f32 %v12476_v61, %v19075_v55  ;;  %v12474_v40 = vmax.f32 %v24677_v5, %v11915_v12  ;;  %v19612_v62 = vld [vmem:[%s20524_s8 + $0x928] sm:$0xff]  }
 0x3ef   : > { %v14712_v23 = vadd.f32 %v22763_v38, %v14505_v30  ;;  %v18866_v42 = vpop.f32.mrf.mxu0  ;;  %v19076_v24 = vpop.f32.mrf.mxu1  ;;  %v24686_v2 = vmax.f32 %v24684_v50, %v24685_v51  ;;  %v19613_v59 = vld [vmem:[%s20524_s8 + $0xc48] sm:$0xff]   ;;  %v24691_v30 = vld [vmem:[#allocation129_spill] sm:$0xff] }
 0x3f0   : > { %15920 = vst.msk [vmem:[%s22364_s22 + $0x130] sm:$0xf] %vm15843_vm3, %v17809_v41  ;;  %v17812_v45 = vpack.c.bf16 %v14914_v39, %v14914_v39  ;;  %v14717_v52 = vadd.f32 %v22763_v38, %v14510_v46  ;;  %v14508_v63 = vmax.f32 %v12474_v40, %v13949_v13  ;;  %v12477_v11 = vmax.f32 %v24680_v29, %v18866_v42  ;;  %v24690_v61 = vld [vmem:[#allocation128_spill] sm:$0xff]  ;;  %v19614_v41 = vld [vmem:[%s20524_s8 + $0x930] sm:$0xff]   ;;  %v24693_v42 = vld [vmem:[#allocation130_spill] sm:$0xff] }
 0x3f1   : > { %v14912_v47 = vmax.f32 %v14712_v23, 0.0  ;;  %v11918_v48 = vpop.f32.mrf.mxu0  ;;  %v13952_v54 = vpop.f32.mrf.mxu1  ;;  %v24692_v12 = vmax.f32 %v24690_v61, %v24691_v30  ;;  %v19615_v39 = vld [vmem:[%s20524_s8 + $0xc50] sm:$0xff]  }
 0x3f2   : > { %15923 = vst.msk [vmem:[%s22364_s22 + $0x13c] sm:$0xf] %vm15843_vm3, %v17812_v45  ;;  %v14917_v33 = vmax.f32 %v14717_v52, 0.0  ;;  %v14715_v21 = vadd.f32 %v22763_v38, %v14508_v63  ;;  %v14511_v1 = vmax.f32 %v12477_v11, %v19076_v24  ;;  %v12475_v31 = vmax.f32 %v24683_v37, %v11918_v48  ;;  %v24694_v24 = vld [vmem:[#allocation131_spill] sm:$0xff]  ;;  %v24696_v11 = vld [vmem:[#allocation132_spill] sm:$0xff]  ;;  %v24699_v37 = vld [vmem:[#allocation134_spill] sm:$0xff] }
 0x3f3   : > { %v17810_v32 = vpack.c.bf16 %v14912_v47, %v14912_v47  ;;  %v18869_v15 = vpop.f32.mrf.mxu0  ;;  %18964 = vmatmul.mubr.msk.bf16.gmra.mxu0 %vm7385_vm2, %v19608_v17  ;;  %v19079_v16 = vpop.f32.mrf.mxu1  ;;  %19174 = vmatmul.mubr.msk.bf16.gmra.mxu1 %vm7385_vm2, %v19609_v44  ;;  %v24695_v17 = vmax.f32 %v24693_v42, %v24694_v24  ;;  %v24711_v24 = vld [vmem:[#allocation142_spill] sm:$0xff] }
 0x3f4   : > { %v17815_v53 = vpack.c.bf16 %v14917_v33, %v14917_v33  ;;  %v14915_v58 = vmax.f32 %v14715_v21, 0.0  ;;  %v14718_v6 = vadd.f32 %v22763_v38, %v14511_v1  ;;  %v14509_v25 = vmax.f32 %v12475_v31, %v13952_v54  ;;  %18967 = vmatprep.mubr.msk.bf16.mxu0 %vm7385_vm2, %v19610_v20  ;;  %19177 = vmatprep.mubr.msk.bf16.mxu1 %vm7385_vm2, %v19611_v43  ;;  %v24697_v20 = vld [vmem:[#allocation133_spill] sm:$0xff]  ;;  %v24700_v31 = vld [vmem:[#allocation135_spill] sm:$0xff] }
 0x3f5   : > { %15921 = vst.msk [vmem:[%s22364_s22 + $0x134] sm:$0xf] %vm15843_vm3, %v17810_v32  ;;  %v12480_v10 = vmax.f32 %v24686_v2, %v18869_v15  ;;  %v11931_v27 = vpop.f32.mrf.mxu0  ;;  %v13965_v3 = vpop.f32.mrf.mxu1  ;;  %v24698_v43 = vmax.f32 %v24696_v11, %v24697_v20  ;;  %v24701_v32 = vmax.f32 %v24699_v37, %v24700_v31  ;;  %v24702_v2 = vld [vmem:[#allocation136_spill] sm:$0xff] }
 0x3f6   : > { %15926 = vst.msk [vmem:[%s22364_s22 + $0x148] sm:$0xf] %vm15843_vm3, %v17815_v53  ;;  %v17813_v26 = vpack.c.bf16 %v14915_v58, %v14915_v58  ;;  %v14918_v22 = vmax.f32 %v14718_v6, 0.0  ;;  %v14716_v7 = vadd.f32 %v22763_v38, %v14509_v25  ;;  %v12478_v35 = vmax.f32 %v24689_v34, %v11931_v27  ;;  %v19616_v58 = vld [vmem:[%s20524_s8 + $0x938] sm:$0xff]  }
 0x3f7   : > { %v14514_v8 = vmax.f32 %v12480_v10, %v19079_v16  ;;  %v18870_v55 = vpop.f32.mrf.mxu0  ;;  %v19080_v56 = vpop.f32.mrf.mxu1  ;;  %v19617_v6 = vld [vmem:[%s20524_s8 + $0xc58] sm:$0xff]   ;;  %v24703_v10 = vld [vmem:[#allocation137_spill] sm:$0xff] }
 0x3f8   : > { %15924 = vst.msk [vmem:[%s22364_s22 + $0x140] sm:$0xf] %vm15843_vm3, %v17813_v26  ;;  %v17816_v9 = vpack.c.bf16 %v14918_v22, %v14918_v22  ;;  %v14916_v57 = vmax.f32 %v14716_v7, 0.0  ;;  %v14512_v60 = vmax.f32 %v12478_v35, %v13965_v3  ;;  %v12481_v13 = vmax.f32 %v24692_v12, %v18870_v55  ;;  %v19618_v26 = vld [vmem:[%s20524_s8 + $0x940] sm:$0xff]   ;;  %v24705_v55 = vld [vmem:[#allocation138_spill] sm:$0xff] }
 0x3f9   : > { %v14721_v46 = vadd.f32 %v22763_v38, %v14514_v8  ;;  %v11934_v49 = vpop.f32.mrf.mxu0  ;;  %v13968_v4 = vpop.f32.mrf.mxu1  ;;  %v24704_v27 = vmax.f32 %v24702_v2, %v24703_v10 }
 0x3fa   : > { %15927 = vst.msk [vmem:[%s22364_s22 + $0x14c] sm:$0xf] %vm15843_vm3, %v17816_v9  ;;  %v17814_v5 = vpack.c.bf16 %v14916_v57, %v14916_v57  ;;  %v14719_v40 = vadd.f32 %v22763_v38, %v14512_v60  ;;  %v14515_v23 = vmax.f32 %v12481_v13, %v19080_v56  ;;  %v12479_v44 = vmax.f32 %v24695_v17, %v11934_v49  ;;  %v24706_v56 = vld [vmem:[#allocation139_spill] sm:$0xff]  ;;  %v24708_v13 = vld [vmem:[#allocation140_spill] sm:$0xff] }
 0x3fb   : > { %v14921_v45 = vmax.f32 %v14721_v46, 0.0  ;;  %v18873_v52 = vpop.f32.mrf.mxu0  ;;  %18968 = vmatmul.mubr.msk.bf16.gmra.mxu0 %vm7385_vm2, %v19612_v62  ;;  %v19083_v63 = vpop.f32.mrf.mxu1  ;;  %19178 = vmatmul.mubr.msk.bf16.gmra.mxu1 %vm7385_vm2, %v19613_v59  ;;  %v24707_v62 = vmax.f32 %v24705_v55, %v24706_v56  ;;  %v24712_v17 = vld [vmem:[#allocation143_spill] sm:$0xff]  ;;  %v24723_v56 = vld [vmem:[#allocation150_spill] sm:$0xff] }
 0x3fc   : > { %15925 = vst.msk [vmem:[%s22364_s22 + $0x144] sm:$0xf] %vm15843_vm3, %v17814_v5  ;;  %v14919_v0 = vmax.f32 %v14719_v40, 0.0  ;;  %v14722_v28 = vadd.f32 %v22763_v38, %v14515_v23  ;;  %v14513_v29 = vmax.f32 %v12479_v44, %v13968_v4  ;;  %v12484_v47 = vmax.f32 %v24698_v43, %v18873_v52  ;;  %18971 = vmatprep.mubr.msk.bf16.mxu0 %vm7385_vm2, %v19614_v41  ;;  %v24709_v41 = vld [vmem:[#allocation141_spill] sm:$0xff] }
 0x3fd   : > { %19181 = vmatprep.mubr.msk.bf16.mxu1 %vm7385_vm2, %v19615_v39  ;;  %v17819_v48 = vpack.c.bf16 %v14921_v45, %v14921_v45  ;;  %v11947_v54 = vpop.f32.mrf.mxu0  ;;  %v13981_v33 = vpop.f32.mrf.mxu1  ;;  %v24710_v39 = vmax.f32 %v24708_v13, %v24709_v41  ;;  %v24713_v44 = vmax.f32 %v24711_v24, %v24712_v17 }
 0x3fe   : > { %v17817_v21 = vpack.c.bf16 %v14919_v0, %v14919_v0  ;;  %v14922_v1 = vmax.f32 %v14722_v28, 0.0  ;;  %v14720_v14 = vadd.f32 %v22763_v38, %v14513_v29  ;;  %v14518_v36 = vmax.f32 %v12484_v47, %v19083_v63  ;;  %v19620_v28 = vld [vmem:[%s20524_s8 + $0x948] sm:$0xff]  }
 0x3ff   : > { %15930 = vst.msk [vmem:[%s22364_s22 + $0x158] sm:$0xf] %vm15843_vm3, %v17819_v48  ;;  %v12482_v15 = vmax.f32 %v24701_v32, %v11947_v54  ;;  %v18874_v16 = vpop.f32.mrf.mxu0  ;;  %v19084_v53 = vpop.f32.mrf.mxu1  ;;  %v19621_v29 = vld [vmem:[%s20524_s8 + $0xc68] sm:$0xff]   ;;  %v19622_v48 = vld [vmem:[%s20524_s8 + $0x950] sm:$0xff]  }
 0x400   : > { %15928 = vst.msk [vmem:[%s22364_s22 + $0x150] sm:$0xf] %vm15843_vm3, %v17817_v21  ;;  %v17820_v25 = vpack.c.bf16 %v14922_v1, %v14922_v1  ;;  %v14920_v50 = vmax.f32 %v14720_v14, 0.0  ;;  %v14725_v51 = vadd.f32 %v22763_v38, %v14518_v36  ;;  %v12485_v3 = vmax.f32 %v24704_v27, %v18874_v16  ;;  %v19623_v54 = vld [vmem:[%s20524_s8 + $0xc70] sm:$0xff]   ;;  %v24717_v16 = vld [vmem:[#allocation146_spill] sm:$0xff] }
 0x401   : > { %v14516_v22 = vmax.f32 %v12482_v15, %v13981_v33  ;;  %v11950_v7 = vpop.f32.mrf.mxu0  ;;  %v13984_v18 = vpop.f32.mrf.mxu1  ;;  %v24714_v33 = vld [vmem:[#allocation144_spill] sm:$0xff]  ;;  %v24715_v21 = vld [vmem:[#allocation145_spill] sm:$0xff] }
 0x402   : > { %15931 = vst.msk [vmem:[%s22364_s22 + $0x15c] sm:$0xf] %vm15843_vm3, %v17820_v25  ;;  %v17818_v34 = vpack.c.bf16 %v14920_v50, %v14920_v50  ;;  %v14925_v35 = vmax.f32 %v14725_v51, 0.0  ;;  %v14519_v8 = vmax.f32 %v12485_v3, %v19084_v53  ;;  %v12483_v59 = vmax.f32 %v24707_v62, %v11950_v7  ;;  %v24718_v53 = vld [vmem:[#allocation147_spill] sm:$0xff]  ;;  %v24720_v3 = vld [vmem:[#allocation148_spill] sm:$0xff] }
 0x403   : > { %v14723_v9 = vadd.f32 %v22763_v38, %v14516_v22  ;;  %v18877_v57 = vpop.f32.mrf.mxu0  ;;  %18972 = vmatmul.mubr.msk.bf16.gmra.mxu0 %vm7385_vm2, %v19616_v58  ;;  %v19087_v60 = vpop.f32.mrf.mxu1  ;;  %19182 = vmatmul.mubr.msk.bf16.gmra.mxu1 %vm7385_vm2, %v19617_v6  ;;  %v24716_v1 = vmax.f32 %v24714_v33, %v24715_v21  ;;  %v24719_v58 = vmax.f32 %v24717_v16, %v24718_v53  ;;  %v24724_v62 = vld [vmem:[#allocation151_spill] sm:$0xff] }
 0x404   : > { %15929 = vst.msk [vmem:[%s22364_s22 + $0x154] sm:$0xf] %vm15843_vm3, %v17818_v34  ;;  %v17823_v61 = vpack.c.bf16 %v14925_v35, %v14925_v35  ;;  %v14726_v30 = vadd.f32 %v22763_v38, %v14519_v8  ;;  %v14517_v12 = vmax.f32 %v12483_v59, %v13984_v18  ;;  %v12488_v46 = vmax.f32 %v24710_v39, %v18877_v57  ;;  %v24736_v16 = vld [vmem:[#allocation159_spill] sm:$0xff] }
 0x405   : > { %18975 = vmatprep.mubr.msk.bf16.mxu0 %vm7385_vm2, %v19618_v26  ;;  %v14923_v49 = vmax.f32 %v14723_v9, 0.0  ;;  %v11963_v4 = vpop.f32.mrf.mxu0  ;;  %v13997_v5 = vpop.f32.mrf.mxu1  ;;  %19185 = vmatprep.mubr.msk.bf16.mxu1 %vm7385_vm2, %v19619_v19  ;;  %v24721_v26 = vld [vmem:[#allocation149_spill] sm:$0xff]  ;;  %v24725_v59 = vmax.f32 %v24723_v56, %v24724_v62  ;;  %v24742_v56 = vld [vmem:[#allocation163_spill] sm:$0xff] }
 0x406   : > { %15934 = vst.msk [vmem:[%s22364_s22 + $0x168] sm:$0xf] %vm15843_vm3, %v17823_v61  ;;  %v14926_v40 = vmax.f32 %v14726_v30, 0.0  ;;  %v14724_v23 = vadd.f32 %v22763_v38, %v14517_v12  ;;  %v14522_v42 = vmax.f32 %v12488_v46, %v19087_v60  ;;  %v12486_v45 = vmax.f32 %v24713_v44, %v11963_v4  ;;  %v19624_v30 = vld [vmem:[%s20524_s8 + $0x958] sm:$0xff]   ;;  %v24726_v46 = vld [vmem:[#allocation152_spill] sm:$0xff] }
 0x407   : > { %v17821_v52 = vpack.c.bf16 %v14923_v49, %v14923_v49  ;;  %v18878_v63 = vpop.f32.mrf.mxu0  ;;  %v19088_v0 = vpop.f32.mrf.mxu1  ;;  %v24722_v22 = vmax.f32 %v24720_v3, %v24721_v26  ;;  %v19625_v12 = vld [vmem:[%s20524_s8 + $0xc78] sm:$0xff]   ;;  %v24727_v49 = vld [vmem:[#allocation153_spill] sm:$0xff] }
 0x408   : > { %v17824_v11 = vpack.c.bf16 %v14926_v40, %v14926_v40  ;;  %v14924_v20 = vmax.f32 %v14724_v23, 0.0  ;;  %v14729_v43 = vadd.f32 %v22763_v38, %v14522_v42  ;;  %v14520_v47 = vmax.f32 %v12486_v45, %v13997_v5  ;;  %v24739_v3 = vld [vmem:[#allocation161_spill] sm:$0xff] }
 0x409   : > { %15932 = vst.msk [vmem:[%s22364_s22 + $0x160] sm:$0xf] %vm15843_vm3, %v17821_v52  ;;  %v12489_v14 = vmax.f32 %v24716_v1, %v18878_v63  ;;  %v11966_v36 = vpop.f32.mrf.mxu0  ;;  %v14000_v37 = vpop.f32.mrf.mxu1  ;;  %v24728_v4 = vmax.f32 %v24726_v46, %v24727_v49  ;;  %v24729_v52 = vld [vmem:[#allocation154_spill] sm:$0xff]  ;;  %v24730_v63 = vld [vmem:[#allocation155_spill] sm:$0xff] }
 0x40a   : > { %15935 = vst.msk [vmem:[%s22364_s22 + $0x16c] sm:$0xf] %vm15843_vm3, %v17824_v11  ;;  %v17822_v31 = vpack.c.bf16 %v14924_v20, %v14924_v20  ;;  %v14929_v32 = vmax.f32 %v14729_v43, 0.0  ;;  %v14727_v15 = vadd.f32 %v22763_v38, %v14520_v47  ;;  %v12487_v6 = vmax.f32 %v24719_v58, %v11966_v36 }
 0x40b   : > { %v14523_v25 = vmax.f32 %v12489_v14, %v19088_v0  ;;  %v18881_v50 = vpop.f32.mrf.mxu0  ;;  %18976 = vmatmul.mubr.msk.bf16.gmra.mxu0 %vm7385_vm2, %v19620_v28  ;;  %v19091_v51 = vpop.f32.mrf.mxu1  ;;  %19186 = vmatmul.mubr.msk.bf16.gmra.mxu1 %vm7385_vm2, %v19621_v29  ;;  %v24731_v0 = vmax.f32 %v24729_v52, %v24730_v63 }
 0x40c   : > { %15933 = vst.msk [vmem:[%s22364_s22 + $0x164] sm:$0xf] %vm15843_vm3, %v17822_v31  ;;  %v17827_v2 = vpack.c.bf16 %v14929_v32, %v14929_v32  ;;  %v14927_v10 = vmax.f32 %v14727_v15, 0.0  ;;  %v14521_v27 = vmax.f32 %v12487_v6, %v14000_v37  ;;  %v12492_v7 = vmax.f32 %v24722_v22, %v18881_v50  ;;  %18979 = vmatprep.mubr.msk.bf16.mxu0 %vm7385_vm2, %v19622_v48  ;;  %v24732_v48 = vld [vmem:[#allocation156_spill] sm:$0xff]  ;;  %v24735_v15 = vld [vmem:[#allocation158_spill] sm:$0xff] }
 0x40d   : > { %19189 = vmatprep.mubr.msk.bf16.mxu1 %vm7385_vm2, %v19623_v54  ;;  %v14730_v18 = vadd.f32 %v22763_v38, %v14523_v25  ;;  %v11979_v19 = vpop.f32.mrf.mxu0  ;;  %v14013_v34 = vpop.f32.mrf.mxu1  ;;  %v24733_v54 = vld [vmem:[#allocation157_spill] sm:$0xff]  ;;  %v24737_v53 = vmax.f32 %v24735_v15, %v24736_v16 }
 0x40e   : > { %15938 = vst.msk [vmem:[%s22364_s22 + $0x178] sm:$0xf] %vm15843_vm3, %v17827_v2  ;;  %v17825_v35 = vpack.c.bf16 %v14927_v10, %v14927_v10  ;;  %v14728_v8 = vadd.f32 %v22763_v38, %v14521_v27  ;;  %v14526_v55 = vmax.f32 %v12492_v7, %v19091_v51  ;;  %v12490_v9 = vmax.f32 %v24725_v59, %v11979_v19  ;;  %v24738_v27 = vld [vmem:[#allocation160_spill] sm:$0xff] }
 0x40f   : > { %v14930_v57 = vmax.f32 %v14730_v18, 0.0  ;;  %v18882_v60 = vpop.f32.mrf.mxu0  ;;  %v19092_v61 = vpop.f32.mrf.mxu1  ;;  %v24734_v33 = vmax.f32 %v24732_v48, %v24733_v54  ;;  %v24740_v26 = vmax.f32 %v24738_v27, %v24739_v3 }
 0x410   : > { %15936 = vst.msk [vmem:[%s22364_s22 + $0x170] sm:$0xf] %vm15843_vm3, %v17825_v35  ;;  %v14928_v13 = vmax.f32 %v14728_v8, 0.0  ;;  %v14733_v41 = vadd.f32 %v22763_v38, %v14526_v55  ;;  %v14524_v39 = vmax.f32 %v12490_v9, %v14013_v34  ;;  %v12493_v5 = vmax.f32 %v24728_v4, %v18882_v60  ;;  %v24741_v55 = vld [vmem:[#allocation162_spill] sm:$0xff] }
 0x411   : > { %v17828_v40 = vpack.c.bf16 %v14930_v57, %v14930_v57  ;;  %v11982_v23 = vpop.f32.mrf.mxu0  ;;  %v14016_v42 = vpop.f32.mrf.mxu1  ;;  %v24743_v62 = vmax.f32 %v24741_v55, %v24742_v56 }
 0x412   : > { %v17826_v24 = vpack.c.bf16 %v14928_v13, %v14928_v13  ;;  %v14933_v17 = vmax.f32 %v14733_v41, 0.0  ;;  %v14731_v44 = vadd.f32 %v22763_v38, %v14524_v39  ;;  %v14527_v45 = vmax.f32 %v12493_v5, %v19092_v61  ;;  %v24744_v41 = vld [vmem:[#allocation164_spill] sm:$0xff]  ;;  %v24745_v39 = vld [vmem:[#allocation165_spill] sm:$0xff] }
 0x413   : > { %15939 = vst.msk [vmem:[%s22364_s22 + $0x17c] sm:$0xf] %vm15843_vm3, %v17828_v40  ;;  %v12491_v28 = vmax.f32 %v24731_v0, %v11982_v23  ;;  %v18885_v29 = vpop.f32.mrf.mxu0  ;;  %18980 = vmatmul.mubr.msk.bf16.gmra.mxu0 %vm7385_vm2, %v19624_v30  ;;  %v19095_v11 = vpop.f32.mrf.mxu1  ;;  %19190 = vmatmul.mubr.msk.bf16.gmra.mxu1 %vm7385_vm2, %v19625_v12  ;;  %v24746_v46 = vmax.f32 %v24744_v41, %v24745_v39 }
 0x414   : > { %15937 = vst.msk [vmem:[%s22364_s22 + $0x174] sm:$0xf] %vm15843_vm3, %v17826_v24  ;;  %v17831_v20 = vpack.c.bf16 %v14933_v17, %v14933_v17  ;;  %v14931_v43 = vmax.f32 %v14731_v44, 0.0  ;;  %v14734_v47 = vadd.f32 %v22763_v38, %v14527_v45  ;;  %v12496_v21 = vmax.f32 %v24734_v33, %v18885_v29  ;;  %v24747_v24 = vld [vmem:[#allocation166_spill] sm:$0xff]  ;;  %v24748_v17 = vld [vmem:[#allocation167_spill] sm:$0xff] }
 0x415   : > { %v14525_v1 = vmax.f32 %v12491_v28, %v14016_v42  ;;  %v11995_v14 = vpop.f32.mrf.mxu0  ;;  %v14029_v36 = vpop.f32.mrf.mxu1  ;;  %v24749_v44 = vmax.f32 %v24747_v24, %v24748_v17 }
 0x416   : > { %15942 = vst.msk [vmem:[%s22364_s22 + $0x188] sm:$0xf] %vm15843_vm3, %v17831_v20  ;;  %v17829_v37 = vpack.c.bf16 %v14931_v43, %v14931_v43  ;;  %v14934_v31 = vmax.f32 %v14734_v47, 0.0  ;;  %v14530_v32 = vmax.f32 %v12496_v21, %v19095_v11  ;;  %v12494_v58 = vmax.f32 %v24737_v53, %v11995_v14  ;;  %v24750_v20 = vld [vmem:[#allocation168_spill] sm:$0xff]  ;;  %v24751_v43 = vld [vmem:[#allocation169_spill] sm:$0xff] }
 0x417   : > { %v14732_v6 = vadd.f32 %v22763_v38, %v14525_v1  ;;  %v18886_v25 = vpop.f32.mrf.mxu0  ;;  %v19096_v50 = vpop.f32.mrf.mxu1  ;;  %v24752_v47 = vmax.f32 %v24750_v20, %v24751_v43 }
 0x418   : > { %15940 = vst.msk [vmem:[%s22364_s22 + $0x180] sm:$0xf] %vm15843_vm3, %v17829_v37  ;;  %v17832_v51 = vpack.c.bf16 %v14934_v31, %v14934_v31  ;;  %v14737_v2 = vadd.f32 %v22763_v38, %v14530_v32  ;;  %v14528_v10 = vmax.f32 %v12494_v58, %v14029_v36  ;;  %v12497_v22 = vmax.f32 %v24740_v26, %v18886_v25  ;;  %v24753_v37 = vld [vmem:[#allocation170_spill] sm:$0xff]  ;;  %v24754_v31 = vld [vmem:[#allocation171_spill] sm:$0xff] }
 0x419   : > { %v14932_v7 = vmax.f32 %v14732_v6, 0.0  ;;  %v11998_v18 = vpop.f32.mrf.mxu0  ;;  %v14032_v19 = vpop.f32.mrf.mxu1  ;;  %v24755_v32 = vmax.f32 %v24753_v37, %v24754_v31 }
 0x41a   : > { %15943 = vst.msk [vmem:[%s22364_s22 + $0x18c] sm:$0xf] %vm15843_vm3, %v17832_v51  ;;  %v14937_v34 = vmax.f32 %v14737_v2, 0.0  ;;  %v14735_v35 = vadd.f32 %v22763_v38, %v14528_v10  ;;  %v14531_v8 = vmax.f32 %v12497_v22, %v19096_v50  ;;  %v12495_v59 = vmax.f32 %v24743_v62, %v11998_v18  ;;  %v24756_v51 = vld [vmem:[#allocation172_spill] sm:$0xff]  ;;  %v24757_v2 = vld [vmem:[#allocation173_spill] sm:$0xff] }
 0x41b   : > { %v17830_v9 = vpack.c.bf16 %v14932_v7, %v14932_v7  ;;  %v18889_v57 = vpop.f32.mrf.mxu0  ;;  %v19099_v60 = vpop.f32.mrf.mxu1  ;;  %v24758_v10 = vmax.f32 %v24756_v51, %v24757_v2 }
 0x41c   : > { %v17835_v61 = vpack.c.bf16 %v14937_v34, %v14937_v34  ;;  %v14935_v30 = vmax.f32 %v14735_v35, 0.0  ;;  %v14738_v12 = vadd.f32 %v22763_v38, %v14531_v8  ;;  %v14529_v13 = vmax.f32 %v12495_v59, %v14032_v19  ;;  %v24759_v35 = vld [vmem:[#allocation174_spill] sm:$0xff]  ;;  %v24760_v8 = vld [vmem:[#allocation175_spill] sm:$0xff] }
 0x41d   : > { %15941 = vst.msk [vmem:[%s22364_s22 + $0x184] sm:$0xf] %vm15843_vm3, %v17830_v9  ;;  %v12500_v49 = vmax.f32 %v24746_v46, %v18889_v57  ;;  %v12011_v4 = vpop.f32.mrf.mxu0  ;;  %v14045_v5 = vpop.f32.mrf.mxu1  ;;  %v24761_v55 = vmax.f32 %v24759_v35, %v24760_v8 }
 0x41e   : > { %15946 = vst.msk [vmem:[%s22364_s22 + $0x198] sm:$0xf] %vm15843_vm3, %v17835_v61  ;;  %v17833_v40 = vpack.c.bf16 %v14935_v30, %v14935_v30  ;;  %v14938_v23 = vmax.f32 %v14738_v12, 0.0  ;;  %v14736_v42 = vadd.f32 %v22763_v38, %v14529_v13  ;;  %v12498_v45 = vmax.f32 %v24749_v44, %v12011_v4  ;;  %v23181_v38 = vld [vmem:[%s23771_s2] ss:$0 sm:$0xff]  ;;  %v24762_v61 = vld [vmem:[#allocation176_spill] sm:$0xff] }
 0x41f   : > { %v14534_v52 = vmax.f32 %v12500_v49, %v19099_v60  ;;  %v18890_v63 = vpop.f32.mrf.mxu0  ;;  %v19100_v0 = vpop.f32.mrf.mxu1  ;;  %v24763_v30 = vld [vmem:[#allocation177_spill] sm:$0xff] }
 0x420   : > { %15944 = vst.msk [vmem:[%s22364_s22 + $0x190] sm:$0xf] %vm15843_vm3, %v17833_v40  ;;  %v17836_v28 = vpack.c.bf16 %v14938_v23, %v14938_v23  ;;  %v14936_v29 = vmax.f32 %v14736_v42, 0.0  ;;  %v14532_v11 = vmax.f32 %v12498_v45, %v14045_v5  ;;  %v12501_v48 = vmax.f32 %v24752_v47, %v18890_v63  ;;  %v24765_v40 = vld [vmem:[#allocation178_spill] sm:$0xff]  ;;  %v24766_v23 = vld [vmem:[#allocation179_spill] sm:$0xff] }
 0x421   : > { %v14741_v54 = vadd.f32 %v23181_v38, %v14534_v52  ;;  %v12014_v33 = vpop.f32.mrf.mxu0  ;;  %v14048_v21 = vpop.f32.mrf.mxu1  ;;  %v24764_v12 = vmax.f32 %v24762_v61, %v24763_v30  ;;  %v24767_v42 = vmax.f32 %v24765_v40, %v24766_v23 }
 0x422   : > { %15947 = vst.msk [vmem:[%s22364_s22 + $0x19c] sm:$0xf] %vm15843_vm3, %v17836_v28  ;;  %v17834_v1 = vpack.c.bf16 %v14936_v29, %v14936_v29  ;;  %v14739_v14 = vadd.f32 %v23181_v38, %v14532_v11  ;;  %v14535_v36 = vmax.f32 %v12501_v48, %v19100_v0  ;;  %v12499_v15 = vmax.f32 %v24755_v32, %v12014_v33  ;;  %v24768_v28 = vld [vmem:[#allocation180_spill] sm:$0xff]  ;;  %v24769_v29 = vld [vmem:[#allocation181_spill] sm:$0xff] }
 0x423   : > { %v14941_v16 = vmax.f32 %v14741_v54, 0.0  ;;  %v18893_v53 = vpop.f32.mrf.mxu0  ;;  %v19103_v58 = vpop.f32.mrf.mxu1  ;;  %v24770_v11 = vmax.f32 %v24768_v28, %v24769_v29 }
 0x424   : > { %15945 = vst.msk [vmem:[%s22364_s22 + $0x194] sm:$0xf] %vm15843_vm3, %v17834_v1  ;;  %v14939_v6 = vmax.f32 %v14739_v14, 0.0  ;;  %v14742_v25 = vadd.f32 %v23181_v38, %v14535_v36  ;;  %v14533_v50 = vmax.f32 %v12499_v15, %v14048_v21  ;;  %v12504_v27 = vmax.f32 %v24758_v10, %v18893_v53  ;;  %v24771_v1 = vld [vmem:[#allocation182_spill] sm:$0xff]  ;;  %v24772_v14 = vld [vmem:[#allocation183_spill] sm:$0xff] }
 0x425   : > { %v17839_v3 = vpack.c.bf16 %v14941_v16, %v14941_v16  ;;  %v12027_v26 = vpop.f32.mrf.mxu0  ;;  %v14061_v22 = vpop.f32.mrf.mxu1  ;;  %v24773_v36 = vmax.f32 %v24771_v1, %v24772_v14 }
 0x426   : > { %v17837_v7 = vpack.c.bf16 %v14939_v6, %v14939_v6  ;;  %v14942_v18 = vmax.f32 %v14742_v25, 0.0  ;;  %v14740_v19 = vadd.f32 %v23181_v38, %v14533_v50  ;;  %v14538_v34 = vmax.f32 %v12504_v27, %v19103_v58  ;;  %v24774_v25 = vld [vmem:[#allocation184_spill] sm:$0xff]  ;;  %v24775_v50 = vld [vmem:[#allocation185_spill] sm:$0xff] }
 0x427   : > { %15950 = vst.msk [vmem:[%s22364_s22 + $0x1a8] sm:$0xf] %vm15843_vm3, %v17839_v3  ;;  %v12502_v56 = vmax.f32 %v24761_v55, %v12027_v26  ;;  %v18894_v62 = vpop.f32.mrf.mxu0  ;;  %v19104_v59 = vpop.f32.mrf.mxu1  ;;  %v24776_v51 = vmax.f32 %v24774_v25, %v24775_v50 }
 0x428   : > { %15948 = vst.msk [vmem:[%s22364_s22 + $0x1a0] sm:$0xf] %vm15843_vm3, %v17837_v7  ;;  %v17840_v9 = vpack.c.bf16 %v14942_v18, %v14942_v18  ;;  %v14940_v57 = vmax.f32 %v14740_v19, 0.0  ;;  %v14745_v60 = vadd.f32 %v23181_v38, %v14538_v34  ;;  %v12505_v13 = vmax.f32 %v24764_v12, %v18894_v62  ;;  %v24777_v7 = vld [vmem:[#allocation186_spill] sm:$0xff]  ;;  %v24778_v18 = vld [vmem:[#allocation187_spill] sm:$0xff] }
 0x429   : > { %v14536_v41 = vmax.f32 %v12502_v56, %v14061_v22  ;;  %v12030_v39 = vpop.f32.mrf.mxu0  ;;  %v14064_v46 = vpop.f32.mrf.mxu1  ;;  %v24779_v19 = vmax.f32 %v24777_v7, %v24778_v18 }
 0x42a   : > { %15951 = vst.msk [vmem:[%s22364_s22 + $0x1ac] sm:$0xf] %vm15843_vm3, %v17840_v9  ;;  %v17838_v49 = vpack.c.bf16 %v14940_v57, %v14940_v57  ;;  %v14945_v4 = vmax.f32 %v14745_v60, 0.0  ;;  %v14539_v5 = vmax.f32 %v12505_v13, %v19104_v59  ;;  %v12503_v24 = vmax.f32 %v24767_v42, %v12030_v39  ;;  %v24780_v9 = vld [vmem:[#allocation188_spill] sm:$0xff]  ;;  %v24781_v57 = vld [vmem:[#allocation189_spill] sm:$0xff] }
 0x42b   : > { %v14743_v17 = vadd.f32 %v23181_v38, %v14536_v41  ;;  %v18897_v44 = vpop.f32.mrf.mxu0  ;;  %v19107_v45 = vpop.f32.mrf.mxu1  ;;  %v24782_v60 = vmax.f32 %v24780_v9, %v24781_v57 }
 0x42c   : > { %15949 = vst.msk [vmem:[%s22364_s22 + $0x1a4] sm:$0xf] %vm15843_vm3, %v17838_v49  ;;  %v17843_v52 = vpack.c.bf16 %v14945_v4, %v14945_v4  ;;  %v14746_v63 = vadd.f32 %v23181_v38, %v14539_v5  ;;  %v14537_v0 = vmax.f32 %v12503_v24, %v14064_v46  ;;  %v12508_v20 = vmax.f32 %v24770_v11, %v18897_v44  ;;  %v24783_v49 = vld [vmem:[#allocation190_spill] sm:$0xff]  ;;  %v24784_v4 = vld [vmem:[#allocation191_spill] sm:$0xff] }
 0x42d   : > { %v14943_v43 = vmax.f32 %v14743_v17, 0.0  ;;  %v12043_v47 = vpop.f32.mrf.mxu0  ;;  %v14077_v48 = vpop.f32.mrf.mxu1  ;;  %v24785_v5 = vmax.f32 %v24783_v49, %v24784_v4 }
 0x42e   : > { %15954 = vst.msk [vmem:[%s22364_s22 + $0x1b8] sm:$0xf] %vm15843_vm3, %v17843_v52  ;;  %v14946_v54 = vmax.f32 %v14746_v63, 0.0  ;;  %v14744_v33 = vadd.f32 %v23181_v38, %v14537_v0  ;;  %v14542_v21 = vmax.f32 %v12508_v20, %v19107_v45  ;;  %v12506_v37 = vmax.f32 %v24773_v36, %v12043_v47  ;;  %v24786_v52 = vld [vmem:[#allocation192_spill] sm:$0xff]  ;;  %v24787_v63 = vld [vmem:[#allocation193_spill] sm:$0xff] }
 0x42f   : > { %v17841_v31 = vpack.c.bf16 %v14943_v43, %v14943_v43  ;;  %v18898_v32 = vpop.f32.mrf.mxu0  ;;  %v19108_v15 = vpop.f32.mrf.mxu1  ;;  %v24788_v0 = vmax.f32 %v24786_v52, %v24787_v63 }
 0x430   : > { %v17844_v16 = vpack.c.bf16 %v14946_v54, %v14946_v54  ;;  %v14944_v53 = vmax.f32 %v14744_v33, 0.0  ;;  %v14749_v58 = vadd.f32 %v23181_v38, %v14542_v21  ;;  %v14540_v6 = vmax.f32 %v12506_v37, %v14077_v48  ;;  %v24789_v33 = vld [vmem:[#allocation194_spill] sm:$0xff]  ;;  %v24790_v21 = vld [vmem:[#allocation195_spill] sm:$0xff] }
 0x431   : > { %15952 = vst.msk [vmem:[%s22364_s22 + $0x1b0] sm:$0xf] %vm15843_vm3, %v17841_v31  ;;  %v12509_v2 = vmax.f32 %v24776_v51, %v18898_v32  ;;  %v12046_v10 = vpop.f32.mrf.mxu0  ;;  %v14080_v27 = vpop.f32.mrf.mxu1  ;;  %v24791_v1 = vmax.f32 %v24789_v33, %v24790_v21 }
 0x432   : > { %15955 = vst.msk [vmem:[%s22364_s22 + $0x1bc] sm:$0xf] %vm15843_vm3, %v17844_v16  ;;  %v17842_v3 = vpack.c.bf16 %v14944_v53, %v14944_v53  ;;  %v14949_v26 = vmax.f32 %v14749_v58, 0.0  ;;  %v14747_v22 = vadd.f32 %v23181_v38, %v14540_v6  ;;  %v12507_v34 = vmax.f32 %v24779_v19, %v12046_v10  ;;  %v24792_v16 = vld [vmem:[#allocation196_spill] sm:$0xff]  ;;  %v24793_v53 = vld [vmem:[#allocation197_spill] sm:$0xff] }
 0x433   : > { %v14543_v35 = vmax.f32 %v12509_v2, %v19108_v15  ;;  %v18901_v8 = vpop.f32.mrf.mxu0  ;;  %v19111_v55 = vpop.f32.mrf.mxu1  ;;  %v24794_v58 = vmax.f32 %v24792_v16, %v24793_v53 }
 0x434   : > { %15953 = vst.msk [vmem:[%s22364_s22 + $0x1b4] sm:$0xf] %vm15843_vm3, %v17842_v3  ;;  %v17847_v56 = vpack.c.bf16 %v14949_v26, %v14949_v26  ;;  %v14947_v62 = vmax.f32 %v14747_v22, 0.0  ;;  %v14541_v59 = vmax.f32 %v12507_v34, %v14080_v27  ;;  %v12512_v61 = vmax.f32 %v24782_v60, %v18901_v8  ;;  %v24795_v3 = vld [vmem:[#allocation198_spill] sm:$0xff]  ;;  %v24796_v26 = vld [vmem:[#allocation199_spill] sm:$0xff] }
 0x435   : > { %v14750_v30 = vadd.f32 %v23181_v38, %v14543_v35  ;;  %v12059_v12 = vpop.f32.mrf.mxu0  ;;  %v14093_v13 = vpop.f32.mrf.mxu1  ;;  %v24797_v22 = vmax.f32 %v24795_v3, %v24796_v26 }
 0x436   : > { %15958 = vst.msk [vmem:[%s22364_s22 + $0x1c8] sm:$0xf] %vm15843_vm3, %v17847_v56  ;;  %v17845_v41 = vpack.c.bf16 %v14947_v62, %v14947_v62  ;;  %v14748_v39 = vadd.f32 %v23181_v38, %v14541_v59  ;;  %v14546_v46 = vmax.f32 %v12512_v61, %v19111_v55  ;;  %v12510_v40 = vmax.f32 %v24785_v5, %v12059_v12  ;;  %v24798_v56 = vld [vmem:[#allocation200_spill] sm:$0xff]  ;;  %v24799_v62 = vld [vmem:[#allocation201_spill] sm:$0xff] }
 0x437   : > { %v14950_v23 = vmax.f32 %v14750_v30, 0.0  ;;  %v18902_v42 = vpop.f32.mrf.mxu0  ;;  %v19112_v24 = vpop.f32.mrf.mxu1  ;;  %v24800_v59 = vmax.f32 %v24798_v56, %v24799_v62 }
 0x438   : > { %15956 = vst.msk [vmem:[%s22364_s22 + $0x1c0] sm:$0xf] %vm15843_vm3, %v17845_v41  ;;  %v14948_v17 = vmax.f32 %v14748_v39, 0.0  ;;  %v14753_v44 = vadd.f32 %v23181_v38, %v14546_v46  ;;  %v14544_v45 = vmax.f32 %v12510_v40, %v14093_v13  ;;  %v12513_v28 = vmax.f32 %v24788_v0, %v18902_v42  ;;  %v24801_v41 = vld [vmem:[#allocation202_spill] sm:$0xff]  ;;  %v24802_v39 = vld [vmem:[#allocation203_spill] sm:$0xff] }
 0x439   : > { %v17848_v29 = vpack.c.bf16 %v14950_v23, %v14950_v23  ;;  %v12062_v11 = vpop.f32.mrf.mxu0  ;;  %v14096_v20 = vpop.f32.mrf.mxu1  ;;  %v24803_v46 = vmax.f32 %v24801_v41, %v24802_v39 }
 0x43a   : > { %v17846_v43 = vpack.c.bf16 %v14948_v17, %v14948_v17  ;;  %v14953_v47 = vmax.f32 %v14753_v44, 0.0  ;;  %v14751_v48 = vadd.f32 %v23181_v38, %v14544_v45  ;;  %v14547_v54 = vmax.f32 %v12513_v28, %v19112_v24  ;;  %v24804_v44 = vld [vmem:[#allocation204_spill] sm:$0xff]  ;;  %v24805_v45 = vld [vmem:[#allocation205_spill] sm:$0xff] }
 0x43b   : > { %15959 = vst.msk [vmem:[%s22364_s22 + $0x1cc] sm:$0xf] %vm15843_vm3, %v17848_v29  ;;  %v12511_v14 = vmax.f32 %v24791_v1, %v12062_v11  ;;  %v18905_v36 = vpop.f32.mrf.mxu0  ;;  %v19115_v37 = vpop.f32.mrf.mxu1  ;;  %v24806_v52 = vmax.f32 %v24804_v44, %v24805_v45 }
 0x43c   : > { %15957 = vst.msk [vmem:[%s22364_s22 + $0x1c4] sm:$0xf] %vm15843_vm3, %v17846_v43  ;;  %v17851_v31 = vpack.c.bf16 %v14953_v47, %v14953_v47  ;;  %v14951_v32 = vmax.f32 %v14751_v48, 0.0  ;;  %v14754_v15 = vadd.f32 %v23181_v38, %v14547_v54  ;;  %v12516_v6 = vmax.f32 %v24794_v58, %v18905_v36  ;;  %v24807_v43 = vld [vmem:[#allocation206_spill] sm:$0xff]  ;;  %v24808_v47 = vld [vmem:[#allocation207_spill] sm:$0xff] }
 0x43d   : > { %v14545_v25 = vmax.f32 %v12511_v14, %v14096_v20  ;;  %v12075_v50 = vpop.f32.mrf.mxu0  ;;  %v14109_v51 = vpop.f32.mrf.mxu1  ;;  %v24809_v48 = vmax.f32 %v24807_v43, %v24808_v47 }
 0x43e   : > { %15962 = vst.msk [vmem:[%s22364_s22 + $0x1d8] sm:$0xf] %vm15843_vm3, %v17851_v31  ;;  %v17849_v2 = vpack.c.bf16 %v14951_v32, %v14951_v32  ;;  %v14954_v10 = vmax.f32 %v14754_v15, 0.0  ;;  %v14550_v27 = vmax.f32 %v12516_v6, %v19115_v37  ;;  %v12514_v7 = vmax.f32 %v24797_v22, %v12075_v50  ;;  %v24810_v31 = vld [vmem:[#allocation208_spill] sm:$0xff]  ;;  %v24811_v32 = vld [vmem:[#allocation209_spill] sm:$0xff] }
 0x43f   : > { %v14752_v18 = vadd.f32 %v23181_v38, %v14545_v25  ;;  %v18906_v19 = vpop.f32.mrf.mxu0  ;;  %v19116_v34 = vpop.f32.mrf.mxu1  ;;  %v24812_v15 = vmax.f32 %v24810_v31, %v24811_v32 }
 0x440   : > { %15960 = vst.msk [vmem:[%s22364_s22 + $0x1d0] sm:$0xf] %vm15843_vm3, %v17849_v2  ;;  %v17852_v35 = vpack.c.bf16 %v14954_v10, %v14954_v10  ;;  %v14757_v8 = vadd.f32 %v23181_v38, %v14550_v27  ;;  %v14548_v55 = vmax.f32 %v12514_v7, %v14109_v51  ;;  %v12517_v9 = vmax.f32 %v24800_v59, %v18906_v19  ;;  %v24813_v2 = vld [vmem:[#allocation210_spill] sm:$0xff]  ;;  %v24814_v10 = vld [vmem:[#allocation211_spill] sm:$0xff] }
 0x441   : > { %v14952_v57 = vmax.f32 %v14752_v18, 0.0  ;;  %v12078_v60 = vpop.f32.mrf.mxu0  ;;  %v14112_v61 = vpop.f32.mrf.mxu1  ;;  %v24815_v27 = vmax.f32 %v24813_v2, %v24814_v10 }
 0x442   : > { %15963 = vst.msk [vmem:[%s22364_s22 + $0x1dc] sm:$0xf] %vm15843_vm3, %v17852_v35  ;;  %v14957_v30 = vmax.f32 %v14757_v8, 0.0  ;;  %v14755_v12 = vadd.f32 %v23181_v38, %v14548_v55  ;;  %v14551_v13 = vmax.f32 %v12517_v9, %v19116_v34  ;;  %v12515_v49 = vmax.f32 %v24803_v46, %v12078_v60  ;;  %v24816_v35 = vld [vmem:[#allocation212_spill] sm:$0xff]  ;;  %v24817_v8 = vld [vmem:[#allocation213_spill] sm:$0xff] }
 0x443   : > { %v17850_v4 = vpack.c.bf16 %v14952_v57, %v14952_v57  ;;  %v18909_v5 = vpop.f32.mrf.mxu0  ;;  %v19119_v40 = vpop.f32.mrf.mxu1  ;;  %v24818_v55 = vmax.f32 %v24816_v35, %v24817_v8 }
 0x444   : > { %v17855_v23 = vpack.c.bf16 %v14957_v30, %v14957_v30  ;;  %v14955_v42 = vmax.f32 %v14755_v12, 0.0  ;;  %v14758_v24 = vadd.f32 %v23181_v38, %v14551_v13  ;;  %v14549_v17 = vmax.f32 %v12515_v49, %v14112_v61  ;;  %v24819_v12 = vld [vmem:[#allocation214_spill] sm:$0xff]  ;;  %v24820_v13 = vld [vmem:[#allocation215_spill] sm:$0xff] }
 0x445   : > { %15961 = vst.msk [vmem:[%s22364_s22 + $0x1d4] sm:$0xf] %vm15843_vm3, %v17850_v4  ;;  %v12520_v63 = vmax.f32 %v24806_v52, %v18909_v5  ;;  %v12091_v0 = vpop.f32.mrf.mxu0  ;;  %v14125_v28 = vpop.f32.mrf.mxu1  ;;  %v24821_v41 = vmax.f32 %v24819_v12, %v24820_v13 }
 0x446   : > { %15966 = vst.msk [vmem:[%s22364_s22 + $0x1e8] sm:$0xf] %vm15843_vm3, %v17855_v23  ;;  %v17853_v29 = vpack.c.bf16 %v14955_v42, %v14955_v42  ;;  %v14958_v11 = vmax.f32 %v14758_v24, 0.0  ;;  %v14756_v20 = vadd.f32 %v23181_v38, %v14549_v17  ;;  %v12518_v54 = vmax.f32 %v24809_v48, %v12091_v0  ;;  %v24822_v23 = vld [vmem:[#allocation216_spill] sm:$0xff]  ;;  %v24823_v42 = vld [vmem:[#allocation217_spill] sm:$0xff] }
 0x447   : > { %v14554_v33 = vmax.f32 %v12520_v63, %v19119_v40  ;;  %v18910_v21 = vpop.f32.mrf.mxu0  ;;  %v19120_v1 = vpop.f32.mrf.mxu1  ;;  %v24824_v24 = vmax.f32 %v24822_v23, %v24823_v42 }
 0x448   : > { %15964 = vst.msk [vmem:[%s22364_s22 + $0x1e0] sm:$0xf] %vm15843_vm3, %v17853_v29  ;;  %v17856_v14 = vpack.c.bf16 %v14958_v11, %v14958_v11  ;;  %v14956_v36 = vmax.f32 %v14756_v20, 0.0  ;;  %v14552_v37 = vmax.f32 %v12518_v54, %v14125_v28  ;;  %v12521_v16 = vmax.f32 %v24812_v15, %v18910_v21  ;;  %v24825_v29 = vld [vmem:[#allocation218_spill] sm:$0xff]  ;;  %v24826_v11 = vld [vmem:[#allocation219_spill] sm:$0xff] }
 0x449   : > { %v14761_v53 = vadd.f32 %v23181_v38, %v14554_v33  ;;  %v12094_v58 = vpop.f32.mrf.mxu0  ;;  %v14128_v6 = vpop.f32.mrf.mxu1  ;;  %v24827_v20 = vmax.f32 %v24825_v29, %v24826_v11 }
 0x44a   : > { %15967 = vst.msk [vmem:[%s22364_s22 + $0x1ec] sm:$0xf] %vm15843_vm3, %v17856_v14  ;;  %v17854_v25 = vpack.c.bf16 %v14956_v36, %v14956_v36  ;;  %v14759_v50 = vadd.f32 %v23181_v38, %v14552_v37  ;;  %v14555_v51 = vmax.f32 %v12521_v16, %v19120_v1  ;;  %v12519_v3 = vmax.f32 %v24815_v27, %v12094_v58  ;;  %v24828_v14 = vld [vmem:[#allocation220_spill] sm:$0xff]  ;;  %v24829_v36 = vld [vmem:[#allocation221_spill] sm:$0xff] }
 0x44b   : > { %v14961_v26 = vmax.f32 %v14761_v53, 0.0  ;;  %v18913_v22 = vpop.f32.mrf.mxu0  ;;  %v19123_v7 = vpop.f32.mrf.mxu1  ;;  %v24830_v37 = vmax.f32 %v24828_v14, %v24829_v36 }
 0x44c   : > { %15965 = vst.msk [vmem:[%s22364_s22 + $0x1e4] sm:$0xf] %vm15843_vm3, %v17854_v25  ;;  %v14959_v18 = vmax.f32 %v14759_v50, 0.0  ;;  %v14762_v19 = vadd.f32 %v23181_v38, %v14555_v51  ;;  %v14553_v34 = vmax.f32 %v12519_v3, %v14128_v6  ;;  %v12524_v56 = vmax.f32 %v24818_v55, %v18913_v22  ;;  %v24831_v25 = vld [vmem:[#allocation222_spill] sm:$0xff]  ;;  %v24832_v50 = vld [vmem:[#allocation223_spill] sm:$0xff] }
 0x44d   : > { %v17859_v62 = vpack.c.bf16 %v14961_v26, %v14961_v26  ;;  %v12107_v59 = vpop.f32.mrf.mxu0  ;;  %v14141_v9 = vpop.f32.mrf.mxu1  ;;  %v24833_v51 = vmax.f32 %v24831_v25, %v24832_v50 }
 0x44e   : > { %v17857_v57 = vpack.c.bf16 %v14959_v18, %v14959_v18  ;;  %v14962_v60 = vmax.f32 %v14762_v19, 0.0  ;;  %v14760_v61 = vadd.f32 %v23181_v38, %v14553_v34  ;;  %v14558_v30 = vmax.f32 %v12524_v56, %v19123_v7  ;;  %v24834_v19 = vld [vmem:[#allocation224_spill] sm:$0xff]  ;;  %v24835_v34 = vld [vmem:[#allocation225_spill] sm:$0xff] }
 0x44f   : > { %15970 = vst.msk [vmem:[%s22364_s22 + $0x1f8] sm:$0xf] %vm15843_vm3, %v17859_v62  ;;  %v12522_v39 = vmax.f32 %v24821_v41, %v12107_v59  ;;  %v18914_v46 = vpop.f32.mrf.mxu0  ;;  %v19124_v49 = vpop.f32.mrf.mxu1  ;;  %v24836_v35 = vmax.f32 %v24834_v19, %v24835_v34 }
 0x450   : > { %15968 = vst.msk [vmem:[%s22364_s22 + $0x1f0] sm:$0xf] %vm15843_vm3, %v17857_v57  ;;  %v17860_v4 = vpack.c.bf16 %v14962_v60, %v14962_v60  ;;  %v14960_v5 = vmax.f32 %v14760_v61, 0.0  ;;  %v14765_v40 = vadd.f32 %v23181_v38, %v14558_v30  ;;  %v12525_v17 = vmax.f32 %v24824_v24, %v18914_v46  ;;  %v24837_v57 = vld [vmem:[#allocation226_spill] sm:$0xff]  ;;  %v24838_v60 = vld [vmem:[#allocation227_spill] sm:$0xff] }
 0x451   : > { %v14556_v44 = vmax.f32 %v12522_v39, %v14141_v9  ;;  %v12110_v45 = vpop.f32.mrf.mxu0  ;;  %v14144_v52 = vpop.f32.mrf.mxu1  ;;  %v24839_v61 = vmax.f32 %v24837_v57, %v24838_v60 }
 0x452   : > { %15971 = vst.msk [vmem:[%s22364_s22 + $0x1fc] sm:$0xf] %vm15843_vm3, %v17860_v4  ;;  %v17858_v63 = vpack.c.bf16 %v14960_v5, %v14960_v5  ;;  %v14965_v0 = vmax.f32 %v14765_v40, 0.0  ;;  %v14559_v28 = vmax.f32 %v12525_v17, %v19124_v49  ;;  %v12523_v43 = vmax.f32 %v24827_v20, %v12110_v45  ;;  %v24840_v4 = vld [vmem:[#allocation228_spill] sm:$0xff]  ;;  %v24841_v5 = vld [vmem:[#allocation229_spill] sm:$0xff] }
 0x453   : > { %v14763_v47 = vadd.f32 %v23181_v38, %v14556_v44  ;;  %v18917_v48 = vpop.f32.mrf.mxu0  ;;  %v19127_v54 = vpop.f32.mrf.mxu1  ;;  %v24842_v40 = vmax.f32 %v24840_v4, %v24841_v5 }
 0x454   : > { %15969 = vst.msk [vmem:[%s22364_s22 + $0x1f4] sm:$0xf] %vm15843_vm3, %v17858_v63  ;;  %v17863_v33 = vpack.c.bf16 %v14965_v0, %v14965_v0  ;;  %v14766_v21 = vadd.f32 %v23181_v38, %v14559_v28  ;;  %v14557_v1 = vmax.f32 %v12523_v43, %v14144_v52  ;;  %v12528_v31 = vmax.f32 %v24830_v37, %v18917_v48  ;;  %v24843_v63 = vld [vmem:[#allocation230_spill] sm:$0xff]  ;;  %v24844_v0 = vld [vmem:[#allocation231_spill] sm:$0xff] }
 0x455   : > { %v14963_v32 = vmax.f32 %v14763_v47, 0.0  ;;  %v12123_v15 = vpop.f32.mrf.mxu0  ;;  %v14157_v16 = vpop.f32.mrf.mxu1  ;;  %v24845_v28 = vmax.f32 %v24843_v63, %v24844_v0 }
 0x456   : > { %15974 = vst.msk [vmem:[%s22364_s22 + $0x208] sm:$0xf] %vm15843_vm3, %v17863_v33  ;;  %v14966_v53 = vmax.f32 %v14766_v21, 0.0  ;;  %v14764_v58 = vadd.f32 %v23181_v38, %v14557_v1  ;;  %v14562_v6 = vmax.f32 %v12528_v31, %v19127_v54  ;;  %v12526_v2 = vmax.f32 %v24833_v51, %v12123_v15  ;;  %v24846_v33 = vld [vmem:[#allocation232_spill] sm:$0xff]  ;;  %v24847_v21 = vld [vmem:[#allocation233_spill] sm:$0xff] }
 0x457   : > { %v17861_v10 = vpack.c.bf16 %v14963_v32, %v14963_v32  ;;  %v18918_v27 = vpop.f32.mrf.mxu0  ;;  %v19128_v3 = vpop.f32.mrf.mxu1  ;;  %v24848_v1 = vmax.f32 %v24846_v33, %v24847_v21 }
 0x458   : > { %v17864_v26 = vpack.c.bf16 %v14966_v53, %v14966_v53  ;;  %v14964_v22 = vmax.f32 %v14764_v58, 0.0  ;;  %v14769_v7 = vadd.f32 %v23181_v38, %v14562_v6  ;;  %v14560_v18 = vmax.f32 %v12526_v2, %v14157_v16  ;;  %v24849_v58 = vld [vmem:[#allocation234_spill] sm:$0xff]  ;;  %v24850_v6 = vld [vmem:[#allocation235_spill] sm:$0xff] }
 0x459   : > { %15972 = vst.msk [vmem:[%s22364_s22 + $0x200] sm:$0xf] %vm15843_vm3, %v17861_v10  ;;  %v12529_v8 = vmax.f32 %v24836_v35, %v18918_v27  ;;  %v12126_v55 = vpop.f32.mrf.mxu0  ;;  %v14160_v56 = vpop.f32.mrf.mxu1  ;;  %v24851_v25 = vmax.f32 %v24849_v58, %v24850_v6 }
 0x45a   : > { %15975 = vst.msk [vmem:[%s22364_s22 + $0x20c] sm:$0xf] %vm15843_vm3, %v17864_v26  ;;  %v17862_v62 = vpack.c.bf16 %v14964_v22, %v14964_v22  ;;  %v14969_v59 = vmax.f32 %v14769_v7, 0.0  ;;  %v14767_v9 = vadd.f32 %v23181_v38, %v14560_v18  ;;  %v12527_v30 = vmax.f32 %v24839_v61, %v12126_v55  ;;  %v24852_v26 = vld [vmem:[#allocation236_spill] sm:$0xff]  ;;  %v24853_v22 = vld [vmem:[#allocation237_spill] sm:$0xff] }
 0x45b   : > { %v14563_v12 = vmax.f32 %v12529_v8, %v19128_v3  ;;  %v18921_v13 = vpop.f32.mrf.mxu0  ;;  %v19131_v41 = vpop.f32.mrf.mxu1  ;;  %v24854_v7 = vmax.f32 %v24852_v26, %v24853_v22 }
 0x45c   : > { %15973 = vst.msk [vmem:[%s22364_s22 + $0x204] sm:$0xf] %vm15843_vm3, %v17862_v62  ;;  %v17867_v39 = vpack.c.bf16 %v14969_v59, %v14969_v59  ;;  %v14967_v46 = vmax.f32 %v14767_v9, 0.0  ;;  %v14561_v49 = vmax.f32 %v12527_v30, %v14160_v56  ;;  %v12532_v23 = vmax.f32 %v24842_v40, %v18921_v13  ;;  %v24855_v62 = vld [vmem:[#allocation238_spill] sm:$0xff]  ;;  %v24856_v59 = vld [vmem:[#allocation239_spill] sm:$0xff] }
 0x45d   : > { %v14770_v42 = vadd.f32 %v23181_v38, %v14563_v12  ;;  %v12139_v24 = vpop.f32.mrf.mxu0  ;;  %v14173_v17 = vpop.f32.mrf.mxu1  ;;  %v24857_v9 = vmax.f32 %v24855_v62, %v24856_v59 }
 0x45e   : > { %15978 = vst.msk [vmem:[%s22364_s22 + $0x218] sm:$0xf] %vm15843_vm3, %v17867_v39  ;;  %v17865_v44 = vpack.c.bf16 %v14967_v46, %v14967_v46  ;;  %v14768_v45 = vadd.f32 %v23181_v38, %v14561_v49  ;;  %v14566_v52 = vmax.f32 %v12532_v23, %v19131_v41  ;;  %v12530_v29 = vmax.f32 %v24845_v28, %v12139_v24  ;;  %v24858_v39 = vld [vmem:[#allocation240_spill] sm:$0xff]  ;;  %v24859_v46 = vld [vmem:[#allocation241_spill] sm:$0xff] }
 0x45f   : > { %v14970_v11 = vmax.f32 %v14770_v42, 0.0  ;;  %v18922_v20 = vpop.f32.mrf.mxu0  ;;  %v19132_v43 = vpop.f32.mrf.mxu1  ;;  %v24860_v49 = vmax.f32 %v24858_v39, %v24859_v46 }
 0x460   : > { %15976 = vst.msk [vmem:[%s22364_s22 + $0x210] sm:$0xf] %vm15843_vm3, %v17865_v44  ;;  %v14968_v47 = vmax.f32 %v14768_v45, 0.0  ;;  %v14773_v48 = vadd.f32 %v23181_v38, %v14566_v52  ;;  %v14564_v54 = vmax.f32 %v12530_v29, %v14173_v17  ;;  %v12533_v14 = vmax.f32 %v24848_v1, %v18922_v20  ;;  %v24861_v44 = vld [vmem:[#allocation242_spill] sm:$0xff]  ;;  %v24862_v45 = vld [vmem:[#allocation243_spill] sm:$0xff] }
 0x461   : > { %v17868_v36 = vpack.c.bf16 %v14970_v11, %v14970_v11  ;;  %v12142_v37 = vpop.f32.mrf.mxu0  ;;  %v14176_v31 = vpop.f32.mrf.mxu1  ;;  %v24863_v52 = vmax.f32 %v24861_v44, %v24862_v45 }
 0x462   : > { %v17866_v32 = vpack.c.bf16 %v14968_v47, %v14968_v47  ;;  %v14973_v15 = vmax.f32 %v14773_v48, 0.0  ;;  %v14771_v16 = vadd.f32 %v23181_v38, %v14564_v54  ;;  %v14567_v53 = vmax.f32 %v12533_v14, %v19132_v43  ;;  %v24864_v48 = vld [vmem:[#allocation244_spill] sm:$0xff]  ;;  %v24865_v54 = vld [vmem:[#allocation245_spill] sm:$0xff] }
 0x463   : > { %15979 = vst.msk [vmem:[%s22364_s22 + $0x21c] sm:$0xf] %vm15843_vm3, %v17868_v36  ;;  %v12531_v50 = vmax.f32 %v24851_v25, %v12142_v37  ;;  %v18925_v51 = vpop.f32.mrf.mxu0  ;;  %v19135_v2 = vpop.f32.mrf.mxu1  ;;  %v24866_v33 = vmax.f32 %v24864_v48, %v24865_v54 }
 0x464   : > { %15977 = vst.msk [vmem:[%s22364_s22 + $0x214] sm:$0xf] %vm15843_vm3, %v17866_v32  ;;  %v17871_v10 = vpack.c.bf16 %v14973_v15, %v14973_v15  ;;  %v14971_v27 = vmax.f32 %v14771_v16, 0.0  ;;  %v14774_v3 = vadd.f32 %v23181_v38, %v14567_v53  ;;  %v12536_v18 = vmax.f32 %v24854_v7, %v18925_v51  ;;  %v24867_v32 = vld [vmem:[#allocation246_spill] sm:$0xff]  ;;  %v24868_v15 = vld [vmem:[#allocation247_spill] sm:$0xff] }
 0x465   : > { %v14565_v19 = vmax.f32 %v12531_v50, %v14176_v31  ;;  %v12155_v34 = vpop.f32.mrf.mxu0  ;;  %v14189_v35 = vpop.f32.mrf.mxu1  ;;  %v24869_v16 = vmax.f32 %v24867_v32, %v24868_v15 }
 0x466   : > { %15982 = vst.msk [vmem:[%s22364_s22 + $0x228] sm:$0xf] %vm15843_vm3, %v17871_v10  ;;  %v17869_v8 = vpack.c.bf16 %v14971_v27, %v14971_v27  ;;  %v14974_v55 = vmax.f32 %v14774_v3, 0.0  ;;  %v14570_v56 = vmax.f32 %v12536_v18, %v19135_v2  ;;  %v12534_v57 = vmax.f32 %v24857_v9, %v12155_v34  ;;  %v24870_v10 = vld [vmem:[#allocation248_spill] sm:$0xff]  ;;  %v24871_v27 = vld [vmem:[#allocation249_spill] sm:$0xff] }
 0x467   : > { %v14772_v60 = vadd.f32 %v23181_v38, %v14565_v19  ;;  %v18926_v61 = vpop.f32.mrf.mxu0  ;;  %v19136_v30 = vpop.f32.mrf.mxu1  ;;  %v24872_v3 = vmax.f32 %v24870_v10, %v24871_v27 }
 0x468   : > { %15980 = vst.msk [vmem:[%s22364_s22 + $0x220] sm:$0xf] %vm15843_vm3, %v17869_v8  ;;  %v17872_v12 = vpack.c.bf16 %v14974_v55, %v14974_v55  ;;  %v14777_v13 = vadd.f32 %v23181_v38, %v14570_v56  ;;  %v14568_v41 = vmax.f32 %v12534_v57, %v14189_v35  ;;  %v12537_v4 = vmax.f32 %v24860_v49, %v18926_v61  ;;  %v24873_v8 = vld [vmem:[#allocation250_spill] sm:$0xff]  ;;  %v24874_v55 = vld [vmem:[#allocation251_spill] sm:$0xff] }
 0x469   : > { %v14972_v5 = vmax.f32 %v14772_v60, 0.0  ;;  %v12158_v40 = vpop.f32.mrf.mxu0  ;;  %v14192_v23 = vpop.f32.mrf.mxu1  ;;  %v24875_v56 = vmax.f32 %v24873_v8, %v24874_v55 }
 0x46a   : > { %15983 = vst.msk [vmem:[%s22364_s22 + $0x22c] sm:$0xf] %vm15843_vm3, %v17872_v12  ;;  %v14977_v42 = vmax.f32 %v14777_v13, 0.0  ;;  %v14775_v24 = vadd.f32 %v23181_v38, %v14568_v41  ;;  %v14571_v17 = vmax.f32 %v12537_v4, %v19136_v30  ;;  %v12535_v63 = vmax.f32 %v24863_v52, %v12158_v40  ;;  %v24876_v12 = vld [vmem:[#allocation252_spill] sm:$0xff]  ;;  %v24877_v13 = vld [vmem:[#allocation253_spill] sm:$0xff] }
 0x46b   : > { %v17870_v0 = vpack.c.bf16 %v14972_v5, %v14972_v5  ;;  %v18929_v28 = vpop.f32.mrf.mxu0  ;;  %v19139_v29 = vpop.f32.mrf.mxu1  ;;  %v24878_v41 = vmax.f32 %v24876_v12, %v24877_v13 }
 0x46c   : > { %v17875_v11 = vpack.c.bf16 %v14977_v42, %v14977_v42  ;;  %v14975_v20 = vmax.f32 %v14775_v24, 0.0  ;;  %v14778_v43 = vadd.f32 %v23181_v38, %v14571_v17  ;;  %v14569_v47 = vmax.f32 %v12535_v63, %v14192_v23  ;;  %v24879_v24 = vld [vmem:[#allocation254_spill] sm:$0xff]  ;;  %v24880_v17 = vld [vmem:[#allocation255_spill] sm:$0xff] }
 0x46d   : > { %15981 = vst.msk [vmem:[%s22364_s22 + $0x224] sm:$0xf] %vm15843_vm3, %v17870_v0  ;;  %v12540_v21 = vmax.f32 %v24866_v33, %v18929_v28  ;;  %v12171_v1 = vpop.f32.mrf.mxu0  ;;  %v14205_v14 = vpop.f32.mrf.mxu1  ;;  %v24881_v44 = vmax.f32 %v24879_v24, %v24880_v17 }
 0x46e   : > { %15986 = vst.msk [vmem:[%s22364_s22 + $0x238] sm:$0xf] %vm15843_vm3, %v17875_v11  ;;  %v17873_v36 = vpack.c.bf16 %v14975_v20, %v14975_v20  ;;  %v14978_v37 = vmax.f32 %v14778_v43, 0.0  ;;  %v14776_v31 = vadd.f32 %v23181_v38, %v14569_v47  ;;  %v12538_v53 = vmax.f32 %v24869_v16, %v12171_v1  ;;  %v24882_v11 = vld [vmem:[#allocation256_spill] sm:$0xff]  ;;  %v24883_v20 = vld [vmem:[#allocation257_spill] sm:$0xff] }
 0x46f   : > { %v14574_v58 = vmax.f32 %v12540_v21, %v19139_v29  ;;  %v18930_v6 = vpop.f32.mrf.mxu0  ;;  %v19140_v25 = vpop.f32.mrf.mxu1  ;;  %v24884_v43 = vmax.f32 %v24882_v11, %v24883_v20 }
 0x470   : > { %15984 = vst.msk [vmem:[%s22364_s22 + $0x230] sm:$0xf] %vm15843_vm3, %v17873_v36  ;;  %v17876_v50 = vpack.c.bf16 %v14978_v37, %v14978_v37  ;;  %v14976_v51 = vmax.f32 %v14776_v31, 0.0  ;;  %v14572_v2 = vmax.f32 %v12538_v53, %v14205_v14  ;;  %v12541_v26 = vmax.f32 %v24872_v3, %v18930_v6  ;;  %v24885_v36 = vld [vmem:[#allocation258_spill] sm:$0xff]  ;;  %v24886_v37 = vld [vmem:[#allocation259_spill] sm:$0xff] }
 0x471   : > { %v14781_v22 = vadd.f32 %v23181_v38, %v14574_v58  ;;  %v12174_v7 = vpop.f32.mrf.mxu0  ;;  %v14208_v18 = vpop.f32.mrf.mxu1  ;;  %v24887_v31 = vmax.f32 %v24885_v36, %v24886_v37 }
 0x472   : > { %15987 = vst.msk [vmem:[%s22364_s22 + $0x23c] sm:$0xf] %vm15843_vm3, %v17876_v50  ;;  %v17874_v19 = vpack.c.bf16 %v14976_v51, %v14976_v51  ;;  %v14779_v34 = vadd.f32 %v23181_v38, %v14572_v2  ;;  %v14575_v35 = vmax.f32 %v12541_v26, %v19140_v25  ;;  %v12539_v62 = vmax.f32 %v24875_v56, %v12174_v7  ;;  %v24888_v50 = vld [vmem:[#allocation260_spill] sm:$0xff]  ;;  %v24889_v51 = vld [vmem:[#allocation261_spill] sm:$0xff] }
 0x473   : > { %v14981_v59 = vmax.f32 %v14781_v22, 0.0  ;;  %v18933_v9 = vpop.f32.mrf.mxu0  ;;  %v19143_v57 = vpop.f32.mrf.mxu1  ;;  %v24890_v2 = vmax.f32 %v24888_v50, %v24889_v51 }
 0x474   : > { %15985 = vst.msk [vmem:[%s22364_s22 + $0x234] sm:$0xf] %vm15843_vm3, %v17874_v19  ;;  %v14979_v60 = vmax.f32 %v14779_v34, 0.0  ;;  %v14782_v61 = vadd.f32 %v23181_v38, %v14575_v35  ;;  %v14573_v30 = vmax.f32 %v12539_v62, %v14208_v18  ;;  %v12544_v39 = vmax.f32 %v24878_v41, %v18933_v9  ;;  %v24891_v19 = vld [vmem:[#allocation262_spill] sm:$0xff]  ;;  %v24892_v34 = vld [vmem:[#allocation263_spill] sm:$0xff] }
 0x475   : > { %v17879_v46 = vpack.c.bf16 %v14981_v59, %v14981_v59  ;;  %v12187_v49 = vpop.f32.mrf.mxu0  ;;  %v14221_v4 = vpop.f32.mrf.mxu1  ;;  %v24893_v35 = vmax.f32 %v24891_v19, %v24892_v34 }
 0x476   : > { %v17877_v5 = vpack.c.bf16 %v14979_v60, %v14979_v60  ;;  %v14982_v40 = vmax.f32 %v14782_v61, 0.0  ;;  %v14780_v23 = vadd.f32 %v23181_v38, %v14573_v30  ;;  %v14578_v42 = vmax.f32 %v12544_v39, %v19143_v57  ;;  %v24894_v61 = vld [vmem:[#allocation264_spill] sm:$0xff]  ;;  %v24895_v30 = vld [vmem:[#allocation265_spill] sm:$0xff] }
 0x477   : > { %15990 = vst.msk [vmem:[%s22364_s22 + $0x248] sm:$0xf] %vm15843_vm3, %v17879_v46  ;;  %v12542_v45 = vmax.f32 %v24881_v44, %v12187_v49  ;;  %v18934_v52 = vpop.f32.mrf.mxu0  ;;  %v19144_v63 = vpop.f32.mrf.mxu1  ;;  %v24896_v12 = vmax.f32 %v24894_v61, %v24895_v30 }
 0x478   : > { %15988 = vst.msk [vmem:[%s22364_s22 + $0x240] sm:$0xf] %vm15843_vm3, %v17877_v5  ;;  %v17880_v0 = vpack.c.bf16 %v14982_v40, %v14982_v40  ;;  %v14980_v28 = vmax.f32 %v14780_v23, 0.0  ;;  %v14785_v29 = vadd.f32 %v23181_v38, %v14578_v42  ;;  %v12545_v47 = vmax.f32 %v24884_v43, %v18934_v52  ;;  %v24897_v5 = vld [vmem:[#allocation266_spill] sm:$0xff]  ;;  %v24898_v40 = vld [vmem:[#allocation267_spill] sm:$0xff] }
 0x479   : > { %v14576_v48 = vmax.f32 %v12542_v45, %v14221_v4  ;;  %v12190_v54 = vpop.f32.mrf.mxu0  ;;  %v14224_v33 = vpop.f32.mrf.mxu1  ;;  %v24899_v23 = vmax.f32 %v24897_v5, %v24898_v40 }
 0x47a   : > { %15991 = vst.msk [vmem:[%s22364_s22 + $0x24c] sm:$0xf] %vm15843_vm3, %v17880_v0  ;;  %v17878_v21 = vpack.c.bf16 %v14980_v28, %v14980_v28  ;;  %v14985_v1 = vmax.f32 %v14785_v29, 0.0  ;;  %v14579_v14 = vmax.f32 %v12545_v47, %v19144_v63  ;;  %v12543_v32 = vmax.f32 %v24887_v31, %v12190_v54  ;;  %v24900_v0 = vld [vmem:[#allocation268_spill] sm:$0xff]  ;;  %v24901_v28 = vld [vmem:[#allocation269_spill] sm:$0xff] }
 0x47b   : > { %v14783_v15 = vadd.f32 %v23181_v38, %v14576_v48  ;;  %v18937_v16 = vpop.f32.mrf.mxu0  ;;  %v19147_v53 = vpop.f32.mrf.mxu1  ;;  %v24902_v29 = vmax.f32 %v24900_v0, %v24901_v28 }
 0x47c   : > { %15989 = vst.msk [vmem:[%s22364_s22 + $0x244] sm:$0xf] %vm15843_vm3, %v17878_v21  ;;  %v17883_v58 = vpack.c.bf16 %v14985_v1, %v14985_v1  ;;  %v14786_v6 = vadd.f32 %v23181_v38, %v14579_v14  ;;  %v14577_v25 = vmax.f32 %v12543_v32, %v14224_v33  ;;  %v12548_v10 = vmax.f32 %v24890_v2, %v18937_v16  ;;  %v24903_v21 = vld [vmem:[#allocation270_spill] sm:$0xff]  ;;  %v24904_v1 = vld [vmem:[#allocation271_spill] sm:$0xff] }
 0x47d   : > { %v14983_v27 = vmax.f32 %v14783_v15, 0.0  ;;  %v12203_v3 = vpop.f32.mrf.mxu0  ;;  %v14237_v26 = vpop.f32.mrf.mxu1  ;;  %v24905_v14 = vmax.f32 %v24903_v21, %v24904_v1 }
 0x47e   : > { %15994 = vst.msk [vmem:[%s22364_s22 + $0x258] sm:$0xf] %vm15843_vm3, %v17883_v58  ;;  %v14986_v22 = vmax.f32 %v14786_v6, 0.0  ;;  %v14784_v7 = vadd.f32 %v23181_v38, %v14577_v25  ;;  %v14582_v18 = vmax.f32 %v12548_v10, %v19147_v53  ;;  %v12546_v8 = vmax.f32 %v24893_v35, %v12203_v3  ;;  %v24906_v58 = vld [vmem:[#allocation272_spill] sm:$0xff]  ;;  %v24907_v6 = vld [vmem:[#allocation273_spill] sm:$0xff] }
 0x47f   : > { %v17881_v55 = vpack.c.bf16 %v14983_v27, %v14983_v27  ;;  %v18938_v56 = vpop.f32.mrf.mxu0  ;;  %v19148_v62 = vpop.f32.mrf.mxu1  ;;  %v24908_v25 = vmax.f32 %v24906_v58, %v24907_v6 }
 0x480   : > { %v17884_v59 = vpack.c.bf16 %v14986_v22, %v14986_v22  ;;  %v14984_v9 = vmax.f32 %v14784_v7, 0.0  ;;  %v14789_v57 = vadd.f32 %v23181_v38, %v14582_v18  ;;  %v14580_v60 = vmax.f32 %v12546_v8, %v14237_v26  ;;  %v24909_v7 = vld [vmem:[#allocation274_spill] sm:$0xff]  ;;  %v24910_v18 = vld [vmem:[#allocation275_spill] sm:$0xff] }
 0x481   : > { %15992 = vst.msk [vmem:[%s22364_s22 + $0x250] sm:$0xf] %vm15843_vm3, %v17881_v55  ;;  %v12549_v13 = vmax.f32 %v24896_v12, %v18938_v56  ;;  %v12206_v41 = vpop.f32.mrf.mxu0  ;;  %v14240_v39 = vpop.f32.mrf.mxu1  ;;  %v24911_v19 = vmax.f32 %v24909_v7, %v24910_v18 }
 0x482   : > { %15995 = vst.msk [vmem:[%s22364_s22 + $0x25c] sm:$0xf] %vm15843_vm3, %v17884_v59  ;;  %v17882_v46 = vpack.c.bf16 %v14984_v9, %v14984_v9  ;;  %v14989_v49 = vmax.f32 %v14789_v57, 0.0  ;;  %v14787_v4 = vadd.f32 %v23181_v38, %v14580_v60  ;;  %v12547_v42 = vmax.f32 %v24899_v23, %v12206_v41  ;;  %v24912_v59 = vld [vmem:[#allocation276_spill] sm:$0xff]  ;;  %v24913_v9 = vld [vmem:[#allocation277_spill] sm:$0xff] }
 0x483   : > { %v14583_v24 = vmax.f32 %v12549_v13, %v19148_v62  ;;  %v18941_v17 = vpop.f32.mrf.mxu0  ;;  %v19151_v44 = vpop.f32.mrf.mxu1  ;;  %v24914_v57 = vmax.f32 %v24912_v59, %v24913_v9 }
 0x484   : > { %15993 = vst.msk [vmem:[%s22364_s22 + $0x254] sm:$0xf] %vm15843_vm3, %v17882_v46  ;;  %v17887_v45 = vpack.c.bf16 %v14989_v49, %v14989_v49  ;;  %v14987_v52 = vmax.f32 %v14787_v4, 0.0  ;;  %v14581_v63 = vmax.f32 %v12547_v42, %v14240_v39  ;;  %v12552_v11 = vmax.f32 %v24902_v29, %v18941_v17  ;;  %v24915_v46 = vld [vmem:[#allocation278_spill] sm:$0xff]  ;;  %v24916_v49 = vld [vmem:[#allocation279_spill] sm:$0xff] }
 0x485   : > { %v14790_v20 = vadd.f32 %v23181_v38, %v14583_v24  ;;  %v12219_v43 = vpop.f32.mrf.mxu0  ;;  %v14253_v47 = vpop.f32.mrf.mxu1  ;;  %v24917_v4 = vmax.f32 %v24915_v46, %v24916_v49 }
 0x486   : > { %15998 = vst.msk [vmem:[%s22364_s22 + $0x268] sm:$0xf] %vm15843_vm3, %v17887_v45  ;;  %v17885_v48 = vpack.c.bf16 %v14987_v52, %v14987_v52  ;;  %v14788_v54 = vadd.f32 %v23181_v38, %v14581_v63  ;;  %v14586_v33 = vmax.f32 %v12552_v11, %v19151_v44  ;;  %v12550_v36 = vmax.f32 %v24905_v14, %v12219_v43  ;;  %v24918_v45 = vld [vmem:[#allocation280_spill] sm:$0xff]  ;;  %v24919_v52 = vld [vmem:[#allocation281_spill] sm:$0xff] }
 0x487   : > { %v14990_v37 = vmax.f32 %v14790_v20, 0.0  ;;  %v18942_v31 = vpop.f32.mrf.mxu0  ;;  %v19152_v32 = vpop.f32.mrf.mxu1  ;;  %v24920_v63 = vmax.f32 %v24918_v45, %v24919_v52 }
 0x488   : > { %15996 = vst.msk [vmem:[%s22364_s22 + $0x260] sm:$0xf] %vm15843_vm3, %v17885_v48  ;;  %v14988_v15 = vmax.f32 %v14788_v54, 0.0  ;;  %v14793_v16 = vadd.f32 %v23181_v38, %v14586_v33  ;;  %v14584_v53 = vmax.f32 %v12550_v36, %v14253_v47  ;;  %v12553_v50 = vmax.f32 %v24908_v25, %v18942_v31  ;;  %v24921_v48 = vld [vmem:[#allocation282_spill] sm:$0xff]  ;;  %v24922_v54 = vld [vmem:[#allocation283_spill] sm:$0xff] }
 0x489   : > { %v17888_v51 = vpack.c.bf16 %v14990_v37, %v14990_v37  ;;  %v12222_v2 = vpop.f32.mrf.mxu0  ;;  %v14256_v10 = vpop.f32.mrf.mxu1  ;;  %v24923_v33 = vmax.f32 %v24921_v48, %v24922_v54 }
 0x48a   : > { %v17886_v27 = vpack.c.bf16 %v14988_v15, %v14988_v15  ;;  %v14993_v3 = vmax.f32 %v14793_v16, 0.0  ;;  %v14791_v26 = vadd.f32 %v23181_v38, %v14584_v53  ;;  %v14587_v22 = vmax.f32 %v12553_v50, %v19152_v32  ;;  %v24924_v16 = vld [vmem:[#allocation284_spill] sm:$0xff]  ;;  %v24925_v53 = vld [vmem:[#allocation285_spill] sm:$0xff] }
 0x48b   : > { %15999 = vst.msk [vmem:[%s22364_s22 + $0x26c] sm:$0xf] %vm15843_vm3, %v17888_v51  ;;  %v12551_v34 = vmax.f32 %v24911_v19, %v12222_v2  ;;  %v18945_v35 = vpop.f32.mrf.mxu0  ;;  %v19155_v8 = vpop.f32.mrf.mxu1  ;;  %v24926_v58 = vmax.f32 %v24924_v16, %v24925_v53 }
 0x48c   : > { %15997 = vst.msk [vmem:[%s22364_s22 + $0x264] sm:$0xf] %vm15843_vm3, %v17886_v27  ;;  %v17891_v55 = vpack.c.bf16 %v14993_v3, %v14993_v3  ;;  %v14991_v56 = vmax.f32 %v14791_v26, 0.0  ;;  %v14794_v62 = vadd.f32 %v23181_v38, %v14587_v22  ;;  %v12556_v60 = vmax.f32 %v24914_v57, %v18945_v35  ;;  %v24927_v27 = vld [vmem:[#allocation286_spill] sm:$0xff]  ;;  %v24928_v3 = vld [vmem:[#allocation287_spill] sm:$0xff] }
 0x48d   : > { %v14585_v61 = vmax.f32 %v12551_v34, %v14256_v10  ;;  %v12235_v30 = vpop.f32.mrf.mxu0  ;;  %v14269_v12 = vpop.f32.mrf.mxu1  ;;  %v24929_v26 = vmax.f32 %v24927_v27, %v24928_v3 }
 0x48e   : > { %16002 = vst.msk [vmem:[%s22364_s22 + $0x278] sm:$0xf] %vm15843_vm3, %v17891_v55  ;;  %v17889_v13 = vpack.c.bf16 %v14991_v56, %v14991_v56  ;;  %v14994_v41 = vmax.f32 %v14794_v62, 0.0  ;;  %v14590_v39 = vmax.f32 %v12556_v60, %v19155_v8  ;;  %v12554_v5 = vmax.f32 %v24917_v4, %v12235_v30  ;;  %v24930_v55 = vld [vmem:[#allocation288_spill] sm:$0xff]  ;;  %v24931_v56 = vld [vmem:[#allocation289_spill] sm:$0xff] }
 0x48f   : > { %v14792_v40 = vadd.f32 %v23181_v38, %v14585_v61  ;;  %v18946_v23 = vpop.f32.mrf.mxu0  ;;  %v19156_v42 = vpop.f32.mrf.mxu1  ;;  %v24932_v62 = vmax.f32 %v24930_v55, %v24931_v56 }
 0x490   : > { %16000 = vst.msk [vmem:[%s22364_s22 + $0x270] sm:$0xf] %vm15843_vm3, %v17889_v13  ;;  %v17892_v24 = vpack.c.bf16 %v14994_v41, %v14994_v41  ;;  %v14797_v17 = vadd.f32 %v23181_v38, %v14590_v39  ;;  %v14588_v44 = vmax.f32 %v12554_v5, %v14269_v12  ;;  %v12557_v0 = vmax.f32 %v24920_v63, %v18946_v23  ;;  %v24933_v13 = vld [vmem:[#allocation290_spill] sm:$0xff]  ;;  %v24934_v41 = vld [vmem:[#allocation291_spill] sm:$0xff] }
 0x491   : > { %v14992_v28 = vmax.f32 %v14792_v40, 0.0  ;;  %v12238_v29 = vpop.f32.mrf.mxu0  ;;  %v14272_v11 = vpop.f32.mrf.mxu1  ;;  %v24935_v39 = vmax.f32 %v24933_v13, %v24934_v41 }
 0x492   : > { %16003 = vst.msk [vmem:[%s22364_s22 + $0x27c] sm:$0xf] %vm15843_vm3, %v17892_v24  ;;  %v14997_v20 = vmax.f32 %v14797_v17, 0.0  ;;  %v14795_v43 = vadd.f32 %v23181_v38, %v14588_v44  ;;  %v14591_v47 = vmax.f32 %v12557_v0, %v19156_v42  ;;  %v12555_v21 = vmax.f32 %v24923_v33, %v12238_v29  ;;  %v24936_v24 = vld [vmem:[#allocation292_spill] sm:$0xff]  ;;  %v24937_v17 = vld [vmem:[#allocation293_spill] sm:$0xff] }
 0x493   : > { %v17890_v1 = vpack.c.bf16 %v14992_v28, %v14992_v28  ;;  %v18949_v14 = vpop.f32.mrf.mxu0  ;;  %v19159_v36 = vpop.f32.mrf.mxu1  ;;  %v24938_v44 = vmax.f32 %v24936_v24, %v24937_v17 }
 0x494   : > { %v17895_v37 = vpack.c.bf16 %v14997_v20, %v14997_v20  ;;  %v14995_v31 = vmax.f32 %v14795_v43, 0.0  ;;  %v14798_v32 = vadd.f32 %v23181_v38, %v14591_v47  ;;  %v14589_v15 = vmax.f32 %v12555_v21, %v14272_v11  ;;  %v24939_v43 = vld [vmem:[#allocation294_spill] sm:$0xff]  ;;  %v24940_v47 = vld [vmem:[#allocation295_spill] sm:$0xff] }
 0x495   : > { %16001 = vst.msk [vmem:[%s22364_s22 + $0x274] sm:$0xf] %vm15843_vm3, %v17890_v1  ;;  %v12560_v6 = vmax.f32 %v24926_v58, %v18949_v14  ;;  %v12251_v25 = vpop.f32.mrf.mxu0  ;;  %v14285_v50 = vpop.f32.mrf.mxu1  ;;  %v24941_v48 = vmax.f32 %v24939_v43, %v24940_v47 }
 0x496   : > { %16006 = vst.msk [vmem:[%s22364_s22 + $0x288] sm:$0xf] %vm15843_vm3, %v17895_v37  ;;  %v17893_v51 = vpack.c.bf16 %v14995_v31, %v14995_v31  ;;  %v14998_v2 = vmax.f32 %v14798_v32, 0.0  ;;  %v14796_v10 = vadd.f32 %v23181_v38, %v14589_v15  ;;  %v12558_v22 = vmax.f32 %v24929_v26, %v12251_v25  ;;  %v24942_v37 = vld [vmem:[#allocation296_spill] sm:$0xff]  ;;  %v24943_v31 = vld [vmem:[#allocation297_spill] sm:$0xff] }
 0x497   : > { %v14594_v7 = vmax.f32 %v12560_v6, %v19159_v36  ;;  %v18950_v18 = vpop.f32.mrf.mxu0  ;;  %v19160_v19 = vpop.f32.mrf.mxu1  ;;  %v24944_v32 = vmax.f32 %v24942_v37, %v24943_v31 }
 0x498   : > { %16004 = vst.msk [vmem:[%s22364_s22 + $0x280] sm:$0xf] %vm15843_vm3, %v17893_v51  ;;  %v17896_v34 = vpack.c.bf16 %v14998_v2, %v14998_v2  ;;  %v14996_v35 = vmax.f32 %v14796_v10, 0.0  ;;  %v14592_v8 = vmax.f32 %v12558_v22, %v14285_v50  ;;  %v12561_v59 = vmax.f32 %v24932_v62, %v18950_v18  ;;  %v24945_v51 = vld [vmem:[#allocation298_spill] sm:$0xff]  ;;  %v24946_v2 = vld [vmem:[#allocation299_spill] sm:$0xff] }
 0x499   : > { %v14801_v9 = vadd.f32 %v23181_v38, %v14594_v7  ;;  %v12254_v57 = vpop.f32.mrf.mxu0  ;;  %v14288_v60 = vpop.f32.mrf.mxu1  ;;  %v24947_v10 = vmax.f32 %v24945_v51, %v24946_v2 }
 0x49a   : > { %16007 = vst.msk [vmem:[%s22364_s22 + $0x28c] sm:$0xf] %vm15843_vm3, %v17896_v34  ;;  %v17894_v61 = vpack.c.bf16 %v14996_v35, %v14996_v35  ;;  %v14799_v30 = vadd.f32 %v23181_v38, %v14592_v8  ;;  %v14595_v12 = vmax.f32 %v12561_v59, %v19160_v19  ;;  %v12559_v46 = vmax.f32 %v24935_v39, %v12254_v57  ;;  %v24948_v34 = vld [vmem:[#allocation300_spill] sm:$0xff]  ;;  %v24949_v35 = vld [vmem:[#allocation301_spill] sm:$0xff] }
 0x49b   : > { %v15001_v49 = vmax.f32 %v14801_v9, 0.0  ;;  %v18953_v4 = vpop.f32.mrf.mxu0  ;;  %v19163_v5 = vpop.f32.mrf.mxu1  ;;  %v24950_v8 = vmax.f32 %v24948_v34, %v24949_v35 }
 0x49c   : > { %16005 = vst.msk [vmem:[%s22364_s22 + $0x284] sm:$0xf] %vm15843_vm3, %v17894_v61  ;;  %v14999_v40 = vmax.f32 %v14799_v30, 0.0  ;;  %v14802_v23 = vadd.f32 %v23181_v38, %v14595_v12  ;;  %v14593_v42 = vmax.f32 %v12559_v46, %v14288_v60  ;;  %v12564_v45 = vmax.f32 %v24938_v44, %v18953_v4  ;;  %v24951_v61 = vld [vmem:[#allocation302_spill] sm:$0xff]  ;;  %v24952_v30 = vld [vmem:[#allocation303_spill] sm:$0xff] }
 0x49d   : > { %v17899_v52 = vpack.c.bf16 %v15001_v49, %v15001_v49  ;;  %v12267_v63 = vpop.f32.mrf.mxu0  ;;  %v14301_v0 = vpop.f32.mrf.mxu1  ;;  %v24953_v12 = vmax.f32 %v24951_v61, %v24952_v30 }
 0x49e   : > { %v17897_v28 = vpack.c.bf16 %v14999_v40, %v14999_v40  ;;  %v15002_v29 = vmax.f32 %v14802_v23, 0.0  ;;  %v14800_v11 = vadd.f32 %v23181_v38, %v14593_v42  ;;  %v14598_v20 = vmax.f32 %v12564_v45, %v19163_v5  ;;  %v24954_v23 = vld [vmem:[#allocation304_spill] sm:$0xff]  ;;  %v24955_v42 = vld [vmem:[#allocation305_spill] sm:$0xff] }
 0x49f   : > { %16010 = vst.msk [vmem:[%s22364_s22 + $0x298] sm:$0xf] %vm15843_vm3, %v17899_v52  ;;  %v12562_v54 = vmax.f32 %v24941_v48, %v12267_v63  ;;  %v18954_v33 = vpop.f32.mrf.mxu0  ;;  %v19164_v21 = vpop.f32.mrf.mxu1  ;;  %v24956_v24 = vmax.f32 %v24954_v23, %v24955_v42 }
 0x4a0   : > { %16008 = vst.msk [vmem:[%s22364_s22 + $0x290] sm:$0xf] %vm15843_vm3, %v17897_v28  ;;  %v17900_v1 = vpack.c.bf16 %v15002_v29, %v15002_v29  ;;  %v15000_v14 = vmax.f32 %v14800_v11, 0.0  ;;  %v14805_v36 = vadd.f32 %v23181_v38, %v14598_v20  ;;  %v12565_v15 = vmax.f32 %v24944_v32, %v18954_v33  ;;  %v23576_v38 = vld [vmem:[%s23771_s2] ss:$0 sm:$0xff]  ;;  %v24957_v28 = vld [vmem:[#allocation306_spill] sm:$0xff] }
 0x4a1   : > { %v14596_v16 = vmax.f32 %v12562_v54, %v14301_v0  ;;  %v12270_v53 = vpop.f32.mrf.mxu0  ;;  %v14304_v58 = vpop.f32.mrf.mxu1  ;;  %v24958_v29 = vld [vmem:[#allocation307_spill] sm:$0xff] }
 0x4a2   : > { %16011 = vst.msk [vmem:[%s22364_s22 + $0x29c] sm:$0xf] %vm15843_vm3, %v17900_v1  ;;  %v17898_v6 = vpack.c.bf16 %v15000_v14, %v15000_v14  ;;  %v15005_v25 = vmax.f32 %v14805_v36, 0.0  ;;  %v14599_v50 = vmax.f32 %v12565_v15, %v19164_v21  ;;  %v12563_v27 = vmax.f32 %v24947_v10, %v12270_v53  ;;  %v24960_v1 = vld [vmem:[#allocation308_spill] sm:$0xff]  ;;  %v24961_v14 = vld [vmem:[#allocation309_spill] sm:$0xff] }
 0x4a3   : > { %v14803_v3 = vadd.f32 %v23576_v38, %v14596_v16  ;;  %v18957_v26 = vpop.f32.mrf.mxu0  ;;  %v19167_v22 = vpop.f32.mrf.mxu1  ;;  %v24959_v11 = vmax.f32 %v24957_v28, %v24958_v29  ;;  %v24962_v36 = vmax.f32 %v24960_v1, %v24961_v14 }
 0x4a4   : > { %16009 = vst.msk [vmem:[%s22364_s22 + $0x294] sm:$0xf] %vm15843_vm3, %v17898_v6  ;;  %v17903_v7 = vpack.c.bf16 %v15005_v25, %v15005_v25  ;;  %v14806_v18 = vadd.f32 %v23576_v38, %v14599_v50  ;;  %v14597_v19 = vmax.f32 %v12563_v27, %v14304_v58  ;;  %v12568_v55 = vmax.f32 %v24950_v8, %v18957_v26  ;;  %v24963_v6 = vld [vmem:[#allocation310_spill] sm:$0xff]  ;;  %v24964_v25 = vld [vmem:[#allocation311_spill] sm:$0xff] }
 0x4a5   : > { %v15003_v56 = vmax.f32 %v14803_v3, 0.0  ;;  %v12283_v62 = vpop.f32.mrf.mxu0  ;;  %v14317_v59 = vpop.f32.mrf.mxu1  ;;  %v24965_v50 = vmax.f32 %v24963_v6, %v24964_v25 }
 0x4a6   : > { %16014 = vst.msk [vmem:[%s22364_s22 + $0x2a8] sm:$0xf] %vm15843_vm3, %v17903_v7  ;;  %v15006_v9 = vmax.f32 %v14806_v18, 0.0  ;;  %v14804_v57 = vadd.f32 %v23576_v38, %v14597_v19  ;;  %v14602_v60 = vmax.f32 %v12568_v55, %v19167_v22  ;;  %v12566_v13 = vmax.f32 %v24953_v12, %v12283_v62  ;;  %v24966_v7 = vld [vmem:[#allocation312_spill] sm:$0xff]  ;;  %v24967_v18 = vld [vmem:[#allocation313_spill] sm:$0xff] }
 0x4a7   : > { %v17901_v41 = vpack.c.bf16 %v15003_v56, %v15003_v56  ;;  %v18958_v39 = vpop.f32.mrf.mxu0  ;;  %v19168_v46 = vpop.f32.mrf.mxu1  ;;  %v24968_v19 = vmax.f32 %v24966_v7, %v24967_v18 }
 0x4a8   : > { %v17904_v49 = vpack.c.bf16 %v15006_v9, %v15006_v9  ;;  %v15004_v4 = vmax.f32 %v14804_v57, 0.0  ;;  %v14809_v5 = vadd.f32 %v23576_v38, %v14602_v60  ;;  %v14600_v40 = vmax.f32 %v12566_v13, %v14317_v59  ;;  %v24969_v57 = vld [vmem:[#allocation314_spill] sm:$0xff]  ;;  %v24970_v60 = vld [vmem:[#allocation315_spill] sm:$0xff] }
 0x4a9   : > { %16012 = vst.msk [vmem:[%s22364_s22 + $0x2a0] sm:$0xf] %vm15843_vm3, %v17901_v41  ;;  %v12569_v17 = vmax.f32 %v24956_v24, %v18958_v39  ;;  %v12286_v44 = vpop.f32.mrf.mxu0  ;;  %v14320_v45 = vpop.f32.mrf.mxu1  ;;  %v24971_v61 = vmax.f32 %v24969_v57, %v24970_v60 }
 0x4aa   : > { %16015 = vst.msk [vmem:[%s22364_s22 + $0x2ac] sm:$0xf] %vm15843_vm3, %v17904_v49  ;;  %v17902_v52 = vpack.c.bf16 %v15004_v4, %v15004_v4  ;;  %v15009_v63 = vmax.f32 %v14809_v5, 0.0  ;;  %v14807_v0 = vadd.f32 %v23576_v38, %v14600_v40  ;;  %v12567_v20 = vmax.f32 %v24959_v11, %v12286_v44  ;;  %v24972_v49 = vld [vmem:[#allocation316_spill] sm:$0xff]  ;;  %v24973_v4 = vld [vmem:[#allocation317_spill] sm:$0xff] }
 0x4ab   : > { %v14603_v43 = vmax.f32 %v12569_v17, %v19168_v46  ;;  %v18961_v47 = vpop.f32.mrf.mxu0  ;;  %v19171_v48 = vpop.f32.mrf.mxu1  ;;  %v24974_v5 = vmax.f32 %v24972_v49, %v24973_v4 }
 0x4ac   : > { %16013 = vst.msk [vmem:[%s22364_s22 + $0x2a4] sm:$0xf] %vm15843_vm3, %v17902_v52  ;;  %v17907_v54 = vpack.c.bf16 %v15009_v63, %v15009_v63  ;;  %v15007_v33 = vmax.f32 %v14807_v0, 0.0  ;;  %v14601_v21 = vmax.f32 %v12567_v20, %v14320_v45  ;;  %v12572_v37 = vmax.f32 %v24962_v36, %v18961_v47  ;;  %v24975_v52 = vld [vmem:[#allocation318_spill] sm:$0xff]  ;;  %v24976_v63 = vld [vmem:[#allocation319_spill] sm:$0xff] }
 0x4ad   : > { %v14810_v31 = vadd.f32 %v23576_v38, %v14603_v43  ;;  %v12299_v32 = vpop.f32.mrf.mxu0  ;;  %v14333_v15 = vpop.f32.mrf.mxu1  ;;  %v24977_v0 = vmax.f32 %v24975_v52, %v24976_v63 }
 0x4ae   : > { %16018 = vst.msk [vmem:[%s22364_s22 + $0x2b8] sm:$0xf] %vm15843_vm3, %v17907_v54  ;;  %v17905_v16 = vpack.c.bf16 %v15007_v33, %v15007_v33  ;;  %v14808_v53 = vadd.f32 %v23576_v38, %v14601_v21  ;;  %v14606_v58 = vmax.f32 %v12572_v37, %v19171_v48  ;;  %v12570_v51 = vmax.f32 %v24965_v50, %v12299_v32  ;;  %v24978_v54 = vld [vmem:[#allocation320_spill] sm:$0xff]  ;;  %v24979_v33 = vld [vmem:[#allocation321_spill] sm:$0xff] }
 0x4af   : > { %v15010_v2 = vmax.f32 %v14810_v31, 0.0  ;;  %v18962_v10 = vpop.f32.mrf.mxu0  ;;  %v19172_v27 = vpop.f32.mrf.mxu1  ;;  %v24980_v21 = vmax.f32 %v24978_v54, %v24979_v33 }
 0x4b0   : > { %16016 = vst.msk [vmem:[%s22364_s22 + $0x2b0] sm:$0xf] %vm15843_vm3, %v17905_v16  ;;  %v15008_v3 = vmax.f32 %v14808_v53, 0.0  ;;  %v14813_v26 = vadd.f32 %v23576_v38, %v14606_v58  ;;  %v14604_v22 = vmax.f32 %v12570_v51, %v14333_v15  ;;  %v12573_v34 = vmax.f32 %v24968_v19, %v18962_v10  ;;  %v24981_v16 = vld [vmem:[#allocation322_spill] sm:$0xff]  ;;  %v24982_v53 = vld [vmem:[#allocation323_spill] sm:$0xff] }
 0x4b1   : > { %v17908_v35 = vpack.c.bf16 %v15010_v2, %v15010_v2  ;;  %v12302_v8 = vpop.f32.mrf.mxu0  ;;  %v14336_v55 = vpop.f32.mrf.mxu1  ;;  %v24983_v58 = vmax.f32 %v24981_v16, %v24982_v53 }
 0x4b2   : > { %v17906_v56 = vpack.c.bf16 %v15008_v3, %v15008_v3  ;;  %v15013_v62 = vmax.f32 %v14813_v26, 0.0  ;;  %v14811_v59 = vadd.f32 %v23576_v38, %v14604_v22  ;;  %v14607_v9 = vmax.f32 %v12573_v34, %v19172_v27  ;;  %v24984_v26 = vld [vmem:[#allocation324_spill] sm:$0xff]  ;;  %v24985_v22 = vld [vmem:[#allocation325_spill] sm:$0xff] }
 0x4b3   : > { %16019 = vst.msk [vmem:[%s22364_s22 + $0x2bc] sm:$0xf] %vm15843_vm3, %v17908_v35  ;;  %v12571_v30 = vmax.f32 %v24971_v61, %v12302_v8  ;;  %v18965_v12 = vpop.f32.mrf.mxu0  ;;  %v19175_v13 = vpop.f32.mrf.mxu1  ;;  %v24986_v7 = vmax.f32 %v24984_v26, %v24985_v22 }
 0x4b4   : > { %16017 = vst.msk [vmem:[%s22364_s22 + $0x2b4] sm:$0xf] %vm15843_vm3, %v17906_v56  ;;  %v17911_v41 = vpack.c.bf16 %v15013_v62, %v15013_v62  ;;  %v15011_v39 = vmax.f32 %v14811_v59, 0.0  ;;  %v14814_v46 = vadd.f32 %v23576_v38, %v14607_v9  ;;  %v12576_v40 = vmax.f32 %v24974_v5, %v18965_v12  ;;  %v24987_v56 = vld [vmem:[#allocation326_spill] sm:$0xff]  ;;  %v24988_v62 = vld [vmem:[#allocation327_spill] sm:$0xff] }
 0x4b5   : > { %v14605_v23 = vmax.f32 %v12571_v30, %v14336_v55  ;;  %v12315_v42 = vpop.f32.mrf.mxu0  ;;  %v14349_v24 = vpop.f32.mrf.mxu1  ;;  %v24989_v59 = vmax.f32 %v24987_v56, %v24988_v62 }
 0x4b6   : > { %16022 = vst.msk [vmem:[%s22364_s22 + $0x2c8] sm:$0xf] %vm15843_vm3, %v17911_v41  ;;  %v17909_v17 = vpack.c.bf16 %v15011_v39, %v15011_v39  ;;  %v15014_v44 = vmax.f32 %v14814_v46, 0.0  ;;  %v14610_v45 = vmax.f32 %v12576_v40, %v19175_v13  ;;  %v12574_v28 = vmax.f32 %v24977_v0, %v12315_v42  ;;  %v24990_v41 = vld [vmem:[#allocation328_spill] sm:$0xff]  ;;  %v24991_v39 = vld [vmem:[#allocation329_spill] sm:$0xff] }
 0x4b7   : > { %v14812_v29 = vadd.f32 %v23576_v38, %v14605_v23  ;;  %v18966_v11 = vpop.f32.mrf.mxu0  ;;  %v19176_v20 = vpop.f32.mrf.mxu1  ;;  %v24992_v46 = vmax.f32 %v24990_v41, %v24991_v39 }
 0x4b8   : > { %16020 = vst.msk [vmem:[%s22364_s22 + $0x2c0] sm:$0xf] %vm15843_vm3, %v17909_v17  ;;  %v17912_v43 = vpack.c.bf16 %v15014_v44, %v15014_v44  ;;  %v14817_v47 = vadd.f32 %v23576_v38, %v14610_v45  ;;  %v14608_v48 = vmax.f32 %v12574_v28, %v14349_v24  ;;  %v12577_v1 = vmax.f32 %v24980_v21, %v18966_v11  ;;  %v24993_v17 = vld [vmem:[#allocation330_spill] sm:$0xff]  ;;  %v24994_v44 = vld [vmem:[#allocation331_spill] sm:$0xff] }
 0x4b9   : > { %v15012_v14 = vmax.f32 %v14812_v29, 0.0  ;;  %v12318_v36 = vpop.f32.mrf.mxu0  ;;  %v14352_v37 = vpop.f32.mrf.mxu1  ;;  %v24995_v45 = vmax.f32 %v24993_v17, %v24994_v44 }
 0x4ba   : > { %16023 = vst.msk [vmem:[%s22364_s22 + $0x2cc] sm:$0xf] %vm15843_vm3, %v17912_v43  ;;  %v15017_v31 = vmax.f32 %v14817_v47, 0.0  ;;  %v14815_v32 = vadd.f32 %v23576_v38, %v14608_v48  ;;  %v14611_v15 = vmax.f32 %v12577_v1, %v19176_v20  ;;  %v12575_v6 = vmax.f32 %v24983_v58, %v12318_v36  ;;  %v24996_v43 = vld [vmem:[#allocation332_spill] sm:$0xff]  ;;  %v24997_v47 = vld [vmem:[#allocation333_spill] sm:$0xff] }
 0x4bb   : > { %v17910_v25 = vpack.c.bf16 %v15012_v14, %v15012_v14  ;;  %v18969_v50 = vpop.f32.mrf.mxu0  ;;  %v19179_v51 = vpop.f32.mrf.mxu1  ;;  %v24998_v48 = vmax.f32 %v24996_v43, %v24997_v47 }
 0x4bc   : > { %v17915_v2 = vpack.c.bf16 %v15017_v31, %v15017_v31  ;;  %v15015_v10 = vmax.f32 %v14815_v32, 0.0  ;;  %v14818_v27 = vadd.f32 %v23576_v38, %v14611_v15  ;;  %v14609_v3 = vmax.f32 %v12575_v6, %v14352_v37  ;;  %v24999_v32 = vld [vmem:[#allocation334_spill] sm:$0xff]  ;;  %v25000_v15 = vld [vmem:[#allocation335_spill] sm:$0xff] }
 0x4bd   : > { %16021 = vst.msk [vmem:[%s22364_s22 + $0x2c4] sm:$0xf] %vm15843_vm3, %v17910_v25  ;;  %v12580_v18 = vmax.f32 %v24986_v7, %v18969_v50  ;;  %v12331_v19 = vpop.f32.mrf.mxu0  ;;  %v14365_v34 = vpop.f32.mrf.mxu1  ;;  %v25001_v16 = vmax.f32 %v24999_v32, %v25000_v15 }
 0x4be   : > { %16026 = vst.msk [vmem:[%s22364_s22 + $0x2d8] sm:$0xf] %vm15843_vm3, %v17915_v2  ;;  %v17913_v35 = vpack.c.bf16 %v15015_v10, %v15015_v10  ;;  %v15018_v8 = vmax.f32 %v14818_v27, 0.0  ;;  %v14816_v55 = vadd.f32 %v23576_v38, %v14609_v3  ;;  %v12578_v9 = vmax.f32 %v24989_v59, %v12331_v19  ;;  %v25002_v2 = vld [vmem:[#allocation336_spill] sm:$0xff]  ;;  %v25003_v10 = vld [vmem:[#allocation337_spill] sm:$0xff] }
 0x4bf   : > { %v14614_v57 = vmax.f32 %v12580_v18, %v19179_v51  ;;  %v18970_v60 = vpop.f32.mrf.mxu0  ;;  %v19180_v61 = vpop.f32.mrf.mxu1  ;;  %v25004_v27 = vmax.f32 %v25002_v2, %v25003_v10 }
 0x4c0   : > { %16024 = vst.msk [vmem:[%s22364_s22 + $0x2d0] sm:$0xf] %vm15843_vm3, %v17913_v35  ;;  %v17916_v30 = vpack.c.bf16 %v15018_v8, %v15018_v8  ;;  %v15016_v12 = vmax.f32 %v14816_v55, 0.0  ;;  %v14612_v13 = vmax.f32 %v12578_v9, %v14365_v34  ;;  %v12581_v49 = vmax.f32 %v24992_v46, %v18970_v60  ;;  %v25005_v35 = vld [vmem:[#allocation338_spill] sm:$0xff]  ;;  %v25006_v8 = vld [vmem:[#allocation339_spill] sm:$0xff] }
 0x4c1   : > { %v14821_v4 = vadd.f32 %v23576_v38, %v14614_v57  ;;  %v12334_v5 = vpop.f32.mrf.mxu0  ;;  %v14368_v40 = vpop.f32.mrf.mxu1  ;;  %v25007_v55 = vmax.f32 %v25005_v35, %v25006_v8 }
 0x4c2   : > { %16027 = vst.msk [vmem:[%s22364_s22 + $0x2dc] sm:$0xf] %vm15843_vm3, %v17916_v30  ;;  %v17914_v23 = vpack.c.bf16 %v15016_v12, %v15016_v12  ;;  %v14819_v42 = vadd.f32 %v23576_v38, %v14612_v13  ;;  %v14615_v24 = vmax.f32 %v12581_v49, %v19180_v61  ;;  %v12579_v52 = vmax.f32 %v24995_v45, %v12334_v5  ;;  %v25008_v30 = vld [vmem:[#allocation340_spill] sm:$0xff]  ;;  %v25009_v12 = vld [vmem:[#allocation341_spill] sm:$0xff] }
 0x4c3   : > { %v15021_v63 = vmax.f32 %v14821_v4, 0.0  ;;  %v18973_v0 = vpop.f32.mrf.mxu0  ;;  %v19183_v28 = vpop.f32.mrf.mxu1  ;;  %v25010_v13 = vmax.f32 %v25008_v30, %v25009_v12 }
 0x4c4   : > { %16025 = vst.msk [vmem:[%s22364_s22 + $0x2d4] sm:$0xf] %vm15843_vm3, %v17914_v23  ;;  %v15019_v29 = vmax.f32 %v14819_v42, 0.0  ;;  %v14822_v11 = vadd.f32 %v23576_v38, %v14615_v24  ;;  %v14613_v20 = vmax.f32 %v12579_v52, %v14368_v40  ;;  %v12584_v54 = vmax.f32 %v24998_v48, %v18973_v0  ;;  %v25011_v23 = vld [vmem:[#allocation342_spill] sm:$0xff]  ;;  %v25012_v42 = vld [vmem:[#allocation343_spill] sm:$0xff] }
 0x4c5   : > { %v17919_v33 = vpack.c.bf16 %v15021_v63, %v15021_v63  ;;  %v12347_v21 = vpop.f32.mrf.mxu0  ;;  %v14381_v1 = vpop.f32.mrf.mxu1  ;;  %v25013_v24 = vmax.f32 %v25011_v23, %v25012_v42 }
 0x4c6   : > { %v17917_v14 = vpack.c.bf16 %v15019_v29, %v15019_v29  ;;  %v15022_v36 = vmax.f32 %v14822_v11, 0.0  ;;  %v14820_v37 = vadd.f32 %v23576_v38, %v14613_v20  ;;  %v14618_v31 = vmax.f32 %v12584_v54, %v19183_v28  ;;  %v25014_v11 = vld [vmem:[#allocation344_spill] sm:$0xff]  ;;  %v25015_v20 = vld [vmem:[#allocation345_spill] sm:$0xff] }
 0x4c7   : > { %16030 = vst.msk [vmem:[%s22364_s22 + $0x2e8] sm:$0xf] %vm15843_vm3, %v17919_v33  ;;  %v12582_v53 = vmax.f32 %v25001_v16, %v12347_v21  ;;  %v18974_v58 = vpop.f32.mrf.mxu0  ;;  %v19184_v6 = vpop.f32.mrf.mxu1  ;;  %v25016_v43 = vmax.f32 %v25014_v11, %v25015_v20 }
 0x4c8   : > { %16028 = vst.msk [vmem:[%s22364_s22 + $0x2e0] sm:$0xf] %vm15843_vm3, %v17917_v14  ;;  %v17920_v25 = vpack.c.bf16 %v15022_v36, %v15022_v36  ;;  %v15020_v50 = vmax.f32 %v14820_v37, 0.0  ;;  %v14825_v51 = vadd.f32 %v23576_v38, %v14618_v31  ;;  %v12585_v3 = vmax.f32 %v25004_v27, %v18974_v58  ;;  %v25017_v14 = vld [vmem:[#allocation346_spill] sm:$0xff]  ;;  %v25018_v36 = vld [vmem:[#allocation347_spill] sm:$0xff] }
 0x4c9   : > { %v14616_v26 = vmax.f32 %v12582_v53, %v14381_v1  ;;  %v12350_v22 = vpop.f32.mrf.mxu0  ;;  %v14384_v7 = vpop.f32.mrf.mxu1  ;;  %v25019_v37 = vmax.f32 %v25017_v14, %v25018_v36 }
 0x4ca   : > { %16031 = vst.msk [vmem:[%s22364_s22 + $0x2ec] sm:$0xf] %vm15843_vm3, %v17920_v25  ;;  %v17918_v18 = vpack.c.bf16 %v15020_v50, %v15020_v50  ;;  %v15025_v19 = vmax.f32 %v14825_v51, 0.0  ;;  %v14619_v34 = vmax.f32 %v12585_v3, %v19184_v6  ;;  %v12583_v56 = vmax.f32 %v25007_v55, %v12350_v22  ;;  %v25020_v25 = vld [vmem:[#allocation348_spill] sm:$0xff]  ;;  %v25021_v50 = vld [vmem:[#allocation349_spill] sm:$0xff] }
 0x4cb   : > { %v14823_v62 = vadd.f32 %v23576_v38, %v14616_v26  ;;  %v18977_v59 = vpop.f32.mrf.mxu0  ;;  %v19187_v9 = vpop.f32.mrf.mxu1  ;;  %v25022_v51 = vmax.f32 %v25020_v25, %v25021_v50 }
 0x4cc   : > { %16029 = vst.msk [vmem:[%s22364_s22 + $0x2e4] sm:$0xf] %vm15843_vm3, %v17918_v18  ;;  %v17923_v57 = vpack.c.bf16 %v15025_v19, %v15025_v19  ;;  %v14826_v60 = vadd.f32 %v23576_v38, %v14619_v34  ;;  %v14617_v61 = vmax.f32 %v12583_v56, %v14384_v7  ;;  %v12588_v41 = vmax.f32 %v25010_v13, %v18977_v59  ;;  %v25023_v18 = vld [vmem:[#allocation350_spill] sm:$0xff]  ;;  %v25024_v19 = vld [vmem:[#allocation351_spill] sm:$0xff] }
 0x4cd   : > { %v15023_v39 = vmax.f32 %v14823_v62, 0.0  ;;  %v12363_v46 = vpop.f32.mrf.mxu0  ;;  %v14397_v49 = vpop.f32.mrf.mxu1  ;;  %v25025_v34 = vmax.f32 %v25023_v18, %v25024_v19 }
 0x4ce   : > { %16034 = vst.msk [vmem:[%s22364_s22 + $0x2f8] sm:$0xf] %vm15843_vm3, %v17923_v57  ;;  %v15026_v4 = vmax.f32 %v14826_v60, 0.0  ;;  %v14824_v5 = vadd.f32 %v23576_v38, %v14617_v61  ;;  %v14622_v40 = vmax.f32 %v12588_v41, %v19187_v9  ;;  %v12586_v17 = vmax.f32 %v25013_v24, %v12363_v46  ;;  %v25026_v9 = vld [vmem:[#allocation352_spill] sm:$0xff]  ;;  %v25027_v57 = vld [vmem:[#allocation353_spill] sm:$0xff] }
 0x4cf   : > { %v17921_v44 = vpack.c.bf16 %v15023_v39, %v15023_v39  ;;  %v18978_v45 = vpop.f32.mrf.mxu0  ;;  %v19188_v52 = vpop.f32.mrf.mxu1  ;;  %v25028_v60 = vmax.f32 %v25026_v9, %v25027_v57 }
 0x4d0   : > { %v17924_v63 = vpack.c.bf16 %v15026_v4, %v15026_v4  ;;  %v15024_v0 = vmax.f32 %v14824_v5, 0.0  ;;  %v14829_v28 = vadd.f32 %v23576_v38, %v14622_v40  ;;  %v14620_v29 = vmax.f32 %v12586_v17, %v14397_v49  ;;  %v25029_v4 = vld [vmem:[#allocation354_spill] sm:$0xff]  ;;  %v25030_v5 = vld [vmem:[#allocation355_spill] sm:$0xff] }
 0x4d1   : > { %16032 = vst.msk [vmem:[%s22364_s22 + $0x2f0] sm:$0xf] %vm15843_vm3, %v17921_v44  ;;  %v12589_v47 = vmax.f32 %v25016_v43, %v18978_v45  ;;  %v12366_v48 = vpop.f32.mrf.mxu0  ;;  %v14400_v54 = vpop.f32.mrf.mxu1  ;;  %v25031_v40 = vmax.f32 %v25029_v4, %v25030_v5 }
 0x4d2   : > { %16035 = vst.msk [vmem:[%s22364_s22 + $0x2fc] sm:$0xf] %vm15843_vm3, %v17924_v63  ;;  %v17922_v33 = vpack.c.bf16 %v15024_v0, %v15024_v0  ;;  %v15029_v21 = vmax.f32 %v14829_v28, 0.0  ;;  %v14827_v1 = vadd.f32 %v23576_v38, %v14620_v29  ;;  %v12587_v31 = vmax.f32 %v25019_v37, %v12366_v48 }
 0x4d3   : > { %v14623_v32 = vmax.f32 %v12589_v47, %v19188_v52  ;;  %v18981_v15 = vpop.f32.mrf.mxu0  ;;  %v19191_v16 = vpop.f32.mrf.mxu1 }
 0x4d4   : > { %16033 = vst.msk [vmem:[%s22364_s22 + $0x2f4] sm:$0xf] %vm15843_vm3, %v17922_v33  ;;  %v17927_v53 = vpack.c.bf16 %v15029_v21, %v15029_v21  ;;  %v15027_v58 = vmax.f32 %v14827_v1, 0.0  ;;  %v14621_v6 = vmax.f32 %v12587_v31, %v14400_v54  ;;  %v12592_v2 = vmax.f32 %v25022_v51, %v18981_v15 }
 0x4d5   : > { %v14830_v10 = vadd.f32 %v23576_v38, %v14623_v32  ;;  %v12379_v27 = vpop.f32.mrf.mxu0  ;;  %v14413_v3 = vpop.f32.mrf.mxu1 }
 0x4d6   : > { %16038 = vst.msk [vmem:[%s22364_s22 + $0x308] sm:$0xf] %vm15843_vm3, %v17927_v53  ;;  %v17925_v26 = vpack.c.bf16 %v15027_v58, %v15027_v58  ;;  %v14828_v22 = vadd.f32 %v23576_v38, %v14621_v6  ;;  %v14626_v7 = vmax.f32 %v12592_v2, %v19191_v16  ;;  %v12590_v35 = vmax.f32 %v25025_v34, %v12379_v27 }
 0x4d7   : > { %v15030_v8 = vmax.f32 %v14830_v10, 0.0  ;;  %v18982_v55 = vpop.f32.mrf.mxu0  ;;  %v19192_v30 = vpop.f32.mrf.mxu1 }
 0x4d8   : > { %16036 = vst.msk [vmem:[%s22364_s22 + $0x300] sm:$0xf] %vm15843_vm3, %v17925_v26  ;;  %v15028_v56 = vmax.f32 %v14828_v22, 0.0  ;;  %v14833_v62 = vadd.f32 %v23576_v38, %v14626_v7  ;;  %v14624_v59 = vmax.f32 %v12590_v35, %v14413_v3  ;;  %v12593_v61 = vmax.f32 %v25028_v60, %v18982_v55 }
 0x4d9   : > { %v17928_v12 = vpack.c.bf16 %v15030_v8, %v15030_v8  ;;  %v12382_v13 = vpop.f32.mrf.mxu0  ;;  %v14416_v44 = vpop.f32.mrf.mxu1 }
 0x4da   : > { %v17926_v41 = vpack.c.bf16 %v15028_v56, %v15028_v56  ;;  %v15033_v39 = vmax.f32 %v14833_v62, 0.0  ;;  %v14831_v46 = vadd.f32 %v23576_v38, %v14624_v59  ;;  %v14627_v49 = vmax.f32 %v12593_v61, %v19192_v30 }
 0x4db   : > { %16039 = vst.msk [vmem:[%s22364_s22 + $0x30c] sm:$0xf] %vm15843_vm3, %v17928_v12  ;;  %v12591_v23 = vmax.f32 %v25031_v40, %v12382_v13 }
 0x4dc   : > { %16037 = vst.msk [vmem:[%s22364_s22 + $0x304] sm:$0xf] %vm15843_vm3, %v17926_v41  ;;  %v17931_v42 = vpack.c.bf16 %v15033_v39, %v15033_v39  ;;  %v15031_v24 = vmax.f32 %v14831_v46, 0.0  ;;  %v14834_v17 = vadd.f32 %v23576_v38, %v14627_v49 }
 0x4dd   : > { %v14625_v45 = vmax.f32 %v12591_v23, %v14416_v44 }
 0x4de   : > { %16042 = vst.msk [vmem:[%s22364_s22 + $0x318] sm:$0xf] %vm15843_vm3, %v17931_v42  ;;  %v17929_v52 = vpack.c.bf16 %v15031_v24, %v15031_v24  ;;  %v15034_v63 = vmax.f32 %v14834_v17, 0.0 }
 0x4df   : > { %v14832_v0 = vadd.f32 %v23576_v38, %v14625_v45 }
 0x4e0   : > { %16040 = vst.msk [vmem:[%s22364_s22 + $0x310] sm:$0xf] %vm15843_vm3, %v17929_v52  ;;  %v17932_v28 = vpack.c.bf16 %v15034_v63, %v15034_v63 }
 0x4e1   : > { %v15032_v29 = vmax.f32 %v14832_v0, 0.0 }
 0x4e2   : > { %16043 = vst.msk [vmem:[%s22364_s22 + $0x31c] sm:$0xf] %vm15843_vm3, %v17932_v28 }
 0x4e3   : > { %v17930_v11 = vpack.c.bf16 %v15032_v29, %v15032_v29 }
 0x4e5   : > { %16041 = vst.msk [vmem:[%s22364_s22 + $0x314] sm:$0xf] %vm15843_vm3, %v17930_v11 }
 0x4e6 PF: > { %p10_p9 = scmp.ge.s32.totalorder %s19691_s16, 4   ;;  %s25032_s12 = smov %s19647_s13 }
 0x4e7   : > { %s25033_s13 = smov %s19700_s19  ;;  %s25034_s14 = smov %s19691_s16 }
 0x4e8   :  { %12 = sbr.rel (!%p10_p9) target bundleno = 2 (0x2), region = 126 }

// kernel: net_forward.4
= control target key start
LH: loop header
LB: loop body
LE: loop exit
PB: predicated region body
PF: predicated region fallthrough
CT: control target
= control target key end

     0   :  { %s3390_s12 = smov 0   ;;  %s3392_s13 = smov 0   ;;  %s4417_s0 = inlined_call_operand.vmem [shape: bf16[4,512,150], index: 0, kind: input, shape index: {}]   ;;  %s4418_s1 = inlined_call_operand.vmem [shape: bf16[150,16], index: 1, kind: input, shape index: {}]   ;;  %s4419_s2 = inlined_call_operand.vmem [shape: f32[1,16], index: 2, kind: input, shape index: {}]   ;;  %s4420_s3 = inlined_call_operand.vmem [shape: bf16[16,32,16], index: 3, kind: output, shape index: {}]  }
   0x1   :  { %s3394_s14 = smov 0  }
   0x2 LB: > { %s2737_s15 = sadd.s32 4294967295, %s3367_s14   ;;  %s3407_s16 = sadd.s32 1, %s3367_s14   ;;  %s3367_s14 = sphi %s3394_s14, %s4500_s14   ;;  %s3363_s13 = sphi %s3392_s13, %s4499_s13   ;;  %s3359_s12 = sphi %s3390_s12, %s4498_s12  }
   0x3   : > { %s17_s17 = ssub.s32 %s3367_s14, %s3407_s16  ;;  %s20_s18 = sadd.s32 1, %s3363_s13 }
   0x4   : > { %p18_p0 = scmp.eq.s32.totalorder %s17_s17, 0  ;;  %p27_p1 = scmp.ne.s32.totalorder %s3363_s13, %s3359_s12 }
   0x5   : > { %p28_p2 = scmp.eq.s32.totalorder %s3367_s14, 0  ;;  %p2740_p4 = scmp.ge.s32.totalorder %s3367_s14, 2 }
   0x6   : > { %s3416_s19 = scalar_select %p18_p0, %s3363_s13, %s20_s18  }
   0x7   : > { %p29_p3 = por %p28_p2, %p27_p1  ;;  %127 = sbr.rel (%p2740_p4) target bundleno = 80 (0x50), region = 24 }
   0xc   : > { %130 = sbr.rel (!%p29_p3) target bundleno = 80 (0x50), region = 28  ;;  %s132_s20 = sand.u32 (%p29_p3), 1, %s3363_s13  }
   0xd   : > { %s3084_s21 = sshll.u32 (%p29_p3), %s3367_s14, 8  ;;  %s2741_s22 = sshll.u32 (%p29_p3), %s132_s20, 10 }
   0xe   : > { %s3424_s25 = scalar_lea.vmem (%p29_p3), %s4417_s0, %s3084_s21  ;;  %s3429_s26 = scalar_lea.vmem (%p29_p3), [#allocation2], %s2741_s22 }
   0xf   : > { %v421_v0 = vld [vmem:[%s3424_s25] sm:$0xff] (%p29_p3)  ;;  %v423_v1 = vld [vmem:[%s3424_s25 + $0x8] sm:$0xff] (%p29_p3)  ;;  %v425_v2 = vld [vmem:[%s3424_s25 + $0x10] sm:$0xff] (%p29_p3) }
  0x10   : > { %422 = vst [vmem:[%s3429_s26] sm:$0xff] (%p29_p3), %v421_v0  ;;  %424 = vst [vmem:[%s3429_s26 + $0x8] sm:$0xff] (%p29_p3), %v423_v1  ;;  %v427_v3 = vld [vmem:[%s3424_s25 + $0x18] sm:$0xff] (%p29_p3)  ;;  %v429_v4 = vld [vmem:[%s3424_s25 + $0x20] sm:$0xff] (%p29_p3) }
  0x11   : > { %426 = vst [vmem:[%s3429_s26 + $0x10] sm:$0xff] %v425_v2  ;;  %v431_v5 = vld [vmem:[%s3424_s25 + $0x28] sm:$0xff]  ;;  %428 = vst [vmem:[%s3429_s26 + $0x18] sm:$0xff] %v427_v3  ;;  %v433_v6 = vld [vmem:[%s3424_s25 + $0x30] sm:$0xff] }
  0x12   : > { %430 = vst [vmem:[%s3429_s26 + $0x20] sm:$0xff] %v429_v4  ;;  %432 = vst [vmem:[%s3429_s26 + $0x28] sm:$0xff] %v431_v5  ;;  %v435_v7 = vld [vmem:[%s3424_s25 + $0x38] sm:$0xff]  ;;  %v437_v8 = vld [vmem:[%s3424_s25 + $0x40] sm:$0xff] }
  0x13   : > { %434 = vst [vmem:[%s3429_s26 + $0x30] sm:$0xff] %v433_v6  ;;  %436 = vst [vmem:[%s3429_s26 + $0x38] sm:$0xff] %v435_v7  ;;  %v439_v9 = vld [vmem:[%s3424_s25 + $0x48] sm:$0xff]  ;;  %v441_v10 = vld [vmem:[%s3424_s25 + $0x50] sm:$0xff] }
  0x14   : > { %438 = vst [vmem:[%s3429_s26 + $0x40] sm:$0xff] %v437_v8  ;;  %v443_v11 = vld [vmem:[%s3424_s25 + $0x58] sm:$0xff]  ;;  %440 = vst [vmem:[%s3429_s26 + $0x48] sm:$0xff] %v439_v9  ;;  %v445_v12 = vld [vmem:[%s3424_s25 + $0x60] sm:$0xff] }
  0x15   : > { %442 = vst [vmem:[%s3429_s26 + $0x50] sm:$0xff] %v441_v10  ;;  %444 = vst [vmem:[%s3429_s26 + $0x58] sm:$0xff] %v443_v11  ;;  %v447_v13 = vld [vmem:[%s3424_s25 + $0x68] sm:$0xff]  ;;  %v449_v14 = vld [vmem:[%s3424_s25 + $0x70] sm:$0xff] }
  0x16   : > { %446 = vst [vmem:[%s3429_s26 + $0x60] sm:$0xff] %v445_v12  ;;  %448 = vst [vmem:[%s3429_s26 + $0x68] sm:$0xff] %v447_v13  ;;  %v451_v15 = vld [vmem:[%s3424_s25 + $0x78] sm:$0xff]  ;;  %v453_v16 = vld [vmem:[%s3424_s25 + $0x80] sm:$0xff] }
  0x17   : > { %450 = vst [vmem:[%s3429_s26 + $0x70] sm:$0xff] %v449_v14  ;;  %v455_v17 = vld [vmem:[%s3424_s25 + $0x88] sm:$0xff]  ;;  %452 = vst [vmem:[%s3429_s26 + $0x78] sm:$0xff] %v451_v15  ;;  %v457_v18 = vld [vmem:[%s3424_s25 + $0x90] sm:$0xff] }
  0x18   : > { %454 = vst [vmem:[%s3429_s26 + $0x80] sm:$0xff] %v453_v16  ;;  %456 = vst [vmem:[%s3429_s26 + $0x88] sm:$0xff] %v455_v17  ;;  %v459_v19 = vld [vmem:[%s3424_s25 + $0x98] sm:$0xff]  ;;  %v461_v20 = vld [vmem:[%s3424_s25 + $0xa0] sm:$0xff] }
  0x19   : > { %458 = vst [vmem:[%s3429_s26 + $0x90] sm:$0xff] %v457_v18  ;;  %460 = vst [vmem:[%s3429_s26 + $0x98] sm:$0xff] %v459_v19  ;;  %v463_v21 = vld [vmem:[%s3424_s25 + $0xa8] sm:$0xff]  ;;  %v465_v22 = vld [vmem:[%s3424_s25 + $0xb0] sm:$0xff] }
  0x1a   : > { %462 = vst [vmem:[%s3429_s26 + $0xa0] sm:$0xff] %v461_v20  ;;  %v467_v23 = vld [vmem:[%s3424_s25 + $0xb8] sm:$0xff]  ;;  %464 = vst [vmem:[%s3429_s26 + $0xa8] sm:$0xff] %v463_v21  ;;  %v469_v24 = vld [vmem:[%s3424_s25 + $0xc0] sm:$0xff] }
  0x1b   : > { %466 = vst [vmem:[%s3429_s26 + $0xb0] sm:$0xff] %v465_v22  ;;  %468 = vst [vmem:[%s3429_s26 + $0xb8] sm:$0xff] %v467_v23  ;;  %v471_v25 = vld [vmem:[%s3424_s25 + $0xc8] sm:$0xff]  ;;  %v473_v26 = vld [vmem:[%s3424_s25 + $0xd0] sm:$0xff] }
  0x1c   : > { %470 = vst [vmem:[%s3429_s26 + $0xc0] sm:$0xff] %v469_v24  ;;  %472 = vst [vmem:[%s3429_s26 + $0xc8] sm:$0xff] %v471_v25  ;;  %v475_v27 = vld [vmem:[%s3424_s25 + $0xd8] sm:$0xff]  ;;  %v477_v28 = vld [vmem:[%s3424_s25 + $0xe0] sm:$0xff] }
  0x1d   : > { %474 = vst [vmem:[%s3429_s26 + $0xd0] sm:$0xff] %v473_v26  ;;  %v479_v29 = vld [vmem:[%s3424_s25 + $0xe8] sm:$0xff]  ;;  %476 = vst [vmem:[%s3429_s26 + $0xd8] sm:$0xff] %v475_v27  ;;  %v481_v30 = vld [vmem:[%s3424_s25 + $0xf0] sm:$0xff] }
  0x1e   : > { %478 = vst [vmem:[%s3429_s26 + $0xe0] sm:$0xff] %v477_v28  ;;  %480 = vst [vmem:[%s3429_s26 + $0xe8] sm:$0xff] %v479_v29  ;;  %v483_v31 = vld [vmem:[%s3424_s25 + $0xf8] sm:$0xff]  ;;  %v485_v32 = vld [vmem:[%s3424_s25 + $0x200] sm:$0xff] }
  0x1f   : > { %482 = vst [vmem:[%s3429_s26 + $0xf0] sm:$0xff] %v481_v30  ;;  %484 = vst [vmem:[%s3429_s26 + $0xf8] sm:$0xff] %v483_v31  ;;  %v487_v33 = vld [vmem:[%s3424_s25 + $0x208] sm:$0xff]  ;;  %v489_v34 = vld [vmem:[%s3424_s25 + $0x210] sm:$0xff] }
  0x20   : > { %486 = vst [vmem:[%s3429_s26 + $0x100] sm:$0xff] %v485_v32  ;;  %v491_v35 = vld [vmem:[%s3424_s25 + $0x218] sm:$0xff]  ;;  %488 = vst [vmem:[%s3429_s26 + $0x108] sm:$0xff] %v487_v33  ;;  %v493_v36 = vld [vmem:[%s3424_s25 + $0x220] sm:$0xff] }
  0x21   : > { %490 = vst [vmem:[%s3429_s26 + $0x110] sm:$0xff] %v489_v34  ;;  %492 = vst [vmem:[%s3429_s26 + $0x118] sm:$0xff] %v491_v35  ;;  %v495_v37 = vld [vmem:[%s3424_s25 + $0x228] sm:$0xff]  ;;  %v497_v38 = vld [vmem:[%s3424_s25 + $0x230] sm:$0xff] }
  0x22   : > { %494 = vst [vmem:[%s3429_s26 + $0x120] sm:$0xff] %v493_v36  ;;  %496 = vst [vmem:[%s3429_s26 + $0x128] sm:$0xff] %v495_v37  ;;  %v499_v39 = vld [vmem:[%s3424_s25 + $0x238] sm:$0xff]  ;;  %v501_v40 = vld [vmem:[%s3424_s25 + $0x240] sm:$0xff] }
  0x23   : > { %498 = vst [vmem:[%s3429_s26 + $0x130] sm:$0xff] %v497_v38  ;;  %v503_v41 = vld [vmem:[%s3424_s25 + $0x248] sm:$0xff]  ;;  %500 = vst [vmem:[%s3429_s26 + $0x138] sm:$0xff] %v499_v39  ;;  %v505_v42 = vld [vmem:[%s3424_s25 + $0x250] sm:$0xff] }
  0x24   : > { %502 = vst [vmem:[%s3429_s26 + $0x140] sm:$0xff] %v501_v40  ;;  %504 = vst [vmem:[%s3429_s26 + $0x148] sm:$0xff] %v503_v41  ;;  %v507_v43 = vld [vmem:[%s3424_s25 + $0x258] sm:$0xff]  ;;  %v509_v44 = vld [vmem:[%s3424_s25 + $0x260] sm:$0xff] }
  0x25   : > { %506 = vst [vmem:[%s3429_s26 + $0x150] sm:$0xff] %v505_v42  ;;  %508 = vst [vmem:[%s3429_s26 + $0x158] sm:$0xff] %v507_v43  ;;  %v511_v45 = vld [vmem:[%s3424_s25 + $0x268] sm:$0xff]  ;;  %v513_v46 = vld [vmem:[%s3424_s25 + $0x270] sm:$0xff] }
  0x26   : > { %510 = vst [vmem:[%s3429_s26 + $0x160] sm:$0xff] %v509_v44  ;;  %v515_v47 = vld [vmem:[%s3424_s25 + $0x278] sm:$0xff]  ;;  %512 = vst [vmem:[%s3429_s26 + $0x168] sm:$0xff] %v511_v45  ;;  %v517_v48 = vld [vmem:[%s3424_s25 + $0x280] sm:$0xff] }
  0x27   : > { %514 = vst [vmem:[%s3429_s26 + $0x170] sm:$0xff] %v513_v46  ;;  %516 = vst [vmem:[%s3429_s26 + $0x178] sm:$0xff] %v515_v47  ;;  %v519_v49 = vld [vmem:[%s3424_s25 + $0x288] sm:$0xff]  ;;  %v521_v50 = vld [vmem:[%s3424_s25 + $0x290] sm:$0xff] }
  0x28   : > { %518 = vst [vmem:[%s3429_s26 + $0x180] sm:$0xff] %v517_v48  ;;  %520 = vst [vmem:[%s3429_s26 + $0x188] sm:$0xff] %v519_v49  ;;  %v523_v51 = vld [vmem:[%s3424_s25 + $0x298] sm:$0xff]  ;;  %v525_v52 = vld [vmem:[%s3424_s25 + $0x2a0] sm:$0xff] }
  0x29   : > { %522 = vst [vmem:[%s3429_s26 + $0x190] sm:$0xff] %v521_v50  ;;  %v527_v53 = vld [vmem:[%s3424_s25 + $0x2a8] sm:$0xff]  ;;  %524 = vst [vmem:[%s3429_s26 + $0x198] sm:$0xff] %v523_v51  ;;  %v529_v54 = vld [vmem:[%s3424_s25 + $0x2b0] sm:$0xff] }
  0x2a   : > { %526 = vst [vmem:[%s3429_s26 + $0x1a0] sm:$0xff] %v525_v52  ;;  %528 = vst [vmem:[%s3429_s26 + $0x1a8] sm:$0xff] %v527_v53  ;;  %v531_v55 = vld [vmem:[%s3424_s25 + $0x2b8] sm:$0xff]  ;;  %v533_v56 = vld [vmem:[%s3424_s25 + $0x2c0] sm:$0xff] }
  0x2b   : > { %530 = vst [vmem:[%s3429_s26 + $0x1b0] sm:$0xff] %v529_v54  ;;  %532 = vst [vmem:[%s3429_s26 + $0x1b8] sm:$0xff] %v531_v55  ;;  %v535_v57 = vld [vmem:[%s3424_s25 + $0x2c8] sm:$0xff]  ;;  %v537_v58 = vld [vmem:[%s3424_s25 + $0x2d0] sm:$0xff] }
  0x2c   : > { %534 = vst [vmem:[%s3429_s26 + $0x1c0] sm:$0xff] %v533_v56  ;;  %v539_v59 = vld [vmem:[%s3424_s25 + $0x2d8] sm:$0xff]  ;;  %536 = vst [vmem:[%s3429_s26 + $0x1c8] sm:$0xff] %v535_v57  ;;  %v541_v60 = vld [vmem:[%s3424_s25 + $0x2e0] sm:$0xff] }
  0x2d   : > { %538 = vst [vmem:[%s3429_s26 + $0x1d0] sm:$0xff] %v537_v58  ;;  %540 = vst [vmem:[%s3429_s26 + $0x1d8] sm:$0xff] %v539_v59  ;;  %v543_v61 = vld [vmem:[%s3424_s25 + $0x2e8] sm:$0xff]  ;;  %v545_v62 = vld [vmem:[%s3424_s25 + $0x2f0] sm:$0xff] }
  0x2e   : > { %542 = vst [vmem:[%s3429_s26 + $0x1e0] sm:$0xff] %v541_v60  ;;  %544 = vst [vmem:[%s3429_s26 + $0x1e8] sm:$0xff] %v543_v61  ;;  %v547_v63 = vld [vmem:[%s3424_s25 + $0x2f8] sm:$0xff]  ;;  %v549_v0 = vld [vmem:[%s3424_s25 + $0x400] sm:$0xff] }
  0x2f   : > { %546 = vst [vmem:[%s3429_s26 + $0x1f0] sm:$0xff] %v545_v62  ;;  %v551_v1 = vld [vmem:[%s3424_s25 + $0x408] sm:$0xff]  ;;  %548 = vst [vmem:[%s3429_s26 + $0x1f8] sm:$0xff] %v547_v63  ;;  %v553_v2 = vld [vmem:[%s3424_s25 + $0x410] sm:$0xff] }
  0x30   : > { %550 = vst [vmem:[%s3429_s26 + $0x200] sm:$0xff] %v549_v0  ;;  %552 = vst [vmem:[%s3429_s26 + $0x208] sm:$0xff] %v551_v1  ;;  %v555_v3 = vld [vmem:[%s3424_s25 + $0x418] sm:$0xff]  ;;  %v557_v4 = vld [vmem:[%s3424_s25 + $0x420] sm:$0xff] }
  0x31   : > { %554 = vst [vmem:[%s3429_s26 + $0x210] sm:$0xff] %v553_v2  ;;  %556 = vst [vmem:[%s3429_s26 + $0x218] sm:$0xff] %v555_v3  ;;  %v559_v5 = vld [vmem:[%s3424_s25 + $0x428] sm:$0xff]  ;;  %v561_v6 = vld [vmem:[%s3424_s25 + $0x430] sm:$0xff] }
  0x32   : > { %558 = vst [vmem:[%s3429_s26 + $0x220] sm:$0xff] %v557_v4  ;;  %v563_v7 = vld [vmem:[%s3424_s25 + $0x438] sm:$0xff]  ;;  %560 = vst [vmem:[%s3429_s26 + $0x228] sm:$0xff] %v559_v5  ;;  %v565_v8 = vld [vmem:[%s3424_s25 + $0x440] sm:$0xff] }
  0x33   : > { %562 = vst [vmem:[%s3429_s26 + $0x230] sm:$0xff] %v561_v6  ;;  %564 = vst [vmem:[%s3429_s26 + $0x238] sm:$0xff] %v563_v7  ;;  %v567_v9 = vld [vmem:[%s3424_s25 + $0x448] sm:$0xff]  ;;  %v569_v10 = vld [vmem:[%s3424_s25 + $0x450] sm:$0xff] }
  0x34   : > { %566 = vst [vmem:[%s3429_s26 + $0x240] sm:$0xff] %v565_v8  ;;  %568 = vst [vmem:[%s3429_s26 + $0x248] sm:$0xff] %v567_v9  ;;  %v571_v11 = vld [vmem:[%s3424_s25 + $0x458] sm:$0xff]  ;;  %v573_v12 = vld [vmem:[%s3424_s25 + $0x460] sm:$0xff] }
  0x35   : > { %570 = vst [vmem:[%s3429_s26 + $0x250] sm:$0xff] %v569_v10  ;;  %v575_v13 = vld [vmem:[%s3424_s25 + $0x468] sm:$0xff]  ;;  %572 = vst [vmem:[%s3429_s26 + $0x258] sm:$0xff] %v571_v11  ;;  %v577_v14 = vld [vmem:[%s3424_s25 + $0x470] sm:$0xff] }
  0x36   : > { %574 = vst [vmem:[%s3429_s26 + $0x260] sm:$0xff] %v573_v12  ;;  %576 = vst [vmem:[%s3429_s26 + $0x268] sm:$0xff] %v575_v13  ;;  %v579_v15 = vld [vmem:[%s3424_s25 + $0x478] sm:$0xff]  ;;  %v581_v16 = vld [vmem:[%s3424_s25 + $0x480] sm:$0xff] }
  0x37   : > { %578 = vst [vmem:[%s3429_s26 + $0x270] sm:$0xff] %v577_v14  ;;  %580 = vst [vmem:[%s3429_s26 + $0x278] sm:$0xff] %v579_v15  ;;  %v583_v17 = vld [vmem:[%s3424_s25 + $0x488] sm:$0xff]  ;;  %v585_v18 = vld [vmem:[%s3424_s25 + $0x490] sm:$0xff] }
  0x38   : > { %582 = vst [vmem:[%s3429_s26 + $0x280] sm:$0xff] %v581_v16  ;;  %v587_v19 = vld [vmem:[%s3424_s25 + $0x498] sm:$0xff]  ;;  %584 = vst [vmem:[%s3429_s26 + $0x288] sm:$0xff] %v583_v17  ;;  %v589_v20 = vld [vmem:[%s3424_s25 + $0x4a0] sm:$0xff] }
  0x39   : > { %586 = vst [vmem:[%s3429_s26 + $0x290] sm:$0xff] %v585_v18  ;;  %588 = vst [vmem:[%s3429_s26 + $0x298] sm:$0xff] %v587_v19  ;;  %v591_v21 = vld [vmem:[%s3424_s25 + $0x4a8] sm:$0xff]  ;;  %v593_v22 = vld [vmem:[%s3424_s25 + $0x4b0] sm:$0xff] }
  0x3a   : > { %590 = vst [vmem:[%s3429_s26 + $0x2a0] sm:$0xff] %v589_v20  ;;  %592 = vst [vmem:[%s3429_s26 + $0x2a8] sm:$0xff] %v591_v21  ;;  %v595_v23 = vld [vmem:[%s3424_s25 + $0x4b8] sm:$0xff]  ;;  %v597_v24 = vld [vmem:[%s3424_s25 + $0x4c0] sm:$0xff] }
  0x3b   : > { %594 = vst [vmem:[%s3429_s26 + $0x2b0] sm:$0xff] %v593_v22  ;;  %v599_v25 = vld [vmem:[%s3424_s25 + $0x4c8] sm:$0xff]  ;;  %596 = vst [vmem:[%s3429_s26 + $0x2b8] sm:$0xff] %v595_v23  ;;  %v601_v26 = vld [vmem:[%s3424_s25 + $0x4d0] sm:$0xff] }
  0x3c   : > { %598 = vst [vmem:[%s3429_s26 + $0x2c0] sm:$0xff] %v597_v24  ;;  %600 = vst [vmem:[%s3429_s26 + $0x2c8] sm:$0xff] %v599_v25  ;;  %v603_v27 = vld [vmem:[%s3424_s25 + $0x4d8] sm:$0xff]  ;;  %v605_v28 = vld [vmem:[%s3424_s25 + $0x4e0] sm:$0xff] }
  0x3d   : > { %602 = vst [vmem:[%s3429_s26 + $0x2d0] sm:$0xff] %v601_v26  ;;  %604 = vst [vmem:[%s3429_s26 + $0x2d8] sm:$0xff] %v603_v27  ;;  %v607_v29 = vld [vmem:[%s3424_s25 + $0x4e8] sm:$0xff]  ;;  %v609_v30 = vld [vmem:[%s3424_s25 + $0x4f0] sm:$0xff] }
  0x3e   : > { %606 = vst [vmem:[%s3429_s26 + $0x2e0] sm:$0xff] %v605_v28  ;;  %v611_v31 = vld [vmem:[%s3424_s25 + $0x4f8] sm:$0xff]  ;;  %608 = vst [vmem:[%s3429_s26 + $0x2e8] sm:$0xff] %v607_v29  ;;  %v613_v32 = vld [vmem:[%s3424_s25 + $0x600] sm:$0xff] }
  0x3f   : > { %610 = vst [vmem:[%s3429_s26 + $0x2f0] sm:$0xff] %v609_v30  ;;  %612 = vst [vmem:[%s3429_s26 + $0x2f8] sm:$0xff] %v611_v31  ;;  %v615_v33 = vld [vmem:[%s3424_s25 + $0x608] sm:$0xff]  ;;  %v617_v34 = vld [vmem:[%s3424_s25 + $0x610] sm:$0xff] }
  0x40   : > { %614 = vst [vmem:[%s3429_s26 + $0x300] sm:$0xff] %v613_v32  ;;  %616 = vst [vmem:[%s3429_s26 + $0x308] sm:$0xff] %v615_v33  ;;  %v619_v35 = vld [vmem:[%s3424_s25 + $0x618] sm:$0xff]  ;;  %v621_v36 = vld [vmem:[%s3424_s25 + $0x620] sm:$0xff] }
  0x41   : > { %618 = vst [vmem:[%s3429_s26 + $0x310] sm:$0xff] %v617_v34  ;;  %v623_v37 = vld [vmem:[%s3424_s25 + $0x628] sm:$0xff]  ;;  %620 = vst [vmem:[%s3429_s26 + $0x318] sm:$0xff] %v619_v35  ;;  %v625_v38 = vld [vmem:[%s3424_s25 + $0x630] sm:$0xff] }
  0x42   : > { %622 = vst [vmem:[%s3429_s26 + $0x320] sm:$0xff] %v621_v36  ;;  %624 = vst [vmem:[%s3429_s26 + $0x328] sm:$0xff] %v623_v37  ;;  %v627_v39 = vld [vmem:[%s3424_s25 + $0x638] sm:$0xff]  ;;  %v629_v40 = vld [vmem:[%s3424_s25 + $0x640] sm:$0xff] }
  0x43   : > { %626 = vst [vmem:[%s3429_s26 + $0x330] sm:$0xff] %v625_v38  ;;  %628 = vst [vmem:[%s3429_s26 + $0x338] sm:$0xff] %v627_v39  ;;  %v631_v41 = vld [vmem:[%s3424_s25 + $0x648] sm:$0xff]  ;;  %v633_v42 = vld [vmem:[%s3424_s25 + $0x650] sm:$0xff] }
  0x44   : > { %630 = vst [vmem:[%s3429_s26 + $0x340] sm:$0xff] %v629_v40  ;;  %v635_v43 = vld [vmem:[%s3424_s25 + $0x658] sm:$0xff]  ;;  %632 = vst [vmem:[%s3429_s26 + $0x348] sm:$0xff] %v631_v41  ;;  %v637_v44 = vld [vmem:[%s3424_s25 + $0x660] sm:$0xff] }
  0x45   : > { %634 = vst [vmem:[%s3429_s26 + $0x350] sm:$0xff] %v633_v42  ;;  %636 = vst [vmem:[%s3429_s26 + $0x358] sm:$0xff] %v635_v43  ;;  %v639_v45 = vld [vmem:[%s3424_s25 + $0x668] sm:$0xff]  ;;  %v641_v46 = vld [vmem:[%s3424_s25 + $0x670] sm:$0xff] }
  0x46   : > { %638 = vst [vmem:[%s3429_s26 + $0x360] sm:$0xff] %v637_v44  ;;  %640 = vst [vmem:[%s3429_s26 + $0x368] sm:$0xff] %v639_v45  ;;  %v643_v47 = vld [vmem:[%s3424_s25 + $0x678] sm:$0xff]  ;;  %v645_v48 = vld [vmem:[%s3424_s25 + $0x680] sm:$0xff] }
  0x47   : > { %642 = vst [vmem:[%s3429_s26 + $0x370] sm:$0xff] %v641_v46  ;;  %v647_v49 = vld [vmem:[%s3424_s25 + $0x688] sm:$0xff]  ;;  %644 = vst [vmem:[%s3429_s26 + $0x378] sm:$0xff] %v643_v47  ;;  %v649_v50 = vld [vmem:[%s3424_s25 + $0x690] sm:$0xff] }
  0x48   : > { %646 = vst [vmem:[%s3429_s26 + $0x380] sm:$0xff] %v645_v48  ;;  %648 = vst [vmem:[%s3429_s26 + $0x388] sm:$0xff] %v647_v49  ;;  %v651_v51 = vld [vmem:[%s3424_s25 + $0x698] sm:$0xff]  ;;  %v653_v52 = vld [vmem:[%s3424_s25 + $0x6a0] sm:$0xff] }
  0x49   : > { %650 = vst [vmem:[%s3429_s26 + $0x390] sm:$0xff] %v649_v50  ;;  %652 = vst [vmem:[%s3429_s26 + $0x398] sm:$0xff] %v651_v51  ;;  %v655_v53 = vld [vmem:[%s3424_s25 + $0x6a8] sm:$0xff]  ;;  %v657_v54 = vld [vmem:[%s3424_s25 + $0x6b0] sm:$0xff] }
  0x4a   : > { %654 = vst [vmem:[%s3429_s26 + $0x3a0] sm:$0xff] %v653_v52  ;;  %v659_v55 = vld [vmem:[%s3424_s25 + $0x6b8] sm:$0xff]  ;;  %656 = vst [vmem:[%s3429_s26 + $0x3a8] sm:$0xff] %v655_v53  ;;  %v661_v56 = vld [vmem:[%s3424_s25 + $0x6c0] sm:$0xff] }
  0x4b   : > { %658 = vst [vmem:[%s3429_s26 + $0x3b0] sm:$0xff] %v657_v54  ;;  %660 = vst [vmem:[%s3429_s26 + $0x3b8] sm:$0xff] %v659_v55  ;;  %v663_v57 = vld [vmem:[%s3424_s25 + $0x6c8] sm:$0xff]  ;;  %v665_v58 = vld [vmem:[%s3424_s25 + $0x6d0] sm:$0xff] }
  0x4c   : > { %662 = vst [vmem:[%s3429_s26 + $0x3c0] sm:$0xff] %v661_v56  ;;  %664 = vst [vmem:[%s3429_s26 + $0x3c8] sm:$0xff] %v663_v57  ;;  %v667_v59 = vld [vmem:[%s3424_s25 + $0x6d8] sm:$0xff]  ;;  %v669_v60 = vld [vmem:[%s3424_s25 + $0x6e0] sm:$0xff] }
  0x4d   : > { %666 = vst [vmem:[%s3429_s26 + $0x3d0] sm:$0xff] %v665_v58  ;;  %v671_v61 = vld [vmem:[%s3424_s25 + $0x6e8] sm:$0xff]  ;;  %668 = vst [vmem:[%s3429_s26 + $0x3d8] sm:$0xff] %v667_v59  ;;  %v673_v62 = vld [vmem:[%s3424_s25 + $0x6f0] sm:$0xff] }
  0x4e   : > { %670 = vst [vmem:[%s3429_s26 + $0x3e0] sm:$0xff] %v669_v60  ;;  %672 = vst [vmem:[%s3429_s26 + $0x3e8] sm:$0xff] %v671_v61  ;;  %v675_v63 = vld [vmem:[%s3424_s25 + $0x6f8] sm:$0xff] }
  0x4f   : > { %674 = vst [vmem:[%s3429_s26 + $0x3f0] sm:$0xff] %v673_v62  ;;  %676 = vst [vmem:[%s3429_s26 + $0x3f8] sm:$0xff] %v675_v63 }
  0x50 PF: > { %p2745_p5 = scmp.ge.s32.totalorder %s3367_s14, 1  ;;  %p681_p6 = scmp.lt.s32.totalorder %s3367_s14, 3 }
  0x52   : > { %p682_p7 = pnand %p2745_p5, %p681_p6 }
  0x54   : > { %685 = sbr.rel (%p682_p7) target bundleno = 586 (0x24a), region = 66 }
  0x59   : > { %v3689_v0 = vld [vmem:[%s4418_s1 + $0x38] sm:$0xff]   ;;  %v3369_v1 = vmov 0   ;;  %v3698_v2 = vld [vmem:[%s4418_s1 + $0x30] sm:$0xff]   ;;  %s688_s4 = sand.u32 1, %s3359_s12   ;;  %v3708_v3 = vld [vmem:[%s4418_s1 + $0x28] sm:$0xff]   ;;  %vm973_vm0 = vcmask 179200  }
  0x5a   : > { %1026 = vmatprep.subr.bf16.mxu0 %v3369_v1  ;;  %1412 = vmatprep.subr.bf16.mxu1 %v3369_v1  ;;  %s2746_s5 = sshll.u32 %s688_s4, 10  ;;  %v3719_v4 = vld [vmem:[%s4418_s1 + $0x20] sm:$0xff]   ;;  %v3731_v7 = vld [vmem:[%s4418_s1 + $0x18] sm:$0xff]   ;;  %v3741_v8 = vld [vmem:[%s4418_s1 + $0x10] sm:$0xff]   ;;  %vm1022_vm1 = vcmask 1042432   ;;  %s2747_s28 = sshll.u32 %s2737_s15, 3 }
  0x5b   : > { %1027 = vmatpush1.bf16.msra.mxu0 %v3689_v0  ;;  %1413 = vmatpush1.bf16.msra.mxu1 %v3689_v0  ;;  %s3712_s8 = scalar_lea.vmem [#allocation2], %s2746_s5  ;;  %v3750_v9 = vld [vmem:[%s4418_s1 + $0x8] sm:$0xff]   ;;  %v3759_v10 = vld [vmem:[%s4418_s1] sm:$0xff]   ;;  %p714_p8 = scmp.lt.s32.totalorder %s2747_s28, 15  ;;  %vm2640_vm2 = vcmask 125952  }
  0x5c   : > { %1028 = vmatprep.subr.bf16.mxu0 %v3369_v1  ;;  %1414 = vmatprep.subr.bf16.mxu1 %v3369_v1  ;;  %v3155_v5 = vld [vmem:[%s3712_s8 + $0x4] ss:$8 sps:$4 sm:$0xff]   ;;  %v3151_v11 = vld [vmem:[%s4418_s1 + $0x48] ss:$0 sps:$4 sm:$0x77]  }
  0x5d   : > { %2792 = vmatprep.mubr.msk.bf16.mxu0 %vm973_vm0, %v3155_v5  ;;  %v3158_v6 = vld [vmem:[%s3712_s8 + $0x104] ss:$8 sps:$4 sm:$0xff]   ;;  %v3770_v12 = vsel %vm1022_vm1, %v3151_v11, 0  ;;  %v3153_v14 = vld [vmem:[%s3712_s8] ss:$8 sps:$4 sm:$0xff]   ;;  %s4502_s28 = smov (!%p714_p8, %s2747_s28), 15 }
  0x5e   : > { %2872 = vmatprep.mubr.msk.bf16.mxu1 %vm973_vm0, %v3158_v6  ;;  %v3777_v13 = vld [vmem:[%s4418_s1 + $0x40] sm:$0xff]   ;;  %v3159_v16 = vld [vmem:[%s3712_s8 + $0x14] ss:$8 sps:$4 sm:$0xff]   ;;  %v3163_v18 = vld [vmem:[%s3712_s8 + $0x10] ss:$8 sps:$4 sm:$0xff]   ;;  %s3085_s15 = sshll.u32 %s4502_s28, 4 }
  0x5f   : > { %1029 = vmatpush1.bf16.msra.mxu0 %v3698_v2  ;;  %1415 = vmatpush1.bf16.msra.mxu1 %v3698_v2  ;;  %v3156_v15 = vld [vmem:[%s3712_s8 + $0x100] ss:$8 sps:$4 sm:$0xff]   ;;  %v3161_v17 = vld [vmem:[%s3712_s8 + $0x114] ss:$8 sps:$4 sm:$0xff]   ;;  %v3164_v19 = vld [vmem:[%s3712_s8 + $0x110] ss:$8 sps:$4 sm:$0xff]   ;;  %s4220_s5 = scalar_lea.vmem %s4420_s3, %s3085_s15 }
  0x60   : > { %1030 = vmatprep.subr.bf16.mxu0 %v3369_v1  ;;  %1416 = vmatprep.subr.bf16.mxu1 %v3369_v1  ;;  %v3165_v20 = vld [vmem:[%s3712_s8 + $0x24] ss:$8 sps:$4 sm:$0xff]   ;;  %v3169_v22 = vld [vmem:[%s3712_s8 + $0x20] ss:$8 sps:$4 sm:$0xff]   ;;  %v3171_v24 = vld [vmem:[%s3712_s8 + $0x34] ss:$8 sps:$4 sm:$0xff]  }
  0x61   : > { %v3167_v21 = vld [vmem:[%s3712_s8 + $0x124] ss:$8 sps:$4 sm:$0xff]   ;;  %v3170_v23 = vld [vmem:[%s3712_s8 + $0x120] ss:$8 sps:$4 sm:$0xff]   ;;  %v3173_v25 = vld [vmem:[%s3712_s8 + $0x134] ss:$8 sps:$4 sm:$0xff]  }
  0x62   : > { %v3175_v26 = vld [vmem:[%s3712_s8 + $0x30] ss:$8 sps:$4 sm:$0xff]   ;;  %v3177_v28 = vld [vmem:[%s3712_s8 + $0x44] ss:$8 sps:$4 sm:$0xff]   ;;  %v3181_v30 = vld [vmem:[%s3712_s8 + $0x40] ss:$8 sps:$4 sm:$0xff]  }
  0x63   : > { %1031 = vmatpush1.bf16.msra.mxu0 %v3708_v3  ;;  %1417 = vmatpush1.bf16.msra.mxu1 %v3708_v3  ;;  %v3176_v27 = vld [vmem:[%s3712_s8 + $0x130] ss:$8 sps:$4 sm:$0xff]   ;;  %v3179_v29 = vld [vmem:[%s3712_s8 + $0x144] ss:$8 sps:$4 sm:$0xff]   ;;  %v3182_v31 = vld [vmem:[%s3712_s8 + $0x140] ss:$8 sps:$4 sm:$0xff]  }
  0x64   : > { %1032 = vmatprep.subr.bf16.mxu0 %v3369_v1  ;;  %1418 = vmatprep.subr.bf16.mxu1 %v3369_v1  ;;  %v3183_v32 = vld [vmem:[%s3712_s8 + $0x54] ss:$8 sps:$4 sm:$0xff]   ;;  %v3187_v34 = vld [vmem:[%s3712_s8 + $0x50] ss:$8 sps:$4 sm:$0xff]   ;;  %v3189_v36 = vld [vmem:[%s3712_s8 + $0x64] ss:$8 sps:$4 sm:$0xff]  }
  0x65   : > { %v3185_v33 = vld [vmem:[%s3712_s8 + $0x154] ss:$8 sps:$4 sm:$0xff]   ;;  %v3188_v35 = vld [vmem:[%s3712_s8 + $0x150] ss:$8 sps:$4 sm:$0xff]   ;;  %v3191_v37 = vld [vmem:[%s3712_s8 + $0x164] ss:$8 sps:$4 sm:$0xff]  }
  0x66   : > { %v3193_v38 = vld [vmem:[%s3712_s8 + $0x60] ss:$8 sps:$4 sm:$0xff]   ;;  %v3195_v40 = vld [vmem:[%s3712_s8 + $0x74] ss:$8 sps:$4 sm:$0xff]   ;;  %v3199_v42 = vld [vmem:[%s3712_s8 + $0x70] ss:$8 sps:$4 sm:$0xff]  }
  0x67   : > { %1033 = vmatpush1.bf16.msra.mxu0 %v3719_v4  ;;  %1419 = vmatpush1.bf16.msra.mxu1 %v3719_v4  ;;  %v3194_v39 = vld [vmem:[%s3712_s8 + $0x160] ss:$8 sps:$4 sm:$0xff]   ;;  %v3197_v41 = vld [vmem:[%s3712_s8 + $0x174] ss:$8 sps:$4 sm:$0xff]   ;;  %v3200_v43 = vld [vmem:[%s3712_s8 + $0x170] ss:$8 sps:$4 sm:$0xff]  }
  0x68   : > { %1034 = vmatprep.subr.bf16.mxu0 %v3369_v1  ;;  %1420 = vmatprep.subr.bf16.mxu1 %v3369_v1  ;;  %v3201_v44 = vld [vmem:[%s3712_s8 + $0x84] ss:$8 sps:$4 sm:$0xff]   ;;  %v3205_v46 = vld [vmem:[%s3712_s8 + $0x80] ss:$8 sps:$4 sm:$0xff]   ;;  %v3207_v48 = vld [vmem:[%s3712_s8 + $0x94] ss:$8 sps:$4 sm:$0xff]  }
  0x69   : > { %v3203_v45 = vld [vmem:[%s3712_s8 + $0x184] ss:$8 sps:$4 sm:$0xff]   ;;  %v3206_v47 = vld [vmem:[%s3712_s8 + $0x180] ss:$8 sps:$4 sm:$0xff]   ;;  %v3209_v49 = vld [vmem:[%s3712_s8 + $0x194] ss:$8 sps:$4 sm:$0xff]  }
  0x6a   : > { %v3211_v50 = vld [vmem:[%s3712_s8 + $0x90] ss:$8 sps:$4 sm:$0xff]   ;;  %v3213_v52 = vld [vmem:[%s3712_s8 + $0xa4] ss:$8 sps:$4 sm:$0xff]   ;;  %v3217_v54 = vld [vmem:[%s3712_s8 + $0xa0] ss:$8 sps:$4 sm:$0xff]  }
  0x6b   : > { %1035 = vmatpush1.bf16.msra.mxu0 %v3731_v7  ;;  %1421 = vmatpush1.bf16.msra.mxu1 %v3731_v7  ;;  %v3212_v51 = vld [vmem:[%s3712_s8 + $0x190] ss:$8 sps:$4 sm:$0xff]   ;;  %v3215_v53 = vld [vmem:[%s3712_s8 + $0x1a4] ss:$8 sps:$4 sm:$0xff]   ;;  %v3218_v55 = vld [vmem:[%s3712_s8 + $0x1a0] ss:$8 sps:$4 sm:$0xff]  }
  0x6c   : > { %1036 = vmatprep.subr.bf16.mxu0 %v3369_v1  ;;  %1422 = vmatprep.subr.bf16.mxu1 %v3369_v1  ;;  %v3219_v56 = vld [vmem:[%s3712_s8 + $0xb4] ss:$8 sps:$4 sm:$0xff]   ;;  %v3223_v58 = vld [vmem:[%s3712_s8 + $0xb0] ss:$8 sps:$4 sm:$0xff]   ;;  %v3225_v60 = vld [vmem:[%s3712_s8 + $0xc4] ss:$8 sps:$4 sm:$0xff]  }
  0x6d   : > { %v3221_v57 = vld [vmem:[%s3712_s8 + $0x1b4] ss:$8 sps:$4 sm:$0xff]   ;;  %v3224_v59 = vld [vmem:[%s3712_s8 + $0x1b0] ss:$8 sps:$4 sm:$0xff]   ;;  %v3227_v61 = vld [vmem:[%s3712_s8 + $0x1c4] ss:$8 sps:$4 sm:$0xff]  }
  0x6e   : > { %v3229_v62 = vld [vmem:[%s3712_s8 + $0xc0] ss:$8 sps:$4 sm:$0xff]   ;;  %v3239_v5 = vld [vmem:[%s3712_s8 + $0x1e4] ss:$8 sps:$4 sm:$0xff]   ;;  %v3248_v11 = vld [vmem:[%s3712_s8 + $0x1f0] ss:$8 sps:$4 sm:$0xff]  }
  0x6f   : > { %1037 = vmatpush1.bf16.msra.mxu0 %v3741_v8  ;;  %1423 = vmatpush1.bf16.msra.mxu1 %v3741_v8  ;;  %v3230_v63 = vld [vmem:[%s3712_s8 + $0x1c0] ss:$8 sps:$4 sm:$0xff]  }
  0x70   : > { %1038 = vmatprep.subr.bf16.mxu0 %v3369_v1  ;;  %1424 = vmatprep.subr.bf16.mxu1 %v3369_v1  ;;  %v3241_v6 = vld [vmem:[%s3712_s8 + $0xe0] ss:$8 sps:$4 sm:$0xff]  }
  0x73   : > { %1039 = vmatpush1.bf16.msra.mxu0 %v3750_v9  ;;  %1425 = vmatpush1.bf16.msra.mxu1 %v3750_v9 }
  0x74   : > { %1040 = vmatprep.subr.bf16.mxu0 %v3369_v1  ;;  %1426 = vmatprep.subr.bf16.mxu1 %v3369_v1 }
  0x77   : > { %1041 = vmatpush1.bf16.msra.mxu0 %v3759_v10  ;;  %1427 = vmatpush1.bf16.msra.mxu1 %v3759_v10 }
  0x78   : > { %1054 = vmatprep.subr.bf16.mxu0 %v3369_v1  ;;  %1440 = vmatprep.subr.bf16.mxu1 %v3369_v1 }
  0x7b   : > { %1055 = vmatpush2.bf16.msra.mxu0 %v3770_v12  ;;  %1441 = vmatpush2.bf16.msra.mxu1 %v3770_v12 }
  0x7c   : > { %1056 = vmatprep.subr.bf16.mxu0 %v3369_v1  ;;  %1442 = vmatprep.subr.bf16.mxu1 %v3369_v1 }
  0x7f   : > { %1057 = vmatpush2.bf16.msra.mxu0 %v3777_v13  ;;  %1443 = vmatpush2.bf16.msra.mxu1 %v3777_v13 }
  0x80   : > { %1830 = vmatprep.subr.bf16.mxu0 %v3369_v1  ;;  %2248 = vmatprep.subr.bf16.mxu1 %v3369_v1 }
  0x82   : > { %1059 = vmatmul.mubr.bf16.vlgmr.msra.gmra.mxu0 %v3153_v14  ;;  %1445 = vmatmul.mubr.bf16.vlgmr.msra.gmra.mxu1 %v3156_v15  ;;  %v3249_v14 = vld [vmem:[%s3712_s8 + $0x200] ss:$8 sps:$4 sm:$0xff]  }
  0x83   : > { %1831 = vmatpush1.bf16.msra.mxu0 %v3689_v0  ;;  %2249 = vmatpush1.bf16.msra.mxu1 %v3689_v0  ;;  %v3231_v0 = vld [vmem:[%s3712_s8 + $0xd4] ss:$8 sps:$4 sm:$0xff]   ;;  %v3252_v15 = vld [vmem:[%s3712_s8 + $0x300] ss:$8 sps:$4 sm:$0xff]  }
  0x84   : > { %2793 = vmatprep.mubr.msk.bf16.mxu0 %vm973_vm0, %v3159_v16  ;;  %2873 = vmatprep.mubr.msk.bf16.mxu1 %vm973_vm0, %v3161_v17  ;;  %v3255_v16 = vld [vmem:[%s3712_s8 + $0x214] ss:$8 sps:$4 sm:$0xff]  }
  0x85   : > { %1832 = vmatprep.subr.bf16.mxu0 %v3369_v1  ;;  %2250 = vmatprep.subr.bf16.mxu1 %v3369_v1  ;;  %v3257_v17 = vld [vmem:[%s3712_s8 + $0x314] ss:$8 sps:$4 sm:$0xff]  }
  0x87   : > { %1833 = vmatpush1.bf16.msra.mxu0 %v3698_v2  ;;  %2251 = vmatpush1.bf16.msra.mxu1 %v3698_v2  ;;  %v3235_v2 = vld [vmem:[%s3712_s8 + $0xd0] ss:$8 sps:$4 sm:$0xff]  }
  0x88   : > { %1834 = vmatprep.subr.bf16.mxu0 %v3369_v1  ;;  %2252 = vmatprep.subr.bf16.mxu1 %v3369_v1 }
  0x8a   : > { %1067 = vmatmul.mubr.bf16.gmra.mxu0 %v3163_v18  ;;  %1453 = vmatmul.mubr.bf16.gmra.mxu1 %v3164_v19  ;;  %v3259_v18 = vld [vmem:[%s3712_s8 + $0x210] ss:$8 sps:$4 sm:$0xff]  }
  0x8b   : > { %2794 = vmatprep.mubr.msk.bf16.mxu0 %vm973_vm0, %v3165_v20  ;;  %2874 = vmatprep.mubr.msk.bf16.mxu1 %vm973_vm0, %v3167_v21  ;;  %v3260_v19 = vld [vmem:[%s3712_s8 + $0x310] ss:$8 sps:$4 sm:$0xff]   ;;  %v3261_v20 = vld [vmem:[%s3712_s8 + $0x224] ss:$8 sps:$4 sm:$0xff]  }
  0x8c   : > { %1835 = vmatpush1.bf16.msra.mxu0 %v3708_v3  ;;  %2253 = vmatpush1.bf16.msra.mxu1 %v3708_v3  ;;  %v3236_v3 = vld [vmem:[%s3712_s8 + $0x1d0] ss:$8 sps:$4 sm:$0xff]   ;;  %v3263_v21 = vld [vmem:[%s3712_s8 + $0x324] ss:$8 sps:$4 sm:$0xff]  }
  0x8d   : > { %1836 = vmatprep.subr.bf16.mxu0 %v3369_v1  ;;  %2254 = vmatprep.subr.bf16.mxu1 %v3369_v1 }
  0x90   : > { %1837 = vmatpush1.bf16.msra.mxu0 %v3719_v4  ;;  %2255 = vmatpush1.bf16.msra.mxu1 %v3719_v4  ;;  %v3237_v4 = vld [vmem:[%s3712_s8 + $0xe4] ss:$8 sps:$4 sm:$0xff]  }
  0x91   : > { %1838 = vmatprep.subr.bf16.mxu0 %v3369_v1  ;;  %2256 = vmatprep.subr.bf16.mxu1 %v3369_v1 }
  0x92   : > { %1075 = vmatmul.mubr.bf16.gmra.mxu0 %v3169_v22  ;;  %1461 = vmatmul.mubr.bf16.gmra.mxu1 %v3170_v23  ;;  %v3265_v22 = vld [vmem:[%s3712_s8 + $0x220] ss:$8 sps:$4 sm:$0xff]  }
  0x93   : > { %2795 = vmatprep.mubr.msk.bf16.mxu0 %vm973_vm0, %v3171_v24  ;;  %2875 = vmatprep.mubr.msk.bf16.mxu1 %vm973_vm0, %v3173_v25  ;;  %v3266_v23 = vld [vmem:[%s3712_s8 + $0x320] ss:$8 sps:$4 sm:$0xff]   ;;  %v3267_v24 = vld [vmem:[%s3712_s8 + $0x234] ss:$8 sps:$4 sm:$0xff]  }
  0x94   : > { %1839 = vmatpush1.bf16.msra.mxu0 %v3731_v7  ;;  %2257 = vmatpush1.bf16.msra.mxu1 %v3731_v7  ;;  %v3242_v7 = vld [vmem:[%s3712_s8 + $0x1e0] ss:$8 sps:$4 sm:$0xff]   ;;  %v3269_v25 = vld [vmem:[%s3712_s8 + $0x334] ss:$8 sps:$4 sm:$0xff]  }
  0x95   : > { %1840 = vmatprep.subr.bf16.mxu0 %v3369_v1  ;;  %2258 = vmatprep.subr.bf16.mxu1 %v3369_v1 }
  0x98   : > { %1841 = vmatpush1.bf16.msra.mxu0 %v3741_v8  ;;  %2259 = vmatpush1.bf16.msra.mxu1 %v3741_v8  ;;  %v3243_v8 = vld [vmem:[%s3712_s8 + $0xf4] ss:$8 sps:$4 sm:$0xff]  }
  0x99   : > { %1842 = vmatprep.subr.bf16.mxu0 %v3369_v1  ;;  %2260 = vmatprep.subr.bf16.mxu1 %v3369_v1 }
  0x9a   : > { %1083 = vmatmul.mubr.bf16.gmra.mxu0 %v3175_v26  ;;  %1469 = vmatmul.mubr.bf16.gmra.mxu1 %v3176_v27  ;;  %v3271_v26 = vld [vmem:[%s3712_s8 + $0x230] ss:$8 sps:$4 sm:$0xff]  }
  0x9b   : > { %2796 = vmatprep.mubr.msk.bf16.mxu0 %vm973_vm0, %v3177_v28  ;;  %2876 = vmatprep.mubr.msk.bf16.mxu1 %vm973_vm0, %v3179_v29  ;;  %v3272_v27 = vld [vmem:[%s3712_s8 + $0x330] ss:$8 sps:$4 sm:$0xff]   ;;  %v3273_v28 = vld [vmem:[%s3712_s8 + $0x244] ss:$8 sps:$4 sm:$0xff]  }
  0x9c   : > { %1843 = vmatpush1.bf16.msra.mxu0 %v3750_v9  ;;  %2261 = vmatpush1.bf16.msra.mxu1 %v3750_v9  ;;  %v3245_v9 = vld [vmem:[%s3712_s8 + $0x1f4] ss:$8 sps:$4 sm:$0xff]   ;;  %v3275_v29 = vld [vmem:[%s3712_s8 + $0x344] ss:$8 sps:$4 sm:$0xff]  }
  0x9d   : > { %1844 = vmatprep.subr.bf16.mxu0 %v3369_v1  ;;  %2262 = vmatprep.subr.bf16.mxu1 %v3369_v1 }
  0xa0   : > { %1845 = vmatpush1.bf16.msra.mxu0 %v3759_v10  ;;  %2263 = vmatpush1.bf16.msra.mxu1 %v3759_v10  ;;  %v3247_v10 = vld [vmem:[%s3712_s8 + $0xf0] ss:$8 sps:$4 sm:$0xff]  }
  0xa1   : > { %1858 = vmatprep.subr.bf16.mxu0 %v3369_v1  ;;  %2276 = vmatprep.subr.bf16.mxu1 %v3369_v1 }
  0xa2   : > { %1091 = vmatmul.mubr.bf16.gmra.mxu0 %v3181_v30  ;;  %1477 = vmatmul.mubr.bf16.gmra.mxu1 %v3182_v31  ;;  %v3277_v30 = vld [vmem:[%s3712_s8 + $0x240] ss:$8 sps:$4 sm:$0xff]  }
  0xa3   : > { %2797 = vmatprep.mubr.msk.bf16.mxu0 %vm973_vm0, %v3183_v32  ;;  %2877 = vmatprep.mubr.msk.bf16.mxu1 %vm973_vm0, %v3185_v33  ;;  %v3278_v31 = vld [vmem:[%s3712_s8 + $0x340] ss:$8 sps:$4 sm:$0xff]   ;;  %v3279_v32 = vld [vmem:[%s3712_s8 + $0x254] ss:$8 sps:$4 sm:$0xff]  }
  0xa4   : > { %1859 = vmatpush2.bf16.msra.mxu0 %v3770_v12  ;;  %2277 = vmatpush2.bf16.msra.mxu1 %v3770_v12  ;;  %v3251_v12 = vld [vmem:[%s3712_s8 + $0x204] ss:$8 sps:$4 sm:$0xff]   ;;  %v3281_v33 = vld [vmem:[%s3712_s8 + $0x354] ss:$8 sps:$4 sm:$0xff]  }
  0xa5   : > { %1860 = vmatprep.subr.bf16.mxu0 %v3369_v1  ;;  %2278 = vmatprep.subr.bf16.mxu1 %v3369_v1  ;;  %v3233_v1 = vld [vmem:[%s3712_s8 + $0x1d4] ss:$8 sps:$4 sm:$0xff]  }
  0xa8   : > { %1861 = vmatpush2.bf16.msra.mxu0 %v3777_v13  ;;  %2279 = vmatpush2.bf16.msra.mxu1 %v3777_v13  ;;  %v3254_v13 = vld [vmem:[%s3712_s8 + $0x304] ss:$8 sps:$4 sm:$0xff]  }
  0xaa   : > { %1099 = vmatmul.mubr.bf16.gmra.mxu0 %v3187_v34  ;;  %1485 = vmatmul.mubr.bf16.gmra.mxu1 %v3188_v35  ;;  %v3283_v34 = vld [vmem:[%s3712_s8 + $0x250] ss:$8 sps:$4 sm:$0xff]  }
  0xab   : > { %2798 = vmatprep.mubr.msk.bf16.mxu0 %vm973_vm0, %v3189_v36  ;;  %2878 = vmatprep.mubr.msk.bf16.mxu1 %vm973_vm0, %v3191_v37  ;;  %v3284_v35 = vld [vmem:[%s3712_s8 + $0x350] ss:$8 sps:$4 sm:$0xff]   ;;  %v3285_v36 = vld [vmem:[%s3712_s8 + $0x264] ss:$8 sps:$4 sm:$0xff]  }
  0xac   : > { %v3287_v37 = vld [vmem:[%s3712_s8 + $0x364] ss:$8 sps:$4 sm:$0xff]  }
  0xb2   : > { %1107 = vmatmul.mubr.bf16.gmra.mxu0 %v3193_v38  ;;  %1493 = vmatmul.mubr.bf16.gmra.mxu1 %v3194_v39  ;;  %v3289_v38 = vld [vmem:[%s3712_s8 + $0x260] ss:$8 sps:$4 sm:$0xff]  }
  0xb3   : > { %2799 = vmatprep.mubr.msk.bf16.mxu0 %vm973_vm0, %v3195_v40  ;;  %2879 = vmatprep.mubr.msk.bf16.mxu1 %vm973_vm0, %v3197_v41  ;;  %v3290_v39 = vld [vmem:[%s3712_s8 + $0x360] ss:$8 sps:$4 sm:$0xff]   ;;  %v3291_v40 = vld [vmem:[%s3712_s8 + $0x274] ss:$8 sps:$4 sm:$0xff]  }
  0xb4   : > { %v3293_v41 = vld [vmem:[%s3712_s8 + $0x374] ss:$8 sps:$4 sm:$0xff]  }
  0xba   : > { %1115 = vmatmul.mubr.bf16.gmra.mxu0 %v3199_v42  ;;  %1501 = vmatmul.mubr.bf16.gmra.mxu1 %v3200_v43  ;;  %v3295_v42 = vld [vmem:[%s3712_s8 + $0x270] ss:$8 sps:$4 sm:$0xff]  }
  0xbb   : > { %2800 = vmatprep.mubr.msk.bf16.mxu0 %vm973_vm0, %v3201_v44  ;;  %2880 = vmatprep.mubr.msk.bf16.mxu1 %vm973_vm0, %v3203_v45  ;;  %v3296_v43 = vld [vmem:[%s3712_s8 + $0x370] ss:$8 sps:$4 sm:$0xff]   ;;  %v3297_v44 = vld [vmem:[%s3712_s8 + $0x284] ss:$8 sps:$4 sm:$0xff]  }
  0xbc   : > { %v3299_v45 = vld [vmem:[%s3712_s8 + $0x384] ss:$8 sps:$4 sm:$0xff]  }
  0xc2   : > { %1123 = vmatmul.mubr.bf16.gmra.mxu0 %v3205_v46  ;;  %1509 = vmatmul.mubr.bf16.gmra.mxu1 %v3206_v47  ;;  %v3301_v46 = vld [vmem:[%s3712_s8 + $0x280] ss:$8 sps:$4 sm:$0xff]  }
  0xc3   : > { %2801 = vmatprep.mubr.msk.bf16.mxu0 %vm973_vm0, %v3207_v48  ;;  %2881 = vmatprep.mubr.msk.bf16.mxu1 %vm973_vm0, %v3209_v49  ;;  %v3302_v47 = vld [vmem:[%s3712_s8 + $0x380] ss:$8 sps:$4 sm:$0xff]   ;;  %v3303_v48 = vld [vmem:[%s3712_s8 + $0x294] ss:$8 sps:$4 sm:$0xff]  }
  0xc4   : > { %v3305_v49 = vld [vmem:[%s3712_s8 + $0x394] ss:$8 sps:$4 sm:$0xff]  }
  0xca   : > { %1131 = vmatmul.mubr.bf16.gmra.mxu0 %v3211_v50  ;;  %1517 = vmatmul.mubr.bf16.gmra.mxu1 %v3212_v51 }
  0xcb   : > { %2802 = vmatprep.mubr.msk.bf16.mxu0 %vm973_vm0, %v3213_v52  ;;  %2882 = vmatprep.mubr.msk.bf16.mxu1 %vm973_vm0, %v3215_v53 }
  0xd2   : > { %1139 = vmatmul.mubr.bf16.gmra.mxu0 %v3217_v54  ;;  %1525 = vmatmul.mubr.bf16.gmra.mxu1 %v3218_v55 }
  0xd3   : > { %2803 = vmatprep.mubr.msk.bf16.mxu0 %vm973_vm0, %v3219_v56  ;;  %2883 = vmatprep.mubr.msk.bf16.mxu1 %vm973_vm0, %v3221_v57  ;;  %v3307_v57 = vld [vmem:[%s3712_s8 + $0x290] ss:$8 sps:$4 sm:$0xff]  }
  0xda   : > { %1147 = vmatmul.mubr.bf16.gmra.mxu0 %v3223_v58  ;;  %1533 = vmatmul.mubr.bf16.gmra.mxu1 %v3224_v59  ;;  %v3308_v58 = vld [vmem:[%s3712_s8 + $0x390] ss:$8 sps:$4 sm:$0xff]  }
  0xdb   : > { %2804 = vmatprep.mubr.msk.bf16.mxu0 %vm973_vm0, %v3225_v60  ;;  %2884 = vmatprep.mubr.msk.bf16.mxu1 %vm973_vm0, %v3227_v61  ;;  %v3309_v60 = vld [vmem:[%s3712_s8 + $0x2a4] ss:$8 sps:$4 sm:$0xff]  }
  0xdc   : > { %v3311_v61 = vld [vmem:[%s3712_s8 + $0x3a4] ss:$8 sps:$4 sm:$0xff]  }
  0xe2   : > { %1155 = vmatmul.mubr.bf16.gmra.mxu0 %v3229_v62  ;;  %1541 = vmatmul.mubr.bf16.gmra.mxu1 %v3230_v63 }
  0xe3   : > { %2805 = vmatprep.mubr.msk.bf16.mxu0 %vm973_vm0, %v3231_v0  ;;  %2885 = vmatprep.mubr.msk.bf16.mxu1 %vm973_vm0, %v3233_v1 }
  0xea   : > { %1163 = vmatmul.mubr.bf16.gmra.mxu0 %v3235_v2  ;;  %1549 = vmatmul.mubr.bf16.gmra.mxu1 %v3236_v3 }
  0xeb   : > { %2806 = vmatprep.mubr.msk.bf16.mxu0 %vm973_vm0, %v3237_v4  ;;  %2886 = vmatprep.mubr.msk.bf16.mxu1 %vm973_vm0, %v3239_v5 }
  0xf2   : > { %1171 = vmatmul.mubr.bf16.gmra.mxu0 %v3241_v6  ;;  %1557 = vmatmul.mubr.bf16.gmra.mxu1 %v3242_v7  ;;  %v3313_v7 = vld [vmem:[%s3712_s8 + $0x2a0] ss:$8 sps:$4 sm:$0xff]  }
  0xf3   : > { %2807 = vmatprep.mubr.msk.bf16.mxu0 %vm973_vm0, %v3243_v8  ;;  %2887 = vmatprep.mubr.msk.bf16.mxu1 %vm973_vm0, %v3245_v9  ;;  %v3314_v8 = vld [vmem:[%s3712_s8 + $0x3a0] ss:$8 sps:$4 sm:$0xff]  }
  0xfa   : > { %1179 = vmatmul.mubr.bf16.gmra.mxu0 %v3247_v10  ;;  %1565 = vmatmul.mubr.bf16.gmra.mxu1 %v3248_v11  ;;  %v3315_v10 = vld [vmem:[%s3712_s8 + $0x2b4] ss:$8 sps:$4 sm:$0xff]  }
  0xfb   : > { %2952 = vmatprep.mubr.msk.bf16.mxu0 %vm973_vm0, %v3251_v12  ;;  %3032 = vmatprep.mubr.msk.bf16.mxu1 %vm973_vm0, %v3254_v13  ;;  %v3317_v11 = vld [vmem:[%s3712_s8 + $0x3b4] ss:$8 sps:$4 sm:$0xff]  }
 0x102   : > { %1863 = vmatmul.mubr.bf16.vlgmr.msra.gmra.mxu0 %v3249_v14  ;;  %2281 = vmatmul.mubr.bf16.vlgmr.msra.gmra.mxu1 %v3252_v15 }
 0x103   : > { %2953 = vmatprep.mubr.msk.bf16.mxu0 %vm973_vm0, %v3255_v16  ;;  %3033 = vmatprep.mubr.msk.bf16.mxu1 %vm973_vm0, %v3257_v17 }
 0x10a   : > { %1871 = vmatmul.mubr.bf16.gmra.mxu0 %v3259_v18  ;;  %2289 = vmatmul.mubr.bf16.gmra.mxu1 %v3260_v19 }
 0x10b   : > { %2954 = vmatprep.mubr.msk.bf16.mxu0 %vm973_vm0, %v3261_v20  ;;  %3034 = vmatprep.mubr.msk.bf16.mxu1 %vm973_vm0, %v3263_v21  ;;  %v3319_v21 = vld [vmem:[%s3712_s8 + $0x2b0] ss:$8 sps:$4 sm:$0xff]  }
 0x112   : > { %1879 = vmatmul.mubr.bf16.gmra.mxu0 %v3265_v22  ;;  %2297 = vmatmul.mubr.bf16.gmra.mxu1 %v3266_v23  ;;  %v3320_v22 = vld [vmem:[%s3712_s8 + $0x3b0] ss:$8 sps:$4 sm:$0xff]  }
 0x113   : > { %2955 = vmatprep.mubr.msk.bf16.mxu0 %vm973_vm0, %v3267_v24  ;;  %3035 = vmatprep.mubr.msk.bf16.mxu1 %vm973_vm0, %v3269_v25  ;;  %v3321_v24 = vld [vmem:[%s3712_s8 + $0x2c4] ss:$8 sps:$4 sm:$0xff]  }
 0x114   : > { %v3323_v25 = vld [vmem:[%s3712_s8 + $0x3c4] ss:$8 sps:$4 sm:$0xff]  }
 0x11a   : > { %1887 = vmatmul.mubr.bf16.gmra.mxu0 %v3271_v26  ;;  %2305 = vmatmul.mubr.bf16.gmra.mxu1 %v3272_v27 }
 0x11b   : > { %2956 = vmatprep.mubr.msk.bf16.mxu0 %vm973_vm0, %v3273_v28  ;;  %3036 = vmatprep.mubr.msk.bf16.mxu1 %vm973_vm0, %v3275_v29 }
 0x122   : > { %1895 = vmatmul.mubr.bf16.gmra.mxu0 %v3277_v30  ;;  %2313 = vmatmul.mubr.bf16.gmra.mxu1 %v3278_v31 }
 0x123   : > { %2957 = vmatprep.mubr.msk.bf16.mxu0 %vm973_vm0, %v3279_v32  ;;  %3037 = vmatprep.mubr.msk.bf16.mxu1 %vm973_vm0, %v3281_v33 }
 0x12a   : > { %1903 = vmatmul.mubr.bf16.gmra.mxu0 %v3283_v34  ;;  %2321 = vmatmul.mubr.bf16.gmra.mxu1 %v3284_v35  ;;  %v3325_v35 = vld [vmem:[%s3712_s8 + $0x2c0] ss:$8 sps:$4 sm:$0xff]  }
 0x12b   : > { %2958 = vmatprep.mubr.msk.bf16.mxu0 %vm973_vm0, %v3285_v36  ;;  %3038 = vmatprep.mubr.msk.bf16.mxu1 %vm973_vm0, %v3287_v37  ;;  %v3326_v36 = vld [vmem:[%s3712_s8 + $0x3c0] ss:$8 sps:$4 sm:$0xff]  }
 0x132   : > { %1911 = vmatmul.mubr.bf16.gmra.mxu0 %v3289_v38  ;;  %2329 = vmatmul.mubr.bf16.gmra.mxu1 %v3290_v39  ;;  %v3327_v38 = vld [vmem:[%s3712_s8 + $0x2d4] ss:$8 sps:$4 sm:$0xff]  }
 0x133   : > { %2959 = vmatprep.mubr.msk.bf16.mxu0 %vm973_vm0, %v3291_v40  ;;  %3039 = vmatprep.mubr.msk.bf16.mxu1 %vm973_vm0, %v3293_v41  ;;  %v3329_v39 = vld [vmem:[%s3712_s8 + $0x3d4] ss:$8 sps:$4 sm:$0xff]  }
 0x13a   : > { %1919 = vmatmul.mubr.bf16.gmra.mxu0 %v3295_v42  ;;  %2337 = vmatmul.mubr.bf16.gmra.mxu1 %v3296_v43 }
 0x13b   : > { %2960 = vmatprep.mubr.msk.bf16.mxu0 %vm973_vm0, %v3297_v44  ;;  %3040 = vmatprep.mubr.msk.bf16.mxu1 %vm973_vm0, %v3299_v45 }
 0x142   : > { %v3971_v50 = vpop.f32.mrf.mxu0  ;;  %v3973_v51 = vpop.f32.mrf.mxu1  ;;  %1927 = vmatmul.mubr.bf16.gmra.mxu0 %v3301_v46  ;;  %2345 = vmatmul.mubr.bf16.gmra.mxu1 %v3302_v47 }
 0x143   : > { %2961 = vmatprep.mubr.msk.bf16.mxu0 %vm973_vm0, %v3303_v48  ;;  %3041 = vmatprep.mubr.msk.bf16.mxu1 %vm973_vm0, %v3305_v49  ;;  %v3331_v49 = vld [vmem:[%s3712_s8 + $0x2d0] ss:$8 sps:$4 sm:$0xff]  }
 0x144   : > { %v1062_v53 = vpop.f32.mrf.mxu0  ;;  %v1448_v54 = vpop.f32.mrf.mxu1 }
 0x145   : > { %v3332_v53 = vld [vmem:[%s3712_s8 + $0x3d0] ss:$8 sps:$4 sm:$0xff]  }
 0x146   : > { %v3979_v55 = vpop.f32.mrf.mxu0  ;;  %v3981_v56 = vpop.f32.mrf.mxu1 }
 0x148   : > { %v1065_v62 = vpop.f32.mrf.mxu0  ;;  %v1451_v63 = vpop.f32.mrf.mxu1 }
 0x14a   : > { %v3989_v0 = vpop.f32.mrf.mxu0  ;;  %v3991_v1 = vpop.f32.mrf.mxu1  ;;  %1935 = vmatmul.mubr.bf16.gmra.mxu0 %v3307_v57  ;;  %2353 = vmatmul.mubr.bf16.gmra.mxu1 %v3308_v58  ;;  %v3333_v57 = vld [vmem:[%s3712_s8 + $0x2e4] ss:$8 sps:$4 sm:$0xff]  }
 0x14b   : > { %2962 = vmatprep.mubr.msk.bf16.mxu0 %vm973_vm0, %v3309_v60  ;;  %3042 = vmatprep.mubr.msk.bf16.mxu1 %vm973_vm0, %v3311_v61  ;;  %v3335_v58 = vld [vmem:[%s3712_s8 + $0x3e4] ss:$8 sps:$4 sm:$0xff]  }
 0x14c   : > { %v1070_v3 = vpop.f32.mrf.mxu0  ;;  %v1456_v4 = vpop.f32.mrf.mxu1 }
 0x14e   : > { %v3997_v5 = vpop.f32.mrf.mxu0  ;;  %v3999_v6 = vpop.f32.mrf.mxu1 }
 0x150   : > { %v1073_v12 = vpop.f32.mrf.mxu0  ;;  %v1459_v13 = vpop.f32.mrf.mxu1 }
 0x151   : > { %v3338_v12 = vld [vmem:[%s3712_s8 + $0x3e0] ss:$8 sps:$4 sm:$0xff]  }
 0x152   : > { %v4007_v14 = vpop.f32.mrf.mxu0  ;;  %v4009_v15 = vpop.f32.mrf.mxu1  ;;  %1943 = vmatmul.mubr.bf16.gmra.mxu0 %v3313_v7  ;;  %2361 = vmatmul.mubr.bf16.gmra.mxu1 %v3314_v8 }
 0x153   : > { %2963 = vmatprep.mubr.msk.bf16.mxu0 %vm973_vm0, %v3315_v10  ;;  %3043 = vmatprep.mubr.msk.bf16.mxu1 %vm973_vm0, %v3317_v11  ;;  %v3337_v11 = vld [vmem:[%s3712_s8 + $0x2e0] ss:$8 sps:$4 sm:$0xff]  }
 0x154   : > { %v1078_v17 = vpop.f32.mrf.mxu0  ;;  %v1464_v18 = vpop.f32.mrf.mxu1 }
 0x155   : > { %v3339_v17 = vld [vmem:[%s3712_s8 + $0x2f4] ss:$8 sps:$4 sm:$0xff]  }
 0x156   : > { %v4015_v19 = vpop.f32.mrf.mxu0  ;;  %v4017_v20 = vpop.f32.mrf.mxu1  ;;  %v3341_v18 = vld [vmem:[%s3712_s8 + $0x3f4] ss:$8 sps:$4 sm:$0xff]  }
 0x158   : > { %v1081_v26 = vpop.f32.mrf.mxu0  ;;  %v1467_v27 = vpop.f32.mrf.mxu1 }
 0x15a   : > { %v4025_v28 = vpop.f32.mrf.mxu0  ;;  %v4027_v29 = vpop.f32.mrf.mxu1  ;;  %1951 = vmatmul.mubr.bf16.gmra.mxu0 %v3319_v21  ;;  %2369 = vmatmul.mubr.bf16.gmra.mxu1 %v3320_v22 }
 0x15b   : > { %2964 = vmatprep.mubr.msk.bf16.mxu0 %vm973_vm0, %v3321_v24  ;;  %3044 = vmatprep.mubr.msk.bf16.mxu1 %vm973_vm0, %v3323_v25 }
 0x15c   : > { %v1086_v31 = vpop.f32.mrf.mxu0  ;;  %v1472_v32 = vpop.f32.mrf.mxu1 }
 0x15e   : > { %v4033_v33 = vpop.f32.mrf.mxu0  ;;  %v4035_v34 = vpop.f32.mrf.mxu1 }
 0x160   : > { %v1089_v40 = vpop.f32.mrf.mxu0  ;;  %v1475_v41 = vpop.f32.mrf.mxu1 }
 0x162   : > { %v4043_v42 = vpop.f32.mrf.mxu0  ;;  %v4045_v43 = vpop.f32.mrf.mxu1  ;;  %1959 = vmatmul.mubr.bf16.gmra.mxu0 %v3325_v35  ;;  %2377 = vmatmul.mubr.bf16.gmra.mxu1 %v3326_v36  ;;  %v3343_v36 = vld [vmem:[%s3712_s8 + $0x2f0] ss:$8 sps:$4 sm:$0xff]  }
 0x163   : > { %2965 = vmatprep.mubr.msk.bf16.mxu0 %vm973_vm0, %v3327_v38  ;;  %3045 = vmatprep.mubr.msk.bf16.mxu1 %vm973_vm0, %v3329_v39  ;;  %v3344_v38 = vld [vmem:[%s3712_s8 + $0x3f0] ss:$8 sps:$4 sm:$0xff]  }
 0x164   : > { %v1094_v45 = vpop.f32.mrf.mxu0  ;;  %v1480_v46 = vpop.f32.mrf.mxu1 }
 0x166   : > { %v4051_v47 = vpop.f32.mrf.mxu0  ;;  %v4053_v48 = vpop.f32.mrf.mxu1 }
 0x168   : > { %v1097_v60 = vpop.f32.mrf.mxu0  ;;  %v1483_v61 = vpop.f32.mrf.mxu1 }
 0x16a   : > { %v4061_v62 = vpop.f32.mrf.mxu0  ;;  %v4063_v63 = vpop.f32.mrf.mxu1  ;;  %1967 = vmatmul.mubr.bf16.gmra.mxu0 %v3331_v49  ;;  %2385 = vmatmul.mubr.bf16.gmra.mxu1 %v3332_v53 }
 0x16b   : > { %2966 = vmatprep.mubr.msk.bf16.mxu0 %vm973_vm0, %v3333_v57  ;;  %3046 = vmatprep.mubr.msk.bf16.mxu1 %vm973_vm0, %v3335_v58 }
 0x16c   : > { %v1102_v4 = vpop.f32.mrf.mxu0  ;;  %v1488_v7 = vpop.f32.mrf.mxu1 }
 0x16e   : > { %v4069_v8 = vpop.f32.mrf.mxu0  ;;  %v4071_v10 = vpop.f32.mrf.mxu1 }
 0x170   : > { %v1105_v21 = vpop.f32.mrf.mxu0  ;;  %v1491_v22 = vpop.f32.mrf.mxu1 }
 0x172   : > { %v4079_v24 = vpop.f32.mrf.mxu0  ;;  %v4081_v25 = vpop.f32.mrf.mxu1  ;;  %1975 = vmatmul.mubr.bf16.gmra.mxu0 %v3337_v11  ;;  %2393 = vmatmul.mubr.bf16.gmra.mxu1 %v3338_v12 }
 0x173   : > { %2967 = vmatprep.mubr.msk.bf16.mxu0 %vm973_vm0, %v3339_v17  ;;  %3047 = vmatprep.mubr.msk.bf16.mxu1 %vm973_vm0, %v3341_v18 }
 0x174   : > { %v1110_v27 = vpop.f32.mrf.mxu0  ;;  %v1496_v31 = vpop.f32.mrf.mxu1 }
 0x176   : > { %v4087_v32 = vpop.f32.mrf.mxu0  ;;  %v4089_v35 = vpop.f32.mrf.mxu1 }
 0x178   : > { %v1113_v40 = vpop.f32.mrf.mxu0  ;;  %v1499_v41 = vpop.f32.mrf.mxu1 }
 0x17a   : > { %v4095_v45 = vpop.f32.mrf.mxu0  ;;  %v4097_v46 = vpop.f32.mrf.mxu1  ;;  %1983 = vmatmul.mubr.bf16.gmra.mxu0 %v3343_v36  ;;  %2401 = vmatmul.mubr.bf16.gmra.mxu1 %v3344_v38 }
 0x17c   : > { %v1118_v53 = vpop.f32.mrf.mxu0  ;;  %v1504_v57 = vpop.f32.mrf.mxu1 }
 0x17e   : > { %v4101_v58 = vpop.f32.mrf.mxu0  ;;  %v4103_v60 = vpop.f32.mrf.mxu1 }
 0x180   : > { %v1121_v4 = vpop.f32.mrf.mxu0  ;;  %v1507_v7 = vpop.f32.mrf.mxu1 }
 0x182   : > { %v4107_v11 = vpop.f32.mrf.mxu0  ;;  %v4109_v12 = vpop.f32.mrf.mxu1 }
 0x184   : > { %v1126_v18 = vpop.f32.mrf.mxu0  ;;  %v1512_v21 = vpop.f32.mrf.mxu1 }
 0x186   : > { %v4113_v22 = vpop.f32.mrf.mxu0  ;;  %v4115_v27 = vpop.f32.mrf.mxu1 }
 0x188   : > { %v1129_v36 = vpop.f32.mrf.mxu0  ;;  %v1515_v38 = vpop.f32.mrf.mxu1 }
 0x18a   : > { %v4119_v40 = vpop.f32.mrf.mxu0  ;;  %v4121_v41 = vpop.f32.mrf.mxu1 }
 0x18c   : > { %v1134_v57 = vpop.f32.mrf.mxu0  ;;  %v1520_v4 = vpop.f32.mrf.mxu1 }
 0x18e   : > { %v4125_v7 = vpop.f32.mrf.mxu0  ;;  %v4127_v18 = vpop.f32.mrf.mxu1 }
 0x190   : > { %v1137_v17 = vpop.f32.mrf.mxu0  ;;  %v1523_v31 = vpop.f32.mrf.mxu1 }
 0x192   : > { %v4131_v36 = vpop.f32.mrf.mxu0  ;;  %v4133_v38 = vpop.f32.mrf.mxu1 }
 0x194   : > { %v1142_v49 = vpop.f32.mrf.mxu0  ;;  %v1528_v53 = vpop.f32.mrf.mxu1 }
 0x196   : > { %v4137_v57 = vpop.f32.mrf.mxu0  ;;  %v4139_v4 = vpop.f32.mrf.mxu1 }
 0x198   : > { %v1145_v26 = vpop.f32.mrf.mxu0  ;;  %v1531_v21 = vpop.f32.mrf.mxu1 }
 0x19a   : > { %v4143_v17 = vpop.f32.mrf.mxu0  ;;  %v4145_v31 = vpop.f32.mrf.mxu1 }
 0x19c   : > { %v1150_v3 = vpop.f32.mrf.mxu0  ;;  %v1536_v61 = vpop.f32.mrf.mxu1 }
 0x19e   : > { %v4149_v49 = vpop.f32.mrf.mxu0  ;;  %v4151_v53 = vpop.f32.mrf.mxu1 }
 0x1a0   : > { %v1153_v44 = vpop.f32.mrf.mxu0  ;;  %v1539_v39 = vpop.f32.mrf.mxu1 }
 0x1a2   : > { %v4155_v26 = vpop.f32.mrf.mxu0  ;;  %v4157_v21 = vpop.f32.mrf.mxu1 }
 0x1a3   : > { %4436 = vst [vmem:[#allocation3_spill] sm:$0xff] %v4157_v21 }
 0x1a4   : > { %v1158_v30 = vpop.f32.mrf.mxu0  ;;  %v1544_v13 = vpop.f32.mrf.mxu1 }
 0x1a6   : > { %v4161_v3 = vpop.f32.mrf.mxu0  ;;  %v4163_v61 = vpop.f32.mrf.mxu1 }
 0x1a7   : > { %4437 = vst [vmem:[#allocation4_spill] sm:$0xff] %v4161_v3  ;;  %4438 = vst [vmem:[#allocation5_spill] sm:$0xff] %v4163_v61 }
 0x1a8   : > { %v1161_v16 = vpop.f32.mrf.mxu0  ;;  %v1547_v54 = vpop.f32.mrf.mxu1 }
 0x1aa   : > { %v4167_v44 = vpop.f32.mrf.mxu0  ;;  %v4169_v39 = vpop.f32.mrf.mxu1 }
 0x1ab   : > { %4439 = vst [vmem:[#allocation6_spill] sm:$0xff] %v4167_v44  ;;  %4440 = vst [vmem:[#allocation7_spill] sm:$0xff] %v4169_v39 }
 0x1ac   : > { %v1166_v2 = vpop.f32.mrf.mxu0  ;;  %v1552_v37 = vpop.f32.mrf.mxu1 }
 0x1ae   : > { %v4173_v30 = vpop.f32.mrf.mxu0  ;;  %v4175_v13 = vpop.f32.mrf.mxu1 }
 0x1af   : > { %4441 = vst [vmem:[#allocation8_spill] sm:$0xff] %v4173_v30  ;;  %4442 = vst [vmem:[#allocation9_spill] sm:$0xff] %v4175_v13 }
 0x1b0   : > { %v1169_v52 = vpop.f32.mrf.mxu0  ;;  %v1555_v23 = vpop.f32.mrf.mxu1 }
 0x1b2   : > { %v4179_v16 = vpop.f32.mrf.mxu0  ;;  %v4181_v54 = vpop.f32.mrf.mxu1 }
 0x1b3   : > { %4443 = vst [vmem:[#allocation10_spill] sm:$0xff] %v4179_v16  ;;  %4444 = vst [vmem:[#allocation11_spill] sm:$0xff] %v4181_v54  ;;  %v4451_v54 = vmax.f32 %v3971_v50, %v3973_v51 }
 0x1b4   : > { %v1174_v9 = vpop.f32.mrf.mxu0  ;;  %v1560_v2 = vpop.f32.mrf.mxu1 }
 0x1b6   : > { %v4185_v37 = vpop.f32.mrf.mxu0  ;;  %v4187_v39 = vpop.f32.mrf.mxu1 }
 0x1b7   : > { %4445 = vst [vmem:[#allocation12_spill] sm:$0xff] %v4185_v37  ;;  %4446 = vst [vmem:[#allocation13_spill] sm:$0xff] %v4187_v39 }
 0x1b8   : > { %v1177_v59 = vpop.f32.mrf.mxu0  ;;  %v1563_v52 = vpop.f32.mrf.mxu1 }
 0x1ba   : > { %v4191_v23 = vpop.f32.mrf.mxu0  ;;  %v4193_v13 = vpop.f32.mrf.mxu1 }
 0x1bb   : > { %4447 = vst [vmem:[#allocation14_spill] sm:$0xff] %v4191_v23  ;;  %4448 = vst [vmem:[#allocation15_spill] sm:$0xff] %v4193_v13 }
 0x1bc   : > { %v1182_v3 = vpop.f32.mrf.mxu0  ;;  %v1568_v61 = vpop.f32.mrf.mxu1 }
 0x1bd   : > { %v4211_v3 = vld [vmem:[%s4419_s2] ss:$0 sm:$0xff] }
 0x1be   : > { %v4199_v9 = vpop.f32.mrf.mxu0  ;;  %v4201_v2 = vpop.f32.mrf.mxu1 }
 0x1bf   : > { %4449 = vst [vmem:[#allocation16_spill] sm:$0xff] %v4199_v9  ;;  %4450 = vst [vmem:[#allocation17_spill] sm:$0xff] %v4201_v2 }
 0x1c0   : > { %v1185_v59 = vpop.f32.mrf.mxu0  ;;  %v1571_v52 = vpop.f32.mrf.mxu1 }
 0x1c1   : > { %v4452_v52 = vmax.f32 %v3979_v55, %v3981_v56  ;;  %v4453_v55 = vmax.f32 %v3989_v0, %v3991_v1 }
 0x1c2   : > { %v1864_v39 = vpop.f32.mrf.mxu0  ;;  %v2282_v37 = vpop.f32.mrf.mxu1 }
 0x1c3   : > { %v1991_v30 = vmax.f32 %v4451_v54, %v1864_v39 }
 0x1c4   : > { %v1866_v61 = vpop.f32.mrf.mxu0  ;;  %v2284_v13 = vpop.f32.mrf.mxu1 }
 0x1c5   : > { %v2409_v23 = vmax.f32 %v1991_v30, %v2282_v37 }
 0x1c6   : > { %v1867_v16 = vpop.f32.mrf.mxu0  ;;  %v2285_v44 = vpop.f32.mrf.mxu1 }
 0x1c7   : > { %v2448_v59 = vadd.f32 %v4211_v3, %v2409_v23  ;;  %v1992_v2 = vmax.f32 %v4452_v52, %v1867_v16 }
 0x1c8   : > { %v1869_v50 = vpop.f32.mrf.mxu0  ;;  %v2287_v51 = vpop.f32.mrf.mxu1 }
 0x1c9   : > { %v2480_v39 = vmax.f32 %v2448_v59, 0.0  ;;  %v2410_v54 = vmax.f32 %v1992_v2, %v2285_v44 }
 0x1ca   : > { %v1872_v30 = vpop.f32.mrf.mxu0  ;;  %v2290_v13 = vpop.f32.mrf.mxu1 }
 0x1cb   : > { %v3086_v37 = vpack.c.bf16 %v2480_v39, %v2480_v39  ;;  %v2449_v23 = vadd.f32 %v4211_v3, %v2410_v54  ;;  %v1993_v56 = vmax.f32 %v4453_v55, %v1872_v30  ;;  %v4454_v39 = vmax.f32 %v3997_v5, %v3999_v6 }
 0x1cc   : > { %v1874_v16 = vpop.f32.mrf.mxu0  ;;  %v2292_v61 = vpop.f32.mrf.mxu1  ;;  %v4455_v55 = vmax.f32 %v4007_v14, %v4009_v15 }
 0x1cd   : > { %2641 = vst.msk [vmem:[%s4220_s5] sm:$0xf] %vm2640_vm2, %v3086_v37  ;;  %v2481_v44 = vmax.f32 %v2449_v23, 0.0  ;;  %v2411_v2 = vmax.f32 %v1993_v56, %v2290_v13 }
 0x1ce   : > { %v1875_v59 = vpop.f32.mrf.mxu0  ;;  %v2293_v52 = vpop.f32.mrf.mxu1 }
 0x1cf   : > { %v3087_v50 = vpack.c.bf16 %v2481_v44, %v2481_v44  ;;  %v2450_v51 = vadd.f32 %v4211_v3, %v2411_v2  ;;  %v1994_v54 = vmax.f32 %v4454_v39, %v1875_v59  ;;  %v4456_v59 = vmax.f32 %v4015_v19, %v4017_v20 }
 0x1d0   : > { %v1877_v9 = vpop.f32.mrf.mxu0  ;;  %v2295_v21 = vpop.f32.mrf.mxu1 }
 0x1d1   : > { %2642 = vst.msk [vmem:[%s4220_s5 + $0x4] sm:$0xf] %vm2640_vm2, %v3087_v50  ;;  %v2482_v0 = vmax.f32 %v2450_v51, 0.0  ;;  %v2412_v1 = vmax.f32 %v1994_v54, %v2293_v52 }
 0x1d2   : > { %v1880_v30 = vpop.f32.mrf.mxu0  ;;  %v2298_v37 = vpop.f32.mrf.mxu1 }
 0x1d3   : > { %v3088_v13 = vpack.c.bf16 %v2482_v0, %v2482_v0  ;;  %v2451_v23 = vadd.f32 %v4211_v3, %v2412_v1  ;;  %v1995_v56 = vmax.f32 %v4455_v55, %v1880_v30  ;;  %v4457_v30 = vmax.f32 %v4025_v28, %v4027_v29 }
 0x1d4   : > { %v1882_v16 = vpop.f32.mrf.mxu0  ;;  %v2300_v61 = vpop.f32.mrf.mxu1 }
 0x1d5   : > { %2643 = vst.msk [vmem:[%s4220_s5 + $0x8] sm:$0xf] %vm2640_vm2, %v3088_v13  ;;  %v2483_v5 = vmax.f32 %v2451_v23, 0.0  ;;  %v2413_v6 = vmax.f32 %v1995_v56, %v2298_v37 }
 0x1d6   : > { %v1883_v21 = vpop.f32.mrf.mxu0  ;;  %v2301_v9 = vpop.f32.mrf.mxu1 }
 0x1d7   : > { %v3089_v44 = vpack.c.bf16 %v2483_v5, %v2483_v5  ;;  %v2452_v2 = vadd.f32 %v4211_v3, %v2413_v6  ;;  %v1996_v52 = vmax.f32 %v4456_v59, %v1883_v21  ;;  %v4458_v5 = vmax.f32 %v4033_v33, %v4035_v34 }
 0x1d8   : > { %v1885_v50 = vpop.f32.mrf.mxu0  ;;  %v2303_v51 = vpop.f32.mrf.mxu1 }
 0x1d9   : > { %2644 = vst.msk [vmem:[%s4220_s5 + $0xc] sm:$0xf] %vm2640_vm2, %v3089_v44  ;;  %v2484_v14 = vmax.f32 %v2452_v2, 0.0  ;;  %v2414_v15 = vmax.f32 %v1996_v52, %v2301_v9  ;;  %v4459_v50 = vmax.f32 %v4043_v42, %v4045_v43 }
 0x1da   : > { %v1888_v39 = vpop.f32.mrf.mxu0  ;;  %v2306_v54 = vpop.f32.mrf.mxu1 }
 0x1db   : > { %v3090_v0 = vpack.c.bf16 %v2484_v14, %v2484_v14  ;;  %v2453_v1 = vadd.f32 %v4211_v3, %v2414_v15  ;;  %v1997_v37 = vmax.f32 %v4457_v30, %v1888_v39  ;;  %v4460_v30 = vmax.f32 %v4051_v47, %v4053_v48 }
 0x1dc   : > { %v1890_v13 = vpop.f32.mrf.mxu0  ;;  %v2308_v23 = vpop.f32.mrf.mxu1 }
 0x1dd   : > { %2645 = vst.msk [vmem:[%s4220_s5 + $0x10] sm:$0xf] %vm2640_vm2, %v3090_v0  ;;  %v2485_v19 = vmax.f32 %v2453_v1, 0.0  ;;  %v2415_v20 = vmax.f32 %v1997_v37, %v2306_v54 }
 0x1de   : > { %v1891_v55 = vpop.f32.mrf.mxu0  ;;  %v2309_v56 = vpop.f32.mrf.mxu1 }
 0x1df   : > { %v3091_v16 = vpack.c.bf16 %v2485_v19, %v2485_v19  ;;  %v2454_v61 = vadd.f32 %v4211_v3, %v2415_v20  ;;  %v1998_v6 = vmax.f32 %v4458_v5, %v1891_v55 }
 0x1e0   : > { %v1893_v21 = vpop.f32.mrf.mxu0  ;;  %v2311_v9 = vpop.f32.mrf.mxu1 }
 0x1e1   : > { %2646 = vst.msk [vmem:[%s4220_s5 + $0x14] sm:$0xf] %vm2640_vm2, %v3091_v16  ;;  %v2486_v28 = vmax.f32 %v2454_v61, 0.0  ;;  %v2416_v29 = vmax.f32 %v1998_v6, %v2309_v56  ;;  %v4461_v16 = vmax.f32 %v4061_v62, %v4063_v63 }
 0x1e2   : > { %v1896_v44 = vpop.f32.mrf.mxu0  ;;  %v2314_v2 = vpop.f32.mrf.mxu1 }
 0x1e3   : > { %v3092_v59 = vpack.c.bf16 %v2486_v28, %v2486_v28  ;;  %v2455_v52 = vadd.f32 %v4211_v3, %v2416_v29  ;;  %v1999_v51 = vmax.f32 %v4459_v50, %v1896_v44  ;;  %v4462_v44 = vmax.f32 %v4069_v8, %v4071_v10 }
 0x1e4   : > { %v1898_v14 = vpop.f32.mrf.mxu0  ;;  %v2316_v15 = vpop.f32.mrf.mxu1 }
 0x1e5   : > { %2647 = vst.msk [vmem:[%s4220_s5 + $0x18] sm:$0xf] %vm2640_vm2, %v3092_v59  ;;  %v2487_v33 = vmax.f32 %v2455_v52, 0.0  ;;  %v2417_v34 = vmax.f32 %v1999_v51, %v2314_v2 }
 0x1e6   : > { %v1899_v39 = vpop.f32.mrf.mxu0  ;;  %v2317_v54 = vpop.f32.mrf.mxu1 }
 0x1e7   : > { %v3093_v0 = vpack.c.bf16 %v2487_v33, %v2487_v33  ;;  %v2456_v1 = vadd.f32 %v4211_v3, %v2417_v34  ;;  %v2000_v37 = vmax.f32 %v4460_v30, %v1899_v39  ;;  %v4463_v33 = vmax.f32 %v4079_v24, %v4081_v25 }
 0x1e8   : > { %v1901_v13 = vpop.f32.mrf.mxu0  ;;  %v2319_v23 = vpop.f32.mrf.mxu1 }
 0x1e9   : > { %2648 = vst.msk [vmem:[%s4220_s5 + $0x1c] sm:$0xf] %vm2640_vm2, %v3093_v0  ;;  %v2488_v42 = vmax.f32 %v2456_v1, 0.0  ;;  %v2418_v43 = vmax.f32 %v2000_v37, %v2317_v54  ;;  %v4464_v13 = vmax.f32 %v4087_v32, %v4089_v35 }
 0x1ea   : > { %v1904_v19 = vpop.f32.mrf.mxu0  ;;  %v2322_v20 = vpop.f32.mrf.mxu1 }
 0x1eb   : > { %v3094_v55 = vpack.c.bf16 %v2488_v42, %v2488_v42  ;;  %v2457_v56 = vadd.f32 %v4211_v3, %v2418_v43  ;;  %v2001_v61 = vmax.f32 %v4461_v16, %v1904_v19  ;;  %v4465_v16 = vmax.f32 %v4095_v45, %v4097_v46 }
 0x1ec   : > { %v1906_v5 = vpop.f32.mrf.mxu0  ;;  %v2324_v6 = vpop.f32.mrf.mxu1 }
 0x1ed   : > { %2649 = vst.msk [vmem:[%s4220_s5 + $0x20] sm:$0xf] %vm2640_vm2, %v3094_v55  ;;  %v2489_v47 = vmax.f32 %v2457_v56, 0.0  ;;  %v2419_v48 = vmax.f32 %v2001_v61, %v2322_v20 }
 0x1ee   : > { %v1907_v21 = vpop.f32.mrf.mxu0  ;;  %v2325_v9 = vpop.f32.mrf.mxu1 }
 0x1ef   : > { %v3095_v28 = vpack.c.bf16 %v2489_v47, %v2489_v47  ;;  %v2458_v29 = vadd.f32 %v4211_v3, %v2419_v48  ;;  %v2002_v2 = vmax.f32 %v4462_v44, %v1907_v21 }
 0x1f0   : > { %v1909_v59 = vpop.f32.mrf.mxu0  ;;  %v2327_v52 = vpop.f32.mrf.mxu1 }
 0x1f1   : > { %2650 = vst.msk [vmem:[%s4220_s5 + $0x24] sm:$0xf] %vm2640_vm2, %v3095_v28  ;;  %v2490_v62 = vmax.f32 %v2458_v29, 0.0  ;;  %v2420_v63 = vmax.f32 %v2002_v2, %v2325_v9  ;;  %v4466_v28 = vmax.f32 %v4101_v58, %v4103_v60 }
 0x1f2   : > { %v1912_v50 = vpop.f32.mrf.mxu0  ;;  %v2330_v51 = vpop.f32.mrf.mxu1 }
 0x1f3   : > { %v3096_v14 = vpack.c.bf16 %v2490_v62, %v2490_v62  ;;  %v2459_v15 = vadd.f32 %v4211_v3, %v2420_v63  ;;  %v2003_v34 = vmax.f32 %v4463_v33, %v1912_v50  ;;  %v4467_v50 = vmax.f32 %v4107_v11, %v4109_v12 }
 0x1f4   : > { %v1914_v39 = vpop.f32.mrf.mxu0  ;;  %v2332_v54 = vpop.f32.mrf.mxu1 }
 0x1f5   : > { %2651 = vst.msk [vmem:[%s4220_s5 + $0x28] sm:$0xf] %vm2640_vm2, %v3096_v14  ;;  %v2491_v8 = vmax.f32 %v2459_v15, 0.0  ;;  %v2421_v10 = vmax.f32 %v2003_v34, %v2330_v51 }
 0x1f6   : > { %v1915_v0 = vpop.f32.mrf.mxu0  ;;  %v2333_v1 = vpop.f32.mrf.mxu1 }
 0x1f7   : > { %v3097_v30 = vpack.c.bf16 %v2491_v8, %v2491_v8  ;;  %v2460_v37 = vadd.f32 %v4211_v3, %v2421_v10  ;;  %v2004_v23 = vmax.f32 %v4464_v13, %v1915_v0  ;;  %v4468_v8 = vmax.f32 %v4113_v22, %v4115_v27 }
 0x1f8   : > { %v1917_v42 = vpop.f32.mrf.mxu0  ;;  %v2335_v43 = vpop.f32.mrf.mxu1 }
 0x1f9   : > { %2652 = vst.msk [vmem:[%s4220_s5 + $0x2c] sm:$0xf] %vm2640_vm2, %v3097_v30  ;;  %v2492_v24 = vmax.f32 %v2460_v37, 0.0  ;;  %v2422_v25 = vmax.f32 %v2004_v23, %v2333_v1  ;;  %v4469_v42 = vmax.f32 %v4119_v40, %v4121_v41 }
 0x1fa   : > { %v1920_v19 = vpop.f32.mrf.mxu0  ;;  %v2338_v20 = vpop.f32.mrf.mxu1 }
 0x1fb   : > { %v3098_v55 = vpack.c.bf16 %v2492_v24, %v2492_v24  ;;  %v2461_v56 = vadd.f32 %v4211_v3, %v2422_v25  ;;  %v2005_v61 = vmax.f32 %v4465_v16, %v1920_v19  ;;  %v4470_v16 = vmax.f32 %v4125_v7, %v4127_v18 }
 0x1fc   : > { %v1922_v5 = vpop.f32.mrf.mxu0  ;;  %v2340_v6 = vpop.f32.mrf.mxu1 }
 0x1fd   : > { %2653 = vst.msk [vmem:[%s4220_s5 + $0x30] sm:$0xf] %vm2640_vm2, %v3098_v55  ;;  %v2493_v32 = vmax.f32 %v2461_v56, 0.0  ;;  %v2423_v35 = vmax.f32 %v2005_v61, %v2338_v20 }
 0x1fe   : > { %v1923_v47 = vpop.f32.mrf.mxu0  ;;  %v2341_v48 = vpop.f32.mrf.mxu1 }
 0x1ff   : > { %v3099_v21 = vpack.c.bf16 %v2493_v32, %v2493_v32  ;;  %v2462_v9 = vadd.f32 %v4211_v3, %v2423_v35  ;;  %v2006_v29 = vmax.f32 %v4466_v28, %v1923_v47 }
 0x200   : > { %v1925_v44 = vpop.f32.mrf.mxu0  ;;  %v2343_v2 = vpop.f32.mrf.mxu1 }
 0x201   : > { %2654 = vst.msk [vmem:[%s4220_s5 + $0x34] sm:$0xf] %vm2640_vm2, %v3099_v21  ;;  %v2494_v45 = vmax.f32 %v2462_v9, 0.0  ;;  %v2424_v46 = vmax.f32 %v2006_v29, %v2341_v48  ;;  %v4471_v21 = vmax.f32 %v4131_v36, %v4133_v38 }
 0x202   : > { %v1928_v59 = vpop.f32.mrf.mxu0  ;;  %v2346_v52 = vpop.f32.mrf.mxu1 }
 0x203   : > { %v3100_v62 = vpack.c.bf16 %v2494_v45, %v2494_v45  ;;  %v2463_v63 = vadd.f32 %v4211_v3, %v2424_v46  ;;  %v2007_v51 = vmax.f32 %v4467_v50, %v1928_v59  ;;  %v4472_v59 = vmax.f32 %v4137_v57, %v4139_v4 }
 0x204   : > { %v1930_v14 = vpop.f32.mrf.mxu0  ;;  %v2348_v15 = vpop.f32.mrf.mxu1 }
 0x205   : > { %2655 = vst.msk [vmem:[%s4220_s5 + $0x38] sm:$0xf] %vm2640_vm2, %v3100_v62  ;;  %v2495_v58 = vmax.f32 %v2463_v63, 0.0  ;;  %v2425_v60 = vmax.f32 %v2007_v51, %v2346_v52 }
 0x206   : > { %v1931_v33 = vpop.f32.mrf.mxu0  ;;  %v2349_v34 = vpop.f32.mrf.mxu1 }
 0x207   : > { %v3101_v39 = vpack.c.bf16 %v2495_v58, %v2495_v58  ;;  %v2464_v54 = vadd.f32 %v4211_v3, %v2425_v60  ;;  %v2008_v10 = vmax.f32 %v4468_v8, %v1931_v33  ;;  %v4473_v58 = vmax.f32 %v4143_v17, %v4145_v31 }
 0x208   : > { %v1933_v0 = vpop.f32.mrf.mxu0  ;;  %v2351_v1 = vpop.f32.mrf.mxu1 }
 0x209   : > { %2656 = vst.msk [vmem:[%s4220_s5 + $0x3c] sm:$0xf] %vm2640_vm2, %v3101_v39  ;;  %v2496_v11 = vmax.f32 %v2464_v54, 0.0  ;;  %v2426_v12 = vmax.f32 %v2008_v10, %v2349_v34  ;;  %v4474_v0 = vmax.f32 %v4149_v49, %v4151_v53 }
 0x20a   : > { %v1936_v30 = vpop.f32.mrf.mxu0  ;;  %v2354_v37 = vpop.f32.mrf.mxu1 }
 0x20b   : > { %v3102_v13 = vpack.c.bf16 %v2496_v11, %v2496_v11  ;;  %v2465_v23 = vadd.f32 %v4211_v3, %v2426_v12  ;;  %v2009_v43 = vmax.f32 %v4469_v42, %v1936_v30  ;;  %v4475_v42 = vld [vmem:[#allocation3_spill] sm:$0xff] }
 0x20c   : > { %v1938_v24 = vpop.f32.mrf.mxu0  ;;  %v2356_v25 = vpop.f32.mrf.mxu1 }
 0x20d   : > { %2657 = vst.msk [vmem:[%s4220_s5 + $0x40] sm:$0xf] %vm2640_vm2, %v3102_v13  ;;  %v2497_v22 = vmax.f32 %v2465_v23, 0.0  ;;  %v2427_v27 = vmax.f32 %v2009_v43, %v2354_v37  ;;  %v4476_v43 = vmax.f32 %v4155_v26, %v4475_v42 }
 0x20e   : > { %v1939_v19 = vpop.f32.mrf.mxu0  ;;  %v2357_v20 = vpop.f32.mrf.mxu1 }
 0x20f   : > { %v3103_v55 = vpack.c.bf16 %v2497_v22, %v2497_v22  ;;  %v2466_v56 = vadd.f32 %v4211_v3, %v2427_v27  ;;  %v2010_v61 = vmax.f32 %v4470_v16, %v1939_v19  ;;  %v4478_v16 = vld [vmem:[#allocation5_spill] sm:$0xff] }
 0x210   : > { %v1941_v5 = vpop.f32.mrf.mxu0  ;;  %v2359_v6 = vpop.f32.mrf.mxu1 }
 0x211   : > { %2658 = vst.msk [vmem:[%s4220_s5 + $0x44] sm:$0xf] %vm2640_vm2, %v3103_v55  ;;  %v2498_v40 = vmax.f32 %v2466_v56, 0.0  ;;  %v2428_v41 = vmax.f32 %v2010_v61, %v2357_v20  ;;  %v4477_v56 = vld [vmem:[#allocation4_spill] sm:$0xff] }
 0x212   : > { %v1944_v32 = vpop.f32.mrf.mxu0  ;;  %v2362_v35 = vpop.f32.mrf.mxu1  ;;  %v4479_v61 = vmax.f32 %v4477_v56, %v4478_v16 }
 0x213   : > { %v3104_v47 = vpack.c.bf16 %v2498_v40, %v2498_v40  ;;  %v2467_v48 = vadd.f32 %v4211_v3, %v2428_v41  ;;  %v2011_v9 = vmax.f32 %v4471_v21, %v1944_v32  ;;  %v4480_v21 = vld [vmem:[#allocation6_spill] sm:$0xff] }
 0x214   : > { %v1946_v28 = vpop.f32.mrf.mxu0  ;;  %v2364_v29 = vpop.f32.mrf.mxu1 }
 0x215   : > { %2659 = vst.msk [vmem:[%s4220_s5 + $0x48] sm:$0xf] %vm2640_vm2, %v3104_v47  ;;  %v2499_v7 = vmax.f32 %v2467_v48, 0.0  ;;  %v2429_v18 = vmax.f32 %v2011_v9, %v2362_v35  ;;  %v4481_v9 = vld [vmem:[#allocation7_spill] sm:$0xff] }
 0x216   : > { %v1947_v44 = vpop.f32.mrf.mxu0  ;;  %v2365_v2 = vpop.f32.mrf.mxu1  ;;  %v4482_v28 = vmax.f32 %v4480_v21, %v4481_v9 }
 0x217   : > { %v3105_v45 = vpack.c.bf16 %v2499_v7, %v2499_v7  ;;  %v2468_v46 = vadd.f32 %v4211_v3, %v2429_v18  ;;  %v2012_v52 = vmax.f32 %v4472_v59, %v1947_v44 }
 0x218   : > { %v1949_v62 = vpop.f32.mrf.mxu0  ;;  %v2367_v63 = vpop.f32.mrf.mxu1 }
 0x219   : > { %2660 = vst.msk [vmem:[%s4220_s5 + $0x4c] sm:$0xf] %vm2640_vm2, %v3105_v45  ;;  %v2500_v36 = vmax.f32 %v2468_v46, 0.0  ;;  %v2430_v38 = vmax.f32 %v2012_v52, %v2365_v2  ;;  %v4483_v62 = vld [vmem:[#allocation8_spill] sm:$0xff]  ;;  %v4484_v63 = vld [vmem:[#allocation9_spill] sm:$0xff] }
 0x21a   : > { %v1952_v50 = vpop.f32.mrf.mxu0  ;;  %v2370_v51 = vpop.f32.mrf.mxu1 }
 0x21b   : > { %v3106_v14 = vpack.c.bf16 %v2500_v36, %v2500_v36  ;;  %v2469_v15 = vadd.f32 %v4211_v3, %v2430_v38  ;;  %v2013_v60 = vmax.f32 %v4473_v58, %v1952_v50  ;;  %v4485_v36 = vmax.f32 %v4483_v62, %v4484_v63 }
 0x21c   : > { %v1954_v33 = vpop.f32.mrf.mxu0  ;;  %v2372_v34 = vpop.f32.mrf.mxu1 }
 0x21d   : > { %2661 = vst.msk [vmem:[%s4220_s5 + $0x50] sm:$0xf] %vm2640_vm2, %v3106_v14  ;;  %v2501_v57 = vmax.f32 %v2469_v15, 0.0  ;;  %v2431_v4 = vmax.f32 %v2013_v60, %v2370_v51 }
 0x21e   : > { %v1955_v39 = vpop.f32.mrf.mxu0  ;;  %v2373_v54 = vpop.f32.mrf.mxu1 }
 0x21f   : > { %v3107_v8 = vpack.c.bf16 %v2501_v57, %v2501_v57  ;;  %v2470_v10 = vadd.f32 %v4211_v3, %v2431_v4  ;;  %v2014_v1 = vmax.f32 %v4474_v0, %v1955_v39  ;;  %v4486_v57 = vld [vmem:[#allocation10_spill] sm:$0xff]  ;;  %v4487_v4 = vld [vmem:[#allocation11_spill] sm:$0xff] }
 0x220   : > { %v1957_v11 = vpop.f32.mrf.mxu0  ;;  %v2375_v12 = vpop.f32.mrf.mxu1  ;;  %v4488_v39 = vmax.f32 %v4486_v57, %v4487_v4 }
 0x221   : > { %2662 = vst.msk [vmem:[%s4220_s5 + $0x54] sm:$0xf] %vm2640_vm2, %v3107_v8  ;;  %v2502_v17 = vmax.f32 %v2470_v10, 0.0  ;;  %v2432_v31 = vmax.f32 %v2014_v1, %v2373_v54 }
 0x222   : > { %v1960_v30 = vpop.f32.mrf.mxu0  ;;  %v2378_v37 = vpop.f32.mrf.mxu1 }
 0x223   : > { %v3108_v13 = vpack.c.bf16 %v2502_v17, %v2502_v17  ;;  %v2471_v23 = vadd.f32 %v4211_v3, %v2432_v31  ;;  %v2015_v24 = vmax.f32 %v4476_v43, %v1960_v30  ;;  %v4489_v30 = vld [vmem:[#allocation12_spill] sm:$0xff] }
 0x224   : > { %v1962_v25 = vpop.f32.mrf.mxu0  ;;  %v2380_v22 = vpop.f32.mrf.mxu1 }
 0x225   : > { %2663 = vst.msk [vmem:[%s4220_s5 + $0x58] sm:$0xf] %vm2640_vm2, %v3108_v13  ;;  %v2503_v49 = vmax.f32 %v2471_v23, 0.0  ;;  %v2433_v53 = vmax.f32 %v2015_v24, %v2378_v37  ;;  %v4490_v37 = vld [vmem:[#allocation13_spill] sm:$0xff] }
 0x226   : > { %v1963_v27 = vpop.f32.mrf.mxu0  ;;  %v2381_v19 = vpop.f32.mrf.mxu1  ;;  %v4491_v13 = vmax.f32 %v4489_v30, %v4490_v37 }
 0x227   : > { %v3109_v20 = vpack.c.bf16 %v2503_v49, %v2503_v49  ;;  %v2472_v55 = vadd.f32 %v4211_v3, %v2433_v53  ;;  %v2016_v5 = vmax.f32 %v4479_v61, %v1963_v27 }
 0x228   : > { %v1965_v6 = vpop.f32.mrf.mxu0  ;;  %v2383_v40 = vpop.f32.mrf.mxu1 }
 0x229   : > { %2664 = vst.msk [vmem:[%s4220_s5 + $0x5c] sm:$0xf] %vm2640_vm2, %v3109_v20  ;;  %v2504_v26 = vmax.f32 %v2472_v55, 0.0  ;;  %v2434_v41 = vmax.f32 %v2016_v5, %v2381_v19  ;;  %v4492_v19 = vld [vmem:[#allocation14_spill] sm:$0xff]  ;;  %v4493_v20 = vld [vmem:[#allocation15_spill] sm:$0xff] }
 0x22a   : > { %v1968_v32 = vpop.f32.mrf.mxu0  ;;  %v2386_v35 = vpop.f32.mrf.mxu1  ;;  %v4494_v55 = vmax.f32 %v4492_v19, %v4493_v20 }
 0x22b   : > { %v3110_v47 = vpack.c.bf16 %v2504_v26, %v2504_v26  ;;  %v2473_v48 = vadd.f32 %v4211_v3, %v2434_v41  ;;  %v2017_v29 = vmax.f32 %v4482_v28, %v1968_v32 }
 0x22c   : > { %v1970_v7 = vpop.f32.mrf.mxu0  ;;  %v2388_v18 = vpop.f32.mrf.mxu1 }
 0x22d   : > { %2665 = vst.msk [vmem:[%s4220_s5 + $0x60] sm:$0xf] %vm2640_vm2, %v3110_v47  ;;  %v2505_v44 = vmax.f32 %v2473_v48, 0.0  ;;  %v2435_v2 = vmax.f32 %v2017_v29, %v2386_v35  ;;  %v4495_v35 = vld [vmem:[#allocation16_spill] sm:$0xff]  ;;  %v4496_v47 = vld [vmem:[#allocation17_spill] sm:$0xff] }
 0x22e   : > { %v1971_v45 = vpop.f32.mrf.mxu0  ;;  %v2389_v46 = vpop.f32.mrf.mxu1  ;;  %v4497_v48 = vmax.f32 %v4495_v35, %v4496_v47 }
 0x22f   : > { %v3111_v59 = vpack.c.bf16 %v2505_v44, %v2505_v44  ;;  %v2474_v52 = vadd.f32 %v4211_v3, %v2435_v2  ;;  %v2018_v38 = vmax.f32 %v4485_v36, %v1971_v45 }
 0x230   : > { %v1973_v50 = vpop.f32.mrf.mxu0  ;;  %v2391_v51 = vpop.f32.mrf.mxu1 }
 0x231   : > { %2666 = vst.msk [vmem:[%s4220_s5 + $0x64] sm:$0xf] %vm2640_vm2, %v3111_v59  ;;  %v2506_v14 = vmax.f32 %v2474_v52, 0.0  ;;  %v2436_v15 = vmax.f32 %v2018_v38, %v2389_v46 }
 0x232   : > { %v1976_v58 = vpop.f32.mrf.mxu0  ;;  %v2394_v60 = vpop.f32.mrf.mxu1 }
 0x233   : > { %v3112_v33 = vpack.c.bf16 %v2506_v14, %v2506_v14  ;;  %v2475_v34 = vadd.f32 %v4211_v3, %v2436_v15  ;;  %v2019_v54 = vmax.f32 %v4488_v39, %v1976_v58 }
 0x234   : > { %v1978_v8 = vpop.f32.mrf.mxu0  ;;  %v2396_v10 = vpop.f32.mrf.mxu1 }
 0x235   : > { %2667 = vst.msk [vmem:[%s4220_s5 + $0x68] sm:$0xf] %vm2640_vm2, %v3112_v33  ;;  %v2507_v0 = vmax.f32 %v2475_v34, 0.0  ;;  %v2437_v1 = vmax.f32 %v2019_v54, %v2394_v60 }
 0x236   : > { %v1979_v11 = vpop.f32.mrf.mxu0  ;;  %v2397_v12 = vpop.f32.mrf.mxu1 }
 0x237   : > { %v3113_v17 = vpack.c.bf16 %v2507_v0, %v2507_v0  ;;  %v2476_v31 = vadd.f32 %v4211_v3, %v2437_v1  ;;  %v2020_v23 = vmax.f32 %v4491_v13, %v1979_v11 }
 0x238   : > { %v1981_v42 = vpop.f32.mrf.mxu0  ;;  %v2399_v43 = vpop.f32.mrf.mxu1 }
 0x239   : > { %2668 = vst.msk [vmem:[%s4220_s5 + $0x6c] sm:$0xf] %vm2640_vm2, %v3113_v17  ;;  %v2508_v24 = vmax.f32 %v2476_v31, 0.0  ;;  %v2438_v25 = vmax.f32 %v2020_v23, %v2397_v12 }
 0x23a   : > { %v1984_v22 = vpop.f32.mrf.mxu0  ;;  %v2402_v49 = vpop.f32.mrf.mxu1 }
 0x23b   : > { %v3114_v53 = vpack.c.bf16 %v2508_v24, %v2508_v24  ;;  %v2477_v27 = vadd.f32 %v4211_v3, %v2438_v25  ;;  %v2021_v56 = vmax.f32 %v4494_v55, %v1984_v22 }
 0x23c   : > { %v1986_v16 = vpop.f32.mrf.mxu0  ;;  %v2404_v61 = vpop.f32.mrf.mxu1 }
 0x23d   : > { %2669 = vst.msk [vmem:[%s4220_s5 + $0x70] sm:$0xf] %vm2640_vm2, %v3114_v53  ;;  %v2509_v5 = vmax.f32 %v2477_v27, 0.0  ;;  %v2439_v6 = vmax.f32 %v2021_v56, %v2402_v49 }
 0x23e   : > { %v1987_v40 = vpop.f32.mrf.mxu0  ;;  %v2405_v26 = vpop.f32.mrf.mxu1 }
 0x23f   : > { %v3115_v41 = vpack.c.bf16 %v2509_v5, %v2509_v5  ;;  %v2478_v32 = vadd.f32 %v4211_v3, %v2439_v6  ;;  %v2022_v21 = vmax.f32 %v4497_v48, %v1987_v40 }
 0x240   : > { %v1989_v9 = vpop.f32.mrf.mxu0  ;;  %v2407_v28 = vpop.f32.mrf.mxu1 }
 0x241   : > { %2670 = vst.msk [vmem:[%s4220_s5 + $0x74] sm:$0xf] %vm2640_vm2, %v3115_v41  ;;  %v2510_v29 = vmax.f32 %v2478_v32, 0.0  ;;  %v2440_v7 = vmax.f32 %v2022_v21, %v2405_v26 }
 0x243   : > { %v3116_v18 = vpack.c.bf16 %v2510_v29, %v2510_v29  ;;  %v2479_v44 = vadd.f32 %v4211_v3, %v2440_v7 }
 0x245   : > { %2671 = vst.msk [vmem:[%s4220_s5 + $0x78] sm:$0xf] %vm2640_vm2, %v3116_v18  ;;  %v2511_v2 = vmax.f32 %v2479_v44, 0.0 }
 0x247   : > { %v3117_v45 = vpack.c.bf16 %v2511_v2, %v2511_v2 }
 0x249   : > { %2672 = vst.msk [vmem:[%s4220_s5 + $0x7c] sm:$0xf] %vm2640_vm2, %v3117_v45 }
 0x24a PF: > { %p10_p9 = scmp.ge.s32.totalorder %s3407_s16, 4   ;;  %s4498_s12 = smov %s3363_s13 }
 0x24b   : > { %s4499_s13 = smov %s3416_s19  ;;  %s4500_s14 = smov %s3407_s16 }
 0x24c   :  { %12 = sbr.rel (!%p10_p9) target bundleno = 2 (0x2), region = 108 }

// kernel: net_forward.5
= control target key start
LH: loop header
LB: loop body
LE: loop exit
PB: predicated region body
PF: predicated region fallthrough
CT: control target
= control target key end

     0   :  { %v796_v1 = vmov 0   ;;  %vm258_vm0 = vcmask 130048   ;;  %v797_v31 = vmov 0.0   ;;  %s1016_s0 = inlined_call_operand.vmem [shape: bf16[10,400], index: 0, kind: input, shape index: {}]   ;;  %s1017_s1 = inlined_call_operand.vmem [shape: bf16[400,128], index: 1, kind: input, shape index: {}]   ;;  %s1018_s2 = inlined_call_operand.vmem [shape: f32[1,128], index: 2, kind: input, shape index: {}]   ;;  %s1019_s3 = inlined_call_operand.vmem [shape: bf16[128,128], index: 3, kind: input, shape index: {}]   ;;  %s1020_s4 = inlined_call_operand.vmem [shape: f32[1,128], index: 4, kind: input, shape index: {}]   ;;  %s1021_s5 = inlined_call_operand.vmem [shape: bf16[128,128], index: 5, kind: input, shape index: {}]   ;;  %s1022_s6 = inlined_call_operand.vmem [shape: f32[1,128], index: 6, kind: input, shape index: {}]   ;;  %s1023_s7 = inlined_call_operand.hbm [shape: f32[10,128], index: 7, kind: output, shape index: {}]  }
   0x1   :  { %v727_v0 = vld [vmem:[%s1017_s1 + $0x78] sm:$0xff]   ;;  %303 = vmatprep.subr.bf16.mxu1 %v796_v1  ;;  %v730_v4 = vld [vmem:[%s1017_s1 + $0x70] sm:$0xff]   ;;  %v733_v7 = vld [vmem:[%s1017_s1 + $0x68] sm:$0xff]  }
   0x2   :  { %v728_v2 = vld [vmem:[%s1017_s1 + $0xb8] sm:$0xff]   ;;  %641 = vmatprep.subr.bf16.mxu0 %v727_v0  ;;  %v731_v5 = vld [vmem:[%s1017_s1 + $0xb0] sm:$0xff]   ;;  %v734_v8 = vld [vmem:[%s1017_s1 + $0xa8] sm:$0xff]  }
   0x3   :  { %v729_v3 = vld [vmem:[%s1017_s1 + $0x38] sm:$0xff]   ;;  %304 = vmatpush1.bf16.msra.mxu1 %v728_v2  ;;  %v732_v6 = vld [vmem:[%s1017_s1 + $0x30] sm:$0xff]   ;;  %v735_v9 = vld [vmem:[%s1017_s1 + $0x28] sm:$0xff]  }
   0x4   :  { %642 = vmatpush3.bf16.msra.mxu0 %v729_v3  ;;  %305 = vmatprep.subr.bf16.mxu1 %v796_v1  ;;  %v736_v10 = vld [vmem:[%s1017_s1 + $0x60] sm:$0xff]   ;;  %v739_v13 = vld [vmem:[%s1017_s1 + $0x58] sm:$0xff]   ;;  %v742_v16 = vld [vmem:[%s1017_s1 + $0x50] sm:$0xff]  }
   0x5   :  { %643 = vmatprep.subr.bf16.mxu0 %v730_v4  ;;  %v737_v11 = vld [vmem:[%s1017_s1 + $0xa0] sm:$0xff]   ;;  %v740_v14 = vld [vmem:[%s1017_s1 + $0x98] sm:$0xff]   ;;  %v743_v17 = vld [vmem:[%s1017_s1 + $0x90] sm:$0xff]  }
   0x6   :  { %v738_v12 = vld [vmem:[%s1017_s1 + $0x20] sm:$0xff]   ;;  %v741_v15 = vld [vmem:[%s1017_s1 + $0x18] sm:$0xff]   ;;  %v744_v18 = vld [vmem:[%s1017_s1 + $0x10] sm:$0xff]  }
   0x7   :  { %306 = vmatpush1.bf16.msra.mxu1 %v731_v5  ;;  %v745_v19 = vld [vmem:[%s1017_s1 + $0x48] sm:$0xff]   ;;  %v748_v22 = vld [vmem:[%s1017_s1 + $0x40] sm:$0xff]   ;;  %v758_v29 = vld [vmem:[%s1019_s3 + $0x38] sm:$0xff]  }
   0x8   :  { %644 = vmatpush3.bf16.msra.mxu0 %v732_v6  ;;  %307 = vmatprep.subr.bf16.mxu1 %v796_v1  ;;  %v746_v20 = vld [vmem:[%s1017_s1 + $0x88] sm:$0xff]   ;;  %v753_v23 = vld [vmem:[%s1016_s0 + $0x4] ss:$16 sps:$4 sm:$0x1f]  }
   0x9   :  { %645 = vmatprep.subr.bf16.mxu0 %v733_v7  ;;  %v747_v21 = vld [vmem:[%s1017_s1 + $0x8] sm:$0xff]   ;;  %v749_v24 = vld [vmem:[%s1017_s1 + $0x80] sm:$0xff]   ;;  %294 = vmatprep.mubr.bf16.mxu0 %v753_v23  ;;  %v759_v32 = vld [vmem:[%s1019_s3 + $0x30] sm:$0xff]  }
   0xa   :  { %v757_v25 = vld [vmem:[%s1016_s0 + $0xc] ss:$16 sps:$4 sm:$0x1f]   ;;  %v750_v26 = vld [vmem:[%s1017_s1] sm:$0xff]  }
   0xb   :  { %308 = vmatpush1.bf16.msra.mxu1 %v734_v8  ;;  %v751_v27 = vld [vmem:[%s1016_s0] ss:$16 sps:$4 sm:$0x1f]   ;;  %622 = vmatprep.mubr.msk.bf16.mxu1 %vm258_vm0, %v757_v25  ;;  %v755_v30 = vld [vmem:[%s1016_s0 + $0x8] ss:$16 sps:$4 sm:$0x1f]  }
   0xc   :  { %646 = vmatpush3.bf16.msra.mxu0 %v735_v9  ;;  %309 = vmatprep.subr.bf16.mxu1 %v796_v1  ;;  %v754_v28 = vld [vmem:[%s1017_s1 + $0xc0] sm:$0xff]   ;;  %v760_v33 = vld [vmem:[%s1019_s3 + $0x28] sm:$0xff]  }
   0xd   :  { %647 = vmatprep.subr.bf16.mxu0 %v736_v10 }
   0xf   :  { %310 = vmatpush1.bf16.msra.mxu1 %v737_v11 }
  0x10   :  { %648 = vmatpush3.bf16.msra.mxu0 %v738_v12  ;;  %311 = vmatprep.subr.bf16.mxu1 %v796_v1 }
  0x11   :  { %649 = vmatprep.subr.bf16.mxu0 %v739_v13 }
  0x13   :  { %312 = vmatpush1.bf16.msra.mxu1 %v740_v14 }
  0x14   :  { %650 = vmatpush3.bf16.msra.mxu0 %v741_v15  ;;  %313 = vmatprep.subr.bf16.mxu1 %v796_v1 }
  0x15   :  { %651 = vmatprep.subr.bf16.mxu0 %v742_v16 }
  0x17   :  { %314 = vmatpush1.bf16.msra.mxu1 %v743_v17 }
  0x18   :  { %652 = vmatpush3.bf16.msra.mxu0 %v744_v18  ;;  %315 = vmatprep.subr.bf16.mxu1 %v796_v1 }
  0x19   :  { %653 = vmatprep.subr.bf16.mxu0 %v745_v19 }
  0x1b   :  { %316 = vmatpush1.bf16.msra.mxu1 %v746_v20 }
  0x1c   :  { %654 = vmatpush3.bf16.msra.mxu0 %v747_v21  ;;  %317 = vmatprep.subr.bf16.mxu1 %v796_v1 }
  0x1d   :  { %655 = vmatprep.subr.bf16.mxu0 %v748_v22 }
  0x1f   :  { %318 = vmatpush1.bf16.msra.mxu1 %v749_v24 }
  0x20   :  { %656 = vmatpush3.bf16.msra.mxu0 %v750_v26  ;;  %333 = vmatprep.subr.bf16.mxu1 %v796_v1 }
  0x21   :  { %681 = vmatprep.subr.bf16.mxu0 %v797_v31 }
  0x23   :  { %295 = vmatmul.mubr.bf16.vlgmr.msra.gmra.mxu0 %v751_v27  ;;  %334 = vmatpush2.bf16.msra.mxu1 %v754_v28 }
  0x24   :  { %682 = vmatpush3.bf16.msra.mxu0 %v758_v29  ;;  %701 = vmatprep.subr.bf16.mxu1 %v797_v31 }
  0x25   :  { %683 = vmatprep.subr.bf16.mxu0 %v797_v31 }
  0x26   :  { %336 = vmatmul.mubr.bf16.vlgmr.msra.gmra.mxu1 %v755_v30 }
  0x28   :  { %684 = vmatpush3.bf16.msra.mxu0 %v759_v32 }
  0x29   :  { %12 = vsyncpa [#allocation3], 0  ;;  %685 = vmatprep.subr.bf16.mxu0 %v797_v31  ;;  %v761_v34 = vld [vmem:[%s1019_s3 + $0x20] sm:$0xff]   ;;  %v762_v35 = vld [vmem:[%s1019_s3 + $0x18] sm:$0xff]   ;;  %vm798_vm1 = vmmov 0  }
  0x2a   :  { %v763_v36 = vld [vmem:[%s1019_s3 + $0x10] sm:$0xff]   ;;  %v764_v37 = vld [vmem:[%s1019_s3 + $0x8] sm:$0xff]   ;;  %v765_v38 = vld [vmem:[%s1019_s3] sm:$0xff]   ;;  %697 = vmatprep.mubr.msk.bf16.mxu0 %vm798_vm1, %v797_v31  ;;  %717 = vmatprep.mubr.msk.bf16.mxu1 %vm798_vm1, %v797_v31 }
  0x2b   :  { %v766_v39 = vld [vmem:[%s1021_s5 + $0x38] sm:$0xff]   ;;  %v767_v40 = vld [vmem:[%s1021_s5 + $0x30] sm:$0xff]   ;;  %v768_v41 = vld [vmem:[%s1021_s5 + $0x28] sm:$0xff]  }
  0x2c   :  { %686 = vmatpush3.bf16.msra.mxu0 %v760_v33  ;;  %702 = vmatpush3.bf16.msra.mxu1 %v766_v39  ;;  %v769_v42 = vld [vmem:[%s1021_s5 + $0x20] sm:$0xff]   ;;  %v770_v43 = vld [vmem:[%s1021_s5 + $0x18] sm:$0xff]   ;;  %v771_v62 = vld [vmem:[%s1021_s5 + $0x10] sm:$0xff]  }
  0x2d   :  { %687 = vmatprep.subr.bf16.mxu0 %v797_v31  ;;  %703 = vmatprep.subr.bf16.mxu1 %v797_v31  ;;  %v592_v46 = vld [vmem:[%s1018_s2] ss:$0 sm:$0xff]  ;;  %v772_v63 = vld [vmem:[%s1021_s5 + $0x8] sm:$0xff]  }
  0x2e   :  { %v773_v0 = vld [vmem:[%s1021_s5] sm:$0xff]   ;;  %s799_s5 = smov [#allocation2]  }
  0x2f   :  { %v623_v1 = vld [vmem:[%s1020_s4] ss:$0 sm:$0xff]  ;;  %s581_s22 = sshll.u32 %s799_s5, 4  ;;  %s582_s22 = int_to_ptr.vmem [resolvable:$true] %s581_s22 }
  0x30   :  { %688 = vmatpush3.bf16.msra.mxu0 %v761_v34  ;;  %704 = vmatpush3.bf16.msra.mxu1 %v767_v40  ;;  %v632_v11 = vld [vmem:[%s1022_s6] ss:$0 sm:$0xff]  ;;  %s774_s4 = scalar_lea.vmem %s582_s22, 256  ;;  %p779_p1 = scmp.lt.s32.totalorder %s582_s22, %s582_s22 }
  0x31   :  { %689 = vmatprep.subr.bf16.mxu0 %v797_v31  ;;  %705 = vmatprep.subr.bf16.mxu1 %v797_v31  ;;  %p775_p0 = scmp.ne.s32.totalorder %s582_s22, %s774_s4  ;;  %p780_p2 = scmp.lt.s32.totalorder %s774_s4, %s774_s4 }
  0x33   :  { %p781_p3 = por %p780_p2, %p779_p1 }
  0x34   :  { %690 = vmatpush3.bf16.msra.mxu0 %v762_v35  ;;  %706 = vmatpush3.bf16.msra.mxu1 %v768_v41 }
  0x35   :  { %691 = vmatprep.subr.bf16.mxu0 %v797_v31  ;;  %707 = vmatprep.subr.bf16.mxu1 %v797_v31  ;;  %p782_p4 = pnand %p781_p3, %p775_p0 }
  0x38   :  { %692 = vmatpush3.bf16.msra.mxu0 %v763_v36  ;;  %708 = vmatpush3.bf16.msra.mxu1 %v769_v42 }
  0x39   :  { %693 = vmatprep.subr.bf16.mxu0 %v797_v31  ;;  %709 = vmatprep.subr.bf16.mxu1 %v797_v31 }
  0x3c   :  { %694 = vmatpush3.bf16.msra.mxu0 %v764_v37  ;;  %710 = vmatpush3.bf16.msra.mxu1 %v770_v43 }
  0x3d   :  { %695 = vmatprep.subr.bf16.mxu0 %v797_v31  ;;  %711 = vmatprep.subr.bf16.mxu1 %v797_v31 }
  0x40   :  { %696 = vmatpush3.bf16.msra.mxu0 %v765_v38  ;;  %712 = vmatpush3.bf16.msra.mxu1 %v771_v62 }
  0x41   :  { %713 = vmatprep.subr.bf16.mxu1 %v797_v31 }
  0x44   :  { %714 = vmatpush3.bf16.msra.mxu1 %v772_v63 }
  0x45   :  { %715 = vmatprep.subr.bf16.mxu1 %v797_v31 }
  0x48   :  { %716 = vmatpush3.bf16.msra.mxu1 %v773_v0 }
  0xe3   :  { %v657_v44 = vpop.f32.mrf.mxu0 }
  0xe5   :  { %v658_v45 = vpop.f32.mrf.mxu0 }
  0xe6   :  { %v659_v47 = vadd.f32 %v658_v45, %v657_v44  ;;  %v337_v48 = vpop.f32.mrf.mxu1 }
  0xe7   :  { %v660_v49 = vpop.f32.mrf.mxu0 }
  0xe8   :  { %v297_v50 = vadd.f32 %v659_v47, %v592_v46  ;;  %v339_v51 = vpop.f32.mrf.mxu1 }
  0xe9   :  { %v661_v52 = vpop.f32.mrf.mxu0 }
  0xea   :  { %v662_v53 = vadd.f32 %v661_v52, %v660_v49  ;;  %v340_v54 = vpop.f32.mrf.mxu1  ;;  %v338_v55 = vadd.f32 %v337_v48, %v297_v50 }
  0xec   :  { %v300_v56 = vadd.f32 %v662_v53, %v592_v46  ;;  %v342_v57 = vpop.f32.mrf.mxu1  ;;  %v344_v59 = vmax.f32 %v338_v55, 0.0 }
  0xee   :  { %v341_v58 = vadd.f32 %v340_v54, %v300_v56 }
  0xf0   :  { %v345_v60 = vmax.f32 %v341_v58, 0.0 }
  0xf2   :  { %v346_v61 = vpack.c.bf16 %v345_v60, %v344_v59 }
  0xf4   :  { %698 = vmatmul.mubr.bf16.vlgmr.msra.gmra.mxu0 %v346_v61 }
 0x1b4   :  { %v452_v2 = vpop.f32.mrf.mxu0 }
 0x1b5   :  { %v453_v4 = vadd.f32 %v623_v1, %v452_v2 }
 0x1b6   :  { %v699_v3 = vpop.f32.mrf.mxu0 }
 0x1b7   :  { %v459_v8 = vmax.f32 %v453_v4, 0.0 }
 0x1b8   :  { %v455_v5 = vpop.f32.mrf.mxu0 }
 0x1b9   :  { %v456_v6 = vadd.f32 %v623_v1, %v455_v5 }
 0x1ba   :  { %v700_v7 = vpop.f32.mrf.mxu0 }
 0x1bb   :  { %v460_v9 = vmax.f32 %v456_v6, 0.0 }
 0x1bd   :  { %v461_v10 = vpack.c.bf16 %v460_v9, %v459_v8 }
 0x1bf   :  { %718 = vmatmul.mubr.bf16.vlgmr.msra.gmra.mxu1 %v461_v10 }
 0x27f   :  { %v567_v12 = vpop.f32.mrf.mxu1 }
 0x280   :  { %v568_v13 = vadd.f32 %v632_v11, %v567_v12 }
 0x281   :  { %v719_v14 = vpop.f32.mrf.mxu1 }
 0x282   :  { %574 = vst [vmem:[#allocation2] sm:$0xff] %v568_v13 }
 0x283   :  { %v570_v15 = vpop.f32.mrf.mxu1 }
 0x284   :  { %v571_v16 = vadd.f32 %v632_v11, %v570_v15 }
 0x285   :  { %v720_v17 = vpop.f32.mrf.mxu1 }
 0x286   :  { %575 = vst [vmem:[#allocation2 + $0x8] sm:$0x3] %v571_v16 }
 0x287   :  { %785 = shalt.err (!%p782_p4)
}
 0x288   :  { %s800_s23 = smov 128   ;;  %s801_s6 = smov 8  }
 0x289   :  { %587 = dma.vmem_to_hbm [thread:$0]  %s582_s22, 256, %s1023_s7, [#allocation3], %s800_s23, %s800_s23, %s801_s6  }
 0x28a   :  { %794 = dma.done.wait [#allocation3], 256  }
 0x28b   :  { %795 = vsyncadd [#allocation3], 4294967040 }
 0x28c   :  { %591 = vsyncpa [#allocation3], 1 }

</bundles_post_ra>
